<compile_context>
chip_gen: v6e
topology: v6e:2x2x1
jax: 0.10.0
libtpu: 0.0.40
codegen_flags: <defaults>
</compile_context>

<pallas_src>
import functools

import numpy as np
import jax
import jax.numpy as jnp
from jax.experimental import pallas as pl
from jax.experimental.pallas import tpu as pltpu


# ---------------------------------------------------------------------------
# Network geometry implied by the PyTorch module (fc1 expects 64*2*2 -> 60x60 input).
# ---------------------------------------------------------------------------
IMG = 60
C1_OUT, C2_OUT, C3_OUT = 32, 32, 64
K1, S1 = 8, 4            # conv1: 60 -> 14
K2, S2 = 4, 2            # conv2: 14 -> 6
K3, S3 = 3, 3            # conv3:  6 -> 2
H1 = (IMG - K1) // S1 + 1      # 14
H2 = (H1 - K2) // S2 + 1       # 6
H3 = (H2 - K3) // S3 + 1       # 2
FC1_IN = C3_OUT * H3 * H3      # 256
HID = 512

K1_COLS = K1 * K1              # 64 conv1 patch columns (Cin = 1); full lane dim, no pad
N_TAP2 = K2 * K2               # 16 conv2 taps (kh2, kw2)
N_TAP3 = K3 * K3               # 9 conv3 taps (kh3, kw3)
N_POS3 = H3 * H3               # 4 conv3 output positions
Q_ROWS = N_TAP3 * N_POS3       # 36 rows per (conv2 tap, image): order (j3, pos3)
QPAD = 128                     # lane-dense q head / softmax width


def _round_up(x, m):
    return ((x + m - 1) // m) * m


# ---------------------------------------------------------------------------
# Fused whole-network kernel: one batch-tile of BT images per grid step.
# Patch rows arrive ordered (j2, j3, pos3, image) so every stage below is a
# contiguous, aligned static slice and every dot has M scaled by BT.
# ---------------------------------------------------------------------------
def _actor_fused_kernel(p_ref, w1_ref, b1_ref, w2_ref, b2_ref, w3_ref, b3_ref,
                        fc1w_ref, fc1b_ref, fc2w_ref, fc2b_ref, qw_ref, qb_ref,
                        out_ref, *, bt):
    f32 = jnp.float32
    bf16 = w2_ref.dtype
    R2 = Q_ROWS * bt          # rows per conv2 tap  (36*bt)
    R3 = N_POS3 * bt          # rows per conv3 tap  (4*bt)

    # conv1: ONE large-M dot over all taps/images of this tile, one bias+ReLU.
    y1 = jnp.dot(p_ref[...], w1_ref[...], preferred_element_type=f32)
    y1 = jnp.maximum(y1 + b1_ref[...], 0.0).astype(bf16)        # (16*36*bt, 32)

    # conv2: accumulate over its 16 taps; operand rows per tap are contiguous.
    acc2 = jnp.zeros((R2, C2_OUT), f32)
    for j2 in range(N_TAP2):
        acc2 = acc2 + jnp.dot(y1[j2 * R2:(j2 + 1) * R2, :],
                              w2_ref[j2 * C1_OUT:(j2 + 1) * C1_OUT, :],
                              preferred_element_type=f32)
    y2 = jnp.maximum(acc2 + b2_ref[...], 0.0).astype(bf16)      # (36*bt, 32), rows (j3,pos3,b)

    # conv3: accumulate over its 9 taps.
    acc3 = jnp.zeros((R3, C3_OUT), f32)
    for j3 in range(N_TAP3):
        acc3 = acc3 + jnp.dot(y2[j3 * R3:(j3 + 1) * R3, :],
                              w3_ref[j3 * C2_OUT:(j3 + 1) * C2_OUT, :],
                              preferred_element_type=f32)
    y3 = jnp.maximum(acc3 + b3_ref[...], 0.0)                   # (4*bt, 64) f32, rows (pos3,b)

    # fc1: contraction over (pos3, c3); fc1 weight rows are pre-permuted to (pos3, c3)
    # so torch's NCHW Flatten is absorbed into the weight (no reshape/transpose here).
    acc4 = jnp.zeros((bt, HID), f32)
    for p3 in range(N_POS3):
        acc4 = acc4 + jnp.dot(y3[p3 * bt:(p3 + 1) * bt, :].astype(bf16),
                              fc1w_ref[p3 * C3_OUT:(p3 + 1) * C3_OUT, :],
                              preferred_element_type=f32)
    y4 = jnp.maximum(acc4 + fc1b_ref[...], 0.0).astype(bf16)    # (bt, 512)

    # fc2
    y5 = jnp.dot(y4, fc2w_ref[...], preferred_element_type=f32)
    y5 = jnp.maximum(y5 + fc2b_ref[...], 0.0).astype(bf16)      # (bt, 512)

    # q head + softmax over 128 lanes (padded logits biased to -1e30 -> exp == 0).
    logits = jnp.dot(y5, qw_ref[...], preferred_element_type=f32) + qb_ref[...]
    m = jnp.max(logits, axis=-1, keepdims=True)
    e = jnp.exp(logits - m)
    denom = jnp.sum(e, axis=-1, keepdims=True)
    out_ref[...] = (e / denom).astype(out_ref.dtype)            # exact normalization


# ---------------------------------------------------------------------------
# XLA-side glue: conv1 im2col of the raw input in (j2, j3, pos3, image) row order.
# No row padding, no lane padding; just strided slices / transposes / one cast.
# ---------------------------------------------------------------------------
def _conv1_patches(x_nchw, nb, bt):
    """Row ((j2*36 + j3*4 + pos3)*bt + b) of tile `nb` holds the 64-pixel conv1 patch
    of image b at conv1-output position (2*(3*oy3+kh3)+kh2, 2*(3*ox3+kw3)+kw2)."""
    # TODO(synk): conv1's stride-4 patch extraction stays in XLA; a stride-4 gather of
    # the raw image has no clean in-kernel TPU-vector equivalent.
    x = x_nchw.astype(jnp.float32).reshape(nb, bt, IMG, IMG)     # Cin == 1
    cols = []
    for kh in range(K1):
        for kw in range(K1):
            cols.append(x[:, :, kh:kh + S1 * H1:S1, kw:kw + S1 * H1:S1])
    p0 = jnp.stack(cols, axis=-1)                                # (nb, bt, 14, 14, 64)
    blocks = []
    for kh2 in range(K2):
        for kw2 in range(K2):
            s = p0[:, :, kh2:kh2 + S2 * H2:S2, kw2:kw2 + S2 * H2:S2, :]  # (nb,bt,6,6,64)
            s = s.reshape(nb, bt, H3, K3, H3, K3, K1_COLS)       # (nb,b,oy3,kh3,ox3,kw3,k)
            s = jnp.transpose(s, (0, 3, 5, 2, 4, 1, 6))          # (nb,kh3,kw3,oy3,ox3,b,k)
            blocks.append(s.reshape(nb, Q_ROWS, bt, K1_COLS))    # (nb, 36, bt, 64)
    p = jnp.stack(blocks, axis=1)                                # (nb, 16, 36, bt, 64)
    return p.reshape(nb * N_TAP2 * Q_ROWS * bt, K1_COLS).astype(jnp.bfloat16)


def _bcast_spec(shape):
    # whole-array block, same block every grid step (DMA'd once, resident in VMEM)
    return pl.BlockSpec(shape, lambda b: (0,) * len(shape))


@functools.partial(jax.jit, static_argnames=("action_space", "block_batch"))
def actor_net_forward(kparams, x_nchw, *, action_space, block_batch=32):
    B = x_nchw.shape[0]
    bt = min(_round_up(block_batch, 8), _round_up(B, 8))   # batch-tile, multiple of 8
    nb = pl.cdiv(B, bt)
    b_pad = nb * bt
    if b_pad != B:
        x_nchw = jnp.pad(x_nchw, ((0, b_pad - B), (0, 0), (0, 0), (0, 0)))

    p = _conv1_patches(x_nchw, nb, bt)                      # (nb*16*36*bt, 64) bf16
    p_tile = N_TAP2 * Q_ROWS * bt

    in_specs = [
        pl.BlockSpec((p_tile, K1_COLS), lambda b: (b, 0)),
        _bcast_spec((K1_COLS, C1_OUT)), _bcast_spec((1, C1_OUT)),
        _bcast_spec((N_TAP2 * C1_OUT, C2_OUT)), _bcast_spec((1, C2_OUT)),
        _bcast_spec((N_TAP3 * C2_OUT, C3_OUT)), _bcast_spec((1, C3_OUT)),
        _bcast_spec((FC1_IN, HID)), _bcast_spec((1, HID)),
        _bcast_spec((HID, HID)), _bcast_spec((1, HID)),
        _bcast_spec((HID, QPAD)), _bcast_spec((1, QPAD)),
    ]
    out = pl.pallas_call(
        functools.partial(_actor_fused_kernel, bt=bt),
        out_shape=jax.ShapeDtypeStruct((b_pad, QPAD), jnp.float32),
        grid_spec=pltpu.PrefetchScalarGridSpec(
            num_scalar_prefetch=0,
            grid=(nb,),
            in_specs=in_specs,
            out_specs=pl.BlockSpec((bt, QPAD), lambda b: (b, 0)),
        ),
        compiler_params=pltpu.CompilerParams(
            dimension_semantics=("parallel",),
            vmem_limit_bytes=32 << 20),
    )(p,
      kparams["w1"], kparams["b1"], kparams["w2"], kparams["b2"],
      kparams["w3"], kparams["b3"], kparams["fc1_w"], kparams["fc1_b"],
      kparams["fc2_w"], kparams["fc2_b"], kparams["q_w"], kparams["q_b"])
    return out[:B, :action_space]


# ---------------------------------------------------------------------------
# Parameters: synthetic torch-layout init + one-time packing into kernel layout
# ---------------------------------------------------------------------------
def init_params(key, action_space):
    """Synthetic parameters in the PyTorch layouts of the original module."""
    ks = jax.random.split(key, 12)

    def w(k, shape, fan_in):
        return (1.0 / jnp.sqrt(fan_in)) * jax.random.normal(k, shape, jnp.float32)

    return {
        "conv1_w": w(ks[0], (C1_OUT, 1, K1, K1), 1 * K1 * K1),
        "conv1_b": w(ks[1], (C1_OUT,), 1 * K1 * K1),
        "conv2_w": w(ks[2], (C2_OUT, C1_OUT, K2, K2), C1_OUT * K2 * K2),
        "conv2_b": w(ks[3], (C2_OUT,), C1_OUT * K2 * K2),
        "conv3_w": w(ks[4], (C3_OUT, C2_OUT, K3, K3), C2_OUT * K3 * K3),
        "conv3_b": w(ks[5], (C3_OUT,), C2_OUT * K3 * K3),
        "fc1_w": w(ks[6], (HID, FC1_IN), FC1_IN), "fc1_b": w(ks[7], (HID,), FC1_IN),
        "fc2_w": w(ks[8], (HID, HID), HID), "fc2_b": w(ks[9], (HID,), HID),
        "q_w": w(ks[10], (action_space, HID), HID),
        "q_b": w(ks[11], (action_space,), HID),
    }


def prepare_params(params, action_space):
    """One-time packing (outside the forward path): conv weights -> (KH*KW*Cin, Cout)
    bf16 matrices, fc1 rows permuted to (pos3, channel) order, q head padded to 128
    lanes with -1e30 masked bias logits."""
    assert action_space <= QPAD
    bf16, f32 = jnp.bfloat16, jnp.float32

    def conv_mat(w):  # (O, I, KH, KW) -> (KH*KW*I, O), row order (kh, kw, cin)
        o, i, kh, kw = w.shape
        return jnp.transpose(w, (2, 3, 1, 0)).reshape(kh * kw * i, o)

    w1 = conv_mat(params["conv1_w"])                      # (64, 32), no pad
    w2 = conv_mat(params["conv2_w"])                      # (512, 32)
    w3 = conv_mat(params["conv3_w"])                      # (288, 64)
    # torch Flatten order is (c, h, w); the kernel consumes conv3 output as (pos, c).
    perm = np.arange(FC1_IN).reshape(C3_OUT, N_POS3).T.reshape(-1)
    fc1 = params["fc1_w"].T[perm, :]
    fc2 = params["fc2_w"].T
    qw = jnp.pad(params["q_w"].T, ((0, 0), (0, QPAD - action_space)))
    qb = jnp.pad(params["q_b"], ((0, QPAD - action_space),), constant_values=-1e30)
    return {
        "w1": w1.astype(bf16), "b1": params["conv1_b"].reshape(1, -1).astype(f32),
        "w2": w2.astype(bf16), "b2": params["conv2_b"].reshape(1, -1).astype(f32),
        "w3": w3.astype(bf16), "b3": params["conv3_b"].reshape(1, -1).astype(f32),
        "fc1_w": fc1.astype(bf16), "fc1_b": params["fc1_b"].reshape(1, -1).astype(f32),
        "fc2_w": fc2.astype(bf16), "fc2_b": params["fc2_b"].reshape(1, -1).astype(f32),
        "q_w": qw.astype(bf16), "q_b": qb.reshape(1, -1).astype(f32),
    }


def actor_net_reference(params, x):
    """Plain-JAX f32 reference with the exact PyTorch semantics (validation only)."""
    def conv(x, w, b, s):
        y = jax.lax.conv_general_dilated(x, w, (s, s), "VALID",
                                         dimension_numbers=("NCHW", "OIHW", "NCHW"))
        return jax.nn.relu(y + b.reshape(1, -1, 1, 1))
    x = conv(x, params["conv1_w"], params["conv1_b"], S1)
    x = conv(x, params["conv2_w"], params["conv2_b"], S2)
    x = conv(x, params["conv3_w"], params["conv3_b"], S3)
    x = x.reshape(x.shape[0], -1)                     # NCHW flatten -> (C, H, W) order
    x = jax.nn.relu(x @ params["fc1_w"].T + params["fc1_b"])
    x = jax.nn.relu(x @ params["fc2_w"].T + params["fc2_b"])
    return jax.nn.softmax(x @ params["q_w"].T + params["q_b"], axis=-1)


if __name__ == "__main__":
    key = jax.random.PRNGKey(0)
    k_params, k_x = jax.random.split(key)

    batch = 2
    action_space = 6
    # 60x60 single-channel input is implied by fc1's 64*2*2 input features.
    x = jax.random.normal(k_x, (batch, 1, IMG, IMG), dtype=jnp.float32)

    params = init_params(k_params, action_space)
    kparams = prepare_params(params, action_space)        # one-time packing

    probs = actor_net_forward(kparams, x, action_space=action_space)
    probs = jax.block_until_ready(probs)

    assert probs.shape == (batch, action_space)
    assert bool(jnp.all(jnp.isfinite(probs)))
    assert bool(jnp.all(probs >= 0.0))
    # exact divide in the softmax -> rows sum to 1 (up to f32 rounding)
    assert bool(jnp.allclose(jnp.sum(probs, axis=-1), 1.0, atol=1e-5))
    # bf16 MXU operands / f32 accumulation vs. a pure-f32 reference
    ref = actor_net_reference(params, x)
    assert bool(jnp.allclose(probs, ref, atol=0.05)), "mismatch vs f32 reference"
    print("KERNEL_OK")
</pallas_src>

<mosaic_0001>
module attributes {stable_mosaic.version = 11 : i64} {
  func.func @_actor_fused_kernel(%arg0: i32, %arg1: memref<4608x64xbf16, #tpu.memory_space<vmem>>, %arg2: memref<64x32xbf16, #tpu.memory_space<vmem>>, %arg3: memref<1x32xf32, #tpu.memory_space<vmem>>, %arg4: memref<512x32xbf16, #tpu.memory_space<vmem>>, %arg5: memref<1x32xf32, #tpu.memory_space<vmem>>, %arg6: memref<288x64xbf16, #tpu.memory_space<vmem>>, %arg7: memref<1x64xf32, #tpu.memory_space<vmem>>, %arg8: memref<256x512xbf16, #tpu.memory_space<vmem>>, %arg9: memref<1x512xf32, #tpu.memory_space<vmem>>, %arg10: memref<512x512xbf16, #tpu.memory_space<vmem>>, %arg11: memref<1x512xf32, #tpu.memory_space<vmem>>, %arg12: memref<512x128xbf16, #tpu.memory_space<vmem>>, %arg13: memref<1x128xf32, #tpu.memory_space<vmem>>, %arg14: memref<8x128xf32, #tpu.memory_space<vmem>>) attributes {dimension_semantics = [#tpu.dimension_semantics<parallel>], iteration_bounds = array<i64: 1>, scalar_prefetch = 0 : i64, scratch_operands = 0 : i64, tpu.core_type = #tpu.core_type<tc>, window_params = [{transform_indices = @transform_0, window_bounds = array<i64: 4608, 64>}, {pipeline_mode = #tpu.pipeline_mode<synchronous>, transform_indices = @transform_1, window_bounds = array<i64: 64, 32>}, {pipeline_mode = #tpu.pipeline_mode<synchronous>, transform_indices = @transform_2, window_bounds = array<i64: 1, 32>}, {pipeline_mode = #tpu.pipeline_mode<synchronous>, transform_indices = @transform_3, window_bounds = array<i64: 512, 32>}, {pipeline_mode = #tpu.pipeline_mode<synchronous>, transform_indices = @transform_4, window_bounds = array<i64: 1, 32>}, {pipeline_mode = #tpu.pipeline_mode<synchronous>, transform_indices = @transform_5, window_bounds = array<i64: 288, 64>}, {pipeline_mode = #tpu.pipeline_mode<synchronous>, transform_indices = @transform_6, window_bounds = array<i64: 1, 64>}, {pipeline_mode = #tpu.pipeline_mode<synchronous>, transform_indices = @transform_7, window_bounds = array<i64: 256, 512>}, {pipeline_mode = #tpu.pipeline_mode<synchronous>, transform_indices = @transform_8, window_bounds = array<i64: 1, 512>}, {pipeline_mode = #tpu.pipeline_mode<synchronous>, transform_indices = @transform_9, window_bounds = array<i64: 512, 512>}, {pipeline_mode = #tpu.pipeline_mode<synchronous>, transform_indices = @transform_10, window_bounds = array<i64: 1, 512>}, {pipeline_mode = #tpu.pipeline_mode<synchronous>, transform_indices = @transform_11, window_bounds = array<i64: 512, 128>}, {pipeline_mode = #tpu.pipeline_mode<synchronous>, transform_indices = @transform_12, window_bounds = array<i64: 1, 128>}, {transform_indices = @transform_13, window_bounds = array<i64: 8, 128>}]} {
    %c0 = arith.constant 0 : index
    %c0_0 = arith.constant 0 : index
    %0 = vector.load %arg1[%c0, %c0_0] : memref<4608x64xbf16, #tpu.memory_space<vmem>>, vector<4608x64xbf16>
    %c0_1 = arith.constant 0 : index
    %c0_2 = arith.constant 0 : index
    %1 = vector.load %arg2[%c0_1, %c0_2] : memref<64x32xbf16, #tpu.memory_space<vmem>>, vector<64x32xbf16>
    %cst = arith.constant dense<0.000000e+00> : vector<4608x32xf32>
    %2 = tpu.matmul %0, %1, %cst {dimension_numbers = #tpu.dot_dimension_numbers<[1], [0], [0], [1], [0, 0, 1, 1], [], []>} : vector<4608x64xbf16>, vector<64x32xbf16>, vector<4608x32xf32> -> vector<4608x32xf32>
    %c0_3 = arith.constant 0 : index
    %c0_4 = arith.constant 0 : index
    %3 = vector.load %arg3[%c0_3, %c0_4] : memref<1x32xf32, #tpu.memory_space<vmem>>, vector<1x32xf32>
    %4 = vector.broadcast %3 : vector<1x32xf32> to vector<4608x32xf32>
    %5 = arith.addf %2, %4 : vector<4608x32xf32>
    %cst_5 = arith.constant 0.000000e+00 : f32
    %6 = vector.broadcast %cst_5 : f32 to vector<4608x32xf32>
    %7 = arith.maximumf %5, %6 : vector<4608x32xf32>
    %8 = arith.truncf %7 : vector<4608x32xf32> to vector<4608x32xbf16>
    %cst_6 = arith.constant 0.000000e+00 : f32
    %9 = vector.broadcast %cst_6 : f32 to vector<288x32xf32>
    %10 = vector.extract_strided_slice %8 {offsets = [0, 0], sizes = [288, 32], strides = [1, 1]} : vector<4608x32xbf16> to vector<288x32xbf16>
    %c0_7 = arith.constant 0 : index
    %c0_8 = arith.constant 0 : index
    %11 = vector.load %arg4[%c0_7, %c0_8] : memref<512x32xbf16, #tpu.memory_space<vmem>>, vector<32x32xbf16>
    %cst_9 = arith.constant dense<0.000000e+00> : vector<288x32xf32>
    %12 = tpu.matmul %10, %11, %cst_9 {dimension_numbers = #tpu.dot_dimension_numbers<[1], [0], [0], [1], [0, 0, 1, 1], [], []>} : vector<288x32xbf16>, vector<32x32xbf16>, vector<288x32xf32> -> vector<288x32xf32>
    %13 = arith.addf %9, %12 : vector<288x32xf32>
    %14 = vector.extract_strided_slice %8 {offsets = [288, 0], sizes = [288, 32], strides = [1, 1]} : vector<4608x32xbf16> to vector<288x32xbf16>
    %c32 = arith.constant 32 : index
    %c0_10 = arith.constant 0 : index
    %15 = vector.load %arg4[%c32, %c0_10] : memref<512x32xbf16, #tpu.memory_space<vmem>>, vector<32x32xbf16>
    %cst_11 = arith.constant dense<0.000000e+00> : vector<288x32xf32>
    %16 = tpu.matmul %14, %15, %cst_11 {dimension_numbers = #tpu.dot_dimension_numbers<[1], [0], [0], [1], [0, 0, 1, 1], [], []>} : vector<288x32xbf16>, vector<32x32xbf16>, vector<288x32xf32> -> vector<288x32xf32>
    %17 = arith.addf %13, %16 : vector<288x32xf32>
    %18 = vector.extract_strided_slice %8 {offsets = [576, 0], sizes = [288, 32], strides = [1, 1]} : vector<4608x32xbf16> to vector<288x32xbf16>
    %c64 = arith.constant 64 : index
    %c0_12 = arith.constant 0 : index
    %19 = vector.load %arg4[%c64, %c0_12] : memref<512x32xbf16, #tpu.memory_space<vmem>>, vector<32x32xbf16>
    %cst_13 = arith.constant dense<0.000000e+00> : vector<288x32xf32>
    %20 = tpu.matmul %18, %19, %cst_13 {dimension_numbers = #tpu.dot_dimension_numbers<[1], [0], [0], [1], [0, 0, 1, 1], [], []>} : vector<288x32xbf16>, vector<32x32xbf16>, vector<288x32xf32> -> vector<288x32xf32>
    %21 = arith.addf %17, %20 : vector<288x32xf32>
    %22 = vector.extract_strided_slice %8 {offsets = [864, 0], sizes = [288, 32], strides = [1, 1]} : vector<4608x32xbf16> to vector<288x32xbf16>
    %c96 = arith.constant 96 : index
    %c0_14 = arith.constant 0 : index
    %23 = vector.load %arg4[%c96, %c0_14] : memref<512x32xbf16, #tpu.memory_space<vmem>>, vector<32x32xbf16>
    %cst_15 = arith.constant dense<0.000000e+00> : vector<288x32xf32>
    %24 = tpu.matmul %22, %23, %cst_15 {dimension_numbers = #tpu.dot_dimension_numbers<[1], [0], [0], [1], [0, 0, 1, 1], [], []>} : vector<288x32xbf16>, vector<32x32xbf16>, vector<288x32xf32> -> vector<288x32xf32>
    %25 = arith.addf %21, %24 : vector<288x32xf32>
    %26 = vector.extract_strided_slice %8 {offsets = [1152, 0], sizes = [288, 32], strides = [1, 1]} : vector<4608x32xbf16> to vector<288x32xbf16>
    %c128 = arith.constant 128 : index
    %c0_16 = arith.constant 0 : index
    %27 = vector.load %arg4[%c128, %c0_16] : memref<512x32xbf16, #tpu.memory_space<vmem>>, vector<32x32xbf16>
    %cst_17 = arith.constant dense<0.000000e+00> : vector<288x32xf32>
    %28 = tpu.matmul %26, %27, %cst_17 {dimension_numbers = #tpu.dot_dimension_numbers<[1], [0], [0], [1], [0, 0, 1, 1], [], []>} : vector<288x32xbf16>, vector<32x32xbf16>, vector<288x32xf32> -> vector<288x32xf32>
    %29 = arith.addf %25, %28 : vector<288x32xf32>
    %30 = vector.extract_strided_slice %8 {offsets = [1440, 0], sizes = [288, 32], strides = [1, 1]} : vector<4608x32xbf16> to vector<288x32xbf16>
    %c160 = arith.constant 160 : index
    %c0_18 = arith.constant 0 : index
    %31 = vector.load %arg4[%c160, %c0_18] : memref<512x32xbf16, #tpu.memory_space<vmem>>, vector<32x32xbf16>
    %cst_19 = arith.constant dense<0.000000e+00> : vector<288x32xf32>
    %32 = tpu.matmul %30, %31, %cst_19 {dimension_numbers = #tpu.dot_dimension_numbers<[1], [0], [0], [1], [0, 0, 1, 1], [], []>} : vector<288x32xbf16>, vector<32x32xbf16>, vector<288x32xf32> -> vector<288x32xf32>
    %33 = arith.addf %29, %32 : vector<288x32xf32>
    %34 = vector.extract_strided_slice %8 {offsets = [1728, 0], sizes = [288, 32], strides = [1, 1]} : vector<4608x32xbf16> to vector<288x32xbf16>
    %c192 = arith.constant 192 : index
    %c0_20 = arith.constant 0 : index
    %35 = vector.load %arg4[%c192, %c0_20] : memref<512x32xbf16, #tpu.memory_space<vmem>>, vector<32x32xbf16>
    %cst_21 = arith.constant dense<0.000000e+00> : vector<288x32xf32>
    %36 = tpu.matmul %34, %35, %cst_21 {dimension_numbers = #tpu.dot_dimension_numbers<[1], [0], [0], [1], [0, 0, 1, 1], [], []>} : vector<288x32xbf16>, vector<32x32xbf16>, vector<288x32xf32> -> vector<288x32xf32>
    %37 = arith.addf %33, %36 : vector<288x32xf32>
    %38 = vector.extract_strided_slice %8 {offsets = [2016, 0], sizes = [288, 32], strides = [1, 1]} : vector<4608x32xbf16> to vector<288x32xbf16>
    %c224 = arith.constant 224 : index
    %c0_22 = arith.constant 0 : index
    %39 = vector.load %arg4[%c224, %c0_22] : memref<512x32xbf16, #tpu.memory_space<vmem>>, vector<32x32xbf16>
    %cst_23 = arith.constant dense<0.000000e+00> : vector<288x32xf32>
    %40 = tpu.matmul %38, %39, %cst_23 {dimension_numbers = #tpu.dot_dimension_numbers<[1], [0], [0], [1], [0, 0, 1, 1], [], []>} : vector<288x32xbf16>, vector<32x32xbf16>, vector<288x32xf32> -> vector<288x32xf32>
    %41 = arith.addf %37, %40 : vector<288x32xf32>
    %42 = vector.extract_strided_slice %8 {offsets = [2304, 0], sizes = [288, 32], strides = [1, 1]} : vector<4608x32xbf16> to vector<288x32xbf16>
    %c256 = arith.constant 256 : index
    %c0_24 = arith.constant 0 : index
    %43 = vector.load %arg4[%c256, %c0_24] : memref<512x32xbf16, #tpu.memory_space<vmem>>, vector<32x32xbf16>
    %cst_25 = arith.constant dense<0.000000e+00> : vector<288x32xf32>
    %44 = tpu.matmul %42, %43, %cst_25 {dimension_numbers = #tpu.dot_dimension_numbers<[1], [0], [0], [1], [0, 0, 1, 1], [], []>} : vector<288x32xbf16>, vector<32x32xbf16>, vector<288x32xf32> -> vector<288x32xf32>
    %45 = arith.addf %41, %44 : vector<288x32xf32>
    %46 = vector.extract_strided_slice %8 {offsets = [2592, 0], sizes = [288, 32], strides = [1, 1]} : vector<4608x32xbf16> to vector<288x32xbf16>
    %c288 = arith.constant 288 : index
    %c0_26 = arith.constant 0 : index
    %47 = vector.load %arg4[%c288, %c0_26] : memref<512x32xbf16, #tpu.memory_space<vmem>>, vector<32x32xbf16>
    %cst_27 = arith.constant dense<0.000000e+00> : vector<288x32xf32>
    %48 = tpu.matmul %46, %47, %cst_27 {dimension_numbers = #tpu.dot_dimension_numbers<[1], [0], [0], [1], [0, 0, 1, 1], [], []>} : vector<288x32xbf16>, vector<32x32xbf16>, vector<288x32xf32> -> vector<288x32xf32>
    %49 = arith.addf %45, %48 : vector<288x32xf32>
    %50 = vector.extract_strided_slice %8 {offsets = [2880, 0], sizes = [288, 32], strides = [1, 1]} : vector<4608x32xbf16> to vector<288x32xbf16>
    %c320 = arith.constant 320 : index
    %c0_28 = arith.constant 0 : index
    %51 = vector.load %arg4[%c320, %c0_28] : memref<512x32xbf16, #tpu.memory_space<vmem>>, vector<32x32xbf16>
    %cst_29 = arith.constant dense<0.000000e+00> : vector<288x32xf32>
    %52 = tpu.matmul %50, %51, %cst_29 {dimension_numbers = #tpu.dot_dimension_numbers<[1], [0], [0], [1], [0, 0, 1, 1], [], []>} : vector<288x32xbf16>, vector<32x32xbf16>, vector<288x32xf32> -> vector<288x32xf32>
    %53 = arith.addf %49, %52 : vector<288x32xf32>
    %54 = vector.extract_strided_slice %8 {offsets = [3168, 0], sizes = [288, 32], strides = [1, 1]} : vector<4608x32xbf16> to vector<288x32xbf16>
    %c352 = arith.constant 352 : index
    %c0_30 = arith.constant 0 : index
    %55 = vector.load %arg4[%c352, %c0_30] : memref<512x32xbf16, #tpu.memory_space<vmem>>, vector<32x32xbf16>
    %cst_31 = arith.constant dense<0.000000e+00> : vector<288x32xf32>
    %56 = tpu.matmul %54, %55, %cst_31 {dimension_numbers = #tpu.dot_dimension_numbers<[1], [0], [0], [1], [0, 0, 1, 1], [], []>} : vector<288x32xbf16>, vector<32x32xbf16>, vector<288x32xf32> -> vector<288x32xf32>
    %57 = arith.addf %53, %56 : vector<288x32xf32>
    %58 = vector.extract_strided_slice %8 {offsets = [3456, 0], sizes = [288, 32], strides = [1, 1]} : vector<4608x32xbf16> to vector<288x32xbf16>
    %c384 = arith.constant 384 : index
    %c0_32 = arith.constant 0 : index
    %59 = vector.load %arg4[%c384, %c0_32] : memref<512x32xbf16, #tpu.memory_space<vmem>>, vector<32x32xbf16>
    %cst_33 = arith.constant dense<0.000000e+00> : vector<288x32xf32>
    %60 = tpu.matmul %58, %59, %cst_33 {dimension_numbers = #tpu.dot_dimension_numbers<[1], [0], [0], [1], [0, 0, 1, 1], [], []>} : vector<288x32xbf16>, vector<32x32xbf16>, vector<288x32xf32> -> vector<288x32xf32>
    %61 = arith.addf %57, %60 : vector<288x32xf32>
    %62 = vector.extract_strided_slice %8 {offsets = [3744, 0], sizes = [288, 32], strides = [1, 1]} : vector<4608x32xbf16> to vector<288x32xbf16>
    %c416 = arith.constant 416 : index
    %c0_34 = arith.constant 0 : index
    %63 = vector.load %arg4[%c416, %c0_34] : memref<512x32xbf16, #tpu.memory_space<vmem>>, vector<32x32xbf16>
    %cst_35 = arith.constant dense<0.000000e+00> : vector<288x32xf32>
    %64 = tpu.matmul %62, %63, %cst_35 {dimension_numbers = #tpu.dot_dimension_numbers<[1], [0], [0], [1], [0, 0, 1, 1], [], []>} : vector<288x32xbf16>, vector<32x32xbf16>, vector<288x32xf32> -> vector<288x32xf32>
    %65 = arith.addf %61, %64 : vector<288x32xf32>
    %66 = vector.extract_strided_slice %8 {offsets = [4032, 0], sizes = [288, 32], strides = [1, 1]} : vector<4608x32xbf16> to vector<288x32xbf16>
    %c448 = arith.constant 448 : index
    %c0_36 = arith.constant 0 : index
    %67 = vector.load %arg4[%c448, %c0_36] : memref<512x32xbf16, #tpu.memory_space<vmem>>, vector<32x32xbf16>
    %cst_37 = arith.constant dense<0.000000e+00> : vector<288x32xf32>
    %68 = tpu.matmul %66, %67, %cst_37 {dimension_numbers = #tpu.dot_dimension_numbers<[1], [0], [0], [1], [0, 0, 1, 1], [], []>} : vector<288x32xbf16>, vector<32x32xbf16>, vector<288x32xf32> -> vector<288x32xf32>
    %69 = arith.addf %65, %68 : vector<288x32xf32>
    %70 = vector.extract_strided_slice %8 {offsets = [4320, 0], sizes = [288, 32], strides = [1, 1]} : vector<4608x32xbf16> to vector<288x32xbf16>
    %c480 = arith.constant 480 : index
    %c0_38 = arith.constant 0 : index
    %71 = vector.load %arg4[%c480, %c0_38] : memref<512x32xbf16, #tpu.memory_space<vmem>>, vector<32x32xbf16>
    %cst_39 = arith.constant dense<0.000000e+00> : vector<288x32xf32>
    %72 = tpu.matmul %70, %71, %cst_39 {dimension_numbers = #tpu.dot_dimension_numbers<[1], [0], [0], [1], [0, 0, 1, 1], [], []>} : vector<288x32xbf16>, vector<32x32xbf16>, vector<288x32xf32> -> vector<288x32xf32>
    %73 = arith.addf %69, %72 : vector<288x32xf32>
    %c0_40 = arith.constant 0 : index
    %c0_41 = arith.constant 0 : index
    %74 = vector.load %arg5[%c0_40, %c0_41] : memref<1x32xf32, #tpu.memory_space<vmem>>, vector<1x32xf32>
    %75 = vector.broadcast %74 : vector<1x32xf32> to vector<288x32xf32>
    %76 = arith.addf %73, %75 : vector<288x32xf32>
    %cst_42 = arith.constant 0.000000e+00 : f32
    %77 = vector.broadcast %cst_42 : f32 to vector<288x32xf32>
    %78 = arith.maximumf %76, %77 : vector<288x32xf32>
    %79 = arith.truncf %78 : vector<288x32xf32> to vector<288x32xbf16>
    %cst_43 = arith.constant 0.000000e+00 : f32
    %80 = vector.broadcast %cst_43 : f32 to vector<32x64xf32>
    %81 = vector.extract_strided_slice %79 {offsets = [0, 0], sizes = [32, 32], strides = [1, 1]} : vector<288x32xbf16> to vector<32x32xbf16>
    %c0_44 = arith.constant 0 : index
    %c0_45 = arith.constant 0 : index
    %82 = vector.load %arg6[%c0_44, %c0_45] : memref<288x64xbf16, #tpu.memory_space<vmem>>, vector<32x64xbf16>
    %cst_46 = arith.constant dense<0.000000e+00> : vector<32x64xf32>
    %83 = tpu.matmul %81, %82, %cst_46 {dimension_numbers = #tpu.dot_dimension_numbers<[1], [0], [0], [1], [0, 0, 1, 1], [], []>} : vector<32x32xbf16>, vector<32x64xbf16>, vector<32x64xf32> -> vector<32x64xf32>
    %84 = arith.addf %80, %83 : vector<32x64xf32>
    %85 = vector.extract_strided_slice %79 {offsets = [32, 0], sizes = [32, 32], strides = [1, 1]} : vector<288x32xbf16> to vector<32x32xbf16>
    %c32_47 = arith.constant 32 : index
    %c0_48 = arith.constant 0 : index
    %86 = vector.load %arg6[%c32_47, %c0_48] : memref<288x64xbf16, #tpu.memory_space<vmem>>, vector<32x64xbf16>
    %cst_49 = arith.constant dense<0.000000e+00> : vector<32x64xf32>
    %87 = tpu.matmul %85, %86, %cst_49 {dimension_numbers = #tpu.dot_dimension_numbers<[1], [0], [0], [1], [0, 0, 1, 1], [], []>} : vector<32x32xbf16>, vector<32x64xbf16>, vector<32x64xf32> -> vector<32x64xf32>
    %88 = arith.addf %84, %87 : vector<32x64xf32>
    %89 = vector.extract_strided_slice %79 {offsets = [64, 0], sizes = [32, 32], strides = [1, 1]} : vector<288x32xbf16> to vector<32x32xbf16>
    %c64_50 = arith.constant 64 : index
    %c0_51 = arith.constant 0 : index
    %90 = vector.load %arg6[%c64_50, %c0_51] : memref<288x64xbf16, #tpu.memory_space<vmem>>, vector<32x64xbf16>
    %cst_52 = arith.constant dense<0.000000e+00> : vector<32x64xf32>
    %91 = tpu.matmul %89, %90, %cst_52 {dimension_numbers = #tpu.dot_dimension_numbers<[1], [0], [0], [1], [0, 0, 1, 1], [], []>} : vector<32x32xbf16>, vector<32x64xbf16>, vector<32x64xf32> -> vector<32x64xf32>
    %92 = arith.addf %88, %91 : vector<32x64xf32>
    %93 = vector.extract_strided_slice %79 {offsets = [96, 0], sizes = [32, 32], strides = [1, 1]} : vector<288x32xbf16> to vector<32x32xbf16>
    %c96_53 = arith.constant 96 : index
    %c0_54 = arith.constant 0 : index
    %94 = vector.load %arg6[%c96_53, %c0_54] : memref<288x64xbf16, #tpu.memory_space<vmem>>, vector<32x64xbf16>
    %cst_55 = arith.constant dense<0.000000e+00> : vector<32x64xf32>
    %95 = tpu.matmul %93, %94, %cst_55 {dimension_numbers = #tpu.dot_dimension_numbers<[1], [0], [0], [1], [0, 0, 1, 1], [], []>} : vector<32x32xbf16>, vector<32x64xbf16>, vector<32x64xf32> -> vector<32x64xf32>
    %96 = arith.addf %92, %95 : vector<32x64xf32>
    %97 = vector.extract_strided_slice %79 {offsets = [128, 0], sizes = [32, 32], strides = [1, 1]} : vector<288x32xbf16> to vector<32x32xbf16>
    %c128_56 = arith.constant 128 : index
    %c0_57 = arith.constant 0 : index
    %98 = vector.load %arg6[%c128_56, %c0_57] : memref<288x64xbf16, #tpu.memory_space<vmem>>, vector<32x64xbf16>
    %cst_58 = arith.constant dense<0.000000e+00> : vector<32x64xf32>
    %99 = tpu.matmul %97, %98, %cst_58 {dimension_numbers = #tpu.dot_dimension_numbers<[1], [0], [0], [1], [0, 0, 1, 1], [], []>} : vector<32x32xbf16>, vector<32x64xbf16>, vector<32x64xf32> -> vector<32x64xf32>
    %100 = arith.addf %96, %99 : vector<32x64xf32>
    %101 = vector.extract_strided_slice %79 {offsets = [160, 0], sizes = [32, 32], strides = [1, 1]} : vector<288x32xbf16> to vector<32x32xbf16>
    %c160_59 = arith.constant 160 : index
    %c0_60 = arith.constant 0 : index
    %102 = vector.load %arg6[%c160_59, %c0_60] : memref<288x64xbf16, #tpu.memory_space<vmem>>, vector<32x64xbf16>
    %cst_61 = arith.constant dense<0.000000e+00> : vector<32x64xf32>
    %103 = tpu.matmul %101, %102, %cst_61 {dimension_numbers = #tpu.dot_dimension_numbers<[1], [0], [0], [1], [0, 0, 1, 1], [], []>} : vector<32x32xbf16>, vector<32x64xbf16>, vector<32x64xf32> -> vector<32x64xf32>
    %104 = arith.addf %100, %103 : vector<32x64xf32>
    %105 = vector.extract_strided_slice %79 {offsets = [192, 0], sizes = [32, 32], strides = [1, 1]} : vector<288x32xbf16> to vector<32x32xbf16>
    %c192_62 = arith.constant 192 : index
    %c0_63 = arith.constant 0 : index
    %106 = vector.load %arg6[%c192_62, %c0_63] : memref<288x64xbf16, #tpu.memory_space<vmem>>, vector<32x64xbf16>
    %cst_64 = arith.constant dense<0.000000e+00> : vector<32x64xf32>
    %107 = tpu.matmul %105, %106, %cst_64 {dimension_numbers = #tpu.dot_dimension_numbers<[1], [0], [0], [1], [0, 0, 1, 1], [], []>} : vector<32x32xbf16>, vector<32x64xbf16>, vector<32x64xf32> -> vector<32x64xf32>
    %108 = arith.addf %104, %107 : vector<32x64xf32>
    %109 = vector.extract_strided_slice %79 {offsets = [224, 0], sizes = [32, 32], strides = [1, 1]} : vector<288x32xbf16> to vector<32x32xbf16>
    %c224_65 = arith.constant 224 : index
    %c0_66 = arith.constant 0 : index
    %110 = vector.load %arg6[%c224_65, %c0_66] : memref<288x64xbf16, #tpu.memory_space<vmem>>, vector<32x64xbf16>
    %cst_67 = arith.constant dense<0.000000e+00> : vector<32x64xf32>
    %111 = tpu.matmul %109, %110, %cst_67 {dimension_numbers = #tpu.dot_dimension_numbers<[1], [0], [0], [1], [0, 0, 1, 1], [], []>} : vector<32x32xbf16>, vector<32x64xbf16>, vector<32x64xf32> -> vector<32x64xf32>
    %112 = arith.addf %108, %111 : vector<32x64xf32>
    %113 = vector.extract_strided_slice %79 {offsets = [256, 0], sizes = [32, 32], strides = [1, 1]} : vector<288x32xbf16> to vector<32x32xbf16>
    %c256_68 = arith.constant 256 : index
    %c0_69 = arith.constant 0 : index
    %114 = vector.load %arg6[%c256_68, %c0_69] : memref<288x64xbf16, #tpu.memory_space<vmem>>, vector<32x64xbf16>
    %cst_70 = arith.constant dense<0.000000e+00> : vector<32x64xf32>
    %115 = tpu.matmul %113, %114, %cst_70 {dimension_numbers = #tpu.dot_dimension_numbers<[1], [0], [0], [1], [0, 0, 1, 1], [], []>} : vector<32x32xbf16>, vector<32x64xbf16>, vector<32x64xf32> -> vector<32x64xf32>
    %116 = arith.addf %112, %115 : vector<32x64xf32>
    %c0_71 = arith.constant 0 : index
    %c0_72 = arith.constant 0 : index
    %117 = vector.load %arg7[%c0_71, %c0_72] : memref<1x64xf32, #tpu.memory_space<vmem>>, vector<1x64xf32>
    %118 = vector.broadcast %117 : vector<1x64xf32> to vector<32x64xf32>
    %119 = arith.addf %116, %118 : vector<32x64xf32>
    %cst_73 = arith.constant 0.000000e+00 : f32
    %120 = vector.broadcast %cst_73 : f32 to vector<32x64xf32>
    %121 = arith.maximumf %119, %120 : vector<32x64xf32>
    %cst_74 = arith.constant 0.000000e+00 : f32
    %122 = vector.broadcast %cst_74 : f32 to vector<8x512xf32>
    %123 = vector.extract_strided_slice %121 {offsets = [0, 0], sizes = [8, 64], strides = [1, 1]} : vector<32x64xf32> to vector<8x64xf32>
    %124 = arith.truncf %123 : vector<8x64xf32> to vector<8x64xbf16>
    %c0_75 = arith.constant 0 : index
    %c0_76 = arith.constant 0 : index
    %125 = vector.load %arg8[%c0_75, %c0_76] : memref<256x512xbf16, #tpu.memory_space<vmem>>, vector<64x512xbf16>
    %cst_77 = arith.constant dense<0.000000e+00> : vector<8x512xf32>
    %126 = tpu.matmul %124, %125, %cst_77 {dimension_numbers = #tpu.dot_dimension_numbers<[1], [0], [0], [1], [0, 0, 1, 1], [], []>} : vector<8x64xbf16>, vector<64x512xbf16>, vector<8x512xf32> -> vector<8x512xf32>
    %127 = arith.addf %122, %126 : vector<8x512xf32>
    %128 = vector.extract_strided_slice %121 {offsets = [8, 0], sizes = [8, 64], strides = [1, 1]} : vector<32x64xf32> to vector<8x64xf32>
    %129 = arith.truncf %128 : vector<8x64xf32> to vector<8x64xbf16>
    %c64_78 = arith.constant 64 : index
    %c0_79 = arith.constant 0 : index
    %130 = vector.load %arg8[%c64_78, %c0_79] : memref<256x512xbf16, #tpu.memory_space<vmem>>, vector<64x512xbf16>
    %cst_80 = arith.constant dense<0.000000e+00> : vector<8x512xf32>
    %131 = tpu.matmul %129, %130, %cst_80 {dimension_numbers = #tpu.dot_dimension_numbers<[1], [0], [0], [1], [0, 0, 1, 1], [], []>} : vector<8x64xbf16>, vector<64x512xbf16>, vector<8x512xf32> -> vector<8x512xf32>
    %132 = arith.addf %127, %131 : vector<8x512xf32>
    %133 = vector.extract_strided_slice %121 {offsets = [16, 0], sizes = [8, 64], strides = [1, 1]} : vector<32x64xf32> to vector<8x64xf32>
    %134 = arith.truncf %133 : vector<8x64xf32> to vector<8x64xbf16>
    %c128_81 = arith.constant 128 : index
    %c0_82 = arith.constant 0 : index
    %135 = vector.load %arg8[%c128_81, %c0_82] : memref<256x512xbf16, #tpu.memory_space<vmem>>, vector<64x512xbf16>
    %cst_83 = arith.constant dense<0.000000e+00> : vector<8x512xf32>
    %136 = tpu.matmul %134, %135, %cst_83 {dimension_numbers = #tpu.dot_dimension_numbers<[1], [0], [0], [1], [0, 0, 1, 1], [], []>} : vector<8x64xbf16>, vector<64x512xbf16>, vector<8x512xf32> -> vector<8x512xf32>
    %137 = arith.addf %132, %136 : vector<8x512xf32>
    %138 = vector.extract_strided_slice %121 {offsets = [24, 0], sizes = [8, 64], strides = [1, 1]} : vector<32x64xf32> to vector<8x64xf32>
    %139 = arith.truncf %138 : vector<8x64xf32> to vector<8x64xbf16>
    %c192_84 = arith.constant 192 : index
    %c0_85 = arith.constant 0 : index
    %140 = vector.load %arg8[%c192_84, %c0_85] : memref<256x512xbf16, #tpu.memory_space<vmem>>, vector<64x512xbf16>
    %cst_86 = arith.constant dense<0.000000e+00> : vector<8x512xf32>
    %141 = tpu.matmul %139, %140, %cst_86 {dimension_numbers = #tpu.dot_dimension_numbers<[1], [0], [0], [1], [0, 0, 1, 1], [], []>} : vector<8x64xbf16>, vector<64x512xbf16>, vector<8x512xf32> -> vector<8x512xf32>
    %142 = arith.addf %137, %141 : vector<8x512xf32>
    %c0_87 = arith.constant 0 : index
    %c0_88 = arith.constant 0 : index
    %143 = vector.load %arg9[%c0_87, %c0_88] : memref<1x512xf32, #tpu.memory_space<vmem>>, vector<1x512xf32>
    %144 = vector.broadcast %143 : vector<1x512xf32> to vector<8x512xf32>
    %145 = arith.addf %142, %144 : vector<8x512xf32>
    %cst_89 = arith.constant 0.000000e+00 : f32
    %146 = vector.broadcast %cst_89 : f32 to vector<8x512xf32>
    %147 = arith.maximumf %145, %146 : vector<8x512xf32>
    %148 = arith.truncf %147 : vector<8x512xf32> to vector<8x512xbf16>
    %c0_90 = arith.constant 0 : index
    %c0_91 = arith.constant 0 : index
    %149 = vector.load %arg10[%c0_90, %c0_91] : memref<512x512xbf16, #tpu.memory_space<vmem>>, vector<512x512xbf16>
    %cst_92 = arith.constant dense<0.000000e+00> : vector<8x512xf32>
    %150 = tpu.matmul %148, %149, %cst_92 {dimension_numbers = #tpu.dot_dimension_numbers<[1], [0], [0], [1], [0, 0, 1, 1], [], []>} : vector<8x512xbf16>, vector<512x512xbf16>, vector<8x512xf32> -> vector<8x512xf32>
    %c0_93 = arith.constant 0 : index
    %c0_94 = arith.constant 0 : index
    %151 = vector.load %arg11[%c0_93, %c0_94] : memref<1x512xf32, #tpu.memory_space<vmem>>, vector<1x512xf32>
    %152 = vector.broadcast %151 : vector<1x512xf32> to vector<8x512xf32>
    %153 = arith.addf %150, %152 : vector<8x512xf32>
    %cst_95 = arith.constant 0.000000e+00 : f32
    %154 = vector.broadcast %cst_95 : f32 to vector<8x512xf32>
    %155 = arith.maximumf %153, %154 : vector<8x512xf32>
    %156 = arith.truncf %155 : vector<8x512xf32> to vector<8x512xbf16>
    %c0_96 = arith.constant 0 : index
    %c0_97 = arith.constant 0 : index
    %157 = vector.load %arg12[%c0_96, %c0_97] : memref<512x128xbf16, #tpu.memory_space<vmem>>, vector<512x128xbf16>
    %cst_98 = arith.constant dense<0.000000e+00> : vector<8x128xf32>
    %158 = tpu.matmul %156, %157, %cst_98 {dimension_numbers = #tpu.dot_dimension_numbers<[1], [0], [0], [1], [0, 0, 1, 1], [], []>} : vector<8x512xbf16>, vector<512x128xbf16>, vector<8x128xf32> -> vector<8x128xf32>
    %c0_99 = arith.constant 0 : index
    %c0_100 = arith.constant 0 : index
    %159 = vector.load %arg13[%c0_99, %c0_100] : memref<1x128xf32, #tpu.memory_space<vmem>>, vector<1x128xf32>
    %160 = vector.broadcast %159 : vector<1x128xf32> to vector<8x128xf32>
    %161 = arith.addf %158, %160 : vector<8x128xf32>
    %cst_101 = arith.constant dense<0xFF800000> : vector<8xf32>
    %162 = vector.multi_reduction <maximumf>, %161, %cst_101 [1] : vector<8x128xf32> to vector<8xf32>
    %163 = vector.shape_cast %162 : vector<8xf32> to vector<8x1xf32>
    %164 = vector.broadcast %163 : vector<8x1xf32> to vector<8x128xf32>
    %165 = arith.subf %161, %164 : vector<8x128xf32>
    %166 = math.exp %165 : vector<8x128xf32>
    %cst_102 = arith.constant dense<0.000000e+00> : vector<8xf32>
    %167 = vector.multi_reduction <add>, %166, %cst_102 [1] : vector<8x128xf32> to vector<8xf32>
    %168 = vector.shape_cast %167 : vector<8xf32> to vector<8x1xf32>
    %169 = vector.broadcast %168 : vector<8x1xf32> to vector<8x128xf32>
    %170 = arith.divf %166, %169 : vector<8x128xf32>
    %c0_103 = arith.constant 0 : index
    %c0_104 = arith.constant 0 : index
    %171 = vector.load %arg14[%c0_103, %c0_104] : memref<8x128xf32, #tpu.memory_space<vmem>>, vector<8x128xf32>
    tpu.vector_store %arg14[%c0_103, %c0_104], %170 {strides = array<i32>} : memref<8x128xf32, #tpu.memory_space<vmem>>, vector<8x128xf32>,
    return
  }
  func.func @transform_0(%arg0: i32) -> (i32, i32) {
    %c0_i32 = arith.constant 0 : i32
    %c0_i32_0 = arith.constant 0 : i32
    return %arg0, %c0_i32 : i32, i32
  }
  func.func @transform_1(%arg0: i32) -> (i32, i32) {
    %c0_i32 = arith.constant 0 : i32
    %c0_i32_0 = arith.constant 0 : i32
    %c0_i32_1 = arith.constant 0 : i32
    return %c0_i32, %c0_i32_0 : i32, i32
  }
  func.func @transform_2(%arg0: i32) -> (i32, i32) {
    %c0_i32 = arith.constant 0 : i32
    %c0_i32_0 = arith.constant 0 : i32
    %c0_i32_1 = arith.constant 0 : i32
    return %c0_i32, %c0_i32_0 : i32, i32
  }
  func.func @transform_3(%arg0: i32) -> (i32, i32) {
    %c0_i32 = arith.constant 0 : i32
    %c0_i32_0 = arith.constant 0 : i32
    %c0_i32_1 = arith.constant 0 : i32
    return %c0_i32, %c0_i32_0 : i32, i32
  }
  func.func @transform_4(%arg0: i32) -> (i32, i32) {
    %c0_i32 = arith.constant 0 : i32
    %c0_i32_0 = arith.constant 0 : i32
    %c0_i32_1 = arith.constant 0 : i32
    return %c0_i32, %c0_i32_0 : i32, i32
  }
  func.func @transform_5(%arg0: i32) -> (i32, i32) {
    %c0_i32 = arith.constant 0 : i32
    %c0_i32_0 = arith.constant 0 : i32
    %c0_i32_1 = arith.constant 0 : i32
    return %c0_i32, %c0_i32_0 : i32, i32
  }
  func.func @transform_6(%arg0: i32) -> (i32, i32) {
    %c0_i32 = arith.constant 0 : i32
    %c0_i32_0 = arith.constant 0 : i32
    %c0_i32_1 = arith.constant 0 : i32
    return %c0_i32, %c0_i32_0 : i32, i32
  }
  func.func @transform_7(%arg0: i32) -> (i32, i32) {
    %c0_i32 = arith.constant 0 : i32
    %c0_i32_0 = arith.constant 0 : i32
    %c0_i32_1 = arith.constant 0 : i32
    return %c0_i32, %c0_i32_0 : i32, i32
  }
  func.func @transform_8(%arg0: i32) -> (i32, i32) {
    %c0_i32 = arith.constant 0 : i32
    %c0_i32_0 = arith.constant 0 : i32
    %c0_i32_1 = arith.constant 0 : i32
    return %c0_i32, %c0_i32_0 : i32, i32
  }
  func.func @transform_9(%arg0: i32) -> (i32, i32) {
    %c0_i32 = arith.constant 0 : i32
    %c0_i32_0 = arith.constant 0 : i32
    %c0_i32_1 = arith.constant 0 : i32
    return %c0_i32, %c0_i32_0 : i32, i32
  }
  func.func @transform_10(%arg0: i32) -> (i32, i32) {
    %c0_i32 = arith.constant 0 : i32
    %c0_i32_0 = arith.constant 0 : i32
    %c0_i32_1 = arith.constant 0 : i32
    return %c0_i32, %c0_i32_0 : i32, i32
  }
  func.func @transform_11(%arg0: i32) -> (i32, i32) {
    %c0_i32 = arith.constant 0 : i32
    %c0_i32_0 = arith.constant 0 : i32
    %c0_i32_1 = arith.constant 0 : i32
    return %c0_i32, %c0_i32_0 : i32, i32
  }
  func.func @transform_12(%arg0: i32) -> (i32, i32) {
    %c0_i32 = arith.constant 0 : i32
    %c0_i32_0 = arith.constant 0 : i32
    %c0_i32_1 = arith.constant 0 : i32
    return %c0_i32, %c0_i32_0 : i32, i32
  }
  func.func @transform_13(%arg0: i32) -> (i32, i32) {
    %c0_i32 = arith.constant 0 : i32
    %c0_i32_0 = arith.constant 0 : i32
    return %arg0, %c0_i32 : i32, i32
  }
}

</mosaic_0001>

<bundles_post_ra>
// kernel: actor_net_forward.1
= control target key start
LH: loop header
LB: loop body
LE: loop exit
PB: predicated region body
PF: predicated region fallthrough
CT: control target
= control target key end

     0   :  { %vm2100_vm0 = vcmask 523264   ;;  %vm6186_vm1 = vcmask 261120   ;;  %s23703_s1 = inlined_call_operand.vmem [shape: bf16[64,32], index: 1, kind: input, shape index: {}]   ;;  %s23704_s0 = inlined_call_operand.vmem [shape: bf16[4608,64], index: 0, kind: input, shape index: {}]   ;;  %s23705_s3 = inlined_call_operand.vmem [shape: bf16[512,32], index: 3, kind: input, shape index: {}]   ;;  %s23706_s2 = inlined_call_operand.vmem [shape: f32[1,32], index: 2, kind: input, shape index: {}]   ;;  %s23707_s5 = inlined_call_operand.vmem [shape: bf16[288,64], index: 5, kind: input, shape index: {}]   ;;  %s23708_s4 = inlined_call_operand.vmem [shape: f32[1,32], index: 4, kind: input, shape index: {}]   ;;  %s23709_s7 = inlined_call_operand.vmem [shape: bf16[256,512], index: 7, kind: input, shape index: {}]   ;;  %s23710_s9 = inlined_call_operand.vmem [shape: bf16[512,512], index: 9, kind: input, shape index: {}]   ;;  %s23711_s6 = inlined_call_operand.vmem [shape: f32[1,64], index: 6, kind: input, shape index: {}]   ;;  %s23712_s11 = inlined_call_operand.vmem [shape: bf16[512,128], index: 11, kind: input, shape index: {}]   ;;  %s23713_s8 = inlined_call_operand.vmem [shape: f32[1,512], index: 8, kind: input, shape index: {}]   ;;  %s23714_s10 = inlined_call_operand.vmem [shape: f32[1,512], index: 10, kind: input, shape index: {}]   ;;  %s23715_s12 = inlined_call_operand.vmem [shape: f32[1,128], index: 12, kind: input, shape index: {}]   ;;  %s23716_s13 = inlined_call_operand.vmem [shape: f32[8,128], index: 13, kind: output, shape index: {}]  }
   0x1   :  { %v16652_v0 = vld [vmem:[%s23703_s1 + $0x18] sm:$0xff]   ;;  %v16653_v1 = vld [vmem:[%s23703_s1 + $0x10] sm:$0xff]   ;;  %v16654_v2 = vld [vmem:[%s23703_s1 + $0x8] sm:$0xff]  }
   0x2   :  { %15355 = vmatprep.subr.bf16.mxu0 %v16652_v0  ;;  %v16656_v3 = vld [vmem:[%s23704_s0] sm:$0xff]   ;;  %v16657_v5 = vld [vmem:[%s23704_s0 + $0x8] sm:$0xff]   ;;  %v16658_v6 = vld [vmem:[%s23704_s0 + $0x10] sm:$0xff]  }
   0x3   :  { %15356 = vmatpush3.bf16.msra.mxu0 %v16652_v0  ;;  %15363 = vmatprep.mubr.msk.bf16.mxu0 %vm2100_vm0, %v16656_v3  ;;  %v16655_v4 = vld [vmem:[%s23703_s1] sm:$0xff]   ;;  %v16659_v7 = vld [vmem:[%s23704_s0 + $0x18] sm:$0xff]   ;;  %v16661_v9 = vld [vmem:[%s23704_s0 + $0x28] sm:$0xff]  }
   0x4   :  { %15357 = vmatprep.subr.bf16.mxu0 %v16653_v1  ;;  %v16660_v8 = vld [vmem:[%s23704_s0 + $0x20] sm:$0xff]   ;;  %v16662_v10 = vld [vmem:[%s23704_s0 + $0x30] sm:$0xff]   ;;  %v16663_v11 = vld [vmem:[%s23704_s0 + $0x38] sm:$0xff]  }
   0x5   :  { %v16664_v12 = vld [vmem:[%s23704_s0 + $0x40] sm:$0xff]   ;;  %v16665_v13 = vld [vmem:[%s23704_s0 + $0x48] sm:$0xff]   ;;  %v16666_v14 = vld [vmem:[%s23704_s0 + $0x50] sm:$0xff]  }
   0x6   :  { %v16667_v15 = vld [vmem:[%s23704_s0 + $0x58] sm:$0xff]   ;;  %v16668_v16 = vld [vmem:[%s23704_s0 + $0x60] sm:$0xff]   ;;  %v16669_v17 = vld [vmem:[%s23704_s0 + $0x68] sm:$0xff]  }
   0x7   :  { %15358 = vmatpush3.bf16.msra.mxu0 %v16653_v1  ;;  %v16670_v18 = vld [vmem:[%s23704_s0 + $0x70] sm:$0xff]   ;;  %v16671_v19 = vld [vmem:[%s23704_s0 + $0x78] sm:$0xff]   ;;  %v16672_v20 = vld [vmem:[%s23704_s0 + $0x80] sm:$0xff]  }
   0x8   :  { %15359 = vmatprep.subr.bf16.mxu0 %v16654_v2  ;;  %v16673_v21 = vld [vmem:[%s23704_s0 + $0x88] sm:$0xff]   ;;  %v16674_v22 = vld [vmem:[%s23704_s0 + $0x90] sm:$0xff]   ;;  %v16675_v23 = vld [vmem:[%s23704_s0 + $0x98] sm:$0xff]  }
   0x9   :  { %v16676_v24 = vld [vmem:[%s23704_s0 + $0xa0] sm:$0xff]   ;;  %v16677_v25 = vld [vmem:[%s23704_s0 + $0xa8] sm:$0xff]   ;;  %v16678_v26 = vld [vmem:[%s23704_s0 + $0xb0] sm:$0xff]  }
   0xa   :  { %v16679_v27 = vld [vmem:[%s23704_s0 + $0xb8] sm:$0xff]   ;;  %v16680_v28 = vld [vmem:[%s23704_s0 + $0xc0] sm:$0xff]   ;;  %v16681_v29 = vld [vmem:[%s23704_s0 + $0xc8] sm:$0xff]  }
   0xb   :  { %15360 = vmatpush3.bf16.msra.mxu0 %v16654_v2  ;;  %v16682_v30 = vld [vmem:[%s23704_s0 + $0xd0] sm:$0xff]   ;;  %v16683_v31 = vld [vmem:[%s23704_s0 + $0xd8] sm:$0xff]   ;;  %v16684_v32 = vld [vmem:[%s23704_s0 + $0xe0] sm:$0xff]  }
   0xc   :  { %15361 = vmatprep.subr.bf16.mxu0 %v16655_v4  ;;  %v16685_v33 = vld [vmem:[%s23704_s0 + $0xe8] sm:$0xff]   ;;  %v16686_v34 = vld [vmem:[%s23704_s0 + $0xf0] sm:$0xff]   ;;  %v16687_v35 = vld [vmem:[%s23704_s0 + $0xf8] sm:$0xff]  }
   0xd   :  { %v16688_v36 = vld [vmem:[%s23704_s0 + $0x100] sm:$0xff]   ;;  %v16689_v37 = vld [vmem:[%s23704_s0 + $0x108] sm:$0xff]   ;;  %v16690_v38 = vld [vmem:[%s23704_s0 + $0x110] sm:$0xff]  }
   0xe   :  { %v16691_v39 = vld [vmem:[%s23704_s0 + $0x118] sm:$0xff]   ;;  %v16692_v40 = vld [vmem:[%s23704_s0 + $0x120] sm:$0xff]   ;;  %v16693_v41 = vld [vmem:[%s23704_s0 + $0x128] sm:$0xff]  }
   0xf   :  { %15362 = vmatpush3.bf16.msra.mxu0 %v16655_v4  ;;  %v16694_v42 = vld [vmem:[%s23704_s0 + $0x130] sm:$0xff]   ;;  %v16708_v43 = vld [vmem:[%s23705_s3 + $0x18] sm:$0xff]   ;;  %v16696_v46 = vld [vmem:[%s23704_s0 + $0x140] sm:$0xff]  }
  0x10   :  { %15939 = vmatprep.subr.bf16.mxu1 %v16708_v43  ;;  %v16710_v44 = vld [vmem:[%s23705_s3 + $0x10] sm:$0xff]   ;;  %v16695_v45 = vld [vmem:[%s23704_s0 + $0x138] sm:$0xff]   ;;  %v17581_v47 = vld [vmem:[%s23705_s3 + $0x8] sm:$0xff]  }
  0x11   :  { %15940 = vmatpush3.bf16.msra.mxu1 %v16708_v43  ;;  %v16697_v48 = vld [vmem:[%s23704_s0 + $0x148] sm:$0xff]   ;;  %v16698_v49 = vld [vmem:[%s23704_s0 + $0x150] sm:$0xff]   ;;  %v16699_v50 = vld [vmem:[%s23704_s0 + $0x158] sm:$0xff]  }
  0x12   :  { %15364 = vmatmul.mubr.msk.bf16.vlgmr.msra.gmra.mxu0 %vm2100_vm0, %v16657_v5  ;;  %15941 = vmatprep.subr.bf16.mxu1 %v16710_v44  ;;  %v16700_v51 = vld [vmem:[%s23704_s0 + $0x160] sm:$0xff]   ;;  %v16701_v52 = vld [vmem:[%s23704_s0 + $0x168] sm:$0xff]   ;;  %v16702_v53 = vld [vmem:[%s23704_s0 + $0x170] sm:$0xff]  }
  0x13   :  { %15367 = vmatprep.mubr.msk.bf16.mxu0 %vm2100_vm0, %v16658_v6  ;;  %v16703_v54 = vld [vmem:[%s23704_s0 + $0x178] sm:$0xff]   ;;  %v16704_v55 = vld [vmem:[%s23704_s0 + $0x180] sm:$0xff]   ;;  %v16705_v56 = vld [vmem:[%s23704_s0 + $0x188] sm:$0xff]  }
  0x14   :  { %v16706_v57 = vld [vmem:[%s23704_s0 + $0x190] sm:$0xff]   ;;  %v17625_v59 = vld [vmem:[%s23706_s2] ss:$0 sm:$0xff]  ;;  %v16707_v62 = vld [vmem:[%s23704_s0 + $0x198] sm:$0xff]  }
  0x15   :  { %15942 = vmatpush3.bf16.msra.mxu1 %v16710_v44  ;;  %v16709_v2 = vld [vmem:[%s23704_s0 + $0x1a0] sm:$0xff]  }
  0x16   :  { %15979 = vmatprep.subr.bf16.mxu1 %v17581_v47 }
  0x1a   :  { %15368 = vmatmul.mubr.msk.bf16.gmra.mxu0 %vm2100_vm0, %v16659_v7 }
  0x1b   :  { %15371 = vmatprep.mubr.msk.bf16.mxu0 %vm2100_vm0, %v16660_v8 }
  0x22   :  { %15372 = vmatmul.mubr.msk.bf16.gmra.mxu0 %vm2100_vm0, %v16661_v9 }
  0x23   :  { %15375 = vmatprep.mubr.msk.bf16.mxu0 %vm2100_vm0, %v16662_v10 }
  0x2a   :  { %15376 = vmatmul.mubr.msk.bf16.gmra.mxu0 %vm2100_vm0, %v16663_v11 }
  0x2b   :  { %15379 = vmatprep.mubr.msk.bf16.mxu0 %vm2100_vm0, %v16664_v12 }
  0x32   :  { %15380 = vmatmul.mubr.msk.bf16.gmra.mxu0 %vm2100_vm0, %v16665_v13 }
  0x33   :  { %15383 = vmatprep.mubr.msk.bf16.mxu0 %vm2100_vm0, %v16666_v14  ;;  %v16711_v14 = vld [vmem:[%s23704_s0 + $0x1a8] sm:$0xff]  }
  0x3a   :  { %15384 = vmatmul.mubr.msk.bf16.gmra.mxu0 %vm2100_vm0, %v16667_v15 }
  0x3b   :  { %15387 = vmatprep.mubr.msk.bf16.mxu0 %vm2100_vm0, %v16668_v16 }
  0x42   :  { %15388 = vmatmul.mubr.msk.bf16.gmra.mxu0 %vm2100_vm0, %v16669_v17 }
  0x43   :  { %15391 = vmatprep.mubr.msk.bf16.mxu0 %vm2100_vm0, %v16670_v18  ;;  %v16713_v18 = vld [vmem:[%s23704_s0 + $0x1b0] sm:$0xff]  }
  0x4a   :  { %15392 = vmatmul.mubr.msk.bf16.gmra.mxu0 %vm2100_vm0, %v16671_v19 }
  0x4b   :  { %15395 = vmatprep.mubr.msk.bf16.mxu0 %vm2100_vm0, %v16672_v20 }
  0x52   :  { %15396 = vmatmul.mubr.msk.bf16.gmra.mxu0 %vm2100_vm0, %v16673_v21 }
  0x53   :  { %15399 = vmatprep.mubr.msk.bf16.mxu0 %vm2100_vm0, %v16674_v22 }
  0x5a   :  { %15400 = vmatmul.mubr.msk.bf16.gmra.mxu0 %vm2100_vm0, %v16675_v23 }
  0x5b   :  { %15403 = vmatprep.mubr.msk.bf16.mxu0 %vm2100_vm0, %v16676_v24 }
  0x62   :  { %15404 = vmatmul.mubr.msk.bf16.gmra.mxu0 %vm2100_vm0, %v16677_v25 }
  0x63   :  { %15407 = vmatprep.mubr.msk.bf16.mxu0 %vm2100_vm0, %v16678_v26 }
  0x6a   :  { %15408 = vmatmul.mubr.msk.bf16.gmra.mxu0 %vm2100_vm0, %v16679_v27 }
  0x6b   :  { %15411 = vmatprep.mubr.msk.bf16.mxu0 %vm2100_vm0, %v16680_v28 }
  0x72   :  { %15412 = vmatmul.mubr.msk.bf16.gmra.mxu0 %vm2100_vm0, %v16681_v29 }
  0x73   :  { %15415 = vmatprep.mubr.msk.bf16.mxu0 %vm2100_vm0, %v16682_v30  ;;  %v16714_v30 = vld [vmem:[%s23704_s0 + $0x1b8] sm:$0xff]  }
  0x7a   :  { %15416 = vmatmul.mubr.msk.bf16.gmra.mxu0 %vm2100_vm0, %v16683_v31 }
  0x7b   :  { %15419 = vmatprep.mubr.msk.bf16.mxu0 %vm2100_vm0, %v16684_v32 }
  0x82   :  { %15420 = vmatmul.mubr.msk.bf16.gmra.mxu0 %vm2100_vm0, %v16685_v33 }
  0x83   :  { %15423 = vmatprep.mubr.msk.bf16.mxu0 %vm2100_vm0, %v16686_v34  ;;  %v16715_v34 = vld [vmem:[%s23704_s0 + $0x1c0] sm:$0xff]  }
  0x8a   :  { %15424 = vmatmul.mubr.msk.bf16.gmra.mxu0 %vm2100_vm0, %v16687_v35 }
  0x8b   :  { %15427 = vmatprep.mubr.msk.bf16.mxu0 %vm2100_vm0, %v16688_v36 }
  0x92   :  { %15428 = vmatmul.mubr.msk.bf16.gmra.mxu0 %vm2100_vm0, %v16689_v37 }
  0x93   :  { %15431 = vmatprep.mubr.msk.bf16.mxu0 %vm2100_vm0, %v16690_v38 }
  0x9a   :  { %15432 = vmatmul.mubr.msk.bf16.gmra.mxu0 %vm2100_vm0, %v16691_v39 }
  0x9b   :  { %15435 = vmatprep.mubr.msk.bf16.mxu0 %vm2100_vm0, %v16692_v40 }
  0xa2   :  { %15436 = vmatmul.mubr.msk.bf16.gmra.mxu0 %vm2100_vm0, %v16693_v41 }
  0xa3   :  { %15439 = vmatprep.mubr.msk.bf16.mxu0 %vm2100_vm0, %v16694_v42 }
  0xaa   :  { %15440 = vmatmul.mubr.msk.bf16.gmra.mxu0 %vm2100_vm0, %v16695_v45 }
  0xab   :  { %15443 = vmatprep.mubr.msk.bf16.mxu0 %vm2100_vm0, %v16696_v46  ;;  %v16716_v46 = vld [vmem:[%s23704_s0 + $0x1c8] sm:$0xff]  }
  0xb2   :  { %15444 = vmatmul.mubr.msk.bf16.gmra.mxu0 %vm2100_vm0, %v16697_v48 }
  0xb3   :  { %15447 = vmatprep.mubr.msk.bf16.mxu0 %vm2100_vm0, %v16698_v49 }
  0xba   :  { %15448 = vmatmul.mubr.msk.bf16.gmra.mxu0 %vm2100_vm0, %v16699_v50 }
  0xbb   :  { %15451 = vmatprep.mubr.msk.bf16.mxu0 %vm2100_vm0, %v16700_v51  ;;  %v16717_v51 = vld [vmem:[%s23704_s0 + $0x1d0] sm:$0xff]  }
  0xc2   :  { %15452 = vmatmul.mubr.msk.bf16.gmra.mxu0 %vm2100_vm0, %v16701_v52 }
  0xc3   :  { %15455 = vmatprep.mubr.msk.bf16.mxu0 %vm2100_vm0, %v16702_v53 }
  0xca   :  { %15456 = vmatmul.mubr.msk.bf16.gmra.mxu0 %vm2100_vm0, %v16703_v54 }
  0xcb   :  { %15459 = vmatprep.mubr.msk.bf16.mxu0 %vm2100_vm0, %v16704_v55 }
  0xd2   :  { %v15365_v58 = vpop.f32.mrf.mxu0  ;;  %15460 = vmatmul.mubr.msk.bf16.gmra.mxu0 %vm2100_vm0, %v16705_v56 }
  0xd3   :  { %15463 = vmatprep.mubr.msk.bf16.mxu0 %vm2100_vm0, %v16706_v57  ;;  %v3008_v61 = vadd.f32 %v15365_v58, %v17625_v59 }
  0xd4   :  { %v2999_v60 = vpop.f32.mrf.mxu0 }
  0xd5   :  { %v3000_v0 = vadd.f32 %v17625_v59, %v2999_v60  ;;  %v5304_v4 = vmax.f32 %v3008_v61, 0.0 }
  0xd6   :  { %v15366_v63 = vpop.f32.mrf.mxu0 }
  0xd7   :  { %v3011_v1 = vadd.f32 %v15366_v63, %v17625_v59  ;;  %v5302_v8 = vmax.f32 %v3000_v0, 0.0  ;;  %v16718_v0 = vld [vmem:[%s23704_s0 + $0x1d8] sm:$0xff]  }
  0xd8   :  { %v3002_v3 = vpop.f32.mrf.mxu0 }
  0xd9   :  { %v5305_v5 = vmax.f32 %v3011_v1, 0.0  ;;  %v3003_v6 = vadd.f32 %v17625_v59, %v3002_v3 }
  0xda   :  { %v15369_v7 = vpop.f32.mrf.mxu0  ;;  %15464 = vmatmul.mubr.msk.bf16.gmra.mxu0 %vm2100_vm0, %v16707_v62 }
  0xdb   :  { %v17640_v9 = vpack.c.bf16 %v5305_v5, %v5304_v4  ;;  %v5303_v10 = vmax.f32 %v3003_v6, 0.0  ;;  %15467 = vmatprep.mubr.msk.bf16.mxu0 %vm2100_vm0, %v16709_v2  ;;  %v3024_v13 = vadd.f32 %v15369_v7, %v17625_v59  ;;  %v16719_v4 = vld [vmem:[%s23704_s0 + $0x1e0] sm:$0xff]  }
  0xdc   :  { %v3015_v11 = vpop.f32.mrf.mxu0 }
  0xdd   :  { %v17643_v12 = vpack.c.bf16 %v5303_v10, %v5302_v8  ;;  %v3016_v16 = vadd.f32 %v17625_v59, %v3015_v11  ;;  %v5308_v20 = vmax.f32 %v3024_v13, 0.0 }
  0xde   :  { %v15370_v15 = vpop.f32.mrf.mxu0 }
  0xdf   :  { %v3027_v17 = vadd.f32 %v15370_v15, %v17625_v59  ;;  %v5306_v24 = vmax.f32 %v3016_v16, 0.0 }
  0xe0   :  { %v3018_v19 = vpop.f32.mrf.mxu0 }
  0xe1   :  { %v5309_v21 = vmax.f32 %v3027_v17, 0.0  ;;  %v3019_v22 = vadd.f32 %v17625_v59, %v3018_v19  ;;  %v16720_v19 = vld [vmem:[%s23704_s0 + $0x1e8] sm:$0xff]  }
  0xe2   :  { %v15373_v23 = vpop.f32.mrf.mxu0  ;;  %15468 = vmatmul.mubr.msk.bf16.gmra.mxu0 %vm2100_vm0, %v16711_v14 }
  0xe3   :  { %v17656_v25 = vpack.c.bf16 %v5309_v21, %v5308_v20  ;;  %v5307_v26 = vmax.f32 %v3019_v22, 0.0  ;;  %15471 = vmatprep.mubr.msk.bf16.mxu0 %vm2100_vm0, %v16713_v18  ;;  %v3040_v29 = vadd.f32 %v15373_v23, %v17625_v59  ;;  %v16721_v22 = vld [vmem:[%s23704_s0 + $0x1f0] sm:$0xff]  }
  0xe4   :  { %v3031_v27 = vpop.f32.mrf.mxu0 }
  0xe5   :  { %v17659_v28 = vpack.c.bf16 %v5307_v26, %v5306_v24  ;;  %v3032_v32 = vadd.f32 %v17625_v59, %v3031_v27  ;;  %v5312_v36 = vmax.f32 %v3040_v29, 0.0 }
  0xe6   :  { %v15374_v31 = vpop.f32.mrf.mxu0 }
  0xe7   :  { %v3043_v33 = vadd.f32 %v15374_v31, %v17625_v59  ;;  %v5310_v40 = vmax.f32 %v3032_v32, 0.0 }
  0xe8   :  { %v3034_v35 = vpop.f32.mrf.mxu0 }
  0xe9   :  { %v5313_v37 = vmax.f32 %v3043_v33, 0.0  ;;  %v3035_v38 = vadd.f32 %v17625_v59, %v3034_v35 }
  0xea   :  { %v15377_v39 = vpop.f32.mrf.mxu0  ;;  %15472 = vmatmul.mubr.msk.bf16.gmra.mxu0 %vm2100_vm0, %v16714_v30 }
  0xeb   :  { %v17672_v41 = vpack.c.bf16 %v5313_v37, %v5312_v36  ;;  %v5311_v42 = vmax.f32 %v3035_v38, 0.0  ;;  %15475 = vmatprep.mubr.msk.bf16.mxu0 %vm2100_vm0, %v16715_v34  ;;  %v3056_v45 = vadd.f32 %v15377_v39, %v17625_v59  ;;  %v16723_v37 = vld [vmem:[%s23704_s0 + $0x1f8] sm:$0xff]  }
  0xec   :  { %v3047_v43 = vpop.f32.mrf.mxu0 }
  0xed   :  { %v17675_v44 = vpack.c.bf16 %v5311_v42, %v5310_v40  ;;  %v3048_v49 = vadd.f32 %v17625_v59, %v3047_v43  ;;  %v5316_v53 = vmax.f32 %v3056_v45, 0.0  ;;  %v16724_v40 = vld [vmem:[%s23704_s0 + $0x200] sm:$0xff]  }
  0xee   :  { %v15378_v48 = vpop.f32.mrf.mxu0 }
  0xef   :  { %v3059_v50 = vadd.f32 %v15378_v48, %v17625_v59  ;;  %v5314_v57 = vmax.f32 %v3048_v49, 0.0 }
  0xf0   :  { %v3050_v52 = vpop.f32.mrf.mxu0 }
  0xf1   :  { %v5317_v54 = vmax.f32 %v3059_v50, 0.0  ;;  %v3051_v55 = vadd.f32 %v17625_v59, %v3050_v52 }
  0xf2   :  { %v15381_v56 = vpop.f32.mrf.mxu0  ;;  %15476 = vmatmul.mubr.msk.bf16.gmra.mxu0 %vm2100_vm0, %v16716_v46 }
  0xf3   :  { %v17688_v58 = vpack.c.bf16 %v5317_v54, %v5316_v53  ;;  %v5315_v60 = vmax.f32 %v3051_v55, 0.0  ;;  %15479 = vmatprep.mubr.msk.bf16.mxu0 %vm2100_vm0, %v16717_v51  ;;  %v3072_v63 = vadd.f32 %v15381_v56, %v17625_v59  ;;  %v16725_v56 = vld [vmem:[%s23704_s0 + $0x208] sm:$0xff]  }
  0xf4   :  { %v3063_v61 = vpop.f32.mrf.mxu0 }
  0xf5   :  { %v17691_v62 = vpack.c.bf16 %v5315_v60, %v5314_v57  ;;  %v3064_v2 = vadd.f32 %v17625_v59, %v3063_v61  ;;  %v5320_v6 = vmax.f32 %v3072_v63, 0.0  ;;  %v16726_v61 = vld [vmem:[%s23704_s0 + $0x210] sm:$0xff]  }
  0xf6   :  { %v15382_v1 = vpop.f32.mrf.mxu0 }
  0xf7   :  { %v3075_v3 = vadd.f32 %v15382_v1, %v17625_v59  ;;  %v5318_v11 = vmax.f32 %v3064_v2, 0.0 }
  0xf8   :  { %v3066_v5 = vpop.f32.mrf.mxu0 }
  0xf9   :  { %v5321_v7 = vmax.f32 %v3075_v3, 0.0  ;;  %v3067_v8 = vadd.f32 %v17625_v59, %v3066_v5 }
  0xfa   :  { %v15385_v10 = vpop.f32.mrf.mxu0  ;;  %15480 = vmatmul.mubr.msk.bf16.gmra.mxu0 %vm2100_vm0, %v16718_v0 }
  0xfb   :  { %v17704_v13 = vpack.c.bf16 %v5321_v7, %v5320_v6  ;;  %v5319_v14 = vmax.f32 %v3067_v8, 0.0  ;;  %15483 = vmatprep.mubr.msk.bf16.mxu0 %vm2100_vm0, %v16719_v4  ;;  %v3088_v17 = vadd.f32 %v15385_v10, %v17625_v59 }
  0xfc   :  { %v3079_v15 = vpop.f32.mrf.mxu0 }
  0xfd   :  { %v17707_v16 = vpack.c.bf16 %v5319_v14, %v5318_v11  ;;  %v3080_v20 = vadd.f32 %v17625_v59, %v3079_v15  ;;  %v5324_v24 = vmax.f32 %v3088_v17, 0.0  ;;  %v16727_v14 = vld [vmem:[%s23704_s0 + $0x218] sm:$0xff]  }
  0xfe   :  { %v15386_v18 = vpop.f32.mrf.mxu0 }
  0xff   :  { %v3091_v21 = vadd.f32 %v15386_v18, %v17625_v59  ;;  %v5322_v30 = vmax.f32 %v3080_v20, 0.0  ;;  %v16728_v18 = vld [vmem:[%s23704_s0 + $0x220] sm:$0xff]  }
 0x100   :  { %v3082_v23 = vpop.f32.mrf.mxu0 }
 0x101   :  { %v5325_v26 = vmax.f32 %v3091_v21, 0.0  ;;  %v3083_v27 = vadd.f32 %v17625_v59, %v3082_v23 }
 0x102   :  { %v15389_v29 = vpop.f32.mrf.mxu0  ;;  %15484 = vmatmul.mubr.msk.bf16.gmra.mxu0 %vm2100_vm0, %v16720_v19 }
 0x103   :  { %v17720_v31 = vpack.c.bf16 %v5325_v26, %v5324_v24  ;;  %v5323_v32 = vmax.f32 %v3083_v27, 0.0  ;;  %15487 = vmatprep.mubr.msk.bf16.mxu0 %vm2100_vm0, %v16721_v22  ;;  %v3104_v35 = vadd.f32 %v15389_v29, %v17625_v59 }
 0x104   :  { %v3095_v33 = vpop.f32.mrf.mxu0 }
 0x105   :  { %v17723_v34 = vpack.c.bf16 %v5323_v32, %v5322_v30  ;;  %v3096_v38 = vadd.f32 %v17625_v59, %v3095_v33  ;;  %v5328_v43 = vmax.f32 %v3104_v35, 0.0  ;;  %v16729_v33 = vld [vmem:[%s23704_s0 + $0x228] sm:$0xff]  }
 0x106   :  { %v15390_v36 = vpop.f32.mrf.mxu0 }
 0x107   :  { %v3107_v39 = vadd.f32 %v15390_v36, %v17625_v59  ;;  %v5326_v49 = vmax.f32 %v3096_v38, 0.0 }
 0x108   :  { %v3098_v42 = vpop.f32.mrf.mxu0 }
 0x109   :  { %v5329_v45 = vmax.f32 %v3107_v39, 0.0  ;;  %v3099_v46 = vadd.f32 %v17625_v59, %v3098_v42 }
 0x10a   :  { %v15393_v48 = vpop.f32.mrf.mxu0  ;;  %15488 = vmatmul.mubr.msk.bf16.gmra.mxu0 %vm2100_vm0, %v16723_v37  ;;  %v16730_v37 = vld [vmem:[%s23704_s0 + $0x230] sm:$0xff]  }
 0x10b   :  { %v17736_v50 = vpack.c.bf16 %v5329_v45, %v5328_v43  ;;  %v5327_v51 = vmax.f32 %v3099_v46, 0.0  ;;  %15491 = vmatprep.mubr.msk.bf16.mxu0 %vm2100_vm0, %v16724_v40  ;;  %v3120_v54 = vadd.f32 %v15393_v48, %v17625_v59 }
 0x10c   :  { %v3111_v52 = vpop.f32.mrf.mxu0 }
 0x10d   :  { %v17739_v53 = vpack.c.bf16 %v5327_v51, %v5326_v49  ;;  %v3112_v57 = vadd.f32 %v17625_v59, %v3111_v52  ;;  %v5332_v0 = vmax.f32 %v3120_v54, 0.0 }
 0x10e   :  { %v15394_v55 = vpop.f32.mrf.mxu0 }
 0x10f   :  { %v3123_v60 = vadd.f32 %v15394_v55, %v17625_v59  ;;  %v5330_v4 = vmax.f32 %v3112_v57, 0.0  ;;  %v16722_v55 = vld [vmem:[%s23705_s3] sm:$0xff]  }
 0x110   :  { %v3114_v63 = vpop.f32.mrf.mxu0 }
 0x111   :  { %v5333_v1 = vmax.f32 %v3123_v60, 0.0  ;;  %v3115_v2 = vadd.f32 %v17625_v59, %v3114_v63 }
 0x112   :  { %v15397_v3 = vpop.f32.mrf.mxu0  ;;  %15492 = vmatmul.mubr.msk.bf16.gmra.mxu0 %vm2100_vm0, %v16725_v56  ;;  %v16731_v56 = vld [vmem:[%s23704_s0 + $0x238] sm:$0xff]  }
 0x113   :  { %v17752_v5 = vpack.c.bf16 %v5333_v1, %v5332_v0  ;;  %v5331_v6 = vmax.f32 %v3115_v2, 0.0  ;;  %15495 = vmatprep.mubr.msk.bf16.mxu0 %vm2100_vm0, %v16726_v61  ;;  %v3136_v10 = vadd.f32 %v15397_v3, %v17625_v59  ;;  %v16733_v61 = vld [vmem:[%s23704_s0 + $0x240] sm:$0xff]  }
 0x114   :  { %v3127_v7 = vpop.f32.mrf.mxu0 }
 0x115   :  { %v17755_v8 = vpack.c.bf16 %v5331_v6, %v5330_v4  ;;  %v3128_v15 = vadd.f32 %v17625_v59, %v3127_v7  ;;  %v5336_v20 = vmax.f32 %v3136_v10, 0.0  ;;  %v17805_v4 = vld [vmem:[%s23705_s3 + $0x28] sm:$0xff]  }
 0x116   :  { %v15398_v11 = vpop.f32.mrf.mxu0 }
 0x117   :  { %v3139_v17 = vadd.f32 %v15398_v11, %v17625_v59  ;;  %v5334_v24 = vmax.f32 %v3128_v15, 0.0 }
 0x118   :  { %v3130_v19 = vpop.f32.mrf.mxu0 }
 0x119   :  { %v5337_v21 = vmax.f32 %v3139_v17, 0.0  ;;  %v3131_v22 = vadd.f32 %v17625_v59, %v3130_v19  ;;  %v16734_v17 = vld [vmem:[%s23704_s0 + $0x248] sm:$0xff]  }
 0x11a   :  { %v15401_v23 = vpop.f32.mrf.mxu0  ;;  %15496 = vmatmul.mubr.msk.bf16.gmra.mxu0 %vm2100_vm0, %v16727_v14 }
 0x11b   :  { %v17768_v26 = vpack.c.bf16 %v5337_v21, %v5336_v20  ;;  %v5335_v27 = vmax.f32 %v3131_v22, 0.0  ;;  %15499 = vmatprep.mubr.msk.bf16.mxu0 %vm2100_vm0, %v16728_v18  ;;  %v3152_v38 = vadd.f32 %v15401_v23, %v17625_v59  ;;  %v16735_v20 = vld [vmem:[%s23704_s0 + $0x250] sm:$0xff]  }
 0x11c   :  { %v3143_v29 = vpop.f32.mrf.mxu0 }
 0x11d   :  { %v17771_v30 = vpack.c.bf16 %v5335_v27, %v5334_v24  ;;  %v3144_v35 = vadd.f32 %v17625_v59, %v3143_v29  ;;  %v5340_v48 = vmax.f32 %v3152_v38, 0.0 }
 0x11e   :  { %v15402_v32 = vpop.f32.mrf.mxu0 }
 0x11f   :  { %v3155_v36 = vadd.f32 %v15402_v32, %v17625_v59  ;;  %v5338_v45 = vmax.f32 %v3144_v35, 0.0 }
 0x120   :  { %v3146_v39 = vpop.f32.mrf.mxu0 }
 0x121   :  { %v3147_v40 = vadd.f32 %v17625_v59, %v3146_v39  ;;  %v5341_v42 = vmax.f32 %v3155_v36, 0.0  ;;  %v16736_v39 = vld [vmem:[%s23704_s0 + $0x258] sm:$0xff]  }
 0x122   :  { %v15405_v43 = vpop.f32.mrf.mxu0  ;;  %15500 = vmatmul.mubr.msk.bf16.gmra.mxu0 %vm2100_vm0, %v16729_v33 }
 0x123   :  { %v5339_v46 = vmax.f32 %v3147_v40, 0.0  ;;  %15503 = vmatprep.mubr.msk.bf16.mxu0 %vm2100_vm0, %v16730_v37  ;;  %v5897_v52 = vpack.c.bf16 %v5341_v42, %v5340_v48  ;;  %v3168_v63 = vadd.f32 %v15405_v43, %v17625_v59  ;;  %v16737_v43 = vld [vmem:[%s23704_s0 + $0x260] sm:$0xff]  }
 0x124   :  { %v3159_v49 = vpop.f32.mrf.mxu0 }
 0x125   :  { %v5896_v51 = vpack.c.bf16 %v5339_v46, %v5338_v45  ;;  %v3160_v57 = vadd.f32 %v17625_v59, %v3159_v49  ;;  %v5344_v10 = vmax.f32 %v3168_v63, 0.0  ;;  %v16738_v63 = vld [vmem:[%s23704_s0 + $0x268] sm:$0xff]  }
 0x126   :  { %v15406_v54 = vpop.f32.mrf.mxu0 }
 0x127   :  { %v3171_v60 = vadd.f32 %v15406_v54, %v17625_v59  ;;  %15943 = vmatprep.mubr.msk.bf16.mxu1 %vm6186_vm1, %v5896_v51  ;;  %v5342_v6 = vmax.f32 %v3160_v57, 0.0 }
 0x128   :  { %v3162_v0 = vpop.f32.mrf.mxu0  ;;  %15944 = vmatmul.mubr.msk.bf16.vlgmr.msra.gmra.mxu1 %vm6186_vm1, %v5897_v52 }
 0x129   :  { %v3163_v1 = vadd.f32 %v17625_v59, %v3162_v0  ;;  %15980 = vmatpush3.bf16.msra.mxu1 %v17581_v47  ;;  %v5345_v2 = vmax.f32 %v3171_v60, 0.0 }
 0x12a   :  { %v15409_v3 = vpop.f32.mrf.mxu0  ;;  %15981 = vmatprep.subr.bf16.mxu1 %v16722_v55  ;;  %15504 = vmatmul.mubr.msk.bf16.gmra.mxu0 %vm2100_vm0, %v16731_v56 }
 0x12b   :  { %v5343_v7 = vmax.f32 %v3163_v1, 0.0  ;;  %15507 = vmatprep.mubr.msk.bf16.mxu0 %vm2100_vm0, %v16733_v61  ;;  %v5899_v15 = vpack.c.bf16 %v5345_v2, %v5344_v10  ;;  %v3184_v21 = vadd.f32 %v15409_v3, %v17625_v59  ;;  %v16739_v2 = vld [vmem:[%s23704_s0 + $0x270] sm:$0xff]  }
 0x12c   :  { %v3175_v11 = vpop.f32.mrf.mxu0 }
 0x12d   :  { %v5898_v14 = vpack.c.bf16 %v5343_v7, %v5342_v6  ;;  %15982 = vmatpush3.bf16.msra.mxu1 %v16722_v55  ;;  %v3176_v18 = vadd.f32 %v17625_v59, %v3175_v11  ;;  %v5348_v33 = vmax.f32 %v3184_v21, 0.0  ;;  %v16740_v21 = vld [vmem:[%s23704_s0 + $0x278] sm:$0xff]  }
 0x12e   :  { %v15410_v47 = vpop.f32.mrf.mxu0  ;;  %16019 = vmatprep.subr.bf16.mxu1 %v17805_v4 }
 0x12f   :  { %v3187_v19 = vadd.f32 %v15410_v47, %v17625_v59  ;;  %15947 = vmatprep.mubr.msk.bf16.mxu1 %vm6186_vm1, %v5898_v14  ;;  %v5346_v29 = vmax.f32 %v3176_v18, 0.0 }
 0x130   :  { %v3178_v22 = vpop.f32.mrf.mxu0  ;;  %15948 = vmatmul.mubr.msk.bf16.gmra.mxu1 %vm6186_vm1, %v5899_v15 }
 0x131   :  { %v3179_v23 = vadd.f32 %v17625_v59, %v3178_v22  ;;  %v5349_v24 = vmax.f32 %v3187_v19, 0.0 }
 0x132   :  { %v15413_v27 = vpop.f32.mrf.mxu0  ;;  %15508 = vmatmul.mubr.msk.bf16.gmra.mxu0 %vm2100_vm0, %v16734_v17 }
 0x133   :  { %v5347_v32 = vmax.f32 %v3179_v23, 0.0  ;;  %15511 = vmatprep.mubr.msk.bf16.mxu0 %vm2100_vm0, %v16735_v20  ;;  %v5901_v37 = vpack.c.bf16 %v5349_v24, %v5348_v33  ;;  %v3200_v45 = vadd.f32 %v15413_v27, %v17625_v59  ;;  %v16741_v24 = vld [vmem:[%s23704_s0 + $0x280] sm:$0xff]  }
 0x134   :  { %v3191_v35 = vpop.f32.mrf.mxu0 }
 0x135   :  { %v5900_v36 = vpack.c.bf16 %v5347_v32, %v5346_v29  ;;  %v3192_v40 = vadd.f32 %v17625_v59, %v3191_v35  ;;  %v5352_v55 = vmax.f32 %v3200_v45, 0.0 }
 0x136   :  { %v15414_v38 = vpop.f32.mrf.mxu0 }
 0x137   :  { %v3203_v42 = vadd.f32 %v15414_v38, %v17625_v59  ;;  %15951 = vmatprep.mubr.msk.bf16.mxu1 %vm6186_vm1, %v5900_v36  ;;  %v5350_v52 = vmax.f32 %v3192_v40, 0.0 }
 0x138   :  { %v3194_v46 = vpop.f32.mrf.mxu0  ;;  %15952 = vmatmul.mubr.msk.bf16.gmra.mxu1 %vm6186_vm1, %v5901_v37 }
 0x139   :  { %v3195_v48 = vadd.f32 %v17625_v59, %v3194_v46  ;;  %v5353_v49 = vmax.f32 %v3203_v42, 0.0  ;;  %v16743_v46 = vld [vmem:[%s23704_s0 + $0x288] sm:$0xff]  }
 0x13a   :  { %v15417_v51 = vpop.f32.mrf.mxu0  ;;  %15512 = vmatmul.mubr.msk.bf16.gmra.mxu0 %vm2100_vm0, %v16736_v39 }
 0x13b   :  { %v5351_v54 = vmax.f32 %v3195_v48, 0.0  ;;  %15515 = vmatprep.mubr.msk.bf16.mxu0 %vm2100_vm0, %v16737_v43  ;;  %v5903_v60 = vpack.c.bf16 %v5353_v49, %v5352_v55  ;;  %v3216_v3 = vadd.f32 %v15417_v51, %v17625_v59  ;;  %v16744_v51 = vld [vmem:[%s23704_s0 + $0x290] sm:$0xff]  }
 0x13c   :  { %v3207_v56 = vpop.f32.mrf.mxu0 }
 0x13d   :  { %v5902_v57 = vpack.c.bf16 %v5351_v54, %v5350_v52  ;;  %v3208_v0 = vadd.f32 %v17625_v59, %v3207_v56  ;;  %v5356_v47 = vmax.f32 %v3216_v3, 0.0  ;;  %v16745_v3 = vld [vmem:[%s23704_s0 + $0x298] sm:$0xff]  }
 0x13e   :  { %v15418_v61 = vpop.f32.mrf.mxu0 }
 0x13f   :  { %v3219_v1 = vadd.f32 %v15418_v61, %v17625_v59  ;;  %15955 = vmatprep.mubr.msk.bf16.mxu1 %vm6186_vm1, %v5902_v57  ;;  %v5354_v14 = vmax.f32 %v3208_v0, 0.0 }
 0x140   :  { %v3210_v6 = vpop.f32.mrf.mxu0  ;;  %15956 = vmatmul.mubr.msk.bf16.gmra.mxu1 %vm6186_vm1, %v5903_v60  ;;  %v16761_v60 = vld [vmem:[%s23707_s5 + $0x8] sm:$0xff]  }
 0x141   :  { %v3211_v7 = vadd.f32 %v17625_v59, %v3210_v6  ;;  %v5357_v10 = vmax.f32 %v3219_v1, 0.0  ;;  %16587 = vmatprep.subr.bf16.mxu0 %v16761_v60 }
 0x142   :  { %v15421_v11 = vpop.f32.mrf.mxu0  ;;  %15516 = vmatmul.mubr.msk.bf16.gmra.mxu0 %vm2100_vm0, %v16738_v63 }
 0x143   :  { %v5355_v15 = vmax.f32 %v3211_v7, 0.0  ;;  %15519 = vmatprep.mubr.msk.bf16.mxu0 %vm2100_vm0, %v16739_v2  ;;  %v5905_v19 = vpack.c.bf16 %v5357_v10, %v5356_v47  ;;  %v3232_v27 = vadd.f32 %v15421_v11, %v17625_v59  ;;  %16588 = vmatpush3.bf16.msra.mxu0 %v16761_v60 }
 0x144   :  { %v3223_v17 = vpop.f32.mrf.mxu0 }
 0x145   :  { %v5904_v18 = vpack.c.bf16 %v5355_v15, %v5354_v14  ;;  %v3224_v22 = vadd.f32 %v17625_v59, %v3223_v17  ;;  %v5360_v38 = vmax.f32 %v3232_v27, 0.0  ;;  %v16746_v14 = vld [vmem:[%s23704_s0 + $0x2a0] sm:$0xff]  }
 0x146   :  { %v15422_v20 = vpop.f32.mrf.mxu0 }
 0x147   :  { %v3235_v23 = vadd.f32 %v15422_v20, %v17625_v59  ;;  %15959 = vmatprep.mubr.msk.bf16.mxu1 %vm6186_vm1, %v5904_v18  ;;  %v5358_v36 = vmax.f32 %v3224_v22, 0.0 }
 0x148   :  { %v3226_v29 = vpop.f32.mrf.mxu0  ;;  %15960 = vmatmul.mubr.msk.bf16.gmra.mxu1 %vm6186_vm1, %v5905_v19 }
 0x149   :  { %v3227_v32 = vadd.f32 %v17625_v59, %v3226_v29  ;;  %v5361_v33 = vmax.f32 %v3235_v23, 0.0 }
 0x14a   :  { %v15425_v35 = vpop.f32.mrf.mxu0  ;;  %15520 = vmatmul.mubr.msk.bf16.gmra.mxu0 %vm2100_vm0, %v16740_v21 }
 0x14b   :  { %v5359_v37 = vmax.f32 %v3227_v32, 0.0  ;;  %15523 = vmatprep.mubr.msk.bf16.mxu0 %vm2100_vm0, %v16741_v24  ;;  %v3248_v42 = vadd.f32 %v15425_v35, %v17625_v59  ;;  %v5907_v43 = vpack.c.bf16 %v5361_v33, %v5360_v38  ;;  %v16747_v24 = vld [vmem:[%s23704_s0 + $0x2a8] sm:$0xff]   ;;  %v16748_v35 = vld [vmem:[%s23704_s0 + $0x2b0] sm:$0xff]  }
 0x14c   :  { %v3239_v39 = vpop.f32.mrf.mxu0 }
 0x14d   :  { %v5906_v40 = vpack.c.bf16 %v5359_v37, %v5358_v36  ;;  %v3240_v48 = vadd.f32 %v17625_v59, %v3239_v39  ;;  %v5364_v54 = vmax.f32 %v3248_v42, 0.0 }
 0x14e   :  { %v15426_v45 = vpop.f32.mrf.mxu0 }
 0x14f   :  { %v3251_v49 = vadd.f32 %v15426_v45, %v17625_v59  ;;  %15963 = vmatprep.mubr.msk.bf16.mxu1 %vm6186_vm1, %v5906_v40  ;;  %v5362_v61 = vmax.f32 %v3240_v48, 0.0 }
 0x150   :  { %v3242_v52 = vpop.f32.mrf.mxu0  ;;  %15964 = vmatmul.mubr.msk.bf16.gmra.mxu1 %vm6186_vm1, %v5907_v43 }
 0x151   :  { %v3243_v55 = vadd.f32 %v17625_v59, %v3242_v52  ;;  %v5365_v56 = vmax.f32 %v3251_v49, 0.0  ;;  %v16750_v52 = vld [vmem:[%s23704_s0 + $0x2c0] sm:$0xff]  }
 0x152   :  { %v15429_v57 = vpop.f32.mrf.mxu0  ;;  %15524 = vmatmul.mubr.msk.bf16.gmra.mxu0 %vm2100_vm0, %v16743_v46 }
 0x153   :  { %v5363_v63 = vmax.f32 %v3243_v55, 0.0  ;;  %15527 = vmatprep.mubr.msk.bf16.mxu0 %vm2100_vm0, %v16744_v51  ;;  %v3264_v2 = vadd.f32 %v15429_v57, %v17625_v59  ;;  %v5909_v6 = vpack.c.bf16 %v5365_v56, %v5364_v54  ;;  %v16742_v57 = vld [vmem:[%s23705_s3 + $0x20] sm:$0xff]  }
 0x154   :  { %v3255_v0 = vpop.f32.mrf.mxu0 }
 0x155   :  { %v5908_v1 = vpack.c.bf16 %v5363_v63, %v5362_v61  ;;  %v3256_v10 = vadd.f32 %v17625_v59, %v3255_v0  ;;  %v5368_v47 = vmax.f32 %v3264_v2, 0.0  ;;  %v16751_v61 = vld [vmem:[%s23704_s0 + $0x2c8] sm:$0xff]   ;;  %v16755_v2 = vld [vmem:[%s23704_s0 + $0x2e0] sm:$0xff]  }
 0x156   :  { %v15430_v7 = vpop.f32.mrf.mxu0 }
 0x157   :  { %v3267_v11 = vadd.f32 %v15430_v7, %v17625_v59  ;;  %15967 = vmatprep.mubr.msk.bf16.mxu1 %vm6186_vm1, %v5908_v1  ;;  %v5366_v20 = vmax.f32 %v3256_v10, 0.0  ;;  %v17958_v1 = vld [vmem:[%s23705_s3 + $0x38] sm:$0xff]  }
 0x158   :  { %v3258_v15 = vpop.f32.mrf.mxu0  ;;  %15968 = vmatmul.mubr.msk.bf16.gmra.mxu1 %vm6186_vm1, %v5909_v6 }
 0x159   :  { %v5369_v17 = vmax.f32 %v3267_v11, 0.0  ;;  %v3259_v18 = vadd.f32 %v17625_v59, %v3258_v15  ;;  %v16756_v11 = vld [vmem:[%s23704_s0 + $0x2e8] sm:$0xff]  }
 0x15a   :  { %v15433_v19 = vpop.f32.mrf.mxu0  ;;  %15528 = vmatmul.mubr.msk.bf16.gmra.mxu0 %vm2100_vm0, %v16745_v3 }
 0x15b   :  { %v5367_v21 = vmax.f32 %v3259_v18, 0.0  ;;  %15531 = vmatprep.mubr.msk.bf16.mxu0 %vm2100_vm0, %v16746_v14  ;;  %v5911_v27 = vpack.c.bf16 %v5369_v17, %v5368_v47  ;;  %v3280_v36 = vadd.f32 %v15433_v19, %v17625_v59  ;;  %v16758_v17 = vld [vmem:[%s23704_s0 + $0x2f8] sm:$0xff]  }
 0x15c   :  { %v3271_v22 = vpop.f32.mrf.mxu0 }
 0x15d   :  { %v5910_v23 = vpack.c.bf16 %v5367_v21, %v5366_v20  ;;  %v3272_v32 = vadd.f32 %v17625_v59, %v3271_v22  ;;  %v5372_v45 = vmax.f32 %v3280_v36, 0.0  ;;  %v16760_v21 = vld [vmem:[%s23704_s0 + $0x308] sm:$0xff]  }
 0x15e   :  { %v15434_v29 = vpop.f32.mrf.mxu0 }
 0x15f   :  { %v3283_v33 = vadd.f32 %v15434_v29, %v17625_v59  ;;  %15971 = vmatprep.mubr.msk.bf16.mxu1 %vm6186_vm1, %v5910_v23  ;;  %v5370_v42 = vmax.f32 %v3272_v32, 0.0 }
 0x160   :  { %v3274_v37 = vpop.f32.mrf.mxu0  ;;  %15972 = vmatmul.mubr.msk.bf16.gmra.mxu1 %vm6186_vm1, %v5911_v27  ;;  %v16764_v27 = vld [vmem:[%s23704_s0 + $0x318] sm:$0xff]  }
 0x161   :  { %v3275_v38 = vadd.f32 %v17625_v59, %v3274_v37  ;;  %v5373_v39 = vmax.f32 %v3283_v33, 0.0  ;;  %v16749_v59 = vld [vmem:[%s23704_s0 + $0x2b8] sm:$0xff]  }
 0x162   :  { %v17908_v40 = vpop.f32.mrf.mxu0  ;;  %15532 = vmatmul.mubr.msk.bf16.gmra.mxu0 %vm2100_vm0, %v16747_v24 }
 0x163   :  { %v5371_v43 = vmax.f32 %v3275_v38, 0.0  ;;  %15535 = vmatprep.mubr.msk.bf16.mxu0 %vm2100_vm0, %v16748_v35  ;;  %v5913_v49 = vpack.c.bf16 %v5373_v39, %v5372_v45  ;;  %v16766_v35 = vld [vmem:[%s23704_s0 + $0x328] sm:$0xff]   ;;  %v18087_v38 = vld [vmem:[%s23706_s2] ss:$0 sm:$0xff] }
 0x164   :  { %v17912_v46 = vpop.f32.mrf.mxu0 }
 0x165   :  { %v5912_v48 = vpack.c.bf16 %v5371_v43, %v5370_v42  ;;  %v16768_v42 = vld [vmem:[%s23704_s0 + $0x338] sm:$0xff]   ;;  %v16769_v43 = vld [vmem:[%s23704_s0 + $0x340] sm:$0xff]  }
 0x166   :  { %v17914_v51 = vpop.f32.mrf.mxu0 }
 0x167   :  { %15975 = vmatprep.mubr.msk.bf16.mxu1 %vm6186_vm1, %v5912_v48 }
 0x168   :  { %15976 = vmatmul.mubr.msk.bf16.gmra.mxu1 %vm6186_vm1, %v5913_v49  ;;  %v17924_v54 = vpop.f32.mrf.mxu0 }
 0x169   :  { %15983 = vmatprep.mubr.msk.bf16.mxu1 %vm6186_vm1, %v17643_v12  ;;  %v16753_v12 = vld [vmem:[%s23704_s0 + $0x2d0] sm:$0xff]   ;;  %v3291_v39 = vadd.f32 %v18087_v38, %v17924_v54 }
 0x16a   :  { %v17928_v55 = vpop.f32.mrf.mxu0  ;;  %15536 = vmatmul.mubr.msk.bf16.gmra.mxu0 %vm2100_vm0, %v16749_v59 }
 0x16b   :  { %15539 = vmatprep.mubr.msk.bf16.mxu0 %vm2100_vm0, %v16750_v52 }
 0x16c   :  { %v17932_v56 = vpop.f32.mrf.mxu0 }
 0x16d   :  { %v3304_v54 = vadd.f32 %v18087_v38, %v17932_v56 }
 0x16e   :  { %v17937_v60 = vpop.f32.mrf.mxu0 }
 0x170   :  { %15984 = vmatmul.mubr.msk.bf16.vlgmr.msra.gmra.mxu1 %vm6186_vm1, %v17640_v9  ;;  %v17947_v63 = vpop.f32.mrf.mxu0 }
 0x171   :  { %16020 = vmatpush3.bf16.msra.mxu1 %v17805_v4  ;;  %15987 = vmatprep.mubr.msk.bf16.mxu1 %vm6186_vm1, %v17659_v28  ;;  %v16754_v28 = vld [vmem:[%s23704_s0 + $0x2d8] sm:$0xff]  }
 0x172   :  { %16021 = vmatprep.subr.bf16.mxu1 %v16742_v57  ;;  %v17952_v0 = vpop.f32.mrf.mxu0  ;;  %15540 = vmatmul.mubr.msk.bf16.gmra.mxu0 %vm2100_vm0, %v16751_v61 }
 0x173   :  { %15543 = vmatprep.mubr.msk.bf16.mxu0 %vm2100_vm0, %v16753_v12  ;;  %v16770_v12 = vld [vmem:[%s23704_s0 + $0x348] sm:$0xff]  }
 0x174   :  { %v17961_v9 = vpop.f32.mrf.mxu0 }
 0x175   :  { %16022 = vmatpush3.bf16.msra.mxu1 %v16742_v57  ;;  %v3296_v57 = vadd.f32 %v18087_v38, %v17908_v40 }
 0x176   :  { %16059 = vmatprep.subr.bf16.mxu1 %v17958_v1  ;;  %v17964_v4 = vpop.f32.mrf.mxu0 }
 0x178   :  { %15988 = vmatmul.mubr.msk.bf16.gmra.mxu1 %vm6186_vm1, %v17656_v25  ;;  %v17974_v3 = vpop.f32.mrf.mxu0  ;;  %v16757_v25 = vld [vmem:[%s23704_s0 + $0x2f0] sm:$0xff]  }
 0x179   :  { %15991 = vmatprep.mubr.msk.bf16.mxu1 %vm6186_vm1, %v17675_v44 }
 0x17a   :  { %v17978_v6 = vpop.f32.mrf.mxu0  ;;  %15544 = vmatmul.mubr.msk.bf16.gmra.mxu0 %vm2100_vm0, %v16754_v28  ;;  %v16771_v28 = vld [vmem:[%s23704_s0 + $0x350] sm:$0xff]  }
 0x17b   :  { %15547 = vmatprep.mubr.msk.bf16.mxu0 %vm2100_vm0, %v16755_v2 }
 0x17c   :  { %v17982_v7 = vpop.f32.mrf.mxu0 }
 0x17e   :  { %v17984_v10 = vpop.f32.mrf.mxu0 }
 0x180   :  { %15992 = vmatmul.mubr.msk.bf16.gmra.mxu1 %vm6186_vm1, %v17672_v41  ;;  %v17994_v44 = vpop.f32.mrf.mxu0  ;;  %v16759_v41 = vld [vmem:[%s23704_s0 + $0x300] sm:$0xff]  }
 0x181   :  { %15995 = vmatprep.mubr.msk.bf16.mxu1 %vm6186_vm1, %v17691_v62 }
 0x182   :  { %v17998_v14 = vpop.f32.mrf.mxu0  ;;  %15548 = vmatmul.mubr.msk.bf16.gmra.mxu0 %vm2100_vm0, %v16756_v11 }
 0x183   :  { %15551 = vmatprep.mubr.msk.bf16.mxu0 %vm2100_vm0, %v16757_v25 }
 0x184   :  { %v18002_v15 = vpop.f32.mrf.mxu0 }
 0x186   :  { %v18004_v47 = vpop.f32.mrf.mxu0 }
 0x188   :  { %15996 = vmatmul.mubr.msk.bf16.gmra.mxu1 %vm6186_vm1, %v17688_v58  ;;  %v18014_v62 = vpop.f32.mrf.mxu0  ;;  %v16762_v58 = vld [vmem:[%s23704_s0 + $0x310] sm:$0xff]  }
 0x189   :  { %15999 = vmatprep.mubr.msk.bf16.mxu1 %vm6186_vm1, %v17707_v16 }
 0x18a   :  { %v18018_v18 = vpop.f32.mrf.mxu0  ;;  %15552 = vmatmul.mubr.msk.bf16.gmra.mxu0 %vm2100_vm0, %v16758_v17 }
 0x18b   :  { %15555 = vmatprep.mubr.msk.bf16.mxu0 %vm2100_vm0, %v16759_v41  ;;  %v3323_v41 = vadd.f32 %v18087_v38, %v17974_v3  ;;  %v16774_v3 = vld [vmem:[%s23704_s0 + $0x360] sm:$0xff]  }
 0x18c   :  { %v18022_v19 = vpop.f32.mrf.mxu0 }
 0x18e   :  { %v18024_v20 = vpop.f32.mrf.mxu0 }
 0x190   :  { %16000 = vmatmul.mubr.msk.bf16.gmra.mxu1 %vm6186_vm1, %v17704_v13  ;;  %v18034_v16 = vpop.f32.mrf.mxu0  ;;  %v16765_v13 = vld [vmem:[%s23704_s0 + $0x320] sm:$0xff]  }
 0x191   :  { %16003 = vmatprep.mubr.msk.bf16.mxu1 %vm6186_vm1, %v17723_v34 }
 0x192   :  { %v18038_v22 = vpop.f32.mrf.mxu0  ;;  %15556 = vmatmul.mubr.msk.bf16.gmra.mxu0 %vm2100_vm0, %v16760_v21 }
 0x193   :  { %15559 = vmatprep.mubr.msk.bf16.mxu0 %vm2100_vm0, %v16762_v58  ;;  %v3312_v58 = vadd.f32 %v18087_v38, %v17928_v55 }
 0x194   :  { %v18042_v23 = vpop.f32.mrf.mxu0 }
 0x196   :  { %v18044_v24 = vpop.f32.mrf.mxu0 }
 0x198   :  { %16004 = vmatmul.mubr.msk.bf16.gmra.mxu1 %vm6186_vm1, %v17720_v31  ;;  %v18054_v34 = vpop.f32.mrf.mxu0  ;;  %v16767_v31 = vld [vmem:[%s23704_s0 + $0x330] sm:$0xff]  }
 0x199   :  { %16007 = vmatprep.mubr.msk.bf16.mxu1 %vm6186_vm1, %v17739_v53 }
 0x19a   :  { %v18058_v29 = vpop.f32.mrf.mxu0  ;;  %15560 = vmatmul.mubr.msk.bf16.gmra.mxu0 %vm2100_vm0, %v16764_v27  ;;  %v3315_v27 = vadd.f32 %v18087_v38, %v17937_v60  ;;  %v5383_v60 = vmax.f32 %v3323_v41, 0.0 }
 0x19b   :  { %15563 = vmatprep.mubr.msk.bf16.mxu0 %vm2100_vm0, %v16765_v13  ;;  %v16763_v13 = vld [vmem:[%s23705_s3 + $0x30] sm:$0xff]  }
 0x19c   :  { %v18062_v32 = vpop.f32.mrf.mxu0 }
 0x19e   :  { %v18064_v33 = vpop.f32.mrf.mxu0 }
 0x1a0   :  { %16008 = vmatmul.mubr.msk.bf16.gmra.mxu1 %vm6186_vm1, %v17736_v50  ;;  %v18074_v53 = vpop.f32.mrf.mxu0  ;;  %v3288_v50 = vadd.f32 %v18087_v38, %v17912_v46  ;;  %v5375_v46 = vmax.f32 %v3291_v39, 0.0  ;;  %v5381_v39 = vmax.f32 %v3315_v27, 0.0 }
 0x1a1   :  { %16011 = vmatprep.mubr.msk.bf16.mxu1 %vm6186_vm1, %v17755_v8 }
 0x1a2   :  { %v18078_v36 = vpop.f32.mrf.mxu0  ;;  %15564 = vmatmul.mubr.msk.bf16.gmra.mxu0 %vm2100_vm0, %v16766_v35  ;;  %v5374_v48 = vmax.f32 %v3288_v50, 0.0  ;;  %v5380_v50 = vmax.f32 %v3312_v58, 0.0  ;;  %v3347_v58 = vadd.f32 %v18087_v38, %v17984_v10 }
 0x1a3   :  { %15567 = vmatprep.mubr.msk.bf16.mxu0 %vm2100_vm0, %v16767_v31 }
 0x1a4   :  { %v18082_v37 = vpop.f32.mrf.mxu0  ;;  %v5914_v52 = vpack.c.bf16 %v5375_v46, %v5374_v48  ;;  %v3336_v46 = vadd.f32 %v18087_v38, %v17982_v7  ;;  %v16776_v7 = vld [vmem:[%s23704_s0 + $0x370] sm:$0xff]   ;;  %v5389_v10 = vmax.f32 %v3347_v58, 0.0  ;;  %v16781_v58 = vld [vmem:[%s23704_s0 + $0x398] sm:$0xff]  }
 0x1a6   :  { %v18093_v8 = vpop.f32.mrf.mxu0 }
 0x1a8   :  { %16012 = vmatmul.mubr.msk.bf16.gmra.mxu1 %vm6186_vm1, %v17752_v5  ;;  %v18103_v45 = vpop.f32.mrf.mxu0  ;;  %v3307_v5 = vadd.f32 %v18087_v38, %v17947_v63  ;;  %v5378_v63 = vmax.f32 %v3304_v54, 0.0  ;;  %v5917_v54 = vpack.c.bf16 %v5381_v39, %v5380_v50  ;;  %v3368_v39 = vadd.f32 %v18087_v38, %v18022_v19  ;;  %v16780_v19 = vld [vmem:[%s23704_s0 + $0x390] sm:$0xff]  }
 0x1a9   :  { %16015 = vmatprep.mubr.msk.bf16.mxu1 %vm6186_vm1, %v17771_v30  ;;  %v3299_v30 = vadd.f32 %v18087_v38, %v17914_v51  ;;  %v5376_v51 = vmax.f32 %v3296_v57, 0.0  ;;  %v3331_v57 = vadd.f32 %v18087_v38, %v17964_v4 }
 0x1aa   :  { %v18107_v49 = vpop.f32.mrf.mxu0  ;;  %15568 = vmatmul.mubr.msk.bf16.gmra.mxu0 %vm2100_vm0, %v16768_v42  ;;  %v5379_v40 = vmax.f32 %v3307_v5, 0.0  ;;  %v3328_v5 = vadd.f32 %v18087_v38, %v17952_v0  ;;  %v5386_v0 = vmax.f32 %v3336_v46, 0.0 }
 0x1ab   :  { %15571 = vmatprep.mubr.msk.bf16.mxu0 %vm2100_vm0, %v16769_v43  ;;  %v5377_v2 = vmax.f32 %v3299_v30, 0.0  ;;  %v18170_v43 = vld [vmem:[%s23705_s3 + $0x48] sm:$0xff]  }
 0x1ac   :  { %v18111_v59 = vpop.f32.mrf.mxu0  ;;  %v5916_v17 = vpack.c.bf16 %v5379_v40, %v5378_v63  ;;  %v5385_v63 = vmax.f32 %v3331_v57, 0.0  ;;  %v16779_v57 = vld [vmem:[%s23704_s0 + $0x388] sm:$0xff]  }
 0x1ad   :  { %v5915_v21 = vpack.c.bf16 %v5377_v2, %v5376_v51 }
 0x1ae   :  { %v18121_v61 = vpop.f32.mrf.mxu0 }
 0x1b0   :  { %16016 = vmatmul.mubr.msk.bf16.gmra.mxu1 %vm6186_vm1, %v17768_v26  ;;  %v18131_v56 = vpop.f32.mrf.mxu0  ;;  %v3320_v26 = vadd.f32 %v18087_v38, %v17961_v9  ;;  %v16772_v9 = vld [vmem:[%s23704_s0 + $0x358] sm:$0xff]  }
 0x1b1   :  { %16023 = vmatprep.mubr.msk.bf16.mxu1 %vm6186_vm1, %v5914_v52  ;;  %v3339_v52 = vadd.f32 %v18087_v38, %v17994_v44 }
 0x1b2   :  { %v18134_v11 = vpop.f32.mrf.mxu0  ;;  %15572 = vmatmul.mubr.msk.bf16.gmra.mxu0 %vm2100_vm0, %v16770_v12  ;;  %v5382_v31 = vmax.f32 %v3320_v26, 0.0  ;;  %v16775_v12 = vld [vmem:[%s23704_s0 + $0x368] sm:$0xff]   ;;  %v3355_v26 = vadd.f32 %v18087_v38, %v18014_v62 }
 0x1b3   :  { %15575 = vmatprep.mubr.msk.bf16.mxu0 %vm2100_vm0, %v16771_v28  ;;  %v5387_v4 = vmax.f32 %v3339_v52, 0.0  ;;  %v5384_v28 = vmax.f32 %v3328_v5, 0.0  ;;  %v3360_v52 = vadd.f32 %v18087_v38, %v17998_v14 }
 0x1b4   :  { %v18138_v25 = vpop.f32.mrf.mxu0 }
 0x1b5   :  { %v5920_v2 = vpack.c.bf16 %v5387_v4, %v5386_v0  ;;  %v5919_v41 = vpack.c.bf16 %v5385_v63, %v5384_v28  ;;  %v3384_v63 = vadd.f32 %v18087_v38, %v18042_v23  ;;  %v16782_v23 = vld [vmem:[%s23704_s0 + $0x3a0] sm:$0xff]  }
 0x1b6   :  { %v18151_v35 = vpop.f32.mrf.mxu0 }
 0x1b8   :  { %16024 = vmatmul.mubr.msk.bf16.vlgmr.msra.gmra.mxu1 %vm6186_vm1, %v5915_v21  ;;  %v18160_v55 = vpop.f32.mrf.mxu0  ;;  %v3344_v21 = vadd.f32 %v18087_v38, %v17978_v6  ;;  %v5391_v6 = vmax.f32 %v3355_v26, 0.0  ;;  %v3376_v26 = vadd.f32 %v18087_v38, %v18018_v18 }
 0x1b9   :  { %16060 = vmatpush3.bf16.msra.mxu1 %v17958_v1  ;;  %16027 = vmatprep.mubr.msk.bf16.mxu1 %vm6186_vm1, %v5916_v17  ;;  %v5918_v1 = vpack.c.bf16 %v5383_v60, %v5382_v31  ;;  %v3352_v17 = vadd.f32 %v18087_v38, %v18002_v15  ;;  %v16778_v15 = vld [vmem:[%s23704_s0 + $0x380] sm:$0xff]  }
 0x1ba   :  { %16061 = vmatprep.subr.bf16.mxu1 %v16763_v13  ;;  %v18164_v42 = vpop.f32.mrf.mxu0  ;;  %15576 = vmatmul.mubr.msk.bf16.gmra.mxu0 %vm2100_vm0, %v16772_v9 }
 0x1bb   :  { %15579 = vmatprep.mubr.msk.bf16.mxu0 %vm2100_vm0, %v16774_v3  ;;  %v5390_v9 = vmax.f32 %v3352_v17, 0.0  ;;  %v5388_v3 = vmax.f32 %v3344_v21, 0.0 }
 0x1bc   :  { %v18173_v48 = vpop.f32.mrf.mxu0 }
 0x1bd   :  { %16062 = vmatpush3.bf16.msra.mxu1 %v16763_v13  ;;  %v16777_v13 = vld [vmem:[%s23704_s0 + $0x378] sm:$0xff]   ;;  %v5922_v50 = vpack.c.bf16 %v5391_v6, %v5390_v9  ;;  %v5921_v46 = vpack.c.bf16 %v5389_v10, %v5388_v3  ;;  %v3400_v10 = vadd.f32 %v18087_v38, %v18062_v32  ;;  %v16785_v32 = vld [vmem:[%s23704_s0 + $0x3b0] sm:$0xff]  }
 0x1be   :  { %16099 = vmatprep.subr.bf16.mxu1 %v18170_v43  ;;  %v18184_v30 = vpop.f32.mrf.mxu0 }
 0x1c0   :  { %16028 = vmatmul.mubr.msk.bf16.gmra.mxu1 %vm6186_vm1, %v5917_v54  ;;  %v18193_v44 = vpop.f32.mrf.mxu0  ;;  %v3363_v54 = vadd.f32 %v18087_v38, %v18004_v47 }
 0x1c1   :  { %16031 = vmatprep.mubr.msk.bf16.mxu1 %vm6186_vm1, %v5918_v1  ;;  %v3371_v1 = vadd.f32 %v18087_v38, %v18034_v16 }
 0x1c2   :  { %v18196_v40 = vpop.f32.mrf.mxu0  ;;  %15580 = vmatmul.mubr.msk.bf16.gmra.mxu0 %vm2100_vm0, %v16775_v12  ;;  %v5394_v12 = vmax.f32 %v3368_v39, 0.0  ;;  %v5393_v47 = vmax.f32 %v3363_v54, 0.0  ;;  %v16784_v54 = vld [vmem:[%s23704_s0 + $0x3a8] sm:$0xff]  }
 0x1c3   :  { %15583 = vmatprep.mubr.msk.bf16.mxu0 %vm2100_vm0, %v16776_v7  ;;  %v5395_v14 = vmax.f32 %v3371_v1, 0.0  ;;  %v5392_v7 = vmax.f32 %v3360_v52, 0.0  ;;  %v3392_v1 = vadd.f32 %v18087_v38, %v18038_v22 }
 0x1c4   :  { %v18200_v51 = vpop.f32.mrf.mxu0 }
 0x1c5   :  { %v5924_v28 = vpack.c.bf16 %v5395_v14, %v5394_v12  ;;  %v5923_v17 = vpack.c.bf16 %v5393_v47, %v5392_v7  ;;  %v3416_v47 = vadd.f32 %v18087_v38, %v18082_v37  ;;  %v16787_v37 = vld [vmem:[%s23704_s0 + $0x3c0] sm:$0xff]  }
 0x1c6   :  { %v18210_v27 = vpop.f32.mrf.mxu0 }
 0x1c8   :  { %16032 = vmatmul.mubr.msk.bf16.gmra.mxu1 %vm6186_vm1, %v5919_v41  ;;  %v18219_v62 = vpop.f32.mrf.mxu0  ;;  %v3379_v41 = vadd.f32 %v18087_v38, %v18024_v20 }
 0x1c9   :  { %16035 = vmatprep.mubr.msk.bf16.mxu1 %vm6186_vm1, %v5920_v2  ;;  %v3387_v2 = vadd.f32 %v18087_v38, %v18054_v34 }
 0x1ca   :  { %v18222_v31 = vpop.f32.mrf.mxu0  ;;  %15584 = vmatmul.mubr.msk.bf16.gmra.mxu0 %vm2100_vm0, %v16777_v13  ;;  %v5398_v13 = vmax.f32 %v3384_v63, 0.0  ;;  %v5397_v20 = vmax.f32 %v3379_v41, 0.0  ;;  %v16786_v41 = vld [vmem:[%s23704_s0 + $0x3b8] sm:$0xff]  }
 0x1cb   :  { %15587 = vmatprep.mubr.msk.bf16.mxu0 %vm2100_vm0, %v16778_v15  ;;  %v5399_v18 = vmax.f32 %v3387_v2, 0.0  ;;  %v5396_v15 = vmax.f32 %v3376_v26, 0.0  ;;  %v3408_v2 = vadd.f32 %v18087_v38, %v18058_v29  ;;  %v5406_v29 = vmax.f32 %v3416_v47, 0.0 }
 0x1cc   :  { %v18226_v60 = vpop.f32.mrf.mxu0 }
 0x1cd   :  { %v5926_v3 = vpack.c.bf16 %v5399_v18, %v5398_v13  ;;  %v5925_v39 = vpack.c.bf16 %v5397_v20, %v5396_v15 }
 0x1ce   :  { %v18236_v5 = vpop.f32.mrf.mxu0 }
 0x1d0   :  { %16036 = vmatmul.mubr.msk.bf16.gmra.mxu1 %vm6186_vm1, %v5921_v46  ;;  %v18245_v16 = vpop.f32.mrf.mxu0  ;;  %v3395_v46 = vadd.f32 %v18087_v38, %v18044_v24 }
 0x1d1   :  { %16039 = vmatprep.mubr.msk.bf16.mxu1 %vm6186_vm1, %v5922_v50  ;;  %v3403_v50 = vadd.f32 %v18087_v38, %v18074_v53 }
 0x1d2   :  { %v18248_v0 = vpop.f32.mrf.mxu0  ;;  %15588 = vmatmul.mubr.msk.bf16.gmra.mxu0 %vm2100_vm0, %v16779_v57  ;;  %v5402_v57 = vmax.f32 %v3400_v10, 0.0  ;;  %v5401_v24 = vmax.f32 %v3395_v46, 0.0  ;;  %v3424_v46 = vadd.f32 %v18087_v38, %v18078_v36 }
 0x1d3   :  { %15591 = vmatprep.mubr.msk.bf16.mxu0 %vm2100_vm0, %v16780_v19  ;;  %v5403_v22 = vmax.f32 %v3403_v50, 0.0  ;;  %v5400_v19 = vmax.f32 %v3392_v1, 0.0  ;;  %v3432_v50 = vadd.f32 %v18087_v38, %v18111_v59  ;;  %v16789_v59 = vld [vmem:[%s23704_s0 + $0x3d0] sm:$0xff]  }
 0x1d4   :  { %v18252_v4 = vpop.f32.mrf.mxu0 }
 0x1d5   :  { %v5928_v7 = vpack.c.bf16 %v5403_v22, %v5402_v57  ;;  %v5927_v63 = vpack.c.bf16 %v5401_v24, %v5400_v19  ;;  %v16788_v22 = vld [vmem:[%s23704_s0 + $0x3c8] sm:$0xff]   ;;  %v5410_v19 = vmax.f32 %v3432_v50, 0.0  ;;  %v5408_v24 = vmax.f32 %v3424_v46, 0.0  ;;  %v16790_v50 = vld [vmem:[%s23704_s0 + $0x3d8] sm:$0xff]  }
 0x1d6   :  { %v18262_v21 = vpop.f32.mrf.mxu0 }
 0x1d8   :  { %16040 = vmatmul.mubr.msk.bf16.gmra.mxu1 %vm6186_vm1, %v5923_v17  ;;  %v18271_v34 = vpop.f32.mrf.mxu0  ;;  %v3411_v17 = vadd.f32 %v18087_v38, %v18064_v33 }
 0x1d9   :  { %16043 = vmatprep.mubr.msk.bf16.mxu1 %vm6186_vm1, %v5924_v28  ;;  %v3419_v28 = vadd.f32 %v18087_v38, %v18103_v45 }
 0x1da   :  { %v18274_v9 = vpop.f32.mrf.mxu0  ;;  %15592 = vmatmul.mubr.msk.bf16.gmra.mxu0 %vm2100_vm0, %v16781_v58  ;;  %v5405_v13 = vmax.f32 %v3411_v17, 0.0 }
 0x1db   :  { %15595 = vmatprep.mubr.msk.bf16.mxu0 %vm2100_vm0, %v16782_v23  ;;  %v5407_v33 = vmax.f32 %v3419_v28, 0.0  ;;  %v5404_v23 = vmax.f32 %v3408_v2, 0.0 }
 0x1dc   :  { %v18278_v6 = vpop.f32.mrf.mxu0 }
 0x1dd   :  { %v5930_v10 = vpack.c.bf16 %v5407_v33, %v5406_v29  ;;  %v5929_v1 = vpack.c.bf16 %v5405_v13, %v5404_v23  ;;  %v3440_v33 = vadd.f32 %v18087_v38, %v18107_v49  ;;  %v3443_v23 = vadd.f32 %v18087_v38, %v18121_v61 }
 0x1de   :  { %v18288_v52 = vpop.f32.mrf.mxu0 }
 0x1df   :  { %v5413_v46 = vmax.f32 %v3443_v23, 0.0 }
 0x1e0   :  { %16044 = vmatmul.mubr.msk.bf16.gmra.mxu1 %vm6186_vm1, %v5925_v39  ;;  %v18297_v53 = vpop.f32.mrf.mxu0  ;;  %v3435_v39 = vadd.f32 %v18087_v38, %v18131_v56 }
 0x1e1   :  { %16047 = vmatprep.mubr.msk.bf16.mxu1 %vm6186_vm1, %v5926_v3 }
 0x1e2   :  { %v18300_v12 = vpop.f32.mrf.mxu0  ;;  %15596 = vmatmul.mubr.msk.bf16.gmra.mxu0 %vm2100_vm0, %v16784_v54  ;;  %v3427_v54 = vadd.f32 %v18087_v38, %v18093_v8  ;;  %v5411_v8 = vmax.f32 %v3435_v39, 0.0 }
 0x1e3   :  { %15599 = vmatprep.mubr.msk.bf16.mxu0 %vm2100_vm0, %v16785_v32 }
 0x1e4   :  { %v18304_v14 = vpop.f32.mrf.mxu0  ;;  %v5932_v17 = vpack.c.bf16 %v5411_v8, %v5410_v19 }
 0x1e6   :  { %v18314_v26 = vpop.f32.mrf.mxu0 }
 0x1e8   :  { %v18322_v58 = vpop.f32.mrf.mxu1  ;;  %16048 = vmatmul.mubr.msk.bf16.gmra.mxu1 %vm6186_vm1, %v5927_v63  ;;  %v18325_v45 = vpop.f32.mrf.mxu0 }
 0x1e9   :  { %16051 = vmatprep.mubr.msk.bf16.mxu1 %vm6186_vm1, %v5928_v7  ;;  %v5409_v7 = vmax.f32 %v3427_v54, 0.0 }
 0x1ea   :  { %v18328_v18 = vpop.f32.mrf.mxu1  ;;  %v18330_v15 = vpop.f32.mrf.mxu0  ;;  %15600 = vmatmul.mubr.msk.bf16.gmra.mxu0 %vm2100_vm0, %v16786_v41  ;;  %v3448_v41 = vadd.f32 %v18087_v38, %v18138_v25  ;;  %v16791_v25 = vld [vmem:[%s23704_s0 + $0x3e0] sm:$0xff]  }
 0x1eb   :  { %15603 = vmatprep.mubr.msk.bf16.mxu0 %vm2100_vm0, %v16787_v37  ;;  %v3451_v37 = vadd.f32 %v18087_v38, %v18160_v55  ;;  %v5931_v29 = vpack.c.bf16 %v5409_v7, %v5408_v24  ;;  %v3464_v24 = vadd.f32 %v18087_v38, %v18173_v48  ;;  %v3467_v7 = vadd.f32 %v18087_v38, %v18193_v44  ;;  %v16792_v48 = vld [vmem:[%s23704_s0 + $0x3e8] sm:$0xff]   ;;  %v16794_v44 = vld [vmem:[%s23704_s0 + $0x3f0] sm:$0xff]  }
 0x1ec   :  { %v18334_v20 = vpop.f32.mrf.mxu1  ;;  %v18336_v3 = vpop.f32.mrf.mxu0  ;;  %v5414_v39 = vmax.f32 %v3448_v41, 0.0  ;;  %v3456_v41 = vadd.f32 %v18087_v38, %v18134_v11 }
 0x1ed   :  { %v5415_v61 = vmax.f32 %v3451_v37, 0.0  ;;  %v3459_v37 = vadd.f32 %v18087_v38, %v18151_v35 }
 0x1ee   :  { %v18346_v32 = vpop.f32.mrf.mxu1  ;;  %v18348_v57 = vpop.f32.mrf.mxu0 }
 0x1ef   :  { %v5934_v8 = vpack.c.bf16 %v5415_v61, %v5414_v39  ;;  %v5416_v39 = vmax.f32 %v3456_v41, 0.0  ;;  %v5417_v61 = vmax.f32 %v3459_v37, 0.0  ;;  %v3483_v41 = vadd.f32 %v18087_v38, %v18219_v62  ;;  %v16796_v62 = vld [vmem:[%s23704_s0 + $0x400] sm:$0xff]  }
 0x1f0   :  { %v18356_v56 = vpop.f32.mrf.mxu1  ;;  %16052 = vmatmul.mubr.msk.bf16.gmra.mxu1 %vm6186_vm1, %v5929_v1  ;;  %v18359_v36 = vpop.f32.mrf.mxu0  ;;  %v5412_v1 = vmax.f32 %v3440_v33, 0.0  ;;  %v16783_v33 = vld [vmem:[%s23705_s3 + $0x40] sm:$0xff]  }
 0x1f1   :  { %16055 = vmatprep.mubr.msk.bf16.mxu1 %vm6186_vm1, %v5930_v10  ;;  %v5935_v37 = vpack.c.bf16 %v5417_v61, %v5416_v39 }
 0x1f2   :  { %v18362_v47 = vpop.f32.mrf.mxu1  ;;  %v18364_v28 = vpop.f32.mrf.mxu0  ;;  %15604 = vmatmul.mubr.msk.bf16.gmra.mxu0 %vm2100_vm0, %v16788_v22 }
 0x1f3   :  { %15607 = vmatprep.mubr.msk.bf16.mxu0 %vm2100_vm0, %v16789_v59 }
 0x1f4   :  { %v18368_v63 = vpop.f32.mrf.mxu1  ;;  %v18370_v2 = vpop.f32.mrf.mxu0 }
 0x1f6   :  { %v18380_v13 = vpop.f32.mrf.mxu1  ;;  %v18382_v10 = vpop.f32.mrf.mxu0 }
 0x1f7   :  { %23719 = vst [vmem:[#allocation2_spill] sm:$0xff] %v18380_v13 }
 0x1f8   :  { %v18390_v55 = vpop.f32.mrf.mxu1  ;;  %16056 = vmatmul.mubr.msk.bf16.gmra.mxu1 %vm6186_vm1, %v5931_v29  ;;  %v18393_v49 = vpop.f32.mrf.mxu0 }
 0x1f9   :  { %23720 = vst [vmem:[#allocation3_spill] sm:$0xff] %v18390_v55  ;;  %16063 = vmatprep.mubr.msk.bf16.mxu1 %vm6186_vm1, %v5932_v17  ;;  %v5933_v17 = vpack.c.bf16 %v5413_v46, %v5412_v1 }
 0x1fa   :  { %v18396_v54 = vpop.f32.mrf.mxu1  ;;  %v18398_v22 = vpop.f32.mrf.mxu0  ;;  %15608 = vmatmul.mubr.msk.bf16.gmra.mxu0 %vm2100_vm0, %v16790_v50  ;;  %v5418_v50 = vmax.f32 %v3464_v24, 0.0 }
 0x1fb   :  { %23721 = vst [vmem:[#allocation4_spill] sm:$0xff] %v18396_v54  ;;  %15611 = vmatprep.mubr.msk.bf16.mxu0 %vm2100_vm0, %v16791_v25  ;;  %v5419_v25 = vmax.f32 %v3467_v7, 0.0  ;;  %v3480_v7 = vadd.f32 %v18087_v38, %v18200_v51  ;;  %v16795_v51 = vld [vmem:[%s23704_s0 + $0x3f8] sm:$0xff]  }
 0x1fc   :  { %v18402_v59 = vpop.f32.mrf.mxu1  ;;  %v18404_v19 = vpop.f32.mrf.mxu0 }
 0x1fd   :  { %23722 = vst [vmem:[#allocation5_spill] sm:$0xff] %v18402_v59  ;;  %v5936_v24 = vpack.c.bf16 %v5419_v25, %v5418_v50  ;;  %v5423_v50 = vmax.f32 %v3483_v41, 0.0  ;;  %v3488_v41 = vadd.f32 %v18087_v38, %v18196_v40 }
 0x1fe   :  { %v18414_v29 = vpop.f32.mrf.mxu1  ;;  %v18419_v23 = vpop.f32.mrf.mxu0 }
 0x1ff   :  { %23723 = vst [vmem:[#allocation6_spill] sm:$0xff] %v18414_v29 }
 0x200   :  { %v18427_v11 = vpop.f32.mrf.mxu1  ;;  %16064 = vmatmul.mubr.msk.bf16.vlgmr.msra.gmra.mxu1 %vm6186_vm1, %v5933_v17  ;;  %v18430_v35 = vpop.f32.mrf.mxu0  ;;  %v18442_v17 = vld [vmem:[%s23705_s3 + $0x58] sm:$0xff]  }
 0x201   :  { %23724 = vst [vmem:[#allocation7_spill] sm:$0xff] %v18427_v11  ;;  %16100 = vmatpush3.bf16.msra.mxu1 %v18170_v43  ;;  %16067 = vmatprep.mubr.msk.bf16.mxu1 %vm6186_vm1, %v5934_v8 }
 0x202   :  { %v18434_v1 = vpop.f32.mrf.mxu1  ;;  %16101 = vmatprep.subr.bf16.mxu1 %v16783_v33  ;;  %v18436_v46 = vpop.f32.mrf.mxu0  ;;  %15612 = vmatmul.mubr.msk.bf16.gmra.mxu0 %vm2100_vm0, %v16792_v48  ;;  %v3472_v48 = vadd.f32 %v18087_v38, %v18164_v42 }
 0x203   :  { %23725 = vst [vmem:[#allocation8_spill] sm:$0xff] %v18434_v1  ;;  %15615 = vmatprep.mubr.msk.bf16.mxu0 %vm2100_vm0, %v16794_v44  ;;  %v3475_v1 = vadd.f32 %v18087_v38, %v18184_v30  ;;  %v5422_v30 = vmax.f32 %v3480_v7, 0.0  ;;  %v3496_v7 = vadd.f32 %v18087_v38, %v18226_v60  ;;  %v16798_v60 = vld [vmem:[%s23704_s0 + $0x410] sm:$0xff]  }
 0x204   :  { %v18445_v43 = vpop.f32.mrf.mxu1  ;;  %v18447_v8 = vpop.f32.mrf.mxu0  ;;  %v5420_v25 = vmax.f32 %v3472_v48, 0.0  ;;  %v3491_v48 = vadd.f32 %v18087_v38, %v18210_v27 }
 0x205   :  { %23726 = vst [vmem:[#allocation9_spill] sm:$0xff] %v18445_v43  ;;  %16102 = vmatpush3.bf16.msra.mxu1 %v16783_v33  ;;  %v5421_v39 = vmax.f32 %v3475_v1, 0.0 }
 0x206   :  { %v18457_v44 = vpop.f32.mrf.mxu1  ;;  %16139 = vmatprep.subr.bf16.mxu1 %v18442_v17  ;;  %v18460_v43 = vpop.f32.mrf.mxu0 }
 0x207   :  { %23727 = vst [vmem:[#allocation10_spill] sm:$0xff] %v18457_v44  ;;  %v5937_v1 = vpack.c.bf16 %v5421_v39, %v5420_v25  ;;  %v5424_v25 = vmax.f32 %v3488_v41, 0.0  ;;  %v5425_v39 = vmax.f32 %v3491_v48, 0.0  ;;  %v3504_v41 = vadd.f32 %v18087_v38, %v18222_v31 }
 0x208   :  { %v18468_v33 = vpop.f32.mrf.mxu1  ;;  %16068 = vmatmul.mubr.msk.bf16.gmra.mxu1 %vm6186_vm1, %v5935_v37  ;;  %v18471_v42 = vpop.f32.mrf.mxu0  ;;  %v5938_v37 = vpack.c.bf16 %v5423_v50, %v5422_v30  ;;  %v16797_v30 = vld [vmem:[%s23704_s0 + $0x408] sm:$0xff]   ;;  %v5426_v50 = vmax.f32 %v3496_v7, 0.0  ;;  %v3512_v7 = vadd.f32 %v18087_v38, %v18252_v4  ;;  %v3507_v48 = vadd.f32 %v18087_v38, %v18236_v5  ;;  %v16800_v4 = vld [vmem:[%s23704_s0 + $0x420] sm:$0xff]  }
 0x209   :  { %23728 = vst [vmem:[#allocation11_spill] sm:$0xff] %v18468_v33  ;;  %16071 = vmatprep.mubr.msk.bf16.mxu1 %vm6186_vm1, %v5936_v24  ;;  %v3499_v24 = vadd.f32 %v18087_v38, %v18245_v16 }
 0x20a   :  { %v18474_v61 = vpop.f32.mrf.mxu1  ;;  %v18476_v44 = vpop.f32.mrf.mxu0  ;;  %15616 = vmatmul.mubr.msk.bf16.gmra.mxu0 %vm2100_vm0, %v16795_v51 }
 0x20b   :  { %23729 = vst [vmem:[#allocation12_spill] sm:$0xff] %v18474_v61  ;;  %15619 = vmatprep.mubr.msk.bf16.mxu0 %vm2100_vm0, %v16796_v62  ;;  %v5427_v27 = vmax.f32 %v3499_v24, 0.0  ;;  %v5939_v24 = vpack.c.bf16 %v5425_v39, %v5424_v25  ;;  %v5428_v25 = vmax.f32 %v3504_v41, 0.0  ;;  %v5429_v39 = vmax.f32 %v3507_v48, 0.0 }
 0x20c   :  { %v18480_v11 = vpop.f32.mrf.mxu1  ;;  %v18482_v33 = vpop.f32.mrf.mxu0  ;;  %v3520_v41 = vadd.f32 %v18087_v38, %v18248_v0  ;;  %v3523_v48 = vadd.f32 %v18087_v38, %v18262_v21 }
 0x20d   :  { %23730 = vst [vmem:[#allocation13_spill] sm:$0xff] %v18480_v11 }
 0x20e   :  { %v18492_v51 = vpop.f32.mrf.mxu1  ;;  %v18494_v62 = vpop.f32.mrf.mxu0 }
 0x20f   :  { %23731 = vst [vmem:[#allocation14_spill] sm:$0xff] %v18492_v51 }
 0x210   :  { %v18502_v16 = vpop.f32.mrf.mxu1  ;;  %16072 = vmatmul.mubr.msk.bf16.gmra.mxu1 %vm6186_vm1, %v5937_v1  ;;  %v18505_v40 = vpop.f32.mrf.mxu0  ;;  %v5940_v1 = vpack.c.bf16 %v5427_v27, %v5426_v50  ;;  %v16799_v50 = vld [vmem:[%s23704_s0 + $0x418] sm:$0xff]   ;;  %v5430_v27 = vmax.f32 %v3512_v7, 0.0  ;;  %v3528_v7 = vadd.f32 %v18087_v38, %v18278_v6  ;;  %v16802_v6 = vld [vmem:[%s23704_s0 + $0x430] sm:$0xff]  }
 0x211   :  { %23732 = vst [vmem:[#allocation15_spill] sm:$0xff] %v18502_v16  ;;  %16075 = vmatprep.mubr.msk.bf16.mxu1 %vm6186_vm1, %v5938_v37  ;;  %v3515_v37 = vadd.f32 %v18087_v38, %v18271_v34 }
 0x212   :  { %v18508_v51 = vpop.f32.mrf.mxu1  ;;  %v18510_v11 = vpop.f32.mrf.mxu0  ;;  %15620 = vmatmul.mubr.msk.bf16.gmra.mxu0 %vm2100_vm0, %v16797_v30 }
 0x213   :  { %23733 = vst [vmem:[#allocation16_spill] sm:$0xff] %v18508_v51  ;;  %15623 = vmatprep.mubr.msk.bf16.mxu0 %vm2100_vm0, %v16798_v60  ;;  %v5431_v5 = vmax.f32 %v3515_v37, 0.0  ;;  %v5941_v37 = vpack.c.bf16 %v5429_v39, %v5428_v25  ;;  %v5432_v25 = vmax.f32 %v3520_v41, 0.0  ;;  %v5433_v39 = vmax.f32 %v3523_v48, 0.0 }
 0x214   :  { %v18514_v61 = vpop.f32.mrf.mxu1  ;;  %v18516_v16 = vpop.f32.mrf.mxu0  ;;  %v3536_v41 = vadd.f32 %v18087_v38, %v18274_v9  ;;  %v3539_v48 = vadd.f32 %v18087_v38, %v18288_v52 }
 0x215   :  { %23734 = vst [vmem:[#allocation17_spill] sm:$0xff] %v18514_v61 }
 0x216   :  { %v18526_v30 = vpop.f32.mrf.mxu1  ;;  %v18528_v60 = vpop.f32.mrf.mxu0 }
 0x217   :  { %23735 = vst [vmem:[#allocation18_spill] sm:$0xff] %v18526_v30 }
 0x218   :  { %v18536_v34 = vpop.f32.mrf.mxu1  ;;  %16076 = vmatmul.mubr.msk.bf16.gmra.mxu1 %vm6186_vm1, %v5939_v24  ;;  %v18539_v31 = vpop.f32.mrf.mxu0  ;;  %v5942_v24 = vpack.c.bf16 %v5431_v5, %v5430_v27  ;;  %v16801_v27 = vld [vmem:[%s23704_s0 + $0x428] sm:$0xff]   ;;  %v5434_v5 = vmax.f32 %v3528_v7, 0.0  ;;  %v3544_v7 = vadd.f32 %v18087_v38, %v18304_v14  ;;  %v16805_v14 = vld [vmem:[%s23704_s0 + $0x440] sm:$0xff]  }
 0x219   :  { %23736 = vst [vmem:[#allocation19_spill] sm:$0xff] %v18536_v34  ;;  %16079 = vmatprep.mubr.msk.bf16.mxu1 %vm6186_vm1, %v5940_v1  ;;  %v3531_v1 = vadd.f32 %v18087_v38, %v18297_v53 }
 0x21a   :  { %v18542_v30 = vpop.f32.mrf.mxu1  ;;  %v18544_v61 = vpop.f32.mrf.mxu0  ;;  %15624 = vmatmul.mubr.msk.bf16.gmra.mxu0 %vm2100_vm0, %v16799_v50 }
 0x21b   :  { %23737 = vst [vmem:[#allocation20_spill] sm:$0xff] %v18542_v30  ;;  %15627 = vmatprep.mubr.msk.bf16.mxu0 %vm2100_vm0, %v16800_v4  ;;  %v5435_v21 = vmax.f32 %v3531_v1, 0.0  ;;  %v5943_v1 = vpack.c.bf16 %v5433_v39, %v5432_v25  ;;  %v5436_v25 = vmax.f32 %v3536_v41, 0.0  ;;  %v5437_v39 = vmax.f32 %v3539_v48, 0.0 }
 0x21c   :  { %v18548_v51 = vpop.f32.mrf.mxu1  ;;  %v18550_v34 = vpop.f32.mrf.mxu0  ;;  %v3552_v41 = vadd.f32 %v18087_v38, %v18300_v12  ;;  %v3555_v48 = vadd.f32 %v18087_v38, %v18314_v26 }
 0x21d   :  { %23738 = vst [vmem:[#allocation21_spill] sm:$0xff] %v18548_v51 }
 0x21e   :  { %v18560_v50 = vpop.f32.mrf.mxu1  ;;  %v18562_v4 = vpop.f32.mrf.mxu0 }
 0x21f   :  { %23739 = vst [vmem:[#allocation22_spill] sm:$0xff] %v18560_v50 }
 0x220   :  { %v18570_v53 = vpop.f32.mrf.mxu1  ;;  %16080 = vmatmul.mubr.msk.bf16.gmra.mxu1 %vm6186_vm1, %v5941_v37  ;;  %v18573_v0 = vpop.f32.mrf.mxu0  ;;  %v5944_v37 = vpack.c.bf16 %v5435_v21, %v5434_v5  ;;  %v16804_v5 = vld [vmem:[%s23704_s0 + $0x438] sm:$0xff]   ;;  %v5438_v21 = vmax.f32 %v3544_v7, 0.0  ;;  %v3560_v7 = vadd.f32 %v18087_v38, %v18336_v3  ;;  %v16807_v3 = vld [vmem:[%s23704_s0 + $0x450] sm:$0xff]  }
 0x221   :  { %23740 = vst [vmem:[#allocation23_spill] sm:$0xff] %v18570_v53  ;;  %16083 = vmatprep.mubr.msk.bf16.mxu1 %vm6186_vm1, %v5942_v24  ;;  %v3547_v24 = vadd.f32 %v18087_v38, %v18325_v45 }
 0x222   :  { %v18576_v50 = vpop.f32.mrf.mxu1  ;;  %v18578_v51 = vpop.f32.mrf.mxu0  ;;  %15628 = vmatmul.mubr.msk.bf16.gmra.mxu0 %vm2100_vm0, %v16801_v27 }
 0x223   :  { %23741 = vst [vmem:[#allocation24_spill] sm:$0xff] %v18576_v50  ;;  %15631 = vmatprep.mubr.msk.bf16.mxu0 %vm2100_vm0, %v16802_v6  ;;  %v5439_v52 = vmax.f32 %v3547_v24, 0.0  ;;  %v5945_v24 = vpack.c.bf16 %v5437_v39, %v5436_v25  ;;  %v5440_v25 = vmax.f32 %v3552_v41, 0.0  ;;  %v5441_v39 = vmax.f32 %v3555_v48, 0.0 }
 0x224   :  { %v18582_v30 = vpop.f32.mrf.mxu1  ;;  %v18584_v53 = vpop.f32.mrf.mxu0  ;;  %v3568_v41 = vadd.f32 %v18087_v38, %v18330_v15  ;;  %v3571_v48 = vadd.f32 %v18087_v38, %v18348_v57 }
 0x225   :  { %23742 = vst [vmem:[#allocation25_spill] sm:$0xff] %v18582_v30 }
 0x226   :  { %v18594_v27 = vpop.f32.mrf.mxu1  ;;  %v18596_v6 = vpop.f32.mrf.mxu0 }
 0x227   :  { %23743 = vst [vmem:[#allocation26_spill] sm:$0xff] %v18594_v27 }
 0x228   :  { %v18604_v45 = vpop.f32.mrf.mxu1  ;;  %16084 = vmatmul.mubr.msk.bf16.gmra.mxu1 %vm6186_vm1, %v5943_v1  ;;  %v18607_v9 = vpop.f32.mrf.mxu0  ;;  %v5946_v1 = vpack.c.bf16 %v5439_v52, %v5438_v21  ;;  %v16806_v21 = vld [vmem:[%s23704_s0 + $0x448] sm:$0xff]   ;;  %v5442_v52 = vmax.f32 %v3560_v7, 0.0  ;;  %v3576_v7 = vadd.f32 %v18087_v38, %v18370_v2  ;;  %v16809_v2 = vld [vmem:[%s23704_s0 + $0x460] sm:$0xff]  }
 0x229   :  { %23744 = vst [vmem:[#allocation27_spill] sm:$0xff] %v18604_v45  ;;  %16087 = vmatprep.mubr.msk.bf16.mxu1 %vm6186_vm1, %v5944_v37  ;;  %v3563_v37 = vadd.f32 %v18087_v38, %v18359_v36 }
 0x22a   :  { %v18610_v27 = vpop.f32.mrf.mxu1  ;;  %v18612_v30 = vpop.f32.mrf.mxu0  ;;  %15632 = vmatmul.mubr.msk.bf16.gmra.mxu0 %vm2100_vm0, %v16804_v5 }
 0x22b   :  { %23745 = vst [vmem:[#allocation28_spill] sm:$0xff] %v18610_v27  ;;  %15635 = vmatprep.mubr.msk.bf16.mxu0 %vm2100_vm0, %v16805_v14  ;;  %v5443_v26 = vmax.f32 %v3563_v37, 0.0  ;;  %v5947_v37 = vpack.c.bf16 %v5441_v39, %v5440_v25  ;;  %v5444_v25 = vmax.f32 %v3568_v41, 0.0  ;;  %v5445_v39 = vmax.f32 %v3571_v48, 0.0 }
 0x22c   :  { %v18616_v50 = vpop.f32.mrf.mxu1  ;;  %v18618_v45 = vpop.f32.mrf.mxu0  ;;  %v3584_v41 = vadd.f32 %v18087_v38, %v18364_v28  ;;  %v3587_v48 = vadd.f32 %v18087_v38, %v18382_v10 }
 0x22d   :  { %23746 = vst [vmem:[#allocation29_spill] sm:$0xff] %v18616_v50 }
 0x22e   :  { %v18628_v5 = vpop.f32.mrf.mxu1  ;;  %v18630_v14 = vpop.f32.mrf.mxu0 }
 0x22f   :  { %23747 = vst [vmem:[#allocation30_spill] sm:$0xff] %v18628_v5 }
 0x230   :  { %v18638_v36 = vpop.f32.mrf.mxu1  ;;  %16088 = vmatmul.mubr.msk.bf16.gmra.mxu1 %vm6186_vm1, %v5945_v24  ;;  %v18641_v12 = vpop.f32.mrf.mxu0  ;;  %v5948_v24 = vpack.c.bf16 %v5443_v26, %v5442_v52  ;;  %v16808_v52 = vld [vmem:[%s23704_s0 + $0x458] sm:$0xff]   ;;  %v5446_v26 = vmax.f32 %v3576_v7, 0.0  ;;  %v3592_v7 = vadd.f32 %v18087_v38, %v18404_v19  ;;  %v16811_v19 = vld [vmem:[%s23704_s0 + $0x470] sm:$0xff]  }
 0x231   :  { %16091 = vmatprep.mubr.msk.bf16.mxu1 %vm6186_vm1, %v5946_v1  ;;  %v3579_v1 = vadd.f32 %v18087_v38, %v18393_v49 }
 0x232   :  { %v18644_v5 = vpop.f32.mrf.mxu1  ;;  %v18646_v50 = vpop.f32.mrf.mxu0  ;;  %15636 = vmatmul.mubr.msk.bf16.gmra.mxu0 %vm2100_vm0, %v16806_v21 }
 0x233   :  { %15639 = vmatprep.mubr.msk.bf16.mxu0 %vm2100_vm0, %v16807_v3  ;;  %v5447_v57 = vmax.f32 %v3579_v1, 0.0  ;;  %v5949_v1 = vpack.c.bf16 %v5445_v39, %v5444_v25  ;;  %v5448_v25 = vmax.f32 %v3584_v41, 0.0  ;;  %v5449_v39 = vmax.f32 %v3587_v48, 0.0 }
 0x234   :  { %v18650_v27 = vpop.f32.mrf.mxu1  ;;  %v18652_v29 = vpop.f32.mrf.mxu0  ;;  %v3600_v41 = vadd.f32 %v18087_v38, %v18398_v22  ;;  %v3603_v48 = vadd.f32 %v18087_v38, %v18419_v23 }
 0x236   :  { %v18662_v21 = vpop.f32.mrf.mxu1  ;;  %v18664_v3 = vpop.f32.mrf.mxu0 }
 0x238   :  { %v18672_v49 = vpop.f32.mrf.mxu1  ;;  %16092 = vmatmul.mubr.msk.bf16.gmra.mxu1 %vm6186_vm1, %v5947_v37  ;;  %v18675_v15 = vpop.f32.mrf.mxu0  ;;  %v5950_v37 = vpack.c.bf16 %v5447_v57, %v5446_v26  ;;  %v16810_v26 = vld [vmem:[%s23704_s0 + $0x468] sm:$0xff]   ;;  %v5450_v57 = vmax.f32 %v3592_v7, 0.0  ;;  %v3608_v7 = vadd.f32 %v18087_v38, %v18447_v8  ;;  %v16812_v8 = vld [vmem:[%s23704_s0 + $0x478] sm:$0xff]  }
 0x239   :  { %16095 = vmatprep.mubr.msk.bf16.mxu1 %vm6186_vm1, %v5948_v24  ;;  %v3595_v24 = vadd.f32 %v18087_v38, %v18430_v35 }
 0x23a   :  { %v18678_v59 = vpop.f32.mrf.mxu1  ;;  %v18680_v54 = vpop.f32.mrf.mxu0  ;;  %15640 = vmatmul.mubr.msk.bf16.gmra.mxu0 %vm2100_vm0, %v16808_v52 }
 0x23b   :  { %23748 = vst [vmem:[#allocation31_spill] sm:$0xff] %v18680_v54  ;;  %15643 = vmatprep.mubr.msk.bf16.mxu0 %vm2100_vm0, %v16809_v2  ;;  %v5451_v10 = vmax.f32 %v3595_v24, 0.0  ;;  %v5951_v24 = vpack.c.bf16 %v5449_v39, %v5448_v25  ;;  %v5452_v39 = vmax.f32 %v3600_v41, 0.0  ;;  %v3627_v41 = vadd.f32 %v18087_v38, %v18505_v40  ;;  %v16816_v40 = vld [vmem:[%s23704_s0 + $0x490] sm:$0xff]  }
 0x23c   :  { %v18684_v55 = vpop.f32.mrf.mxu1  ;;  %v18686_v13 = vpop.f32.mrf.mxu0 }
 0x23e   :  { %v18696_v52 = vpop.f32.mrf.mxu1  ;;  %v18698_v2 = vpop.f32.mrf.mxu0 }
 0x23f   :  { %23749 = vst [vmem:[#allocation32_spill] sm:$0xff] %v18696_v52  ;;  %23750 = vst [vmem:[#allocation33_spill] sm:$0xff] %v18698_v2 }
 0x240   :  { %v18706_v35 = vpop.f32.mrf.mxu1  ;;  %16096 = vmatmul.mubr.msk.bf16.gmra.mxu1 %vm6186_vm1, %v5949_v1  ;;  %v18709_v28 = vpop.f32.mrf.mxu0  ;;  %v5952_v1 = vpack.c.bf16 %v5451_v10, %v5450_v57  ;;  %v5454_v10 = vmax.f32 %v3608_v7, 0.0 }
 0x241   :  { %23751 = vst [vmem:[#allocation34_spill] sm:$0xff] %v18706_v35  ;;  %16103 = vmatprep.mubr.msk.bf16.mxu1 %vm6186_vm1, %v5950_v37  ;;  %v3611_v37 = vadd.f32 %v18087_v38, %v18471_v42  ;;  %v16814_v42 = vld [vmem:[%s23704_s0 + $0x480] sm:$0xff]  }
 0x242   :  { %v18712_v2 = vpop.f32.mrf.mxu1  ;;  %v18714_v54 = vpop.f32.mrf.mxu0  ;;  %15644 = vmatmul.mubr.msk.bf16.gmra.mxu0 %vm2100_vm0, %v16810_v26 }
 0x243   :  { %23752 = vst [vmem:[#allocation35_spill] sm:$0xff] %v18714_v54  ;;  %15647 = vmatprep.mubr.msk.bf16.mxu0 %vm2100_vm0, %v16811_v19  ;;  %v16803_v19 = vld [vmem:[%s23705_s3 + $0x50] sm:$0xff]   ;;  %v5455_v25 = vmax.f32 %v3611_v37, 0.0  ;;  %v3624_v37 = vadd.f32 %v18087_v38, %v18482_v33  ;;  %v16815_v33 = vld [vmem:[%s23704_s0 + $0x488] sm:$0xff]  }
 0x244   :  { %v18718_v52 = vpop.f32.mrf.mxu1  ;;  %v18720_v35 = vpop.f32.mrf.mxu0 }
 0x245   :  { %v5954_v7 = vpack.c.bf16 %v5455_v25, %v5454_v10 }
 0x246   :  { %v18730_v26 = vpop.f32.mrf.mxu1  ;;  %v18735_v57 = vpop.f32.mrf.mxu0 }
 0x247   :  { %23753 = vst [vmem:[#allocation36_spill] sm:$0xff] %v18730_v26  ;;  %23754 = vst [vmem:[#allocation37_spill] sm:$0xff] %v18735_v57  ;;  %v5453_v57 = vmax.f32 %v3603_v48, 0.0 }
 0x248   :  { %v18743_v22 = vpop.f32.mrf.mxu1  ;;  %16104 = vmatmul.mubr.msk.bf16.vlgmr.msra.gmra.mxu1 %vm6186_vm1, %v5951_v24  ;;  %v18746_v23 = vpop.f32.mrf.mxu0  ;;  %v18758_v24 = vld [vmem:[%s23705_s3 + $0x68] sm:$0xff]  }
 0x249   :  { %16140 = vmatpush3.bf16.msra.mxu1 %v18442_v17  ;;  %16107 = vmatprep.mubr.msk.bf16.mxu1 %vm6186_vm1, %v5952_v1  ;;  %v5953_v48 = vpack.c.bf16 %v5453_v57, %v5452_v39  ;;  %v5459_v57 = vmax.f32 %v3627_v41, 0.0  ;;  %v3632_v41 = vadd.f32 %v18087_v38, %v18476_v44 }
 0x24a   :  { %v18750_v54 = vpop.f32.mrf.mxu1  ;;  %16141 = vmatprep.subr.bf16.mxu1 %v16803_v19  ;;  %v18752_v26 = vpop.f32.mrf.mxu0  ;;  %15648 = vmatmul.mubr.msk.bf16.gmra.mxu0 %vm2100_vm0, %v16812_v8  ;;  %v3616_v8 = vadd.f32 %v18087_v38, %v18436_v46 }
 0x24b   :  { %23755 = vst [vmem:[#allocation38_spill] sm:$0xff] %v18752_v26  ;;  %15651 = vmatprep.mubr.msk.bf16.mxu0 %vm2100_vm0, %v16814_v42  ;;  %v3619_v26 = vadd.f32 %v18087_v38, %v18460_v43  ;;  %v5458_v43 = vmax.f32 %v3624_v37, 0.0  ;;  %v3640_v37 = vadd.f32 %v18087_v38, %v18516_v16  ;;  %v16818_v16 = vld [vmem:[%s23704_s0 + $0x4a0] sm:$0xff]  }
 0x24c   :  { %v18761_v17 = vpop.f32.mrf.mxu1  ;;  %v18763_v1 = vpop.f32.mrf.mxu0  ;;  %v5456_v10 = vmax.f32 %v3616_v8, 0.0  ;;  %v3635_v8 = vadd.f32 %v18087_v38, %v18494_v62  ;;  %v5460_v62 = vmax.f32 %v3632_v41, 0.0 }
 0x24d   :  { %23756 = vst [vmem:[#allocation39_spill] sm:$0xff] %v18761_v17  ;;  %16142 = vmatpush3.bf16.msra.mxu1 %v16803_v19  ;;  %v5457_v25 = vmax.f32 %v3619_v26, 0.0 }
 0x24e   :  { %v18773_v42 = vpop.f32.mrf.mxu1  ;;  %16179 = vmatprep.subr.bf16.mxu1 %v18758_v24  ;;  %v18776_v17 = vpop.f32.mrf.mxu0 }
 0x24f   :  { %23757 = vst [vmem:[#allocation40_spill] sm:$0xff] %v18773_v42  ;;  %23758 = vst [vmem:[#allocation41_spill] sm:$0xff] %v18776_v17  ;;  %v5955_v26 = vpack.c.bf16 %v5457_v25, %v5456_v10  ;;  %v5461_v10 = vmax.f32 %v3635_v8, 0.0 }
 0x250   :  { %v18784_v19 = vpop.f32.mrf.mxu1  ;;  %16108 = vmatmul.mubr.msk.bf16.gmra.mxu1 %vm6186_vm1, %v5953_v48  ;;  %v18787_v46 = vpop.f32.mrf.mxu0  ;;  %v5956_v48 = vpack.c.bf16 %v5459_v57, %v5458_v43  ;;  %v16817_v43 = vld [vmem:[%s23704_s0 + $0x498] sm:$0xff]   ;;  %v5462_v57 = vmax.f32 %v3640_v37, 0.0 }
 0x251   :  { %23759 = vst [vmem:[#allocation42_spill] sm:$0xff] %v18784_v19  ;;  %16111 = vmatprep.mubr.msk.bf16.mxu1 %vm6186_vm1, %v5954_v7  ;;  %v3643_v7 = vadd.f32 %v18087_v38, %v18539_v31  ;;  %v5957_v41 = vpack.c.bf16 %v5461_v10, %v5460_v62 }
 0x252   :  { %v18790_v39 = vpop.f32.mrf.mxu1  ;;  %v18792_v17 = vpop.f32.mrf.mxu0  ;;  %15652 = vmatmul.mubr.msk.bf16.gmra.mxu0 %vm2100_vm0, %v16815_v33 }
 0x253   :  { %23760 = vst [vmem:[#allocation43_spill] sm:$0xff] %v18792_v17  ;;  %15655 = vmatprep.mubr.msk.bf16.mxu0 %vm2100_vm0, %v16816_v40  ;;  %v5463_v38 = vmax.f32 %v3643_v7, 0.0 }
 0x254   :  { %v18796_v42 = vpop.f32.mrf.mxu1  ;;  %v18798_v19 = vpop.f32.mrf.mxu0 }
 0x256   :  { %v18808_v33 = vpop.f32.mrf.mxu1  ;;  %v18810_v40 = vpop.f32.mrf.mxu0 }
 0x257   :  { %23761 = vst [vmem:[#allocation44_spill] sm:$0xff] %v18810_v40 }
 0x258   :  { %v18818_v31 = vpop.f32.mrf.mxu1  ;;  %16112 = vmatmul.mubr.msk.bf16.gmra.mxu1 %vm6186_vm1, %v5955_v26  ;;  %v18821_v44 = vpop.f32.mrf.mxu0  ;;  %v5958_v26 = vpack.c.bf16 %v5463_v38, %v5462_v57  ;;  %v16819_v38 = vld [vmem:[%s23704_s0 + $0x4a8] sm:$0xff]  }
 0x259   :  { %23762 = vst [vmem:[#allocation45_spill] sm:$0xff] %v18818_v31  ;;  %16115 = vmatprep.mubr.msk.bf16.mxu1 %vm6186_vm1, %v5956_v48  ;;  %v18837_v48 = vld [vmem:[%s23706_s2] ss:$0 sm:$0xff] }
 0x25a   :  { %v18824_v25 = vpop.f32.mrf.mxu1  ;;  %v18826_v40 = vpop.f32.mrf.mxu0  ;;  %15656 = vmatmul.mubr.msk.bf16.gmra.mxu0 %vm2100_vm0, %v16817_v43  ;;  %v3656_v37 = vadd.f32 %v18837_v48, %v18550_v34  ;;  %v3659_v7 = vadd.f32 %v18837_v48, %v18573_v0  ;;  %v3648_v8 = vadd.f32 %v18837_v48, %v18510_v11  ;;  %v3651_v43 = vadd.f32 %v18837_v48, %v18528_v60  ;;  %v16820_v34 = vld [vmem:[%s23704_s0 + $0x4b0] sm:$0xff]  }
 0x25b   :  { %23763 = vst [vmem:[#allocation46_spill] sm:$0xff] %v18826_v40  ;;  %15659 = vmatprep.mubr.msk.bf16.mxu0 %vm2100_vm0, %v16818_v16 }
 0x25c   :  { %v18830_v17 = vpop.f32.mrf.mxu1  ;;  %v18832_v31 = vpop.f32.mrf.mxu0  ;;  %v5466_v62 = vmax.f32 %v3656_v37, 0.0  ;;  %v5467_v60 = vmax.f32 %v3659_v7, 0.0  ;;  %v5464_v10 = vmax.f32 %v3648_v8, 0.0  ;;  %v3672_v37 = vadd.f32 %v18837_v48, %v18584_v53  ;;  %v16822_v53 = vld [vmem:[%s23704_s0 + $0x4c0] sm:$0xff]  }
 0x25d   :  { %23764 = vst [vmem:[#allocation47_spill] sm:$0xff] %v18830_v17  ;;  %v3664_v8 = vadd.f32 %v18837_v48, %v18544_v61 }
 0x25e   :  { %v18847_v16 = vpop.f32.mrf.mxu1  ;;  %v18849_v57 = vpop.f32.mrf.mxu0 }
 0x25f   :  { %23765 = vst [vmem:[#allocation48_spill] sm:$0xff] %v18847_v16  ;;  %23766 = vst [vmem:[#allocation49_spill] sm:$0xff] %v18849_v57  ;;  %v5465_v57 = vmax.f32 %v3651_v43, 0.0  ;;  %v3667_v43 = vadd.f32 %v18837_v48, %v18562_v4 }
 0x260   :  { %v18857_v0 = vpop.f32.mrf.mxu1  ;;  %16116 = vmatmul.mubr.msk.bf16.gmra.mxu1 %vm6186_vm1, %v5957_v41  ;;  %v18860_v11 = vpop.f32.mrf.mxu0  ;;  %v5960_v41 = vpack.c.bf16 %v5467_v60, %v5466_v62  ;;  %v16821_v62 = vld [vmem:[%s23704_s0 + $0x4b8] sm:$0xff]   ;;  %v5468_v60 = vmax.f32 %v3664_v8, 0.0  ;;  %v3680_v8 = vadd.f32 %v18837_v48, %v18578_v51 }
 0x261   :  { %23767 = vst [vmem:[#allocation50_spill] sm:$0xff] %v18857_v0  ;;  %16119 = vmatprep.mubr.msk.bf16.mxu1 %vm6186_vm1, %v5958_v26  ;;  %v3675_v26 = vadd.f32 %v18837_v48, %v18607_v9  ;;  %v5959_v7 = vpack.c.bf16 %v5465_v57, %v5464_v10  ;;  %v5470_v57 = vmax.f32 %v3672_v37, 0.0  ;;  %v5469_v10 = vmax.f32 %v3667_v43, 0.0 }
 0x262   :  { %v18863_v40 = vpop.f32.mrf.mxu1  ;;  %v18865_v16 = vpop.f32.mrf.mxu0  ;;  %15660 = vmatmul.mubr.msk.bf16.gmra.mxu0 %vm2100_vm0, %v16819_v38  ;;  %v3688_v37 = vadd.f32 %v18837_v48, %v18618_v45  ;;  %v3683_v43 = vadd.f32 %v18837_v48, %v18596_v6  ;;  %v16825_v45 = vld [vmem:[%s23704_s0 + $0x4d0] sm:$0xff]  }
 0x263   :  { %23768 = vst [vmem:[#allocation51_spill] sm:$0xff] %v18865_v16  ;;  %15663 = vmatprep.mubr.msk.bf16.mxu0 %vm2100_vm0, %v16820_v34  ;;  %v5471_v4 = vmax.f32 %v3675_v26, 0.0  ;;  %v5961_v26 = vpack.c.bf16 %v5469_v10, %v5468_v60  ;;  %v5472_v60 = vmax.f32 %v3680_v8, 0.0  ;;  %v3696_v8 = vadd.f32 %v18837_v48, %v18612_v30 }
 0x264   :  { %v18869_v17 = vpop.f32.mrf.mxu1  ;;  %v18871_v0 = vpop.f32.mrf.mxu0  ;;  %v5473_v10 = vmax.f32 %v3683_v43, 0.0  ;;  %v3699_v43 = vadd.f32 %v18837_v48, %v18630_v14  ;;  %v6519_v14 = vadd.f32 %v18644_v5, %v18328_v18  ;;  %v6522_v18 = vadd.f32 %v18662_v21, %v18346_v32 }
 0x266   :  { %v18881_v38 = vpop.f32.mrf.mxu1  ;;  %v18883_v34 = vpop.f32.mrf.mxu0 }
 0x267   :  { %23769 = vst [vmem:[#allocation52_spill] sm:$0xff] %v18881_v38  ;;  %23770 = vst [vmem:[#allocation53_spill] sm:$0xff] %v18883_v34 }
 0x268   :  { %v18891_v9 = vpop.f32.mrf.mxu1  ;;  %16120 = vmatmul.mubr.msk.bf16.gmra.mxu1 %vm6186_vm1, %v5959_v7  ;;  %v18894_v61 = vpop.f32.mrf.mxu0  ;;  %v5962_v7 = vpack.c.bf16 %v5471_v4, %v5470_v57  ;;  %v16824_v57 = vld [vmem:[%s23704_s0 + $0x4c8] sm:$0xff]   ;;  %v5474_v4 = vmax.f32 %v3688_v37, 0.0  ;;  %v3704_v37 = vadd.f32 %v18837_v48, %v18652_v29  ;;  %v6527_v29 = vadd.f32 %v18638_v36, %v18322_v58 }
 0x269   :  { %23771 = vst [vmem:[#allocation54_spill] sm:$0xff] %v18891_v9  ;;  %16123 = vmatprep.mubr.msk.bf16.mxu1 %vm6186_vm1, %v5960_v41  ;;  %v3691_v41 = vadd.f32 %v18837_v48, %v18641_v12  ;;  %v5477_v58 = vmax.f32 %v3699_v43, 0.0  ;;  %v3723_v43 = vadd.f32 %v18837_v48, %v18709_v28  ;;  %v16829_v28 = vld [vmem:[%s23704_s0 + $0x4f0] sm:$0xff]  }
 0x26a   :  { %v18897_v34 = vpop.f32.mrf.mxu1  ;;  %v18899_v16 = vpop.f32.mrf.mxu0  ;;  %15664 = vmatmul.mubr.msk.bf16.gmra.mxu0 %vm2100_vm0, %v16821_v62 }
 0x26b   :  { %23772 = vst [vmem:[#allocation55_spill] sm:$0xff] %v18899_v16  ;;  %15667 = vmatprep.mubr.msk.bf16.mxu0 %vm2100_vm0, %v16822_v53  ;;  %v5475_v6 = vmax.f32 %v3691_v41, 0.0  ;;  %v5963_v41 = vpack.c.bf16 %v5473_v10, %v5472_v60  ;;  %v5478_v60 = vmax.f32 %v3704_v37, 0.0 }
 0x26c   :  { %v18903_v38 = vpop.f32.mrf.mxu1  ;;  %v18905_v9 = vpop.f32.mrf.mxu0 }
 0x26e   :  { %v18915_v62 = vpop.f32.mrf.mxu1  ;;  %v18917_v53 = vpop.f32.mrf.mxu0 }
 0x26f   :  { %23773 = vst [vmem:[#allocation56_spill] sm:$0xff] %v18915_v62  ;;  %23774 = vst [vmem:[#allocation57_spill] sm:$0xff] %v18917_v53 }
 0x270   :  { %v18925_v12 = vpop.f32.mrf.mxu1  ;;  %16124 = vmatmul.mubr.msk.bf16.gmra.mxu1 %vm6186_vm1, %v5961_v26  ;;  %v18928_v51 = vpop.f32.mrf.mxu0  ;;  %v5964_v26 = vpack.c.bf16 %v5475_v6, %v5474_v4  ;;  %v16826_v4 = vld [vmem:[%s23704_s0 + $0x4d8] sm:$0xff]  }
 0x271   :  { %23775 = vst [vmem:[#allocation58_spill] sm:$0xff] %v18925_v12  ;;  %16127 = vmatprep.mubr.msk.bf16.mxu1 %vm6186_vm1, %v5962_v7  ;;  %v3707_v7 = vadd.f32 %v18837_v48, %v18675_v15  ;;  %v16827_v15 = vld [vmem:[%s23704_s0 + $0x4e0] sm:$0xff]  }
 0x272   :  { %v18931_v53 = vpop.f32.mrf.mxu1  ;;  %v18933_v16 = vpop.f32.mrf.mxu0  ;;  %15668 = vmatmul.mubr.msk.bf16.gmra.mxu0 %vm2100_vm0, %v16824_v57 }
 0x273   :  { %23776 = vst [vmem:[#allocation59_spill] sm:$0xff] %v18933_v16  ;;  %15671 = vmatprep.mubr.msk.bf16.mxu0 %vm2100_vm0, %v16825_v45  ;;  %v5476_v16 = vmax.f32 %v3696_v8, 0.0  ;;  %v3720_v8 = vadd.f32 %v18837_v48, %v18686_v13  ;;  %v6543_v13 = vadd.f32 %v18672_v49, %v18356_v56  ;;  %v5483_v56 = vmax.f32 %v3723_v43, 0.0 }
 0x274   :  { %v18937_v62 = vpop.f32.mrf.mxu1  ;;  %v18939_v12 = vpop.f32.mrf.mxu0 }
 0x275   :  { %23777 = vst [vmem:[#allocation60_spill] sm:$0xff] %v18937_v62 }
 0x276   :  { %v18949_v57 = vpop.f32.mrf.mxu1  ;;  %v18951_v45 = vpop.f32.mrf.mxu0 }
 0x277   :  { %23778 = vst [vmem:[#allocation61_spill] sm:$0xff] %v18949_v57  ;;  %23779 = vst [vmem:[#allocation62_spill] sm:$0xff] %v18951_v45  ;;  %v5479_v45 = vmax.f32 %v3707_v7, 0.0 }
 0x278   :  { %v16025_v6 = vpop.f32.mrf.mxu1  ;;  %16128 = vmatmul.mubr.msk.bf16.gmra.mxu1 %vm6186_vm1, %v5963_v41  ;;  %v18962_v30 = vpop.f32.mrf.mxu0  ;;  %v6530_v41 = vadd.f32 %v18650_v27, %v18334_v20  ;;  %v5965_v20 = vpack.c.bf16 %v5477_v58, %v5476_v16  ;;  %v3712_v27 = vadd.f32 %v18837_v48, %v18646_v50  ;;  %v6535_v16 = vadd.f32 %v18678_v59, %v18362_v47  ;;  %v23780_v47 = vld [vmem:[#allocation2_spill] sm:$0xff]  ;;  %v23781_v59 = vld [vmem:[#allocation32_spill] sm:$0xff] }
 0x279   :  { %v18966_v10 = vadd.f32 %v16025_v6, %v6527_v29  ;;  %16131 = vmatprep.mubr.msk.bf16.mxu1 %vm6186_vm1, %v5964_v26  ;;  %v5966_v37 = vpack.c.bf16 %v5479_v45, %v5478_v60  ;;  %v16828_v45 = vld [vmem:[%s23704_s0 + $0x4e8] sm:$0xff]  }
 0x27a   :  { %v6765_v36 = vpop.f32.mrf.mxu1  ;;  %v18969_v57 = vpop.f32.mrf.mxu0  ;;  %15672 = vmatmul.mubr.msk.bf16.gmra.mxu0 %vm2100_vm0, %v16826_v4  ;;  %v3715_v4 = vadd.f32 %v18837_v48, %v18664_v3  ;;  %v5480_v49 = vmax.f32 %v3712_v27, 0.0  ;;  %v3739_v27 = vadd.f32 %v18837_v48, %v18746_v23  ;;  %v16831_v23 = vld [vmem:[%s23704_s0 + $0x500] sm:$0xff]  }
 0x27b   :  { %v18974_v62 = vadd.f32 %v6765_v36, %v6519_v14  ;;  %15675 = vmatprep.mubr.msk.bf16.mxu0 %vm2100_vm0, %v16827_v15  ;;  %v5482_v15 = vmax.f32 %v3720_v8, 0.0  ;;  %v6546_v36 = vadd.f32 %v18684_v55, %v18368_v63  ;;  %v23782_v55 = vld [vmem:[#allocation31_spill] sm:$0xff] }
 0x27c   :  { %v16026_v5 = vpop.f32.mrf.mxu1  ;;  %v18979_v26 = vpop.f32.mrf.mxu0  ;;  %v5481_v14 = vmax.f32 %v3715_v4, 0.0  ;;  %v3728_v4 = vadd.f32 %v18837_v48, %v23782_v55 }
 0x27d   :  { %v18981_v7 = vadd.f32 %v16026_v5, %v6530_v41  ;;  %v5968_v8 = vpack.c.bf16 %v5483_v56, %v5482_v15  ;;  %v23785_v15 = vld [vmem:[#allocation34_spill] sm:$0xff] }
 0x27e   :  { %v6768_v32 = vpop.f32.mrf.mxu1  ;;  %v18991_v21 = vpop.f32.mrf.mxu0  ;;  %v5967_v63 = vpack.c.bf16 %v5481_v14, %v5480_v49 }
 0x27f   :  { %v18998_v29 = vadd.f32 %v6768_v32, %v6522_v18  ;;  %v6538_v18 = vadd.f32 %v23781_v59, %v23780_v47  ;;  %v23783_v32 = vld [vmem:[#allocation33_spill] sm:$0xff] }
 0x280   :  { %v16029_v50 = vpop.f32.mrf.mxu1  ;;  %16132 = vmatmul.mubr.msk.bf16.gmra.mxu1 %vm6186_vm1, %v5965_v20  ;;  %v19004_v3 = vpop.f32.mrf.mxu0  ;;  %v3736_v20 = vadd.f32 %v18837_v48, %v18720_v35 }
 0x281   :  { %v19008_v6 = vadd.f32 %v16029_v50, %v6543_v13  ;;  %16135 = vmatprep.mubr.msk.bf16.mxu1 %vm6186_vm1, %v5966_v37  ;;  %v16830_v50 = vld [vmem:[%s23704_s0 + $0x4f8] sm:$0xff]  }
 0x282   :  { %v6781_v60 = vpop.f32.mrf.mxu1  ;;  %v19011_v58 = vpop.f32.mrf.mxu0  ;;  %15676 = vmatmul.mubr.msk.bf16.gmra.mxu0 %vm2100_vm0, %v16828_v45  ;;  %v3731_v45 = vadd.f32 %v18837_v48, %v23783_v32  ;;  %v5486_v47 = vmax.f32 %v3736_v20, 0.0  ;;  %v23789_v20 = vld [vmem:[#allocation36_spill] sm:$0xff] }
 0x283   :  { %v19016_v41 = vadd.f32 %v6781_v60, %v6535_v16  ;;  %15679 = vmatprep.mubr.msk.bf16.mxu0 %vm2100_vm0, %v16829_v28  ;;  %v23784_v16 = vld [vmem:[#allocation3_spill] sm:$0xff]  ;;  %v23786_v60 = vld [vmem:[#allocation4_spill] sm:$0xff] }
 0x284   :  { %v16030_v5 = vpop.f32.mrf.mxu1  ;;  %v19021_v37 = vpop.f32.mrf.mxu0  ;;  %v6559_v35 = vadd.f32 %v23785_v15, %v23784_v16  ;;  %v5485_v55 = vmax.f32 %v3731_v45, 0.0  ;;  %v23787_v16 = vld [vmem:[#allocation5_spill] sm:$0xff]  ;;  %v3752_v45 = vadd.f32 %v18837_v48, %v18763_v1  ;;  %v16832_v1 = vld [vmem:[%s23704_s0 + $0x508] sm:$0xff]  }
 0x285   :  { %v19023_v43 = vadd.f32 %v16030_v5, %v6546_v36  ;;  %v6551_v36 = vadd.f32 %v18712_v2, %v23786_v60  ;;  %v5487_v5 = vmax.f32 %v3739_v27, 0.0  ;;  %v23788_v2 = vld [vmem:[#allocation6_spill] sm:$0xff]  ;;  %v23790_v60 = vld [vmem:[#allocation35_spill] sm:$0xff] }
 0x286   :  { %v6784_v13 = vpop.f32.mrf.mxu1  ;;  %v19033_v28 = vpop.f32.mrf.mxu0 }
 0x287   :  { %v19040_v56 = vadd.f32 %v6784_v13, %v6538_v18  ;;  %v5484_v18 = vmax.f32 %v3728_v4, 0.0  ;;  %v5970_v27 = vpack.c.bf16 %v5487_v5, %v5486_v47  ;;  %v16823_v47 = vld [vmem:[%s23705_s3 + $0x60] sm:$0xff]  }
 0x288   :  { %v16033_v49 = vpop.f32.mrf.mxu1  ;;  %16136 = vmatmul.mubr.msk.bf16.gmra.mxu1 %vm6186_vm1, %v5967_v63  ;;  %v19046_v14 = vpop.f32.mrf.mxu0  ;;  %v6562_v63 = vadd.f32 %v18718_v52, %v23787_v16 }
 0x289   :  { %v19050_v59 = vadd.f32 %v16033_v49, %v6559_v35  ;;  %16143 = vmatprep.mubr.msk.bf16.mxu1 %vm6186_vm1, %v5968_v8  ;;  %v6554_v35 = vadd.f32 %v23789_v20, %v23788_v2  ;;  %v5969_v52 = vpack.c.bf16 %v5485_v55, %v5484_v18  ;;  %v16834_v55 = vld [vmem:[%s23704_s0 + $0x510] sm:$0xff]  }
 0x28a   :  { %v6797_v32 = vpop.f32.mrf.mxu1  ;;  %v19053_v13 = vpop.f32.mrf.mxu0  ;;  %15680 = vmatmul.mubr.msk.bf16.gmra.mxu0 %vm2100_vm0, %v16830_v50  ;;  %v3755_v50 = vadd.f32 %v18837_v48, %v18787_v46 }
 0x28b   :  { %v19058_v15 = vadd.f32 %v6797_v32, %v6551_v36  ;;  %15683 = vmatprep.mubr.msk.bf16.mxu0 %vm2100_vm0, %v16831_v23  ;;  %v3744_v36 = vadd.f32 %v18837_v48, %v23790_v60  ;;  %v23791_v23 = vld [vmem:[#allocation37_spill] sm:$0xff] }
 0x28c   :  { %v16034_v49 = vpop.f32.mrf.mxu1  ;;  %v19063_v8 = vpop.f32.mrf.mxu0  ;;  %v3747_v32 = vadd.f32 %v18837_v48, %v23791_v23  ;;  %v5490_v23 = vmax.f32 %v3752_v45, 0.0  ;;  %v23798_v45 = vld [vmem:[#allocation9_spill] sm:$0xff] }
 0x28d   :  { %v19065_v4 = vadd.f32 %v16034_v49, %v6562_v63  ;;  %v23793_v63 = vld [vmem:[#allocation7_spill] sm:$0xff]  ;;  %v23795_v49 = vld [vmem:[#allocation8_spill] sm:$0xff] }
 0x28e   :  { %v6800_v16 = vpop.f32.mrf.mxu1  ;;  %v19078_v5 = vpop.f32.mrf.mxu0  ;;  %v6575_v46 = vadd.f32 %v18743_v22, %v23793_v63  ;;  %v6567_v60 = vadd.f32 %v18750_v54, %v23795_v49  ;;  %v5491_v22 = vmax.f32 %v3755_v50, 0.0  ;;  %v19105_v54 = vld [vmem:[%s23705_s3 + $0x78] sm:$0xff]   ;;  %v23802_v50 = vld [vmem:[#allocation40_spill] sm:$0xff] }
 0x28f   :  { %23792 = vst [vmem:[#allocation2_spill] sm:$0xff] %v19078_v5  ;;  %v19085_v18 = vadd.f32 %v6800_v16, %v6554_v35  ;;  %v5488_v35 = vmax.f32 %v3744_v36, 0.0  ;;  %v5489_v16 = vmax.f32 %v3747_v32, 0.0 }
 0x290   :  { %v16037_v2 = vpop.f32.mrf.mxu1  ;;  %16144 = vmatmul.mubr.msk.bf16.vlgmr.msra.gmra.mxu1 %vm6186_vm1, %v5969_v52  ;;  %v19091_v20 = vpop.f32.mrf.mxu0  ;;  %v23799_v52 = vld [vmem:[#allocation39_spill] sm:$0xff]  ;;  %v5972_v49 = vpack.c.bf16 %v5491_v22, %v5490_v23 }
 0x291   :  { %23794 = vst [vmem:[#allocation32_spill] sm:$0xff] %v19085_v18  ;;  %v19095_v5 = vadd.f32 %v16037_v2, %v6575_v46  ;;  %16180 = vmatpush3.bf16.msra.mxu1 %v18758_v24  ;;  %16147 = vmatprep.mubr.msk.bf16.mxu1 %vm6186_vm1, %v5970_v27  ;;  %v6578_v46 = vadd.f32 %v23799_v52, %v23798_v45  ;;  %v23801_v27 = vld [vmem:[#allocation10_spill] sm:$0xff]  ;;  %v23805_v45 = vld [vmem:[#allocation41_spill] sm:$0xff]  ;;  %v23807_v22 = vld [vmem:[#allocation11_spill] sm:$0xff] }
 0x292   :  { %v6813_v63 = vpop.f32.mrf.mxu1  ;;  %16181 = vmatprep.subr.bf16.mxu1 %v16823_v47  ;;  %v19099_v18 = vpop.f32.mrf.mxu0  ;;  %15684 = vmatmul.mubr.msk.bf16.gmra.mxu0 %vm2100_vm0, %v16832_v1  ;;  %v6570_v36 = vadd.f32 %v23802_v50, %v23801_v27  ;;  %v3763_v52 = vadd.f32 %v18837_v48, %v23805_v45 }
 0x293   :  { %23796 = vst [vmem:[#allocation31_spill] sm:$0xff] %v19095_v5  ;;  %23797 = vst [vmem:[#allocation33_spill] sm:$0xff] %v19099_v18  ;;  %v19109_v24 = vadd.f32 %v6813_v63, %v6567_v60  ;;  %15687 = vmatprep.mubr.msk.bf16.mxu0 %vm2100_vm0, %v16834_v55  ;;  %v3768_v18 = vadd.f32 %v18837_v48, %v18798_v19  ;;  %v3771_v5 = vadd.f32 %v18837_v48, %v18821_v44  ;;  %v23804_v63 = vld [vmem:[#allocation38_spill] sm:$0xff]  ;;  %v16835_v19 = vld [vmem:[%s23704_s0 + $0x518] sm:$0xff]  }
 0x294   :  { %v16038_v32 = vpop.f32.mrf.mxu1  ;;  %v19114_v2 = vpop.f32.mrf.mxu0  ;;  %v5971_v60 = vpack.c.bf16 %v5489_v16, %v5488_v35  ;;  %v3760_v55 = vadd.f32 %v18837_v48, %v23804_v63  ;;  %v16836_v35 = vld [vmem:[%s23704_s0 + $0x520] sm:$0xff]  }
 0x295   :  { %23800 = vst [vmem:[#allocation3_spill] sm:$0xff] %v19109_v24  ;;  %v19116_v1 = vadd.f32 %v16038_v32, %v6578_v46  ;;  %16182 = vmatpush3.bf16.msra.mxu1 %v16823_v47  ;;  %v23808_v46 = vld [vmem:[#allocation42_spill] sm:$0xff]  ;;  %v23810_v32 = vld [vmem:[#allocation12_spill] sm:$0xff]  ;;  %v5494_v45 = vmax.f32 %v3768_v18, 0.0 }
 0x296   :  { %v6816_v27 = vpop.f32.mrf.mxu1  ;;  %16219 = vmatprep.subr.bf16.mxu1 %v19105_v54  ;;  %v19127_v23 = vpop.f32.mrf.mxu0  ;;  %v6591_v44 = vadd.f32 %v23808_v46, %v23807_v22  ;;  %v6583_v63 = vadd.f32 %v18790_v39, %v23810_v32  ;;  %v5495_v22 = vmax.f32 %v3771_v5, 0.0  ;;  %v23813_v39 = vld [vmem:[#allocation14_spill] sm:$0xff] }
 0x297   :  { %23803 = vst [vmem:[#allocation34_spill] sm:$0xff] %v19116_v1  ;;  %23806 = vst [vmem:[#allocation4_spill] sm:$0xff] %v19127_v23  ;;  %v19134_v47 = vadd.f32 %v6816_v27, %v6570_v36  ;;  %v5492_v36 = vmax.f32 %v3760_v55, 0.0  ;;  %v5493_v27 = vmax.f32 %v3763_v52, 0.0  ;;  %v23812_v1 = vld [vmem:[#allocation13_spill] sm:$0xff]  ;;  %v6586_v18 = vadd.f32 %v18808_v33, %v23813_v39  ;;  %v23821_v39 = vld [vmem:[#allocation16_spill] sm:$0xff] }
 0x298   :  { %v16041_v16 = vpop.f32.mrf.mxu1  ;;  %16148 = vmatmul.mubr.msk.bf16.gmra.mxu1 %vm6186_vm1, %v5971_v60  ;;  %v19140_v50 = vpop.f32.mrf.mxu0  ;;  %v6594_v60 = vadd.f32 %v18796_v42, %v23812_v1  ;;  %v5974_v5 = vpack.c.bf16 %v5495_v22, %v5494_v45  ;;  %v3784_v52 = vadd.f32 %v18837_v48, %v18832_v31  ;;  %v23815_v1 = vld [vmem:[#allocation43_spill] sm:$0xff] }
 0x299   :  { %23809 = vst [vmem:[#allocation5_spill] sm:$0xff] %v19134_v47  ;;  %v19144_v23 = vadd.f32 %v16041_v16, %v6591_v44  ;;  %16151 = vmatprep.mubr.msk.bf16.mxu1 %vm6186_vm1, %v5972_v49  ;;  %v5973_v42 = vpack.c.bf16 %v5493_v27, %v5492_v36  ;;  %v3776_v16 = vadd.f32 %v18837_v48, %v23815_v1  ;;  %v16837_v45 = vld [vmem:[%s23704_s0 + $0x528] sm:$0xff]  }
 0x29a   :  { %v6829_v46 = vpop.f32.mrf.mxu1  ;;  %v19147_v47 = vpop.f32.mrf.mxu0  ;;  %15688 = vmatmul.mubr.msk.bf16.gmra.mxu0 %vm2100_vm0, %v16835_v19  ;;  %v3787_v19 = vadd.f32 %v18837_v48, %v18860_v11  ;;  %v23818_v22 = vld [vmem:[#allocation15_spill] sm:$0xff]  ;;  %v16838_v11 = vld [vmem:[%s23704_s0 + $0x530] sm:$0xff]   ;;  %v5498_v1 = vmax.f32 %v3784_v52, 0.0 }
 0x29b   :  { %23811 = vst [vmem:[#allocation6_spill] sm:$0xff] %v19147_v47  ;;  %v19152_v24 = vadd.f32 %v6829_v46, %v6583_v63  ;;  %15691 = vmatprep.mubr.msk.bf16.mxu0 %vm2100_vm0, %v16836_v35  ;;  %v23816_v35 = vld [vmem:[#allocation44_spill] sm:$0xff]  ;;  %v23819_v46 = vld [vmem:[#allocation45_spill] sm:$0xff] }
 0x29c   :  { %v16042_v44 = vpop.f32.mrf.mxu1  ;;  %v19157_v49 = vpop.f32.mrf.mxu0  ;;  %v3779_v32 = vadd.f32 %v18837_v48, %v23816_v35  ;;  %v6607_v31 = vadd.f32 %v23819_v46, %v23818_v22  ;;  %v5499_v22 = vmax.f32 %v3787_v19, 0.0  ;;  %v23826_v52 = vld [vmem:[#allocation48_spill] sm:$0xff] }
 0x29d   :  { %v19159_v55 = vadd.f32 %v16042_v44, %v6594_v60  ;;  %v6599_v44 = vadd.f32 %v18824_v25, %v23821_v39  ;;  %v23825_v25 = vld [vmem:[#allocation18_spill] sm:$0xff] }
 0x29e   :  { %v6832_v33 = vpop.f32.mrf.mxu1  ;;  %v19169_v63 = vpop.f32.mrf.mxu0  ;;  %v5976_v19 = vpack.c.bf16 %v5499_v22, %v5498_v1  ;;  %v23828_v39 = vld [vmem:[#allocation46_spill] sm:$0xff]  ;;  %v23831_v1 = vld [vmem:[#allocation19_spill] sm:$0xff] }
 0x29f   :  { %23814 = vst [vmem:[#allocation36_spill] sm:$0xff] %v19159_v55  ;;  %23817 = vst [vmem:[#allocation35_spill] sm:$0xff] %v19169_v63  ;;  %v19176_v60 = vadd.f32 %v6832_v33, %v6586_v18  ;;  %v5496_v18 = vmax.f32 %v3776_v16, 0.0  ;;  %v5497_v33 = vmax.f32 %v3779_v32, 0.0  ;;  %v23823_v63 = vld [vmem:[#allocation17_spill] sm:$0xff]  ;;  %v3800_v32 = vadd.f32 %v18837_v48, %v18871_v0  ;;  %v23832_v22 = vld [vmem:[#allocation50_spill] sm:$0xff] }
 0x2a0   :  { %v16045_v36 = vpop.f32.mrf.mxu1  ;;  %16152 = vmatmul.mubr.msk.bf16.gmra.mxu1 %vm6186_vm1, %v5973_v42  ;;  %v19182_v27 = vpop.f32.mrf.mxu0  ;;  %v23824_v42 = vld [vmem:[#allocation47_spill] sm:$0xff]  ;;  %v6623_v0 = vadd.f32 %v23832_v22, %v23831_v1 }
 0x2a1   :  { %23820 = vst [vmem:[#allocation37_spill] sm:$0xff] %v19176_v60  ;;  %v19186_v35 = vadd.f32 %v16045_v36, %v6607_v31  ;;  %16155 = vmatprep.mubr.msk.bf16.mxu1 %vm6186_vm1, %v5974_v5  ;;  %v6610_v47 = vadd.f32 %v23824_v42, %v23823_v63  ;;  %v6602_v31 = vadd.f32 %v23826_v52, %v23825_v25 }
 0x2a2   :  { %v6845_v46 = vpop.f32.mrf.mxu1  ;;  %v19189_v60 = vpop.f32.mrf.mxu0  ;;  %15692 = vmatmul.mubr.msk.bf16.gmra.mxu0 %vm2100_vm0, %v16837_v45  ;;  %v3803_v45 = vadd.f32 %v18837_v48, %v18894_v61  ;;  %v5975_v63 = vpack.c.bf16 %v5497_v33, %v5496_v18  ;;  %v16840_v61 = vld [vmem:[%s23704_s0 + $0x540] sm:$0xff]  }
 0x2a3   :  { %23822 = vst [vmem:[#allocation7_spill] sm:$0xff] %v19189_v60  ;;  %v19194_v55 = vadd.f32 %v6845_v46, %v6599_v44  ;;  %15695 = vmatprep.mubr.msk.bf16.mxu0 %vm2100_vm0, %v16838_v11  ;;  %v3792_v44 = vadd.f32 %v18837_v48, %v23828_v39  ;;  %v23829_v11 = vld [vmem:[#allocation49_spill] sm:$0xff] }
 0x2a4   :  { %v16046_v36 = vpop.f32.mrf.mxu1  ;;  %v19199_v5 = vpop.f32.mrf.mxu0  ;;  %v3795_v46 = vadd.f32 %v18837_v48, %v23829_v11  ;;  %v5502_v11 = vmax.f32 %v3800_v32, 0.0  ;;  %v5503_v1 = vmax.f32 %v3803_v45, 0.0  ;;  %v23836_v60 = vld [vmem:[#allocation21_spill] sm:$0xff]  ;;  %v23838_v32 = vld [vmem:[#allocation52_spill] sm:$0xff] }
 0x2a5   :  { %v19201_v16 = vadd.f32 %v16046_v36, %v6610_v47  ;;  %v16839_v47 = vld [vmem:[%s23704_s0 + $0x538] sm:$0xff]   ;;  %v23834_v36 = vld [vmem:[#allocation20_spill] sm:$0xff] }
 0x2a6   :  { %v6848_v42 = vpop.f32.mrf.mxu1  ;;  %v19211_v25 = vpop.f32.mrf.mxu0  ;;  %v6615_v39 = vadd.f32 %v18863_v40, %v23834_v36  ;;  %v23837_v40 = vld [vmem:[#allocation22_spill] sm:$0xff]  ;;  %v5978_v45 = vpack.c.bf16 %v5503_v1, %v5502_v11  ;;  %v16841_v11 = vld [vmem:[%s23704_s0 + $0x548] sm:$0xff]  }
 0x2a7   :  { %23827 = vst [vmem:[#allocation8_spill] sm:$0xff] %v19201_v16  ;;  %23830 = vst [vmem:[#allocation9_spill] sm:$0xff] %v19211_v25  ;;  %v19218_v52 = vadd.f32 %v6848_v42, %v6602_v31  ;;  %v5500_v31 = vmax.f32 %v3792_v44, 0.0  ;;  %v5501_v42 = vmax.f32 %v3795_v46, 0.0  ;;  %v3816_v46 = vadd.f32 %v18837_v48, %v18905_v9  ;;  %v23843_v1 = vld [vmem:[#allocation23_spill] sm:$0xff] }
 0x2a8   :  { %v16049_v18 = vpop.f32.mrf.mxu1  ;;  %16156 = vmatmul.mubr.msk.bf16.gmra.mxu1 %vm6186_vm1, %v5975_v63  ;;  %v19224_v33 = vpop.f32.mrf.mxu0  ;;  %v6626_v63 = vadd.f32 %v18869_v17, %v23836_v60  ;;  %v23840_v60 = vld [vmem:[#allocation51_spill] sm:$0xff] }
 0x2a9   :  { %23833 = vst [vmem:[#allocation39_spill] sm:$0xff] %v19218_v52  ;;  %v19228_v25 = vadd.f32 %v16049_v18, %v6623_v0  ;;  %16159 = vmatprep.mubr.msk.bf16.mxu1 %vm6186_vm1, %v5976_v19  ;;  %v6618_v0 = vadd.f32 %v23838_v32, %v23837_v40  ;;  %v5977_v17 = vpack.c.bf16 %v5501_v42, %v5500_v31 }
 0x2aa   :  { %v6861_v22 = vpop.f32.mrf.mxu1  ;;  %v19231_v52 = vpop.f32.mrf.mxu0  ;;  %15696 = vmatmul.mubr.msk.bf16.gmra.mxu0 %vm2100_vm0, %v16839_v47  ;;  %v3819_v47 = vadd.f32 %v18837_v48, %v18928_v51  ;;  %v3808_v36 = vadd.f32 %v18837_v48, %v23840_v60  ;;  %v16842_v51 = vld [vmem:[%s23704_s0 + $0x550] sm:$0xff]  }
 0x2ab   :  { %23835 = vst [vmem:[#allocation10_spill] sm:$0xff] %v19231_v52  ;;  %v19236_v16 = vadd.f32 %v6861_v22, %v6615_v39  ;;  %15699 = vmatprep.mubr.msk.bf16.mxu0 %vm2100_vm0, %v16840_v61  ;;  %v23841_v61 = vld [vmem:[#allocation53_spill] sm:$0xff] }
 0x2ac   :  { %v16050_v18 = vpop.f32.mrf.mxu1  ;;  %v19241_v19 = vpop.f32.mrf.mxu0  ;;  %v3811_v39 = vadd.f32 %v18837_v48, %v23841_v61  ;;  %v5506_v61 = vmax.f32 %v3816_v46, 0.0  ;;  %v23848_v52 = vld [vmem:[#allocation25_spill] sm:$0xff]  ;;  %v23851_v46 = vld [vmem:[#allocation56_spill] sm:$0xff] }
 0x2ad   :  { %v19243_v44 = vadd.f32 %v16050_v18, %v6626_v63  ;;  %v23844_v63 = vld [vmem:[#allocation54_spill] sm:$0xff]  ;;  %v23846_v18 = vld [vmem:[#allocation24_spill] sm:$0xff] }
 0x2ae   :  { %v6864_v22 = vpop.f32.mrf.mxu1  ;;  %v19253_v40 = vpop.f32.mrf.mxu0  ;;  %v6639_v9 = vadd.f32 %v23844_v63, %v23843_v1  ;;  %v6631_v60 = vadd.f32 %v18897_v34, %v23846_v18  ;;  %v5507_v1 = vmax.f32 %v3819_v47, 0.0  ;;  %v23850_v34 = vld [vmem:[#allocation26_spill] sm:$0xff] }
 0x2af   :  { %23839 = vst [vmem:[#allocation40_spill] sm:$0xff] %v19243_v44  ;;  %23842 = vst [vmem:[#allocation38_spill] sm:$0xff] %v19253_v40  ;;  %v19260_v32 = vadd.f32 %v6864_v22, %v6618_v0  ;;  %v5504_v0 = vmax.f32 %v3808_v36, 0.0  ;;  %v5505_v22 = vmax.f32 %v3811_v39, 0.0  ;;  %v3832_v39 = vadd.f32 %v18837_v48, %v18939_v12 }
 0x2b0   :  { %v16053_v31 = vpop.f32.mrf.mxu1  ;;  %16160 = vmatmul.mubr.msk.bf16.gmra.mxu1 %vm6186_vm1, %v5977_v17  ;;  %v19266_v42 = vpop.f32.mrf.mxu0  ;;  %v6642_v17 = vadd.f32 %v18903_v38, %v23848_v52  ;;  %v5980_v47 = vpack.c.bf16 %v5507_v1, %v5506_v61  ;;  %v23853_v52 = vld [vmem:[#allocation55_spill] sm:$0xff]  ;;  %v16844_v61 = vld [vmem:[%s23704_s0 + $0x558] sm:$0xff]  }
 0x2b1   :  { %23845 = vst [vmem:[#allocation41_spill] sm:$0xff] %v19260_v32  ;;  %v19270_v40 = vadd.f32 %v16053_v31, %v6639_v9  ;;  %16163 = vmatprep.mubr.msk.bf16.mxu1 %vm6186_vm1, %v5978_v45  ;;  %v6634_v9 = vadd.f32 %v23851_v46, %v23850_v34  ;;  %v5979_v38 = vpack.c.bf16 %v5505_v22, %v5504_v0  ;;  %v23856_v1 = vld [vmem:[#allocation27_spill] sm:$0xff] }
 0x2b2   :  { %v6877_v63 = vpop.f32.mrf.mxu1  ;;  %v19273_v32 = vpop.f32.mrf.mxu0  ;;  %15700 = vmatmul.mubr.msk.bf16.gmra.mxu0 %vm2100_vm0, %v16841_v11  ;;  %v3835_v11 = vadd.f32 %v18837_v48, %v18962_v30  ;;  %v3824_v18 = vadd.f32 %v18837_v48, %v23853_v52  ;;  %v16845_v30 = vld [vmem:[%s23704_s0 + $0x560] sm:$0xff]  }
 0x2b3   :  { %23847 = vst [vmem:[#allocation11_spill] sm:$0xff] %v19273_v32  ;;  %v19278_v44 = vadd.f32 %v6877_v63, %v6631_v60  ;;  %15703 = vmatprep.mubr.msk.bf16.mxu0 %vm2100_vm0, %v16842_v51  ;;  %v23854_v51 = vld [vmem:[#allocation57_spill] sm:$0xff] }
 0x2b4   :  { %v16054_v31 = vpop.f32.mrf.mxu1  ;;  %v19283_v45 = vpop.f32.mrf.mxu0  ;;  %v3827_v60 = vadd.f32 %v18837_v48, %v23854_v51  ;;  %v5510_v51 = vmax.f32 %v3832_v39, 0.0  ;;  %v23860_v32 = vld [vmem:[#allocation29_spill] sm:$0xff] }
 0x2b5   :  { %23849 = vst [vmem:[#allocation42_spill] sm:$0xff] %v19278_v44  ;;  %v19285_v36 = vadd.f32 %v16054_v31, %v6642_v17  ;;  %v23857_v17 = vld [vmem:[#allocation58_spill] sm:$0xff]  ;;  %v23859_v31 = vld [vmem:[#allocation28_spill] sm:$0xff]  ;;  %v23863_v39 = vld [vmem:[#allocation61_spill] sm:$0xff] }
 0x2b6   :  { %v6880_v63 = vpop.f32.mrf.mxu1  ;;  %v19295_v34 = vpop.f32.mrf.mxu0  ;;  %v6655_v12 = vadd.f32 %v23857_v17, %v23856_v1  ;;  %v6647_v52 = vadd.f32 %v18931_v53, %v23859_v31  ;;  %v5511_v1 = vmax.f32 %v3835_v11, 0.0  ;;  %v23862_v53 = vld [vmem:[#allocation30_spill] sm:$0xff]  ;;  %v23864_v31 = vld [vmem:[#allocation59_spill] sm:$0xff] }
 0x2b7   :  { %23852 = vst [vmem:[#allocation12_spill] sm:$0xff] %v19285_v36  ;;  %23855 = vst [vmem:[#allocation13_spill] sm:$0xff] %v19295_v34  ;;  %v19302_v46 = vadd.f32 %v6880_v63, %v6634_v9  ;;  %v5508_v9 = vmax.f32 %v3824_v18, 0.0  ;;  %v5509_v63 = vmax.f32 %v3827_v60, 0.0  ;;  %v3848_v60 = vadd.f32 %v18837_v48, %v18979_v26  ;;  %v16847_v26 = vld [vmem:[%s23704_s0 + $0x570] sm:$0xff]  }
 0x2b8   :  { %v16057_v0 = vpop.f32.mrf.mxu1  ;;  %16164 = vmatmul.mubr.msk.bf16.gmra.mxu1 %vm6186_vm1, %v5979_v38  ;;  %v19308_v22 = vpop.f32.mrf.mxu0  ;;  %v23861_v38 = vld [vmem:[#allocation60_spill] sm:$0xff]  ;;  %v5982_v11 = vpack.c.bf16 %v5511_v1, %v5510_v51 }
 0x2b9   :  { %23858 = vst [vmem:[#allocation14_spill] sm:$0xff] %v19302_v46  ;;  %v19312_v34 = vadd.f32 %v16057_v0, %v6655_v12  ;;  %16167 = vmatprep.mubr.msk.bf16.mxu1 %vm6186_vm1, %v5980_v47  ;;  %v6658_v36 = vadd.f32 %v23861_v38, %v23860_v32  ;;  %v6650_v12 = vadd.f32 %v23863_v39, %v23862_v53 }
 0x2ba   :  { %v6893_v17 = vpop.f32.mrf.mxu1  ;;  %v19315_v46 = vpop.f32.mrf.mxu0  ;;  %15704 = vmatmul.mubr.msk.bf16.gmra.mxu0 %vm2100_vm0, %v16844_v61  ;;  %v3851_v61 = vadd.f32 %v18837_v48, %v19004_v3  ;;  %v5981_v32 = vpack.c.bf16 %v5509_v63, %v5508_v9  ;;  %v5514_v9 = vmax.f32 %v3848_v60, 0.0 }
 0x2bb   :  { %v19320_v44 = vadd.f32 %v6893_v17, %v6647_v52  ;;  %15707 = vmatprep.mubr.msk.bf16.mxu0 %vm2100_vm0, %v16845_v30  ;;  %v3840_v52 = vadd.f32 %v18837_v48, %v23864_v31  ;;  %v23865_v30 = vld [vmem:[#allocation62_spill] sm:$0xff] }
 0x2bc   :  { %v16058_v0 = vpop.f32.mrf.mxu1  ;;  %v19325_v47 = vpop.f32.mrf.mxu0  ;;  %v3843_v17 = vadd.f32 %v18837_v48, %v23865_v30  ;;  %v5515_v39 = vmax.f32 %v3851_v61, 0.0  ;;  %v3867_v61 = vadd.f32 %v18837_v48, %v19046_v14 }
 0x2bd   :  { %v19327_v18 = vadd.f32 %v16058_v0, %v6658_v36  ;;  %v16846_v36 = vld [vmem:[%s23704_s0 + $0x568] sm:$0xff]   ;;  %v5512_v0 = vmax.f32 %v3840_v52, 0.0 }
 0x2be   :  { %v6896_v38 = vpop.f32.mrf.mxu1  ;;  %v19337_v53 = vpop.f32.mrf.mxu0  ;;  %v5513_v31 = vmax.f32 %v3843_v17, 0.0  ;;  %v3859_v17 = vadd.f32 %v18837_v48, %v18991_v21 }
 0x2bf   :  { %v19342_v51 = vadd.f32 %v6896_v38, %v6650_v12 }
 0x2c0   :  { %v16065_v3 = vpop.f32.mrf.mxu1  ;;  %16168 = vmatmul.mubr.msk.bf16.gmra.mxu1 %vm6186_vm1, %v5981_v32  ;;  %v19348_v1 = vpop.f32.mrf.mxu0  ;;  %v5983_v52 = vpack.c.bf16 %v5513_v31, %v5512_v0  ;;  %v5519_v0 = vmax.f32 %v3867_v61, 0.0  ;;  %v3883_v61 = vadd.f32 %v18837_v48, %v19091_v20 }
 0x2c1   :  { %v19351_v63 = vadd.f32 %v16065_v3, %v18966_v10  ;;  %16171 = vmatprep.mubr.msk.bf16.mxu1 %vm6186_vm1, %v5982_v11  ;;  %v5984_v10 = vpack.c.bf16 %v5515_v39, %v5514_v9  ;;  %v3864_v11 = vadd.f32 %v18837_v48, %v19021_v37  ;;  %v16849_v37 = vld [vmem:[%s23704_s0 + $0x580] sm:$0xff]  }
 0x2c2   :  { %v7048_v12 = vpop.f32.mrf.mxu1  ;;  %v19354_v30 = vpop.f32.mrf.mxu0  ;;  %15708 = vmatmul.mubr.msk.bf16.gmra.mxu0 %vm2100_vm0, %v16846_v36 }
 0x2c3   :  { %v19358_v38 = vadd.f32 %v7048_v12, %v18974_v62  ;;  %15711 = vmatprep.mubr.msk.bf16.mxu0 %vm2100_vm0, %v16847_v26  ;;  %v3856_v62 = vadd.f32 %v18837_v48, %v18969_v57  ;;  %v5518_v21 = vmax.f32 %v3864_v11, 0.0  ;;  %v5517_v12 = vmax.f32 %v3859_v17, 0.0 }
 0x2c4   :  { %v16066_v32 = vpop.f32.mrf.mxu1  ;;  %v19361_v60 = vpop.f32.mrf.mxu0  ;;  %v3875_v17 = vadd.f32 %v18837_v48, %v19033_v28 }
 0x2c5   :  { %v19364_v3 = vadd.f32 %v16066_v32, %v18981_v7  ;;  %v16848_v7 = vld [vmem:[%s23704_s0 + $0x578] sm:$0xff]   ;;  %v5516_v31 = vmax.f32 %v3856_v62, 0.0 }
 0x2c6   :  { %v7051_v36 = vpop.f32.mrf.mxu1  ;;  %v19374_v26 = vpop.f32.mrf.mxu0 }
 0x2c7   :  { %v19380_v9 = vadd.f32 %v7051_v36, %v18998_v29  ;;  %v5985_v62 = vpack.c.bf16 %v5517_v12, %v5516_v31  ;;  %v5523_v31 = vmax.f32 %v3883_v61, 0.0  ;;  %v3899_v61 = vadd.f32 %v18837_v48, %v19140_v50 }
 0x2c8   :  { %v16069_v14 = vpop.f32.mrf.mxu1  ;;  %16172 = vmatmul.mubr.msk.bf16.gmra.mxu1 %vm6186_vm1, %v5983_v52  ;;  %v19386_v57 = vpop.f32.mrf.mxu0 }
 0x2c9   :  { %v19389_v39 = vadd.f32 %v16069_v14, %v19008_v6  ;;  %16175 = vmatprep.mubr.msk.bf16.mxu1 %vm6186_vm1, %v5984_v10  ;;  %v5986_v6 = vpack.c.bf16 %v5519_v0, %v5518_v21  ;;  %v3880_v10 = vadd.f32 %v18837_v48, %v19063_v8  ;;  %v16851_v8 = vld [vmem:[%s23704_s0 + $0x590] sm:$0xff]  }
 0x2ca   :  { %v7064_v29 = vpop.f32.mrf.mxu1  ;;  %v19392_v32 = vpop.f32.mrf.mxu0  ;;  %15712 = vmatmul.mubr.msk.bf16.gmra.mxu0 %vm2100_vm0, %v16848_v7 }
 0x2cb   :  { %v19396_v36 = vadd.f32 %v7064_v29, %v19016_v41  ;;  %15715 = vmatprep.mubr.msk.bf16.mxu0 %vm2100_vm0, %v16849_v37  ;;  %v3872_v41 = vadd.f32 %v18837_v48, %v19011_v58  ;;  %v5522_v28 = vmax.f32 %v3880_v10, 0.0  ;;  %v5521_v29 = vmax.f32 %v3875_v17, 0.0  ;;  %v23867_v17 = vld [vmem:[#allocation2_spill] sm:$0xff] }
 0x2cc   :  { %v16070_v52 = vpop.f32.mrf.mxu1  ;;  %v19399_v11 = vpop.f32.mrf.mxu0 }
 0x2cd   :  { %v19402_v14 = vadd.f32 %v16070_v52, %v19023_v43  ;;  %v16850_v43 = vld [vmem:[%s23704_s0 + $0x588] sm:$0xff]   ;;  %v5520_v12 = vmax.f32 %v3872_v41, 0.0 }
 0x2ce   :  { %v7067_v7 = vpop.f32.mrf.mxu1  ;;  %v19412_v37 = vpop.f32.mrf.mxu0 }
 0x2cf   :  { %v19418_v21 = vadd.f32 %v7067_v7, %v19040_v56  ;;  %v5987_v41 = vpack.c.bf16 %v5521_v29, %v5520_v12 }
 0x2d0   :  { %v16073_v20 = vpop.f32.mrf.mxu1  ;;  %16176 = vmatmul.mubr.msk.bf16.gmra.mxu1 %vm6186_vm1, %v5985_v62  ;;  %v19424_v58 = vpop.f32.mrf.mxu0 }
 0x2d1   :  { %v19427_v0 = vadd.f32 %v16073_v20, %v19050_v59  ;;  %16183 = vmatprep.mubr.msk.bf16.mxu1 %vm6186_vm1, %v5986_v6  ;;  %v5988_v59 = vpack.c.bf16 %v5523_v31, %v5522_v28  ;;  %v3896_v6 = vadd.f32 %v18837_v48, %v19114_v2  ;;  %v16843_v28 = vld [vmem:[%s23705_s3 + $0x70] sm:$0xff]   ;;  %v16852_v2 = vld [vmem:[%s23704_s0 + $0x598] sm:$0xff]  }
 0x2d2   :  { %v7080_v56 = vpop.f32.mrf.mxu1  ;;  %v19430_v52 = vpop.f32.mrf.mxu0  ;;  %15716 = vmatmul.mubr.msk.bf16.gmra.mxu0 %vm2100_vm0, %v16850_v43  ;;  %v3891_v43 = vadd.f32 %v18837_v48, %v23867_v17  ;;  %v23869_v31 = vld [vmem:[#allocation32_spill] sm:$0xff] }
 0x2d3   :  { %23866 = vst [vmem:[#allocation43_spill] sm:$0xff] %v19430_v52  ;;  %v19434_v7 = vadd.f32 %v7080_v56, %v19058_v15  ;;  %15719 = vmatprep.mubr.msk.bf16.mxu0 %vm2100_vm0, %v16851_v8  ;;  %v3888_v15 = vadd.f32 %v18837_v48, %v19053_v13  ;;  %v16854_v13 = vld [vmem:[%s23704_s0 + $0x5a0] sm:$0xff]   ;;  %v5526_v56 = vmax.f32 %v3896_v6, 0.0  ;;  %v19478_v6 = vld [vmem:[%s23705_s3 + $0x88] sm:$0xff]  }
 0x2d4   :  { %v16074_v62 = vpop.f32.mrf.mxu1  ;;  %v19437_v10 = vpop.f32.mrf.mxu0 }
 0x2d5   :  { %v19440_v20 = vadd.f32 %v16074_v62, %v19065_v4  ;;  %v23871_v62 = vld [vmem:[#allocation31_spill] sm:$0xff] }
 0x2d6   :  { %v7083_v8 = vpop.f32.mrf.mxu1  ;;  %v19453_v4 = vpop.f32.mrf.mxu0 }
 0x2d7   :  { %23868 = vst [vmem:[#allocation44_spill] sm:$0xff] %v19453_v4  ;;  %v19459_v50 = vadd.f32 %v7083_v8, %v23869_v31  ;;  %v5527_v4 = vmax.f32 %v3899_v61, 0.0  ;;  %v5524_v8 = vmax.f32 %v3888_v15, 0.0  ;;  %v5525_v31 = vmax.f32 %v3891_v43, 0.0  ;;  %v23876_v15 = vld [vmem:[#allocation34_spill] sm:$0xff] }
 0x2d8   :  { %v16077_v12 = vpop.f32.mrf.mxu1  ;;  %16184 = vmatmul.mubr.msk.bf16.vlgmr.msra.gmra.mxu1 %vm6186_vm1, %v5987_v41  ;;  %v19465_v29 = vpop.f32.mrf.mxu0  ;;  %v23874_v41 = vld [vmem:[#allocation3_spill] sm:$0xff] }
 0x2d9   :  { %23870 = vst [vmem:[#allocation15_spill] sm:$0xff] %v19459_v50  ;;  %v19468_v17 = vadd.f32 %v16077_v12, %v23871_v62  ;;  %16220 = vmatpush3.bf16.msra.mxu1 %v19105_v54  ;;  %16187 = vmatprep.mubr.msk.bf16.mxu1 %vm6186_vm1, %v5988_v59  ;;  %v5990_v61 = vpack.c.bf16 %v5527_v4, %v5526_v56  ;;  %v23880_v56 = vld [vmem:[#allocation5_spill] sm:$0xff] }
 0x2da   :  { %v7096_v50 = vpop.f32.mrf.mxu1  ;;  %16221 = vmatprep.subr.bf16.mxu1 %v16843_v28  ;;  %v19472_v52 = vpop.f32.mrf.mxu0  ;;  %15720 = vmatmul.mubr.msk.bf16.gmra.mxu0 %vm2100_vm0, %v16852_v2  ;;  %v3912_v2 = vadd.f32 %v18837_v48, %v19157_v49  ;;  %v3915_v62 = vadd.f32 %v18837_v48, %v19182_v27  ;;  %v16855_v49 = vld [vmem:[%s23704_s0 + $0x5a8] sm:$0xff]   ;;  %v16856_v27 = vld [vmem:[%s23704_s0 + $0x5b0] sm:$0xff]  }
 0x2db   :  { %23872 = vst [vmem:[#allocation45_spill] sm:$0xff] %v19468_v17  ;;  %23873 = vst [vmem:[#allocation16_spill] sm:$0xff] %v19472_v52  ;;  %v19481_v12 = vadd.f32 %v7096_v50, %v23874_v41  ;;  %15723 = vmatprep.mubr.msk.bf16.mxu0 %vm2100_vm0, %v16854_v13  ;;  %v5989_v52 = vpack.c.bf16 %v5525_v31, %v5524_v8  ;;  %v23877_v17 = vld [vmem:[#allocation33_spill] sm:$0xff]  ;;  %v23878_v41 = vld [vmem:[#allocation4_spill] sm:$0xff] }
 0x2dc   :  { %v16078_v54 = vpop.f32.mrf.mxu1  ;;  %v19484_v59 = vpop.f32.mrf.mxu0  ;;  %v3904_v50 = vadd.f32 %v18837_v48, %v23877_v17  ;;  %v3907_v13 = vadd.f32 %v18837_v48, %v23878_v41  ;;  %v5530_v8 = vmax.f32 %v3912_v2, 0.0 }
 0x2dd   :  { %23875 = vst [vmem:[#allocation17_spill] sm:$0xff] %v19481_v12  ;;  %v19487_v43 = vadd.f32 %v16078_v54, %v23876_v15  ;;  %16222 = vmatpush3.bf16.msra.mxu1 %v16843_v28  ;;  %v5531_v15 = vmax.f32 %v3915_v62, 0.0  ;;  %v19533_v62 = vld [vmem:[%s23706_s2] ss:$0 sm:$0xff] }
 0x2de   :  { %v7099_v12 = vpop.f32.mrf.mxu1  ;;  %16259 = vmatprep.subr.bf16.mxu1 %v19478_v6  ;;  %v19498_v4 = vpop.f32.mrf.mxu0  ;;  %v5528_v41 = vmax.f32 %v3904_v50, 0.0 }
 0x2df   :  { %23879 = vst [vmem:[#allocation47_spill] sm:$0xff] %v19498_v4  ;;  %v19504_v54 = vadd.f32 %v7099_v12, %v23880_v56  ;;  %v5529_v4 = vmax.f32 %v3907_v13, 0.0  ;;  %v23885_v13 = vld [vmem:[#allocation6_spill] sm:$0xff] }
 0x2e0   :  { %v16081_v28 = vpop.f32.mrf.mxu1  ;;  %16188 = vmatmul.mubr.msk.bf16.gmra.mxu1 %vm6186_vm1, %v5989_v52  ;;  %v19510_v17 = vpop.f32.mrf.mxu0 }
 0x2e1   :  { %23881 = vst [vmem:[#allocation18_spill] sm:$0xff] %v19504_v54  ;;  %v19513_v31 = vadd.f32 %v16081_v28, %v19144_v23  ;;  %16191 = vmatprep.mubr.msk.bf16.mxu1 %vm6186_vm1, %v5990_v61  ;;  %v5992_v23 = vpack.c.bf16 %v5531_v15, %v5530_v8  ;;  %v23884_v28 = vld [vmem:[#allocation36_spill] sm:$0xff]  ;;  %v3928_v61 = vadd.f32 %v18837_v48, %v19199_v5  ;;  %v16857_v48 = vld [vmem:[%s23704_s0 + $0x5b8] sm:$0xff]  }
 0x2e2   :  { %v7112_v12 = vpop.f32.mrf.mxu1  ;;  %v19516_v56 = vpop.f32.mrf.mxu0  ;;  %15724 = vmatmul.mubr.msk.bf16.gmra.mxu0 %vm2100_vm0, %v16855_v49  ;;  %v5991_v50 = vpack.c.bf16 %v5529_v4, %v5528_v41  ;;  %v3920_v49 = vadd.f32 %v19533_v62, %v23885_v13  ;;  %v23888_v5 = vld [vmem:[#allocation37_spill] sm:$0xff] }
 0x2e3   :  { %23882 = vst [vmem:[#allocation48_spill] sm:$0xff] %v19513_v31  ;;  %23883 = vst [vmem:[#allocation46_spill] sm:$0xff] %v19516_v56  ;;  %v19520_v54 = vadd.f32 %v7112_v12, %v19152_v24  ;;  %15727 = vmatprep.mubr.msk.bf16.mxu0 %vm2100_vm0, %v16856_v27  ;;  %v3931_v24 = vadd.f32 %v19533_v62, %v19224_v33  ;;  %v23886_v27 = vld [vmem:[#allocation35_spill] sm:$0xff]  ;;  %v16858_v33 = vld [vmem:[%s23704_s0 + $0x5c0] sm:$0xff]  }
 0x2e4   :  { %v16082_v52 = vpop.f32.mrf.mxu1  ;;  %v19523_v2 = vpop.f32.mrf.mxu0  ;;  %v3923_v8 = vadd.f32 %v19533_v62, %v23886_v27 }
 0x2e5   :  { %v19526_v31 = vadd.f32 %v16082_v52, %v23884_v28  ;;  %v5534_v28 = vmax.f32 %v3928_v61, 0.0  ;;  %v5535_v27 = vmax.f32 %v3931_v24, 0.0  ;;  %v3947_v24 = vadd.f32 %v19533_v62, %v19266_v42 }
 0x2e6   :  { %v7115_v15 = vpop.f32.mrf.mxu1  ;;  %v19541_v12 = vpop.f32.mrf.mxu0  ;;  %v5533_v56 = vmax.f32 %v3923_v8, 0.0  ;;  %v23893_v8 = vld [vmem:[#allocation7_spill] sm:$0xff] }
 0x2e7   :  { %23887 = vst [vmem:[#allocation49_spill] sm:$0xff] %v19541_v12  ;;  %v19547_v52 = vadd.f32 %v7115_v15, %v23888_v5  ;;  %v5532_v12 = vmax.f32 %v3920_v49, 0.0 }
 0x2e8   :  { %v16085_v4 = vpop.f32.mrf.mxu1  ;;  %16192 = vmatmul.mubr.msk.bf16.gmra.mxu1 %vm6186_vm1, %v5991_v50  ;;  %v19553_v41 = vpop.f32.mrf.mxu0 }
 0x2e9   :  { %23889 = vst [vmem:[#allocation19_spill] sm:$0xff] %v19547_v52  ;;  %v19556_v13 = vadd.f32 %v16085_v4, %v19186_v35  ;;  %16195 = vmatprep.mubr.msk.bf16.mxu1 %vm6186_vm1, %v5992_v23  ;;  %v5994_v35 = vpack.c.bf16 %v5535_v27, %v5534_v28  ;;  %v23892_v4 = vld [vmem:[#allocation8_spill] sm:$0xff]  ;;  %v3944_v23 = vadd.f32 %v19533_v62, %v19241_v19  ;;  %v16859_v28 = vld [vmem:[%s23704_s0 + $0x5c8] sm:$0xff]  }
 0x2ea   :  { %v7128_v15 = vpop.f32.mrf.mxu1  ;;  %v19559_v5 = vpop.f32.mrf.mxu0  ;;  %15728 = vmatmul.mubr.msk.bf16.gmra.mxu0 %vm2100_vm0, %v16857_v48  ;;  %v5993_v49 = vpack.c.bf16 %v5533_v56, %v5532_v12  ;;  %v23894_v48 = vld [vmem:[#allocation9_spill] sm:$0xff]  ;;  %v23896_v27 = vld [vmem:[#allocation39_spill] sm:$0xff]  ;;  %v16860_v19 = vld [vmem:[%s23704_s0 + $0x5d0] sm:$0xff]  }
 0x2eb   :  { %23890 = vst [vmem:[#allocation50_spill] sm:$0xff] %v19556_v13  ;;  %23891 = vst [vmem:[#allocation20_spill] sm:$0xff] %v19559_v5  ;;  %v19563_v52 = vadd.f32 %v7128_v15, %v19194_v55  ;;  %15731 = vmatprep.mubr.msk.bf16.mxu0 %vm2100_vm0, %v16858_v33  ;;  %v3936_v55 = vadd.f32 %v19533_v62, %v23893_v8  ;;  %v3939_v33 = vadd.f32 %v19533_v62, %v23894_v48 }
 0x2ec   :  { %v16086_v50 = vpop.f32.mrf.mxu1  ;;  %v19566_v61 = vpop.f32.mrf.mxu0  ;;  %v5538_v12 = vmax.f32 %v3944_v23, 0.0  ;;  %v5539_v8 = vmax.f32 %v3947_v24, 0.0  ;;  %v3963_v24 = vadd.f32 %v19533_v62, %v19308_v22 }
 0x2ed   :  { %v19569_v13 = vadd.f32 %v16086_v50, %v23892_v4  ;;  %v5536_v48 = vmax.f32 %v3936_v55, 0.0 }
 0x2ee   :  { %v7131_v15 = vpop.f32.mrf.mxu1  ;;  %v19579_v5 = vpop.f32.mrf.mxu0 }
 0x2ef   :  { %23895 = vst [vmem:[#allocation21_spill] sm:$0xff] %v19579_v5  ;;  %v19585_v50 = vadd.f32 %v7131_v15, %v23896_v27  ;;  %v5537_v5 = vmax.f32 %v3939_v33, 0.0  ;;  %v23902_v33 = vld [vmem:[#allocation10_spill] sm:$0xff] }
 0x2f0   :  { %v16089_v42 = vpop.f32.mrf.mxu1  ;;  %16196 = vmatmul.mubr.msk.bf16.gmra.mxu1 %vm6186_vm1, %v5993_v49  ;;  %v19591_v56 = vpop.f32.mrf.mxu0 }
 0x2f1   :  { %23897 = vst [vmem:[#allocation22_spill] sm:$0xff] %v19585_v50  ;;  %v19594_v4 = vadd.f32 %v16089_v42, %v19228_v25  ;;  %16199 = vmatprep.mubr.msk.bf16.mxu1 %vm6186_vm1, %v5994_v35  ;;  %v5996_v25 = vpack.c.bf16 %v5539_v8, %v5538_v12  ;;  %v23900_v42 = vld [vmem:[#allocation40_spill] sm:$0xff]  ;;  %v3960_v35 = vadd.f32 %v19533_v62, %v19283_v45  ;;  %v16861_v12 = vld [vmem:[%s23704_s0 + $0x5d8] sm:$0xff]   ;;  %v16862_v45 = vld [vmem:[%s23704_s0 + $0x5e0] sm:$0xff]  }
 0x2f2   :  { %v7144_v15 = vpop.f32.mrf.mxu1  ;;  %v19597_v27 = vpop.f32.mrf.mxu0  ;;  %15732 = vmatmul.mubr.msk.bf16.gmra.mxu0 %vm2100_vm0, %v16859_v28  ;;  %v5995_v55 = vpack.c.bf16 %v5537_v5, %v5536_v48  ;;  %v23903_v28 = vld [vmem:[#allocation38_spill] sm:$0xff]  ;;  %v23905_v8 = vld [vmem:[#allocation41_spill] sm:$0xff] }
 0x2f3   :  { %23898 = vst [vmem:[#allocation52_spill] sm:$0xff] %v19594_v4  ;;  %23899 = vst [vmem:[#allocation51_spill] sm:$0xff] %v19597_v27  ;;  %v19601_v50 = vadd.f32 %v7144_v15, %v19236_v16  ;;  %15735 = vmatprep.mubr.msk.bf16.mxu0 %vm2100_vm0, %v16860_v19  ;;  %v3952_v16 = vadd.f32 %v19533_v62, %v23902_v33  ;;  %v3955_v19 = vadd.f32 %v19533_v62, %v23903_v28 }
 0x2f4   :  { %v16090_v49 = vpop.f32.mrf.mxu1  ;;  %v19604_v23 = vpop.f32.mrf.mxu0  ;;  %v5542_v48 = vmax.f32 %v3960_v35, 0.0  ;;  %v5543_v33 = vmax.f32 %v3963_v24, 0.0  ;;  %v3979_v24 = vadd.f32 %v19533_v62, %v19348_v1 }
 0x2f5   :  { %v19607_v4 = vadd.f32 %v16090_v49, %v23900_v42  ;;  %v5540_v28 = vmax.f32 %v3952_v16, 0.0 }
 0x2f6   :  { %v7147_v15 = vpop.f32.mrf.mxu1  ;;  %v19617_v27 = vpop.f32.mrf.mxu0 }
 0x2f7   :  { %23901 = vst [vmem:[#allocation53_spill] sm:$0xff] %v19607_v4  ;;  %23904 = vst [vmem:[#allocation23_spill] sm:$0xff] %v19617_v27  ;;  %v19623_v49 = vadd.f32 %v7147_v15, %v23905_v8  ;;  %v5541_v27 = vmax.f32 %v3955_v19, 0.0  ;;  %v23911_v19 = vld [vmem:[#allocation11_spill] sm:$0xff] }
 0x2f8   :  { %v16093_v22 = vpop.f32.mrf.mxu1  ;;  %16200 = vmatmul.mubr.msk.bf16.gmra.mxu1 %vm6186_vm1, %v5995_v55  ;;  %v19629_v5 = vpop.f32.mrf.mxu0 }
 0x2f9   :  { %23906 = vst [vmem:[#allocation54_spill] sm:$0xff] %v19623_v49  ;;  %v19632_v42 = vadd.f32 %v16093_v22, %v19270_v40  ;;  %16203 = vmatprep.mubr.msk.bf16.mxu1 %vm6186_vm1, %v5996_v25  ;;  %v23909_v49 = vld [vmem:[#allocation42_spill] sm:$0xff]  ;;  %v5998_v40 = vpack.c.bf16 %v5543_v33, %v5542_v48  ;;  %v23910_v22 = vld [vmem:[#allocation12_spill] sm:$0xff]  ;;  %v3976_v25 = vadd.f32 %v19533_v62, %v19325_v47  ;;  %v16864_v48 = vld [vmem:[%s23704_s0 + $0x5e8] sm:$0xff]  }
 0x2fa   :  { %v7160_v15 = vpop.f32.mrf.mxu1  ;;  %v19635_v8 = vpop.f32.mrf.mxu0  ;;  %15736 = vmatmul.mubr.msk.bf16.gmra.mxu0 %vm2100_vm0, %v16861_v12  ;;  %v5997_v16 = vpack.c.bf16 %v5541_v27, %v5540_v28  ;;  %v3968_v12 = vadd.f32 %v19533_v62, %v23911_v19  ;;  %v23914_v33 = vld [vmem:[#allocation14_spill] sm:$0xff]  ;;  %v16865_v47 = vld [vmem:[%s23704_s0 + $0x5f0] sm:$0xff]   ;;  %v5547_v19 = vmax.f32 %v3979_v24, 0.0  ;;  %v3995_v24 = vadd.f32 %v19533_v62, %v19386_v57 }
 0x2fb   :  { %23907 = vst [vmem:[#allocation24_spill] sm:$0xff] %v19632_v42  ;;  %23908 = vst [vmem:[#allocation25_spill] sm:$0xff] %v19635_v8  ;;  %v19639_v4 = vadd.f32 %v7160_v15, %v23909_v49  ;;  %15739 = vmatprep.mubr.msk.bf16.mxu0 %vm2100_vm0, %v16862_v45  ;;  %v23912_v49 = vld [vmem:[#allocation13_spill] sm:$0xff]  ;;  %v5546_v28 = vmax.f32 %v3976_v25, 0.0 }
 0x2fc   :  { %v16094_v55 = vpop.f32.mrf.mxu1  ;;  %v19642_v35 = vpop.f32.mrf.mxu0  ;;  %v3971_v45 = vadd.f32 %v19533_v62, %v23912_v49  ;;  %v5544_v49 = vmax.f32 %v3968_v12, 0.0 }
 0x2fd   :  { %v19645_v42 = vadd.f32 %v16094_v55, %v23910_v22 }
 0x2fe   :  { %v7163_v15 = vpop.f32.mrf.mxu1  ;;  %v19655_v8 = vpop.f32.mrf.mxu0 }
 0x2ff   :  { %23913 = vst [vmem:[#allocation26_spill] sm:$0xff] %v19655_v8  ;;  %v19661_v55 = vadd.f32 %v7163_v15, %v23914_v33  ;;  %v5545_v8 = vmax.f32 %v3971_v45, 0.0  ;;  %v3987_v45 = vadd.f32 %v19533_v62, %v19337_v53 }
 0x300   :  { %v16097_v1 = vpop.f32.mrf.mxu1  ;;  %16204 = vmatmul.mubr.msk.bf16.gmra.mxu1 %vm6186_vm1, %v5997_v16  ;;  %v19667_v27 = vpop.f32.mrf.mxu0 }
 0x301   :  { %23915 = vst [vmem:[#allocation56_spill] sm:$0xff] %v19661_v55  ;;  %v19670_v22 = vadd.f32 %v16097_v1, %v19312_v34  ;;  %16207 = vmatprep.mubr.msk.bf16.mxu1 %vm6186_vm1, %v5998_v40  ;;  %v6000_v34 = vpack.c.bf16 %v5547_v19, %v5546_v28  ;;  %v3992_v40 = vadd.f32 %v19533_v62, %v19361_v60  ;;  %v16867_v60 = vld [vmem:[%s23704_s0 + $0x600] sm:$0xff]   ;;  %v5551_v19 = vmax.f32 %v3995_v24, 0.0 }
 0x302   :  { %v7176_v15 = vpop.f32.mrf.mxu1  ;;  %v19673_v33 = vpop.f32.mrf.mxu0  ;;  %15740 = vmatmul.mubr.msk.bf16.gmra.mxu0 %vm2100_vm0, %v16864_v48  ;;  %v5999_v12 = vpack.c.bf16 %v5545_v8, %v5544_v49  ;;  %v4011_v24 = vadd.f32 %v19533_v62, %v19424_v58 }
 0x303   :  { %v19677_v55 = vadd.f32 %v7176_v15, %v19320_v44  ;;  %15743 = vmatprep.mubr.msk.bf16.mxu0 %vm2100_vm0, %v16865_v47  ;;  %v3984_v44 = vadd.f32 %v19533_v62, %v19315_v46  ;;  %v5550_v53 = vmax.f32 %v3992_v40, 0.0  ;;  %v5549_v15 = vmax.f32 %v3987_v45, 0.0 }
 0x304   :  { %v16098_v16 = vpop.f32.mrf.mxu1  ;;  %v19680_v25 = vpop.f32.mrf.mxu0  ;;  %v4003_v45 = vadd.f32 %v19533_v62, %v19374_v26 }
 0x305   :  { %v19683_v1 = vadd.f32 %v16098_v16, %v19327_v18  ;;  %v16866_v18 = vld [vmem:[%s23704_s0 + $0x5f8] sm:$0xff]   ;;  %v5548_v49 = vmax.f32 %v3984_v44, 0.0 }
 0x306   :  { %v7179_v48 = vpop.f32.mrf.mxu1  ;;  %v19693_v47 = vpop.f32.mrf.mxu0 }
 0x307   :  { %v19699_v28 = vadd.f32 %v7179_v48, %v19342_v51  ;;  %v6001_v44 = vpack.c.bf16 %v5549_v15, %v5548_v49  ;;  %v5555_v49 = vmax.f32 %v4011_v24, 0.0  ;;  %v4027_v24 = vadd.f32 %v19533_v62, %v19465_v29 }
 0x308   :  { %v16105_v57 = vpop.f32.mrf.mxu1  ;;  %16208 = vmatmul.mubr.msk.bf16.gmra.mxu1 %vm6186_vm1, %v5999_v12  ;;  %v19705_v46 = vpop.f32.mrf.mxu0 }
 0x309   :  { %v19708_v8 = vadd.f32 %v16105_v57, %v19351_v63  ;;  %16211 = vmatprep.mubr.msk.bf16.mxu1 %vm6186_vm1, %v6000_v34  ;;  %v6002_v63 = vpack.c.bf16 %v5551_v19, %v5550_v53  ;;  %v4008_v34 = vadd.f32 %v19533_v62, %v19399_v11  ;;  %v16869_v11 = vld [vmem:[%s23704_s0 + $0x610] sm:$0xff]  }
 0x30a   :  { %v7331_v51 = vpop.f32.mrf.mxu1  ;;  %v19711_v16 = vpop.f32.mrf.mxu0  ;;  %15744 = vmatmul.mubr.msk.bf16.gmra.mxu0 %vm2100_vm0, %v16866_v18 }
 0x30b   :  { %v19715_v48 = vadd.f32 %v7331_v51, %v19358_v38  ;;  %15747 = vmatprep.mubr.msk.bf16.mxu0 %vm2100_vm0, %v16867_v60  ;;  %v4000_v38 = vadd.f32 %v19533_v62, %v19354_v30  ;;  %v5554_v26 = vmax.f32 %v4008_v34, 0.0  ;;  %v5553_v51 = vmax.f32 %v4003_v45, 0.0 }
 0x30c   :  { %v16106_v12 = vpop.f32.mrf.mxu1  ;;  %v19718_v40 = vpop.f32.mrf.mxu0  ;;  %v4019_v45 = vadd.f32 %v19533_v62, %v19412_v37 }
 0x30d   :  { %v19721_v57 = vadd.f32 %v16106_v12, %v19364_v3  ;;  %v16868_v3 = vld [vmem:[%s23704_s0 + $0x608] sm:$0xff]   ;;  %v5552_v15 = vmax.f32 %v4000_v38, 0.0 }
 0x30e   :  { %v7334_v18 = vpop.f32.mrf.mxu1  ;;  %v19731_v60 = vpop.f32.mrf.mxu0 }
 0x30f   :  { %v19737_v53 = vadd.f32 %v7334_v18, %v19380_v9  ;;  %v6003_v38 = vpack.c.bf16 %v5553_v51, %v5552_v15  ;;  %v5559_v15 = vmax.f32 %v4027_v24, 0.0  ;;  %v4043_v24 = vadd.f32 %v19533_v62, %v19510_v17 }
 0x310   :  { %v16109_v58 = vpop.f32.mrf.mxu1  ;;  %16212 = vmatmul.mubr.msk.bf16.gmra.mxu1 %vm6186_vm1, %v6001_v44  ;;  %v19743_v30 = vpop.f32.mrf.mxu0 }
 0x311   :  { %v19746_v19 = vadd.f32 %v16109_v58, %v19389_v39  ;;  %16215 = vmatprep.mubr.msk.bf16.mxu1 %vm6186_vm1, %v6002_v63  ;;  %v6004_v39 = vpack.c.bf16 %v5555_v49, %v5554_v26  ;;  %v4024_v63 = vadd.f32 %v19533_v62, %v19437_v10  ;;  %v16871_v10 = vld [vmem:[%s23704_s0 + $0x620] sm:$0xff]  }
 0x312   :  { %v7347_v9 = vpop.f32.mrf.mxu1  ;;  %v19749_v12 = vpop.f32.mrf.mxu0  ;;  %15748 = vmatmul.mubr.msk.bf16.gmra.mxu0 %vm2100_vm0, %v16868_v3 }
 0x313   :  { %v19753_v18 = vadd.f32 %v7347_v9, %v19396_v36  ;;  %15751 = vmatprep.mubr.msk.bf16.mxu0 %vm2100_vm0, %v16869_v11  ;;  %v4016_v36 = vadd.f32 %v19533_v62, %v19392_v32  ;;  %v5558_v37 = vmax.f32 %v4024_v63, 0.0  ;;  %v5557_v9 = vmax.f32 %v4019_v45, 0.0  ;;  %v23918_v45 = vld [vmem:[#allocation43_spill] sm:$0xff] }
 0x314   :  { %v16110_v44 = vpop.f32.mrf.mxu1  ;;  %v19756_v34 = vpop.f32.mrf.mxu0 }
 0x315   :  { %v19759_v58 = vadd.f32 %v16110_v44, %v19402_v14  ;;  %v16870_v14 = vld [vmem:[%s23704_s0 + $0x618] sm:$0xff]   ;;  %v5556_v51 = vmax.f32 %v4016_v36, 0.0 }
 0x316   :  { %v7350_v3 = vpop.f32.mrf.mxu1  ;;  %v19769_v11 = vpop.f32.mrf.mxu0 }
 0x317   :  { %v19775_v26 = vadd.f32 %v7350_v3, %v19418_v21  ;;  %v6005_v36 = vpack.c.bf16 %v5557_v9, %v5556_v51  ;;  %v16874_v51 = vld [vmem:[%s23704_s0 + $0x630] sm:$0xff]  }
 0x318   :  { %v16113_v29 = vpop.f32.mrf.mxu1  ;;  %16216 = vmatmul.mubr.msk.bf16.gmra.mxu1 %vm6186_vm1, %v6003_v38  ;;  %v19781_v32 = vpop.f32.mrf.mxu0 }
 0x319   :  { %v19784_v49 = vadd.f32 %v16113_v29, %v19427_v0  ;;  %16223 = vmatprep.mubr.msk.bf16.mxu1 %vm6186_vm1, %v6004_v39  ;;  %v6006_v0 = vpack.c.bf16 %v5559_v15, %v5558_v37  ;;  %v4040_v39 = vadd.f32 %v19533_v62, %v19484_v59  ;;  %v16863_v37 = vld [vmem:[%s23705_s3 + $0x80] sm:$0xff]   ;;  %v16872_v59 = vld [vmem:[%s23704_s0 + $0x628] sm:$0xff]  }
 0x31a   :  { %v7363_v21 = vpop.f32.mrf.mxu1  ;;  %v19787_v44 = vpop.f32.mrf.mxu0  ;;  %15752 = vmatmul.mubr.msk.bf16.gmra.mxu0 %vm2100_vm0, %v16870_v14  ;;  %v23919_v14 = vld [vmem:[#allocation44_spill] sm:$0xff]  ;;  %v23921_v15 = vld [vmem:[#allocation15_spill] sm:$0xff] }
 0x31b   :  { %23916 = vst [vmem:[#allocation55_spill] sm:$0xff] %v19787_v44  ;;  %v19791_v3 = vadd.f32 %v7363_v21, %v19434_v7  ;;  %15755 = vmatprep.mubr.msk.bf16.mxu0 %vm2100_vm0, %v16871_v10  ;;  %v4032_v7 = vadd.f32 %v19533_v62, %v23918_v45  ;;  %v4035_v10 = vadd.f32 %v19533_v62, %v23919_v14  ;;  %v5562_v45 = vmax.f32 %v4040_v39, 0.0  ;;  %v23923_v14 = vld [vmem:[#allocation45_spill] sm:$0xff] }
 0x31c   :  { %v16114_v38 = vpop.f32.mrf.mxu1  ;;  %v19794_v63 = vpop.f32.mrf.mxu0  ;;  %v19835_v39 = vld [vmem:[%s23705_s3 + $0x98] sm:$0xff]  }
 0x31d   :  { %v19797_v29 = vadd.f32 %v16114_v38, %v19440_v20 }
 0x31e   :  { %v7366_v21 = vpop.f32.mrf.mxu1  ;;  %v19810_v20 = vpop.f32.mrf.mxu0 }
 0x31f   :  { %23917 = vst [vmem:[#allocation57_spill] sm:$0xff] %v19797_v29  ;;  %23920 = vst [vmem:[#allocation27_spill] sm:$0xff] %v19810_v20  ;;  %v19816_v17 = vadd.f32 %v7366_v21, %v23921_v15  ;;  %v5563_v20 = vmax.f32 %v4043_v24, 0.0  ;;  %v5560_v21 = vmax.f32 %v4032_v7, 0.0  ;;  %v5561_v15 = vmax.f32 %v4035_v10, 0.0 }
 0x320   :  { %v16117_v9 = vpop.f32.mrf.mxu1  ;;  %16224 = vmatmul.mubr.msk.bf16.vlgmr.msra.gmra.mxu1 %vm6186_vm1, %v6005_v36  ;;  %v19822_v38 = vpop.f32.mrf.mxu0  ;;  %v23925_v36 = vld [vmem:[#allocation17_spill] sm:$0xff]  ;;  %v4056_v10 = vadd.f32 %v19533_v62, %v19523_v2  ;;  %v23931_v2 = vld [vmem:[#allocation18_spill] sm:$0xff] }
 0x321   :  { %23922 = vst [vmem:[#allocation58_spill] sm:$0xff] %v19816_v17  ;;  %v19825_v44 = vadd.f32 %v16117_v9, %v23923_v14  ;;  %16260 = vmatpush3.bf16.msra.mxu1 %v19478_v6  ;;  %16227 = vmatprep.mubr.msk.bf16.mxu1 %vm6186_vm1, %v6006_v0  ;;  %v6008_v24 = vpack.c.bf16 %v5563_v20, %v5562_v45 }
 0x322   :  { %v7379_v17 = vpop.f32.mrf.mxu1  ;;  %16261 = vmatprep.subr.bf16.mxu1 %v16863_v37  ;;  %v19829_v29 = vpop.f32.mrf.mxu0  ;;  %15756 = vmatmul.mubr.msk.bf16.gmra.mxu0 %vm2100_vm0, %v16872_v59  ;;  %v4059_v59 = vadd.f32 %v19533_v62, %v19553_v41  ;;  %v6007_v14 = vpack.c.bf16 %v5561_v15, %v5560_v21  ;;  %v16876_v41 = vld [vmem:[%s23704_s0 + $0x640] sm:$0xff]   ;;  %v5566_v21 = vmax.f32 %v4056_v10, 0.0  ;;  %v23933_v15 = vld [vmem:[#allocation48_spill] sm:$0xff] }
 0x323   :  { %23924 = vst [vmem:[#allocation28_spill] sm:$0xff] %v19829_v29  ;;  %v19838_v9 = vadd.f32 %v7379_v17, %v23925_v36  ;;  %15759 = vmatprep.mubr.msk.bf16.mxu0 %vm2100_vm0, %v16874_v51  ;;  %v23928_v29 = vld [vmem:[#allocation16_spill] sm:$0xff]  ;;  %v23929_v36 = vld [vmem:[#allocation47_spill] sm:$0xff] }
 0x324   :  { %v16118_v6 = vpop.f32.mrf.mxu1  ;;  %v19841_v0 = vpop.f32.mrf.mxu0  ;;  %v4048_v17 = vadd.f32 %v19533_v62, %v23928_v29  ;;  %v4051_v51 = vadd.f32 %v19533_v62, %v23929_v36  ;;  %v5567_v36 = vmax.f32 %v4059_v59, 0.0  ;;  %v4075_v59 = vadd.f32 %v19533_v62, %v19591_v56 }
 0x325   :  { %23926 = vst [vmem:[#allocation29_spill] sm:$0xff] %v19838_v9  ;;  %v19844_v7 = vadd.f32 %v16118_v6, %v19487_v43  ;;  %16262 = vmatpush3.bf16.msra.mxu1 %v16863_v37  ;;  %v16875_v43 = vld [vmem:[%s23704_s0 + $0x638] sm:$0xff]  }
 0x326   :  { %v7382_v9 = vpop.f32.mrf.mxu1  ;;  %16299 = vmatprep.subr.bf16.mxu1 %v19835_v39  ;;  %v19855_v20 = vpop.f32.mrf.mxu0 }
 0x327   :  { %23927 = vst [vmem:[#allocation60_spill] sm:$0xff] %v19844_v7  ;;  %23930 = vst [vmem:[#allocation30_spill] sm:$0xff] %v19855_v20  ;;  %v19861_v45 = vadd.f32 %v7382_v9, %v23931_v2  ;;  %v5564_v20 = vmax.f32 %v4048_v17, 0.0  ;;  %v5565_v7 = vmax.f32 %v4051_v51, 0.0  ;;  %v23936_v51 = vld [vmem:[#allocation46_spill] sm:$0xff] }
 0x328   :  { %v16121_v29 = vpop.f32.mrf.mxu1  ;;  %16228 = vmatmul.mubr.msk.bf16.gmra.mxu1 %vm6186_vm1, %v6007_v14  ;;  %v19867_v37 = vpop.f32.mrf.mxu0 }
 0x329   :  { %23932 = vst [vmem:[#allocation61_spill] sm:$0xff] %v19861_v45  ;;  %v19870_v6 = vadd.f32 %v16121_v29, %v23933_v15  ;;  %16231 = vmatprep.mubr.msk.bf16.mxu1 %vm6186_vm1, %v6008_v24  ;;  %v6010_v29 = vpack.c.bf16 %v5567_v36, %v5566_v21  ;;  %v4072_v24 = vadd.f32 %v19533_v62, %v19566_v61  ;;  %v23939_v21 = vld [vmem:[#allocation19_spill] sm:$0xff]  ;;  %v16878_v61 = vld [vmem:[%s23704_s0 + $0x650] sm:$0xff]  }
 0x32a   :  { %v7395_v9 = vpop.f32.mrf.mxu1  ;;  %v19873_v2 = vpop.f32.mrf.mxu0  ;;  %15760 = vmatmul.mubr.msk.bf16.gmra.mxu0 %vm2100_vm0, %v16875_v43  ;;  %v6009_v17 = vpack.c.bf16 %v5565_v7, %v5564_v20  ;;  %v23937_v43 = vld [vmem:[#allocation49_spill] sm:$0xff] }
 0x32b   :  { %23934 = vst [vmem:[#allocation59_spill] sm:$0xff] %v19873_v2  ;;  %v19877_v45 = vadd.f32 %v7395_v9, %v19520_v54  ;;  %15763 = vmatprep.mubr.msk.bf16.mxu0 %vm2100_vm0, %v16876_v41  ;;  %v4064_v54 = vadd.f32 %v19533_v62, %v23936_v51  ;;  %v4067_v41 = vadd.f32 %v19533_v62, %v23937_v43  ;;  %v5570_v20 = vmax.f32 %v4072_v24, 0.0 }
 0x32c   :  { %v16122_v14 = vpop.f32.mrf.mxu1  ;;  %v19880_v10 = vpop.f32.mrf.mxu0  ;;  %v5571_v43 = vmax.f32 %v4075_v59, 0.0  ;;  %v4091_v59 = vadd.f32 %v19533_v62, %v19629_v5 }
 0x32d   :  { %v19883_v15 = vadd.f32 %v16122_v14, %v19526_v31  ;;  %v16877_v31 = vld [vmem:[%s23704_s0 + $0x648] sm:$0xff]   ;;  %v23941_v14 = vld [vmem:[#allocation50_spill] sm:$0xff] }
 0x32e   :  { %v7398_v9 = vpop.f32.mrf.mxu1  ;;  %v19893_v2 = vpop.f32.mrf.mxu0 }
 0x32f   :  { %23935 = vst [vmem:[#allocation62_spill] sm:$0xff] %v19883_v15  ;;  %23938 = vst [vmem:[#allocation2_spill] sm:$0xff] %v19893_v2  ;;  %v19899_v36 = vadd.f32 %v7398_v9, %v23939_v21  ;;  %v5568_v2 = vmax.f32 %v4064_v54, 0.0  ;;  %v5569_v15 = vmax.f32 %v4067_v41, 0.0  ;;  %v23944_v41 = vld [vmem:[#allocation20_spill] sm:$0xff] }
 0x330   :  { %v16125_v56 = vpop.f32.mrf.mxu1  ;;  %16232 = vmatmul.mubr.msk.bf16.gmra.mxu1 %vm6186_vm1, %v6009_v17  ;;  %v19905_v7 = vpop.f32.mrf.mxu0 }
 0x331   :  { %23940 = vst [vmem:[#allocation32_spill] sm:$0xff] %v19899_v36  ;;  %v19908_v51 = vadd.f32 %v16125_v56, %v23941_v14  ;;  %16235 = vmatprep.mubr.msk.bf16.mxu1 %vm6186_vm1, %v6010_v29  ;;  %v6012_v56 = vpack.c.bf16 %v5571_v43, %v5570_v20  ;;  %v4088_v29 = vadd.f32 %v19533_v62, %v19604_v23  ;;  %v23947_v20 = vld [vmem:[#allocation22_spill] sm:$0xff] }
 0x332   :  { %v7411_v9 = vpop.f32.mrf.mxu1  ;;  %v19911_v21 = vpop.f32.mrf.mxu0  ;;  %15764 = vmatmul.mubr.msk.bf16.gmra.mxu0 %vm2100_vm0, %v16877_v31  ;;  %v6011_v54 = vpack.c.bf16 %v5569_v15, %v5568_v2  ;;  %v23945_v31 = vld [vmem:[#allocation21_spill] sm:$0xff]  ;;  %v16880_v23 = vld [vmem:[%s23704_s0 + $0x660] sm:$0xff]  }
 0x333   :  { %23942 = vst [vmem:[#allocation31_spill] sm:$0xff] %v19911_v21  ;;  %v19915_v36 = vadd.f32 %v7411_v9, %v19563_v52  ;;  %15767 = vmatprep.mubr.msk.bf16.mxu0 %vm2100_vm0, %v16878_v61  ;;  %v4080_v52 = vadd.f32 %v19533_v62, %v23944_v41  ;;  %v4083_v61 = vadd.f32 %v19533_v62, %v23945_v31  ;;  %v5574_v15 = vmax.f32 %v4088_v29, 0.0 }
 0x334   :  { %v16126_v17 = vpop.f32.mrf.mxu1  ;;  %v19918_v24 = vpop.f32.mrf.mxu0  ;;  %v5575_v31 = vmax.f32 %v4091_v59, 0.0  ;;  %v4107_v59 = vadd.f32 %v19533_v62, %v19667_v27 }
 0x335   :  { %v19921_v14 = vadd.f32 %v16126_v17, %v19569_v13  ;;  %v16879_v13 = vld [vmem:[%s23704_s0 + $0x658] sm:$0xff]   ;;  %v23949_v17 = vld [vmem:[#allocation52_spill] sm:$0xff] }
 0x336   :  { %v7414_v9 = vpop.f32.mrf.mxu1  ;;  %v19931_v21 = vpop.f32.mrf.mxu0 }
 0x337   :  { %23943 = vst [vmem:[#allocation3_spill] sm:$0xff] %v19921_v14  ;;  %23946 = vst [vmem:[#allocation34_spill] sm:$0xff] %v19931_v21  ;;  %v19937_v43 = vadd.f32 %v7414_v9, %v23947_v20  ;;  %v5572_v21 = vmax.f32 %v4080_v52, 0.0  ;;  %v5573_v14 = vmax.f32 %v4083_v61, 0.0  ;;  %v23954_v61 = vld [vmem:[#allocation51_spill] sm:$0xff] }
 0x338   :  { %v16129_v5 = vpop.f32.mrf.mxu1  ;;  %16236 = vmatmul.mubr.msk.bf16.gmra.mxu1 %vm6186_vm1, %v6011_v54  ;;  %v19943_v2 = vpop.f32.mrf.mxu0 }
 0x339   :  { %23948 = vst [vmem:[#allocation33_spill] sm:$0xff] %v19937_v43  ;;  %v19946_v41 = vadd.f32 %v16129_v5, %v23949_v17  ;;  %16239 = vmatprep.mubr.msk.bf16.mxu1 %vm6186_vm1, %v6012_v56  ;;  %v6014_v5 = vpack.c.bf16 %v5575_v31, %v5574_v15  ;;  %v23952_v17 = vld [vmem:[#allocation53_spill] sm:$0xff]  ;;  %v4104_v56 = vadd.f32 %v19533_v62, %v19642_v35  ;;  %v16881_v15 = vld [vmem:[%s23704_s0 + $0x668] sm:$0xff]   ;;  %v23957_v31 = vld [vmem:[#allocation54_spill] sm:$0xff] }
 0x33a   :  { %v7427_v9 = vpop.f32.mrf.mxu1  ;;  %v19949_v20 = vpop.f32.mrf.mxu0  ;;  %15768 = vmatmul.mubr.msk.bf16.gmra.mxu0 %vm2100_vm0, %v16879_v13  ;;  %v6013_v52 = vpack.c.bf16 %v5573_v14, %v5572_v21  ;;  %v23955_v13 = vld [vmem:[#allocation23_spill] sm:$0xff]  ;;  %v16882_v35 = vld [vmem:[%s23704_s0 + $0x670] sm:$0xff]  }
 0x33b   :  { %23950 = vst [vmem:[#allocation4_spill] sm:$0xff] %v19946_v41  ;;  %23951 = vst [vmem:[#allocation5_spill] sm:$0xff] %v19949_v20  ;;  %v19953_v43 = vadd.f32 %v7427_v9, %v19601_v50  ;;  %15771 = vmatprep.mubr.msk.bf16.mxu0 %vm2100_vm0, %v16880_v23  ;;  %v4096_v50 = vadd.f32 %v19533_v62, %v23954_v61  ;;  %v4099_v23 = vadd.f32 %v19533_v62, %v23955_v13 }
 0x33c   :  { %v16130_v54 = vpop.f32.mrf.mxu1  ;;  %v19956_v29 = vpop.f32.mrf.mxu0  ;;  %v5578_v14 = vmax.f32 %v4104_v56, 0.0  ;;  %v5579_v13 = vmax.f32 %v4107_v59, 0.0  ;;  %v4123_v59 = vadd.f32 %v19533_v62, %v19705_v46 }
 0x33d   :  { %v19959_v41 = vadd.f32 %v16130_v54, %v23952_v17  ;;  %v23959_v17 = vld [vmem:[#allocation24_spill] sm:$0xff] }
 0x33e   :  { %v7430_v9 = vpop.f32.mrf.mxu1  ;;  %v19969_v20 = vpop.f32.mrf.mxu0 }
 0x33f   :  { %23953 = vst [vmem:[#allocation36_spill] sm:$0xff] %v19959_v41  ;;  %23956 = vst [vmem:[#allocation6_spill] sm:$0xff] %v19969_v20  ;;  %v19975_v54 = vadd.f32 %v7430_v9, %v23957_v31  ;;  %v5576_v20 = vmax.f32 %v4096_v50, 0.0  ;;  %v5577_v41 = vmax.f32 %v4099_v23, 0.0  ;;  %v23961_v23 = vld [vmem:[#allocation25_spill] sm:$0xff] }
 0x340   :  { %v16133_v27 = vpop.f32.mrf.mxu1  ;;  %16240 = vmatmul.mubr.msk.bf16.gmra.mxu1 %vm6186_vm1, %v6013_v52  ;;  %v19981_v21 = vpop.f32.mrf.mxu0 }
 0x341   :  { %23958 = vst [vmem:[#allocation35_spill] sm:$0xff] %v19975_v54  ;;  %v19984_v61 = vadd.f32 %v16133_v27, %v23959_v17  ;;  %16243 = vmatprep.mubr.msk.bf16.mxu1 %vm6186_vm1, %v6014_v5  ;;  %v6016_v27 = vpack.c.bf16 %v5579_v13, %v5578_v14  ;;  %v4120_v5 = vadd.f32 %v19533_v62, %v19680_v25  ;;  %v23964_v14 = vld [vmem:[#allocation56_spill] sm:$0xff]  ;;  %v16885_v25 = vld [vmem:[%s23704_s0 + $0x680] sm:$0xff]  }
 0x342   :  { %v7443_v9 = vpop.f32.mrf.mxu1  ;;  %v19987_v31 = vpop.f32.mrf.mxu0  ;;  %15772 = vmatmul.mubr.msk.bf16.gmra.mxu0 %vm2100_vm0, %v16881_v15  ;;  %v6015_v50 = vpack.c.bf16 %v5577_v41, %v5576_v20  ;;  %v23962_v15 = vld [vmem:[#allocation26_spill] sm:$0xff] }
 0x343   :  { %23960 = vst [vmem:[#allocation37_spill] sm:$0xff] %v19987_v31  ;;  %v19991_v54 = vadd.f32 %v7443_v9, %v19639_v4  ;;  %15775 = vmatprep.mubr.msk.bf16.mxu0 %vm2100_vm0, %v16882_v35  ;;  %v4112_v4 = vadd.f32 %v19533_v62, %v23961_v23  ;;  %v4115_v35 = vadd.f32 %v19533_v62, %v23962_v15  ;;  %v5582_v20 = vmax.f32 %v4120_v5, 0.0 }
 0x344   :  { %v16134_v52 = vpop.f32.mrf.mxu1  ;;  %v19994_v56 = vpop.f32.mrf.mxu0  ;;  %v5583_v23 = vmax.f32 %v4123_v59, 0.0  ;;  %v4139_v59 = vadd.f32 %v19533_v62, %v19743_v30 }
 0x345   :  { %v19997_v17 = vadd.f32 %v16134_v52, %v19645_v42  ;;  %v16884_v42 = vld [vmem:[%s23704_s0 + $0x678] sm:$0xff]   ;;  %v5580_v15 = vmax.f32 %v4112_v4, 0.0 }
 0x346   :  { %v7446_v9 = vpop.f32.mrf.mxu1  ;;  %v20007_v31 = vpop.f32.mrf.mxu0 }
 0x347   :  { %23963 = vst [vmem:[#allocation8_spill] sm:$0xff] %v20007_v31  ;;  %v20013_v13 = vadd.f32 %v7446_v9, %v23964_v14  ;;  %v5581_v31 = vmax.f32 %v4115_v35, 0.0  ;;  %v4131_v35 = vadd.f32 %v19533_v62, %v19693_v47 }
 0x348   :  { %v16137_v46 = vpop.f32.mrf.mxu1  ;;  %16244 = vmatmul.mubr.msk.bf16.gmra.mxu1 %vm6186_vm1, %v6015_v50  ;;  %v20019_v41 = vpop.f32.mrf.mxu0 }
 0x349   :  { %23965 = vst [vmem:[#allocation7_spill] sm:$0xff] %v20013_v13  ;;  %v20022_v52 = vadd.f32 %v16137_v46, %v19670_v22  ;;  %16247 = vmatprep.mubr.msk.bf16.mxu1 %vm6186_vm1, %v6016_v27  ;;  %v6018_v22 = vpack.c.bf16 %v5583_v23, %v5582_v20  ;;  %v4136_v27 = vadd.f32 %v19533_v62, %v19718_v40  ;;  %v16887_v40 = vld [vmem:[%s23704_s0 + $0x690] sm:$0xff]   ;;  %v5587_v23 = vmax.f32 %v4139_v59, 0.0 }
 0x34a   :  { %v7459_v9 = vpop.f32.mrf.mxu1  ;;  %v20025_v14 = vpop.f32.mrf.mxu0  ;;  %15776 = vmatmul.mubr.msk.bf16.gmra.mxu0 %vm2100_vm0, %v16884_v42  ;;  %v6017_v4 = vpack.c.bf16 %v5581_v31, %v5580_v15  ;;  %v4155_v59 = vadd.f32 %v19533_v62, %v19781_v32 }
 0x34b   :  { %v20029_v13 = vadd.f32 %v7459_v9, %v19677_v55  ;;  %15779 = vmatprep.mubr.msk.bf16.mxu0 %vm2100_vm0, %v16885_v25  ;;  %v4128_v55 = vadd.f32 %v19533_v62, %v19673_v33  ;;  %v5586_v47 = vmax.f32 %v4136_v27, 0.0  ;;  %v5585_v9 = vmax.f32 %v4131_v35, 0.0 }
 0x34c   :  { %v16138_v50 = vpop.f32.mrf.mxu1  ;;  %v20032_v5 = vpop.f32.mrf.mxu0  ;;  %v4147_v35 = vadd.f32 %v19533_v62, %v19731_v60 }
 0x34d   :  { %v20035_v46 = vadd.f32 %v16138_v50, %v19683_v1  ;;  %v16886_v1 = vld [vmem:[%s23704_s0 + $0x688] sm:$0xff]   ;;  %v5584_v15 = vmax.f32 %v4128_v55, 0.0 }
 0x34e   :  { %v7462_v42 = vpop.f32.mrf.mxu1  ;;  %v20045_v25 = vpop.f32.mrf.mxu0 }
 0x34f   :  { %v20051_v20 = vadd.f32 %v7462_v42, %v19699_v28  ;;  %v6019_v55 = vpack.c.bf16 %v5585_v9, %v5584_v15  ;;  %v5591_v15 = vmax.f32 %v4155_v59, 0.0  ;;  %v4171_v59 = vadd.f32 %v19533_v62, %v19822_v38 }
 0x350   :  { %v16145_v30 = vpop.f32.mrf.mxu1  ;;  %16248 = vmatmul.mubr.msk.bf16.gmra.mxu1 %vm6186_vm1, %v6017_v4  ;;  %v20057_v33 = vpop.f32.mrf.mxu0 }
 0x351   :  { %v20060_v31 = vadd.f32 %v16145_v30, %v19708_v8  ;;  %16251 = vmatprep.mubr.msk.bf16.mxu1 %vm6186_vm1, %v6018_v22  ;;  %v6020_v8 = vpack.c.bf16 %v5587_v23, %v5586_v47  ;;  %v4152_v22 = vadd.f32 %v19533_v62, %v19756_v34  ;;  %v16889_v34 = vld [vmem:[%s23704_s0 + $0x6a0] sm:$0xff]  }
 0x352   :  { %v7614_v28 = vpop.f32.mrf.mxu1  ;;  %v20063_v50 = vpop.f32.mrf.mxu0  ;;  %15780 = vmatmul.mubr.msk.bf16.gmra.mxu0 %vm2100_vm0, %v16886_v1 }
 0x353   :  { %v20067_v42 = vadd.f32 %v7614_v28, %v19715_v48  ;;  %15783 = vmatprep.mubr.msk.bf16.mxu0 %vm2100_vm0, %v16887_v40  ;;  %v4144_v48 = vadd.f32 %v19533_v62, %v19711_v16  ;;  %v5590_v60 = vmax.f32 %v4152_v22, 0.0  ;;  %v5589_v28 = vmax.f32 %v4147_v35, 0.0 }
 0x354   :  { %v16146_v4 = vpop.f32.mrf.mxu1  ;;  %v20070_v27 = vpop.f32.mrf.mxu0  ;;  %v4163_v35 = vadd.f32 %v19533_v62, %v19769_v11 }
 0x355   :  { %v20073_v30 = vadd.f32 %v16146_v4, %v19721_v57  ;;  %v16888_v57 = vld [vmem:[%s23704_s0 + $0x698] sm:$0xff]   ;;  %v5588_v9 = vmax.f32 %v4144_v48, 0.0 }
 0x356   :  { %v7617_v1 = vpop.f32.mrf.mxu1  ;;  %v20083_v40 = vpop.f32.mrf.mxu0 }
 0x357   :  { %v20089_v47 = vadd.f32 %v7617_v1, %v19737_v53  ;;  %v6021_v48 = vpack.c.bf16 %v5589_v28, %v5588_v9  ;;  %v5595_v9 = vmax.f32 %v4171_v59, 0.0  ;;  %v4187_v59 = vadd.f32 %v19533_v62, %v19867_v37 }
 0x358   :  { %v16149_v32 = vpop.f32.mrf.mxu1  ;;  %16252 = vmatmul.mubr.msk.bf16.gmra.mxu1 %vm6186_vm1, %v6019_v55  ;;  %v20095_v16 = vpop.f32.mrf.mxu0 }
 0x359   :  { %v20098_v23 = vadd.f32 %v16149_v32, %v19746_v19  ;;  %16255 = vmatprep.mubr.msk.bf16.mxu1 %vm6186_vm1, %v6020_v8  ;;  %v6022_v19 = vpack.c.bf16 %v5591_v15, %v5590_v60  ;;  %v4168_v8 = vadd.f32 %v19533_v62, %v19794_v63  ;;  %v16891_v63 = vld [vmem:[%s23704_s0 + $0x6b0] sm:$0xff]  }
 0x35a   :  { %v7630_v53 = vpop.f32.mrf.mxu1  ;;  %v20101_v4 = vpop.f32.mrf.mxu0  ;;  %15784 = vmatmul.mubr.msk.bf16.gmra.mxu0 %vm2100_vm0, %v16888_v57 }
 0x35b   :  { %v20105_v1 = vadd.f32 %v7630_v53, %v19753_v18  ;;  %15787 = vmatprep.mubr.msk.bf16.mxu0 %vm2100_vm0, %v16889_v34  ;;  %v4160_v18 = vadd.f32 %v19533_v62, %v19749_v12  ;;  %v5594_v11 = vmax.f32 %v4168_v8, 0.0  ;;  %v5593_v53 = vmax.f32 %v4163_v35, 0.0  ;;  %v23969_v35 = vld [vmem:[#allocation55_spill] sm:$0xff] }
 0x35c   :  { %v16150_v55 = vpop.f32.mrf.mxu1  ;;  %v20108_v22 = vpop.f32.mrf.mxu0 }
 0x35d   :  { %v20111_v32 = vadd.f32 %v16150_v55, %v19759_v58  ;;  %v16890_v58 = vld [vmem:[%s23704_s0 + $0x6a8] sm:$0xff]   ;;  %v5592_v28 = vmax.f32 %v4160_v18, 0.0 }
 0x35e   :  { %v7633_v57 = vpop.f32.mrf.mxu1  ;;  %v20121_v34 = vpop.f32.mrf.mxu0 }
 0x35f   :  { %v20127_v60 = vadd.f32 %v7633_v57, %v19775_v26  ;;  %v6023_v18 = vpack.c.bf16 %v5593_v53, %v5592_v28  ;;  %v16894_v28 = vld [vmem:[%s23704_s0 + $0x6c0] sm:$0xff]  }
 0x360   :  { %v16153_v38 = vpop.f32.mrf.mxu1  ;;  %16256 = vmatmul.mubr.msk.bf16.gmra.mxu1 %vm6186_vm1, %v6021_v48  ;;  %v20133_v12 = vpop.f32.mrf.mxu0 }
 0x361   :  { %v20136_v15 = vadd.f32 %v16153_v38, %v19784_v49  ;;  %16263 = vmatprep.mubr.msk.bf16.mxu1 %vm6186_vm1, %v6022_v19  ;;  %v6024_v49 = vpack.c.bf16 %v5595_v9, %v5594_v11  ;;  %v23968_v38 = vld [vmem:[#allocation57_spill] sm:$0xff]  ;;  %v4184_v19 = vadd.f32 %v19533_v62, %v19841_v0  ;;  %v16883_v11 = vld [vmem:[%s23705_s3 + $0x90] sm:$0xff]  }
 0x362   :  { %v7646_v26 = vpop.f32.mrf.mxu1  ;;  %v20139_v55 = vpop.f32.mrf.mxu0  ;;  %15788 = vmatmul.mubr.msk.bf16.gmra.mxu0 %vm2100_vm0, %v16890_v58  ;;  %v23970_v58 = vld [vmem:[#allocation27_spill] sm:$0xff]  ;;  %v16892_v0 = vld [vmem:[%s23704_s0 + $0x6b8] sm:$0xff]  }
 0x363   :  { %23966 = vst [vmem:[#allocation9_spill] sm:$0xff] %v20136_v15  ;;  %23967 = vst [vmem:[#allocation39_spill] sm:$0xff] %v20139_v55  ;;  %v20143_v57 = vadd.f32 %v7646_v26, %v19791_v3  ;;  %15791 = vmatprep.mubr.msk.bf16.mxu0 %vm2100_vm0, %v16891_v63  ;;  %v4176_v3 = vadd.f32 %v19533_v62, %v23969_v35  ;;  %v4179_v63 = vadd.f32 %v19533_v62, %v23970_v58 }
 0x364   :  { %v16154_v48 = vpop.f32.mrf.mxu1  ;;  %v20146_v8 = vpop.f32.mrf.mxu0  ;;  %v5598_v35 = vmax.f32 %v4184_v19, 0.0  ;;  %v20187_v19 = vld [vmem:[%s23705_s3 + $0xa8] sm:$0xff]  }
 0x365   :  { %v20149_v15 = vadd.f32 %v16154_v48, %v23968_v38  ;;  %v23972_v48 = vld [vmem:[#allocation58_spill] sm:$0xff] }
 0x366   :  { %v7649_v26 = vpop.f32.mrf.mxu1  ;;  %v20162_v9 = vpop.f32.mrf.mxu0 }
 0x367   :  { %23971 = vst [vmem:[#allocation40_spill] sm:$0xff] %v20162_v9  ;;  %v20168_v37 = vadd.f32 %v7649_v26, %v23972_v48  ;;  %v5599_v9 = vmax.f32 %v4187_v59, 0.0  ;;  %v5596_v26 = vmax.f32 %v4176_v3, 0.0  ;;  %v5597_v48 = vmax.f32 %v4179_v63, 0.0  ;;  %v23978_v3 = vld [vmem:[#allocation60_spill] sm:$0xff] }
 0x368   :  { %v16157_v53 = vpop.f32.mrf.mxu1  ;;  %16264 = vmatmul.mubr.msk.bf16.vlgmr.msra.gmra.mxu1 %vm6186_vm1, %v6023_v18  ;;  %v20174_v38 = vpop.f32.mrf.mxu0 }
 0x369   :  { %23973 = vst [vmem:[#allocation10_spill] sm:$0xff] %v20168_v37  ;;  %v20177_v58 = vadd.f32 %v16157_v53, %v19825_v44  ;;  %16300 = vmatpush3.bf16.msra.mxu1 %v19835_v39  ;;  %16267 = vmatprep.mubr.msk.bf16.mxu1 %vm6186_vm1, %v6024_v49  ;;  %v23976_v44 = vld [vmem:[#allocation29_spill] sm:$0xff]  ;;  %v6026_v59 = vpack.c.bf16 %v5599_v9, %v5598_v35 }
 0x36a   :  { %v7662_v37 = vpop.f32.mrf.mxu1  ;;  %16301 = vmatprep.subr.bf16.mxu1 %v16883_v11  ;;  %v20181_v55 = vpop.f32.mrf.mxu0  ;;  %15792 = vmatmul.mubr.msk.bf16.gmra.mxu0 %vm2100_vm0, %v16892_v0  ;;  %v4200_v0 = vadd.f32 %v19533_v62, %v19880_v10  ;;  %v4203_v53 = vadd.f32 %v19533_v62, %v19905_v7  ;;  %v16895_v10 = vld [vmem:[%s23704_s0 + $0x6c8] sm:$0xff]   ;;  %v23981_v35 = vld [vmem:[#allocation61_spill] sm:$0xff]  ;;  %v16896_v7 = vld [vmem:[%s23704_s0 + $0x6d0] sm:$0xff]  }
 0x36b   :  { %23974 = vst [vmem:[#allocation38_spill] sm:$0xff] %v20177_v58  ;;  %23975 = vst [vmem:[#allocation41_spill] sm:$0xff] %v20181_v55  ;;  %v20190_v18 = vadd.f32 %v7662_v37, %v23976_v44  ;;  %15795 = vmatprep.mubr.msk.bf16.mxu0 %vm2100_vm0, %v16894_v28  ;;  %v6025_v55 = vpack.c.bf16 %v5597_v48, %v5596_v26  ;;  %v23979_v58 = vld [vmem:[#allocation28_spill] sm:$0xff]  ;;  %v23980_v44 = vld [vmem:[#allocation30_spill] sm:$0xff] }
 0x36c   :  { %v16158_v39 = vpop.f32.mrf.mxu1  ;;  %v20193_v49 = vpop.f32.mrf.mxu0  ;;  %v4192_v37 = vadd.f32 %v19533_v62, %v23979_v58  ;;  %v4195_v28 = vadd.f32 %v19533_v62, %v23980_v44  ;;  %v5602_v58 = vmax.f32 %v4200_v0, 0.0  ;;  %v5603_v48 = vmax.f32 %v4203_v53, 0.0 }
 0x36d   :  { %23977 = vst [vmem:[#allocation42_spill] sm:$0xff] %v20190_v18  ;;  %v20196_v63 = vadd.f32 %v16158_v39, %v23978_v3  ;;  %16302 = vmatpush3.bf16.msra.mxu1 %v16883_v11 }
 0x36e   :  { %v7665_v18 = vpop.f32.mrf.mxu1  ;;  %16339 = vmatprep.subr.bf16.mxu1 %v20187_v19  ;;  %v20207_v9 = vpop.f32.mrf.mxu0  ;;  %v5600_v3 = vmax.f32 %v4192_v37, 0.0  ;;  %v5601_v44 = vmax.f32 %v4195_v28, 0.0  ;;  %v23987_v28 = vld [vmem:[#allocation59_spill] sm:$0xff] }
 0x36f   :  { %v20213_v39 = vadd.f32 %v7665_v18, %v23981_v35 }
 0x370   :  { %v16161_v11 = vpop.f32.mrf.mxu1  ;;  %16268 = vmatmul.mubr.msk.bf16.gmra.mxu1 %vm6186_vm1, %v6025_v55  ;;  %v20219_v62 = vpop.f32.mrf.mxu0  ;;  %v6027_v37 = vpack.c.bf16 %v5601_v44, %v5600_v3 }
 0x371   :  { %23982 = vst [vmem:[#allocation12_spill] sm:$0xff] %v20213_v39  ;;  %v20222_v26 = vadd.f32 %v16161_v11, %v19870_v6  ;;  %16271 = vmatprep.mubr.msk.bf16.mxu1 %vm6186_vm1, %v6026_v59  ;;  %v6028_v6 = vpack.c.bf16 %v5603_v48, %v5602_v58  ;;  %v23985_v11 = vld [vmem:[#allocation62_spill] sm:$0xff] }
 0x372   :  { %v7678_v18 = vpop.f32.mrf.mxu1  ;;  %v20225_v35 = vpop.f32.mrf.mxu0  ;;  %15796 = vmatmul.mubr.msk.bf16.gmra.mxu0 %vm2100_vm0, %v16895_v10  ;;  %v20240_v59 = vld [vmem:[%s23706_s2] ss:$0 sm:$0xff] }
 0x373   :  { %23983 = vst [vmem:[#allocation11_spill] sm:$0xff] %v20222_v26  ;;  %23984 = vst [vmem:[#allocation13_spill] sm:$0xff] %v20225_v35  ;;  %v20229_v39 = vadd.f32 %v7678_v18, %v19877_v45  ;;  %15799 = vmatprep.mubr.msk.bf16.mxu0 %vm2100_vm0, %v16896_v7  ;;  %v4216_v53 = vadd.f32 %v20240_v59, %v19918_v24  ;;  %v4219_v45 = vadd.f32 %v20240_v59, %v19943_v2  ;;  %v23988_v7 = vld [vmem:[#allocation2_spill] sm:$0xff] }
 0x374   :  { %v16162_v55 = vpop.f32.mrf.mxu1  ;;  %v20232_v0 = vpop.f32.mrf.mxu0  ;;  %v4208_v10 = vadd.f32 %v20240_v59, %v23987_v28  ;;  %v4211_v58 = vadd.f32 %v20240_v59, %v23988_v7  ;;  %v16898_v24 = vld [vmem:[%s23704_s0 + $0x6e0] sm:$0xff]  }
 0x375   :  { %v20235_v26 = vadd.f32 %v16162_v55, %v23985_v11  ;;  %v16897_v55 = vld [vmem:[%s23704_s0 + $0x6d8] sm:$0xff]   ;;  %v23990_v11 = vld [vmem:[#allocation32_spill] sm:$0xff]  ;;  %v5606_v44 = vmax.f32 %v4216_v53, 0.0  ;;  %v5607_v7 = vmax.f32 %v4219_v45, 0.0  ;;  %v4235_v45 = vadd.f32 %v20240_v59, %v19981_v21 }
 0x376   :  { %v7681_v48 = vpop.f32.mrf.mxu1  ;;  %v20250_v18 = vpop.f32.mrf.mxu0 }
 0x377   :  { %23986 = vst [vmem:[#allocation14_spill] sm:$0xff] %v20235_v26  ;;  %23989 = vst [vmem:[#allocation43_spill] sm:$0xff] %v20250_v18  ;;  %v20256_v35 = vadd.f32 %v7681_v48, %v23990_v11  ;;  %v5604_v18 = vmax.f32 %v4208_v10, 0.0  ;;  %v5605_v26 = vmax.f32 %v4211_v58, 0.0  ;;  %v23996_v58 = vld [vmem:[#allocation31_spill] sm:$0xff] }
 0x378   :  { %v16165_v2 = vpop.f32.mrf.mxu1  ;;  %16272 = vmatmul.mubr.msk.bf16.gmra.mxu1 %vm6186_vm1, %v6027_v37  ;;  %v20262_v3 = vpop.f32.mrf.mxu0 }
 0x379   :  { %23991 = vst [vmem:[#allocation44_spill] sm:$0xff] %v20256_v35  ;;  %v20265_v28 = vadd.f32 %v16165_v2, %v19908_v51  ;;  %16275 = vmatprep.mubr.msk.bf16.mxu1 %vm6186_vm1, %v6028_v6  ;;  %v6030_v51 = vpack.c.bf16 %v5607_v7, %v5606_v44  ;;  %v23994_v2 = vld [vmem:[#allocation3_spill] sm:$0xff]  ;;  %v4232_v6 = vadd.f32 %v20240_v59, %v19956_v29  ;;  %v23999_v7 = vld [vmem:[#allocation33_spill] sm:$0xff]  ;;  %v16900_v29 = vld [vmem:[%s23704_s0 + $0x6f0] sm:$0xff]  }
 0x37a   :  { %v7694_v48 = vpop.f32.mrf.mxu1  ;;  %v20268_v11 = vpop.f32.mrf.mxu0  ;;  %15800 = vmatmul.mubr.msk.bf16.gmra.mxu0 %vm2100_vm0, %v16897_v55  ;;  %v6029_v10 = vpack.c.bf16 %v5605_v26, %v5604_v18  ;;  %v23997_v55 = vld [vmem:[#allocation34_spill] sm:$0xff]  ;;  %v16899_v44 = vld [vmem:[%s23704_s0 + $0x6e8] sm:$0xff]  }
 0x37b   :  { %23992 = vst [vmem:[#allocation15_spill] sm:$0xff] %v20265_v28  ;;  %23993 = vst [vmem:[#allocation45_spill] sm:$0xff] %v20268_v11  ;;  %v20272_v35 = vadd.f32 %v7694_v48, %v19915_v36  ;;  %15803 = vmatprep.mubr.msk.bf16.mxu0 %vm2100_vm0, %v16898_v24  ;;  %v4224_v36 = vadd.f32 %v20240_v59, %v23996_v58  ;;  %v4227_v24 = vadd.f32 %v20240_v59, %v23997_v55 }
 0x37c   :  { %v16166_v37 = vpop.f32.mrf.mxu1  ;;  %v20275_v53 = vpop.f32.mrf.mxu0  ;;  %v5610_v18 = vmax.f32 %v4232_v6, 0.0  ;;  %v5611_v55 = vmax.f32 %v4235_v45, 0.0  ;;  %v4251_v45 = vadd.f32 %v20240_v59, %v20019_v41 }
 0x37d   :  { %v20278_v28 = vadd.f32 %v16166_v37, %v23994_v2  ;;  %v24001_v2 = vld [vmem:[#allocation4_spill] sm:$0xff] }
 0x37e   :  { %v7697_v48 = vpop.f32.mrf.mxu1  ;;  %v20288_v11 = vpop.f32.mrf.mxu0 }
 0x37f   :  { %23995 = vst [vmem:[#allocation17_spill] sm:$0xff] %v20278_v28  ;;  %23998 = vst [vmem:[#allocation16_spill] sm:$0xff] %v20288_v11  ;;  %v20294_v37 = vadd.f32 %v7697_v48, %v23999_v7  ;;  %v5608_v11 = vmax.f32 %v4224_v36, 0.0  ;;  %v5609_v28 = vmax.f32 %v4227_v24, 0.0  ;;  %v24005_v24 = vld [vmem:[#allocation5_spill] sm:$0xff] }
 0x380   :  { %v16169_v21 = vpop.f32.mrf.mxu1  ;;  %16276 = vmatmul.mubr.msk.bf16.gmra.mxu1 %vm6186_vm1, %v6029_v10  ;;  %v20300_v26 = vpop.f32.mrf.mxu0 }
 0x381   :  { %24000 = vst [vmem:[#allocation47_spill] sm:$0xff] %v20294_v37  ;;  %v20303_v58 = vadd.f32 %v16169_v21, %v24001_v2  ;;  %16279 = vmatprep.mubr.msk.bf16.mxu1 %vm6186_vm1, %v6030_v51  ;;  %v6032_v21 = vpack.c.bf16 %v5611_v55, %v5610_v18  ;;  %v24004_v2 = vld [vmem:[#allocation36_spill] sm:$0xff]  ;;  %v4248_v51 = vadd.f32 %v20240_v59, %v19994_v56  ;;  %v16901_v18 = vld [vmem:[%s23704_s0 + $0x6f8] sm:$0xff]   ;;  %v24008_v55 = vld [vmem:[#allocation35_spill] sm:$0xff] }
 0x382   :  { %v7710_v48 = vpop.f32.mrf.mxu1  ;;  %v20306_v7 = vpop.f32.mrf.mxu0  ;;  %15804 = vmatmul.mubr.msk.bf16.gmra.mxu0 %vm2100_vm0, %v16899_v44  ;;  %v6031_v36 = vpack.c.bf16 %v5609_v28, %v5608_v11  ;;  %v24006_v44 = vld [vmem:[#allocation6_spill] sm:$0xff] }
 0x383   :  { %24002 = vst [vmem:[#allocation18_spill] sm:$0xff] %v20303_v58  ;;  %24003 = vst [vmem:[#allocation48_spill] sm:$0xff] %v20306_v7  ;;  %v20310_v37 = vadd.f32 %v7710_v48, %v19953_v43  ;;  %15807 = vmatprep.mubr.msk.bf16.mxu0 %vm2100_vm0, %v16900_v29  ;;  %v4240_v43 = vadd.f32 %v20240_v59, %v24005_v24  ;;  %v4243_v29 = vadd.f32 %v20240_v59, %v24006_v44  ;;  %v16902_v56 = vld [vmem:[%s23704_s0 + $0x700] sm:$0xff]  }
 0x384   :  { %v16170_v10 = vpop.f32.mrf.mxu1  ;;  %v20313_v6 = vpop.f32.mrf.mxu0  ;;  %v5614_v11 = vmax.f32 %v4248_v51, 0.0  ;;  %v5615_v24 = vmax.f32 %v4251_v45, 0.0  ;;  %v4267_v45 = vadd.f32 %v20240_v59, %v20057_v33 }
 0x385   :  { %v20316_v58 = vadd.f32 %v16170_v10, %v24004_v2  ;;  %v5612_v44 = vmax.f32 %v4240_v43, 0.0 }
 0x386   :  { %v7713_v48 = vpop.f32.mrf.mxu1  ;;  %v20326_v7 = vpop.f32.mrf.mxu0 }
 0x387   :  { %24007 = vst [vmem:[#allocation46_spill] sm:$0xff] %v20326_v7  ;;  %v20332_v10 = vadd.f32 %v7713_v48, %v24008_v55  ;;  %v5613_v7 = vmax.f32 %v4243_v29, 0.0  ;;  %v24011_v29 = vld [vmem:[#allocation37_spill] sm:$0xff] }
 0x388   :  { %v16173_v41 = vpop.f32.mrf.mxu1  ;;  %16280 = vmatmul.mubr.msk.bf16.gmra.mxu1 %vm6186_vm1, %v6031_v36  ;;  %v20338_v28 = vpop.f32.mrf.mxu0 }
 0x389   :  { %24009 = vst [vmem:[#allocation49_spill] sm:$0xff] %v20332_v10  ;;  %v20341_v2 = vadd.f32 %v16173_v41, %v19984_v61  ;;  %16283 = vmatprep.mubr.msk.bf16.mxu1 %vm6186_vm1, %v6032_v21  ;;  %v6034_v61 = vpack.c.bf16 %v5615_v24, %v5614_v11  ;;  %v4264_v21 = vadd.f32 %v20240_v59, %v20032_v5  ;;  %v24014_v11 = vld [vmem:[#allocation7_spill] sm:$0xff]  ;;  %v16905_v5 = vld [vmem:[%s23704_s0 + $0x710] sm:$0xff]  }
 0x38a   :  { %v7726_v48 = vpop.f32.mrf.mxu1  ;;  %v20344_v55 = vpop.f32.mrf.mxu0  ;;  %15808 = vmatmul.mubr.msk.bf16.gmra.mxu0 %vm2100_vm0, %v16901_v18  ;;  %v6033_v43 = vpack.c.bf16 %v5613_v7, %v5612_v44  ;;  %v24012_v18 = vld [vmem:[#allocation8_spill] sm:$0xff] }
 0x38b   :  { %24010 = vst [vmem:[#allocation19_spill] sm:$0xff] %v20344_v55  ;;  %v20348_v10 = vadd.f32 %v7726_v48, %v19991_v54  ;;  %15811 = vmatprep.mubr.msk.bf16.mxu0 %vm2100_vm0, %v16902_v56  ;;  %v4256_v54 = vadd.f32 %v20240_v59, %v24011_v29  ;;  %v4259_v56 = vadd.f32 %v20240_v59, %v24012_v18  ;;  %v5618_v44 = vmax.f32 %v4264_v21, 0.0 }
 0x38c   :  { %v16174_v36 = vpop.f32.mrf.mxu1  ;;  %v20351_v51 = vpop.f32.mrf.mxu0  ;;  %v5619_v29 = vmax.f32 %v4267_v45, 0.0  ;;  %v4283_v45 = vadd.f32 %v20240_v59, %v20095_v16 }
 0x38d   :  { %v20354_v41 = vadd.f32 %v16174_v36, %v19997_v17  ;;  %v16904_v17 = vld [vmem:[%s23704_s0 + $0x708] sm:$0xff]   ;;  %v5616_v18 = vmax.f32 %v4256_v54, 0.0 }
 0x38e   :  { %v7729_v48 = vpop.f32.mrf.mxu1  ;;  %v20364_v55 = vpop.f32.mrf.mxu0 }
 0x38f   :  { %24013 = vst [vmem:[#allocation50_spill] sm:$0xff] %v20364_v55  ;;  %v20370_v24 = vadd.f32 %v7729_v48, %v24014_v11  ;;  %v5617_v55 = vmax.f32 %v4259_v56, 0.0  ;;  %v4272_v56 = vadd.f32 %v20240_v59, %v20025_v14 }
 0x390   :  { %v16177_v33 = vpop.f32.mrf.mxu1  ;;  %16284 = vmatmul.mubr.msk.bf16.gmra.mxu1 %vm6186_vm1, %v6033_v43  ;;  %v20376_v7 = vpop.f32.mrf.mxu0 }
 0x391   :  { %24015 = vst [vmem:[#allocation20_spill] sm:$0xff] %v20370_v24  ;;  %v20379_v36 = vadd.f32 %v16177_v33, %v20022_v52  ;;  %16287 = vmatprep.mubr.msk.bf16.mxu1 %vm6186_vm1, %v6034_v61  ;;  %v6036_v52 = vpack.c.bf16 %v5619_v29, %v5618_v44  ;;  %v4280_v61 = vadd.f32 %v20240_v59, %v20070_v27  ;;  %v16906_v27 = vld [vmem:[%s23704_s0 + $0x718] sm:$0xff]  }
 0x392   :  { %v7742_v48 = vpop.f32.mrf.mxu1  ;;  %v20382_v11 = vpop.f32.mrf.mxu0  ;;  %15812 = vmatmul.mubr.msk.bf16.gmra.mxu0 %vm2100_vm0, %v16904_v17  ;;  %v6035_v54 = vpack.c.bf16 %v5617_v55, %v5616_v18  ;;  %v4275_v17 = vadd.f32 %v20240_v59, %v20045_v25  ;;  %v16907_v55 = vld [vmem:[%s23704_s0 + $0x720] sm:$0xff]   ;;  %v5623_v18 = vmax.f32 %v4283_v45, 0.0  ;;  %v4299_v45 = vadd.f32 %v20240_v59, %v20133_v12 }
 0x393   :  { %v20386_v24 = vadd.f32 %v7742_v48, %v20029_v13  ;;  %15815 = vmatprep.mubr.msk.bf16.mxu0 %vm2100_vm0, %v16905_v5  ;;  %v16922_v13 = vld [vmem:[%s23707_s5] sm:$0xff]   ;;  %v5622_v25 = vmax.f32 %v4280_v61, 0.0 }
 0x394   :  { %v16178_v43 = vpop.f32.mrf.mxu1  ;;  %v20389_v21 = vpop.f32.mrf.mxu0  ;;  %16589 = vmatprep.subr.bf16.mxu0 %v16922_v13  ;;  %v5621_v48 = vmax.f32 %v4275_v17, 0.0  ;;  %v4291_v17 = vadd.f32 %v20240_v59, %v20083_v40 }
 0x395   :  { %v20392_v33 = vadd.f32 %v16178_v43, %v20035_v46  ;;  %16590 = vmatpush3.bf16.msra.mxu0 %v16922_v13 }
 0x396   :  { %v7745_v5 = vpop.f32.mrf.mxu1  ;;  %v20405_v46 = vpop.f32.mrf.mxu0 }
 0x397   :  { %v20411_v16 = vadd.f32 %v7745_v5, %v20051_v20  ;;  %v5620_v20 = vmax.f32 %v4272_v56, 0.0 }
 0x398   :  { %v16185_v44 = vpop.f32.mrf.mxu1  ;;  %16288 = vmatmul.mubr.msk.bf16.gmra.mxu1 %vm6186_vm1, %v6035_v54  ;;  %v20417_v14 = vpop.f32.mrf.mxu0 }
 0x399   :  { %24016 = vst [vmem:[#allocation21_spill] sm:$0xff] %v20411_v16  ;;  %v20420_v29 = vadd.f32 %v16185_v44, %v20060_v31  ;;  %16291 = vmatprep.mubr.msk.bf16.mxu1 %vm6186_vm1, %v6036_v52  ;;  %v6038_v31 = vpack.c.bf16 %v5623_v18, %v5622_v25  ;;  %v4296_v52 = vadd.f32 %v20240_v59, %v20108_v22  ;;  %v16909_v22 = vld [vmem:[%s23704_s0 + $0x730] sm:$0xff]   ;;  %v5627_v18 = vmax.f32 %v4299_v45, 0.0 }
 0x39a   :  { %v7897_v43 = vpop.f32.mrf.mxu1  ;;  %v20423_v5 = vpop.f32.mrf.mxu0  ;;  %15816 = vmatmul.mubr.msk.bf16.gmra.mxu0 %vm2100_vm0, %v16906_v27  ;;  %v6037_v56 = vpack.c.bf16 %v5621_v48, %v5620_v20  ;;  %v5625_v48 = vmax.f32 %v4291_v17, 0.0  ;;  %v4315_v45 = vadd.f32 %v20240_v59, %v20174_v38  ;;  %v4307_v17 = vadd.f32 %v20240_v59, %v20121_v34 }
 0x39b   :  { %v20427_v16 = vadd.f32 %v7897_v43, %v20067_v42  ;;  %15819 = vmatprep.mubr.msk.bf16.mxu0 %vm2100_vm0, %v16907_v55  ;;  %v4288_v42 = vadd.f32 %v20240_v59, %v20063_v50  ;;  %v5626_v40 = vmax.f32 %v4296_v52, 0.0 }
 0x39c   :  { %v16186_v13 = vpop.f32.mrf.mxu1  ;;  %v20430_v61 = vpop.f32.mrf.mxu0 }
 0x39d   :  { %v20433_v54 = vadd.f32 %v16186_v13, %v20073_v30  ;;  %v16908_v30 = vld [vmem:[%s23704_s0 + $0x728] sm:$0xff]   ;;  %v5624_v20 = vmax.f32 %v4288_v42, 0.0 }
 0x39e   :  { %v7900_v27 = vpop.f32.mrf.mxu1  ;;  %v20443_v55 = vpop.f32.mrf.mxu0 }
 0x39f   :  { %v20449_v44 = vadd.f32 %v7900_v27, %v20089_v47  ;;  %v6039_v42 = vpack.c.bf16 %v5625_v48, %v5624_v20  ;;  %v5631_v20 = vmax.f32 %v4315_v45, 0.0  ;;  %v4331_v45 = vadd.f32 %v20240_v59, %v20219_v62 }
 0x3a0   :  { %v16189_v12 = vpop.f32.mrf.mxu1  ;;  %16292 = vmatmul.mubr.msk.bf16.gmra.mxu1 %vm6186_vm1, %v6037_v56  ;;  %v20455_v50 = vpop.f32.mrf.mxu0 }
 0x3a1   :  { %v20458_v25 = vadd.f32 %v16189_v12, %v20098_v23  ;;  %16295 = vmatprep.mubr.msk.bf16.mxu1 %vm6186_vm1, %v6038_v31  ;;  %v6040_v23 = vpack.c.bf16 %v5627_v18, %v5626_v40  ;;  %v4312_v31 = vadd.f32 %v20240_v59, %v20146_v8  ;;  %v16911_v8 = vld [vmem:[%s23704_s0 + $0x740] sm:$0xff]   ;;  %v24017_v40 = vld [vmem:[#allocation9_spill] sm:$0xff] }
 0x3a2   :  { %v7913_v47 = vpop.f32.mrf.mxu1  ;;  %v20461_v43 = vpop.f32.mrf.mxu0  ;;  %15820 = vmatmul.mubr.msk.bf16.gmra.mxu0 %vm2100_vm0, %v16908_v30 }
 0x3a3   :  { %v20465_v13 = vadd.f32 %v7913_v47, %v20105_v1  ;;  %15823 = vmatprep.mubr.msk.bf16.mxu0 %vm2100_vm0, %v16909_v22  ;;  %v4304_v1 = vadd.f32 %v20240_v59, %v20101_v4  ;;  %v5630_v34 = vmax.f32 %v4312_v31, 0.0  ;;  %v5629_v47 = vmax.f32 %v4307_v17, 0.0  ;;  %v24020_v17 = vld [vmem:[#allocation39_spill] sm:$0xff] }
 0x3a4   :  { %v16190_v56 = vpop.f32.mrf.mxu1  ;;  %v20468_v52 = vpop.f32.mrf.mxu0 }
 0x3a5   :  { %v20471_v27 = vadd.f32 %v16190_v56, %v20111_v32  ;;  %v16910_v32 = vld [vmem:[%s23704_s0 + $0x738] sm:$0xff]   ;;  %v5628_v48 = vmax.f32 %v4304_v1, 0.0 }
 0x3a6   :  { %v7916_v30 = vpop.f32.mrf.mxu1  ;;  %v20481_v22 = vpop.f32.mrf.mxu0 }
 0x3a7   :  { %v20487_v12 = vadd.f32 %v7916_v30, %v20127_v60  ;;  %v6041_v1 = vpack.c.bf16 %v5629_v47, %v5628_v48  ;;  %v16914_v48 = vld [vmem:[%s23704_s0 + $0x750] sm:$0xff]  }
 0x3a8   :  { %v16193_v38 = vpop.f32.mrf.mxu1  ;;  %16296 = vmatmul.mubr.msk.bf16.gmra.mxu1 %vm6186_vm1, %v6039_v42  ;;  %v20493_v4 = vpop.f32.mrf.mxu0 }
 0x3a9   :  { %v20496_v18 = vadd.f32 %v16193_v38, %v24017_v40  ;;  %16303 = vmatprep.mubr.msk.bf16.mxu1 %vm6186_vm1, %v6040_v23  ;;  %v6042_v38 = vpack.c.bf16 %v5631_v20, %v5630_v34  ;;  %v4328_v23 = vadd.f32 %v20240_v59, %v20193_v49  ;;  %v16903_v34 = vld [vmem:[%s23705_s3 + $0xa0] sm:$0xff]   ;;  %v16912_v49 = vld [vmem:[%s23704_s0 + $0x748] sm:$0xff]  }
 0x3aa   :  { %v7929_v60 = vpop.f32.mrf.mxu1  ;;  %v20499_v56 = vpop.f32.mrf.mxu0  ;;  %15824 = vmatmul.mubr.msk.bf16.gmra.mxu0 %vm2100_vm0, %v16910_v32  ;;  %v24021_v32 = vld [vmem:[#allocation40_spill] sm:$0xff]  ;;  %v24023_v20 = vld [vmem:[#allocation10_spill] sm:$0xff] }
 0x3ab   :  { %24018 = vst [vmem:[#allocation22_spill] sm:$0xff] %v20499_v56  ;;  %v20503_v30 = vadd.f32 %v7929_v60, %v20143_v57  ;;  %15827 = vmatprep.mubr.msk.bf16.mxu0 %vm2100_vm0, %v16911_v8  ;;  %v4320_v57 = vadd.f32 %v20240_v59, %v24020_v17  ;;  %v4323_v8 = vadd.f32 %v20240_v59, %v24021_v32  ;;  %v5634_v17 = vmax.f32 %v4328_v23, 0.0  ;;  %v24025_v32 = vld [vmem:[#allocation38_spill] sm:$0xff]  ;;  %v20547_v23 = vld [vmem:[%s23705_s3 + $0xb8] sm:$0xff]  }
 0x3ac   :  { %v16194_v42 = vpop.f32.mrf.mxu1  ;;  %v20506_v31 = vpop.f32.mrf.mxu0 }
 0x3ad   :  { %v20509_v40 = vadd.f32 %v16194_v42, %v20149_v15 }
 0x3ae   :  { %v7932_v60 = vpop.f32.mrf.mxu1  ;;  %v20522_v15 = vpop.f32.mrf.mxu0 }
 0x3af   :  { %24019 = vst [vmem:[#allocation52_spill] sm:$0xff] %v20509_v40  ;;  %24022 = vst [vmem:[#allocation53_spill] sm:$0xff] %v20522_v15  ;;  %v20528_v62 = vadd.f32 %v7932_v60, %v24023_v20  ;;  %v5635_v15 = vmax.f32 %v4331_v45, 0.0  ;;  %v5632_v60 = vmax.f32 %v4320_v57, 0.0  ;;  %v5633_v20 = vmax.f32 %v4323_v8, 0.0 }
 0x3b0   :  { %v16197_v47 = vpop.f32.mrf.mxu1  ;;  %16304 = vmatmul.mubr.msk.bf16.vlgmr.msra.gmra.mxu1 %vm6186_vm1, %v6041_v1  ;;  %v20534_v42 = vpop.f32.mrf.mxu0  ;;  %v24027_v1 = vld [vmem:[#allocation42_spill] sm:$0xff]  ;;  %v4344_v8 = vadd.f32 %v20240_v59, %v20232_v0  ;;  %v24031_v0 = vld [vmem:[#allocation12_spill] sm:$0xff] }
 0x3b1   :  { %24024 = vst [vmem:[#allocation51_spill] sm:$0xff] %v20528_v62  ;;  %v20537_v56 = vadd.f32 %v16197_v47, %v24025_v32  ;;  %16340 = vmatpush3.bf16.msra.mxu1 %v20187_v19  ;;  %16307 = vmatprep.mubr.msk.bf16.mxu1 %vm6186_vm1, %v6042_v38  ;;  %v6044_v45 = vpack.c.bf16 %v5635_v15, %v5634_v17 }
 0x3b2   :  { %v7945_v62 = vpop.f32.mrf.mxu1  ;;  %16341 = vmatprep.subr.bf16.mxu1 %v16903_v34  ;;  %v20541_v40 = vpop.f32.mrf.mxu0  ;;  %15828 = vmatmul.mubr.msk.bf16.gmra.mxu0 %vm2100_vm0, %v16912_v49  ;;  %v4347_v49 = vadd.f32 %v20240_v59, %v20262_v3  ;;  %v6043_v32 = vpack.c.bf16 %v5633_v20, %v5632_v60  ;;  %v16916_v3 = vld [vmem:[%s23704_s0 + $0x760] sm:$0xff]   ;;  %v24033_v60 = vld [vmem:[#allocation11_spill] sm:$0xff] }
 0x3b3   :  { %24026 = vst [vmem:[#allocation23_spill] sm:$0xff] %v20541_v40  ;;  %v20550_v47 = vadd.f32 %v7945_v62, %v24027_v1  ;;  %15831 = vmatprep.mubr.msk.bf16.mxu0 %vm2100_vm0, %v16914_v48  ;;  %v24029_v40 = vld [vmem:[#allocation41_spill] sm:$0xff]  ;;  %v4339_v48 = vadd.f32 %v20240_v59, %v20207_v9 }
 0x3b4   :  { %v16198_v19 = vpop.f32.mrf.mxu1  ;;  %v20553_v38 = vpop.f32.mrf.mxu0  ;;  %v4336_v62 = vadd.f32 %v20240_v59, %v24029_v40 }
 0x3b5   :  { %v20556_v57 = vadd.f32 %v16198_v19, %v20196_v63  ;;  %16342 = vmatpush3.bf16.msra.mxu1 %v16903_v34  ;;  %v16915_v63 = vld [vmem:[%s23704_s0 + $0x758] sm:$0xff]   ;;  %v5638_v34 = vmax.f32 %v4344_v8, 0.0  ;;  %v5639_v19 = vmax.f32 %v4347_v49, 0.0  ;;  %v4363_v49 = vadd.f32 %v20240_v59, %v20300_v26 }
 0x3b6   :  { %v7948_v1 = vpop.f32.mrf.mxu1  ;;  %16379 = vmatprep.subr.bf16.mxu1 %v20547_v23  ;;  %v20567_v15 = vpop.f32.mrf.mxu0 }
 0x3b7   :  { %24028 = vst [vmem:[#allocation54_spill] sm:$0xff] %v20556_v57  ;;  %24030 = vst [vmem:[#allocation24_spill] sm:$0xff] %v20567_v15  ;;  %v20573_v17 = vadd.f32 %v7948_v1, %v24031_v0  ;;  %v5636_v15 = vmax.f32 %v4336_v62, 0.0  ;;  %v5637_v57 = vmax.f32 %v4339_v48, 0.0  ;;  %v24038_v48 = vld [vmem:[#allocation13_spill] sm:$0xff] }
 0x3b8   :  { %v16201_v40 = vpop.f32.mrf.mxu1  ;;  %16308 = vmatmul.mubr.msk.bf16.gmra.mxu1 %vm6186_vm1, %v6043_v32  ;;  %v20579_v9 = vpop.f32.mrf.mxu0 }
 0x3b9   :  { %24032 = vst [vmem:[#allocation25_spill] sm:$0xff] %v20573_v17  ;;  %v20582_v20 = vadd.f32 %v16201_v40, %v24033_v60  ;;  %16311 = vmatprep.mubr.msk.bf16.mxu1 %vm6186_vm1, %v6044_v45  ;;  %v6046_v40 = vpack.c.bf16 %v5639_v19, %v5638_v34  ;;  %v24036_v60 = vld [vmem:[#allocation14_spill] sm:$0xff]  ;;  %v4360_v45 = vadd.f32 %v20240_v59, %v20275_v53  ;;  %v16917_v34 = vld [vmem:[%s23704_s0 + $0x768] sm:$0xff]   ;;  %v24041_v19 = vld [vmem:[#allocation44_spill] sm:$0xff] }
 0x3ba   :  { %v7961_v1 = vpop.f32.mrf.mxu1  ;;  %v20585_v0 = vpop.f32.mrf.mxu0  ;;  %15832 = vmatmul.mubr.msk.bf16.gmra.mxu0 %vm2100_vm0, %v16915_v63  ;;  %v6045_v62 = vpack.c.bf16 %v5637_v57, %v5636_v15  ;;  %v24039_v63 = vld [vmem:[#allocation43_spill] sm:$0xff]  ;;  %v16918_v53 = vld [vmem:[%s23704_s0 + $0x770] sm:$0xff]  }
 0x3bb   :  { %24034 = vst [vmem:[#allocation26_spill] sm:$0xff] %v20582_v20  ;;  %24035 = vst [vmem:[#allocation56_spill] sm:$0xff] %v20585_v0  ;;  %v20589_v17 = vadd.f32 %v7961_v1, %v20229_v39  ;;  %15835 = vmatprep.mubr.msk.bf16.mxu0 %vm2100_vm0, %v16916_v3  ;;  %v4352_v39 = vadd.f32 %v20240_v59, %v24038_v48  ;;  %v4355_v3 = vadd.f32 %v20240_v59, %v24039_v63 }
 0x3bc   :  { %v16202_v32 = vpop.f32.mrf.mxu1  ;;  %v20592_v8 = vpop.f32.mrf.mxu0  ;;  %v5642_v15 = vmax.f32 %v4360_v45, 0.0  ;;  %v5643_v63 = vmax.f32 %v4363_v49, 0.0  ;;  %v4379_v49 = vadd.f32 %v20240_v59, %v20338_v28 }
 0x3bd   :  { %v20595_v20 = vadd.f32 %v16202_v32, %v24036_v60  ;;  %v24043_v60 = vld [vmem:[#allocation15_spill] sm:$0xff] }
 0x3be   :  { %v7964_v1 = vpop.f32.mrf.mxu1  ;;  %v20605_v0 = vpop.f32.mrf.mxu0 }
 0x3bf   :  { %24037 = vst [vmem:[#allocation57_spill] sm:$0xff] %v20595_v20  ;;  %24040 = vst [vmem:[#allocation55_spill] sm:$0xff] %v20605_v0  ;;  %v20611_v32 = vadd.f32 %v7964_v1, %v24041_v19  ;;  %v5640_v0 = vmax.f32 %v4352_v39, 0.0  ;;  %v5641_v20 = vmax.f32 %v4355_v3, 0.0  ;;  %v24048_v3 = vld [vmem:[#allocation45_spill] sm:$0xff] }
 0x3c0   :  { %v16205_v26 = vpop.f32.mrf.mxu1  ;;  %16312 = vmatmul.mubr.msk.bf16.gmra.mxu1 %vm6186_vm1, %v6045_v62  ;;  %v20617_v57 = vpop.f32.mrf.mxu0 }
 0x3c1   :  { %24042 = vst [vmem:[#allocation27_spill] sm:$0xff] %v20611_v32  ;;  %v20620_v48 = vadd.f32 %v16205_v26, %v24043_v60  ;;  %16315 = vmatprep.mubr.msk.bf16.mxu1 %vm6186_vm1, %v6046_v40  ;;  %v6048_v26 = vpack.c.bf16 %v5643_v63, %v5642_v15  ;;  %v24046_v60 = vld [vmem:[#allocation17_spill] sm:$0xff]  ;;  %v4376_v40 = vadd.f32 %v20240_v59, %v20313_v6  ;;  %v24051_v63 = vld [vmem:[#allocation47_spill] sm:$0xff]  ;;  %v16920_v6 = vld [vmem:[%s23704_s0 + $0x780] sm:$0xff]  }
 0x3c2   :  { %v7977_v1 = vpop.f32.mrf.mxu1  ;;  %v20623_v19 = vpop.f32.mrf.mxu0  ;;  %15836 = vmatmul.mubr.msk.bf16.gmra.mxu0 %vm2100_vm0, %v16917_v34  ;;  %v6047_v39 = vpack.c.bf16 %v5641_v20, %v5640_v0  ;;  %v24049_v34 = vld [vmem:[#allocation16_spill] sm:$0xff]  ;;  %v16919_v15 = vld [vmem:[%s23704_s0 + $0x778] sm:$0xff]  }
 0x3c3   :  { %24044 = vst [vmem:[#allocation58_spill] sm:$0xff] %v20620_v48  ;;  %24045 = vst [vmem:[#allocation29_spill] sm:$0xff] %v20623_v19  ;;  %v20627_v32 = vadd.f32 %v7977_v1, %v20272_v35  ;;  %15839 = vmatprep.mubr.msk.bf16.mxu0 %vm2100_vm0, %v16918_v53  ;;  %v4368_v35 = vadd.f32 %v20240_v59, %v24048_v3  ;;  %v4371_v53 = vadd.f32 %v20240_v59, %v24049_v34 }
 0x3c4   :  { %v16206_v62 = vpop.f32.mrf.mxu1  ;;  %v20630_v45 = vpop.f32.mrf.mxu0  ;;  %v5646_v0 = vmax.f32 %v4376_v40, 0.0  ;;  %v5647_v34 = vmax.f32 %v4379_v49, 0.0  ;;  %v4395_v49 = vadd.f32 %v20240_v59, %v20376_v7 }
 0x3c5   :  { %v20633_v48 = vadd.f32 %v16206_v62, %v24046_v60  ;;  %v24053_v60 = vld [vmem:[#allocation18_spill] sm:$0xff] }
 0x3c6   :  { %v7980_v1 = vpop.f32.mrf.mxu1  ;;  %v20643_v19 = vpop.f32.mrf.mxu0 }
 0x3c7   :  { %24047 = vst [vmem:[#allocation60_spill] sm:$0xff] %v20633_v48  ;;  %24050 = vst [vmem:[#allocation28_spill] sm:$0xff] %v20643_v19  ;;  %v20649_v62 = vadd.f32 %v7980_v1, %v24051_v63  ;;  %v5644_v19 = vmax.f32 %v4368_v35, 0.0  ;;  %v5645_v48 = vmax.f32 %v4371_v53, 0.0  ;;  %v24055_v53 = vld [vmem:[#allocation48_spill] sm:$0xff] }
 0x3c8   :  { %v16209_v28 = vpop.f32.mrf.mxu1  ;;  %16316 = vmatmul.mubr.msk.bf16.gmra.mxu1 %vm6186_vm1, %v6047_v39  ;;  %v20655_v20 = vpop.f32.mrf.mxu0 }
 0x3c9   :  { %24052 = vst [vmem:[#allocation30_spill] sm:$0xff] %v20649_v62  ;;  %v20658_v3 = vadd.f32 %v16209_v28, %v24053_v60  ;;  %16319 = vmatprep.mubr.msk.bf16.mxu1 %vm6186_vm1, %v6048_v26  ;;  %v6050_v28 = vpack.c.bf16 %v5647_v34, %v5646_v0  ;;  %v4392_v26 = vadd.f32 %v20240_v59, %v20351_v51  ;;  %v24058_v0 = vld [vmem:[#allocation49_spill] sm:$0xff]  ;;  %v16923_v51 = vld [vmem:[%s23704_s0 + $0x790] sm:$0xff]  }
 0x3ca   :  { %v7993_v1 = vpop.f32.mrf.mxu1  ;;  %v20661_v63 = vpop.f32.mrf.mxu0  ;;  %15840 = vmatmul.mubr.msk.bf16.gmra.mxu0 %vm2100_vm0, %v16919_v15  ;;  %v6049_v35 = vpack.c.bf16 %v5645_v48, %v5644_v19  ;;  %v24056_v15 = vld [vmem:[#allocation46_spill] sm:$0xff] }
 0x3cb   :  { %24054 = vst [vmem:[#allocation61_spill] sm:$0xff] %v20661_v63  ;;  %v20665_v62 = vadd.f32 %v7993_v1, %v20310_v37  ;;  %15843 = vmatprep.mubr.msk.bf16.mxu0 %vm2100_vm0, %v16920_v6  ;;  %v4384_v37 = vadd.f32 %v20240_v59, %v24055_v53  ;;  %v4387_v6 = vadd.f32 %v20240_v59, %v24056_v15  ;;  %v5650_v19 = vmax.f32 %v4392_v26, 0.0 }
 0x3cc   :  { %v16210_v39 = vpop.f32.mrf.mxu1  ;;  %v20668_v40 = vpop.f32.mrf.mxu0  ;;  %v5651_v53 = vmax.f32 %v4395_v49, 0.0  ;;  %v4411_v49 = vadd.f32 %v20240_v59, %v20417_v14 }
 0x3cd   :  { %v20671_v60 = vadd.f32 %v16210_v39, %v20316_v58  ;;  %v16921_v58 = vld [vmem:[%s23704_s0 + $0x788] sm:$0xff]   ;;  %v5648_v15 = vmax.f32 %v4384_v37, 0.0 }
 0x3ce   :  { %v7996_v1 = vpop.f32.mrf.mxu1  ;;  %v20681_v63 = vpop.f32.mrf.mxu0 }
 0x3cf   :  { %24057 = vst [vmem:[#allocation62_spill] sm:$0xff] %v20681_v63  ;;  %v20687_v34 = vadd.f32 %v7996_v1, %v24058_v0  ;;  %v5649_v63 = vmax.f32 %v4387_v6, 0.0  ;;  %v24061_v6 = vld [vmem:[#allocation19_spill] sm:$0xff] }
 0x3d0   :  { %v16213_v7 = vpop.f32.mrf.mxu1  ;;  %16320 = vmatmul.mubr.msk.bf16.gmra.mxu1 %vm6186_vm1, %v6049_v35  ;;  %v20693_v48 = vpop.f32.mrf.mxu0 }
 0x3d1   :  { %24059 = vst [vmem:[#allocation59_spill] sm:$0xff] %v20687_v34  ;;  %v20696_v39 = vadd.f32 %v16213_v7, %v20341_v2  ;;  %16323 = vmatprep.mubr.msk.bf16.mxu1 %vm6186_vm1, %v6050_v28  ;;  %v6052_v2 = vpack.c.bf16 %v5651_v53, %v5650_v19  ;;  %v4408_v28 = vadd.f32 %v20240_v59, %v20389_v21  ;;  %v24064_v19 = vld [vmem:[#allocation20_spill] sm:$0xff]  ;;  %v16926_v21 = vld [vmem:[%s23704_s0 + $0x7a0] sm:$0xff]  }
 0x3d2   :  { %v8009_v1 = vpop.f32.mrf.mxu1  ;;  %v20699_v0 = vpop.f32.mrf.mxu0  ;;  %15844 = vmatmul.mubr.msk.bf16.gmra.mxu0 %vm2100_vm0, %v16921_v58  ;;  %v6051_v37 = vpack.c.bf16 %v5649_v63, %v5648_v15  ;;  %v24062_v58 = vld [vmem:[#allocation50_spill] sm:$0xff] }
 0x3d3   :  { %24060 = vst [vmem:[#allocation2_spill] sm:$0xff] %v20699_v0  ;;  %v20703_v34 = vadd.f32 %v8009_v1, %v20348_v10  ;;  %15847 = vmatprep.mubr.msk.bf16.mxu0 %vm2100_vm0, %v16923_v51  ;;  %v4400_v10 = vadd.f32 %v20240_v59, %v24061_v6  ;;  %v4403_v51 = vadd.f32 %v20240_v59, %v24062_v58  ;;  %v5654_v15 = vmax.f32 %v4408_v28, 0.0 }
 0x3d4   :  { %v16214_v35 = vpop.f32.mrf.mxu1  ;;  %v20706_v26 = vpop.f32.mrf.mxu0  ;;  %v5655_v6 = vmax.f32 %v4411_v49, 0.0  ;;  %v4427_v49 = vadd.f32 %v20240_v59, %v20455_v50 }
 0x3d5   :  { %v20709_v7 = vadd.f32 %v16214_v35, %v20354_v41  ;;  %v16925_v41 = vld [vmem:[%s23704_s0 + $0x798] sm:$0xff]   ;;  %v5652_v58 = vmax.f32 %v4400_v10, 0.0 }
 0x3d6   :  { %v8012_v1 = vpop.f32.mrf.mxu1  ;;  %v20719_v0 = vpop.f32.mrf.mxu0 }
 0x3d7   :  { %24063 = vst [vmem:[#allocation32_spill] sm:$0xff] %v20719_v0  ;;  %v20725_v53 = vadd.f32 %v8012_v1, %v24064_v19  ;;  %v5653_v0 = vmax.f32 %v4403_v51, 0.0  ;;  %v4419_v51 = vadd.f32 %v20240_v59, %v20405_v46 }
 0x3d8   :  { %v16217_v14 = vpop.f32.mrf.mxu1  ;;  %16324 = vmatmul.mubr.msk.bf16.gmra.mxu1 %vm6186_vm1, %v6051_v37  ;;  %v20731_v63 = vpop.f32.mrf.mxu0 }
 0x3d9   :  { %24065 = vst [vmem:[#allocation3_spill] sm:$0xff] %v20725_v53  ;;  %v20734_v35 = vadd.f32 %v16217_v14, %v20379_v36  ;;  %16327 = vmatprep.mubr.msk.bf16.mxu1 %vm6186_vm1, %v6052_v2  ;;  %v6054_v36 = vpack.c.bf16 %v5655_v6, %v5654_v15  ;;  %v4424_v2 = vadd.f32 %v20240_v59, %v20430_v61  ;;  %v24066_v15 = vld [vmem:[#allocation21_spill] sm:$0xff]  ;;  %v16928_v61 = vld [vmem:[%s23704_s0 + $0x7b0] sm:$0xff]  }
 0x3da   :  { %v8025_v1 = vpop.f32.mrf.mxu1  ;;  %v20737_v19 = vpop.f32.mrf.mxu0  ;;  %15848 = vmatmul.mubr.msk.bf16.gmra.mxu0 %vm2100_vm0, %v16925_v41  ;;  %v6053_v10 = vpack.c.bf16 %v5653_v0, %v5652_v58  ;;  %v5659_v58 = vmax.f32 %v4427_v49, 0.0  ;;  %v4443_v49 = vadd.f32 %v20240_v59, %v20493_v4 }
 0x3db   :  { %v20741_v53 = vadd.f32 %v8025_v1, %v20386_v24  ;;  %15851 = vmatprep.mubr.msk.bf16.mxu0 %vm2100_vm0, %v16926_v21  ;;  %v4416_v24 = vadd.f32 %v20240_v59, %v20382_v11  ;;  %v5658_v46 = vmax.f32 %v4424_v2, 0.0 }
 0x3dc   :  { %v16218_v37 = vpop.f32.mrf.mxu1  ;;  %v20744_v28 = vpop.f32.mrf.mxu0 }
 0x3dd   :  { %v20747_v14 = vadd.f32 %v16218_v37, %v20392_v33  ;;  %v16927_v33 = vld [vmem:[%s23704_s0 + $0x7a8] sm:$0xff]   ;;  %v5656_v1 = vmax.f32 %v4416_v24, 0.0  ;;  %v5657_v37 = vmax.f32 %v4419_v51, 0.0  ;;  %v4435_v51 = vadd.f32 %v20240_v59, %v20443_v55 }
 0x3de   :  { %v8028_v41 = vpop.f32.mrf.mxu1  ;;  %v20757_v21 = vpop.f32.mrf.mxu0 }
 0x3df   :  { %v20763_v6 = vadd.f32 %v8028_v41, %v24066_v15  ;;  %v6055_v24 = vpack.c.bf16 %v5657_v37, %v5656_v1  ;;  %v5663_v1 = vmax.f32 %v4443_v49, 0.0  ;;  %v4459_v49 = vadd.f32 %v20240_v59, %v20534_v42 }
 0x3e0   :  { %v16225_v50 = vpop.f32.mrf.mxu1  ;;  %16328 = vmatmul.mubr.msk.bf16.gmra.mxu1 %vm6186_vm1, %v6053_v10  ;;  %v20769_v11 = vpop.f32.mrf.mxu0 }
 0x3e1   :  { %24067 = vst [vmem:[#allocation31_spill] sm:$0xff] %v20763_v6  ;;  %v20772_v0 = vadd.f32 %v16225_v50, %v20420_v29  ;;  %16331 = vmatprep.mubr.msk.bf16.mxu1 %vm6186_vm1, %v6054_v36  ;;  %v6056_v29 = vpack.c.bf16 %v5659_v58, %v5658_v46  ;;  %v4440_v36 = vadd.f32 %v20240_v59, %v20468_v52  ;;  %v16930_v52 = vld [vmem:[%s23704_s0 + $0x7c0] sm:$0xff]  }
 0x3e2   :  { %v8180_v41 = vpop.f32.mrf.mxu1  ;;  %v20775_v15 = vpop.f32.mrf.mxu0  ;;  %15852 = vmatmul.mubr.msk.bf16.gmra.mxu0 %vm2100_vm0, %v16927_v33 }
 0x3e3   :  { %v20779_v6 = vadd.f32 %v8180_v41, %v20427_v16  ;;  %15855 = vmatprep.mubr.msk.bf16.mxu0 %vm2100_vm0, %v16928_v61  ;;  %v4432_v16 = vadd.f32 %v20240_v59, %v20423_v5  ;;  %v5662_v55 = vmax.f32 %v4440_v36, 0.0  ;;  %v5661_v41 = vmax.f32 %v4435_v51, 0.0 }
 0x3e4   :  { %v16226_v10 = vpop.f32.mrf.mxu1  ;;  %v20782_v2 = vpop.f32.mrf.mxu0  ;;  %v4451_v51 = vadd.f32 %v20240_v59, %v20481_v22 }
 0x3e5   :  { %v20785_v50 = vadd.f32 %v16226_v10, %v20433_v54  ;;  %v16929_v54 = vld [vmem:[%s23704_s0 + $0x7b8] sm:$0xff]   ;;  %v5660_v37 = vmax.f32 %v4432_v16, 0.0 }
 0x3e6   :  { %v8183_v33 = vpop.f32.mrf.mxu1  ;;  %v20795_v61 = vpop.f32.mrf.mxu0 }
 0x3e7   :  { %v20801_v46 = vadd.f32 %v8183_v33, %v20449_v44  ;;  %v6057_v16 = vpack.c.bf16 %v5661_v41, %v5660_v37  ;;  %v5667_v37 = vmax.f32 %v4459_v49, 0.0  ;;  %v4475_v49 = vadd.f32 %v20240_v59, %v20579_v9 }
 0x3e8   :  { %v16229_v4 = vpop.f32.mrf.mxu1  ;;  %16332 = vmatmul.mubr.msk.bf16.gmra.mxu1 %vm6186_vm1, %v6055_v24  ;;  %v20807_v5 = vpop.f32.mrf.mxu0 }
 0x3e9   :  { %v20810_v58 = vadd.f32 %v16229_v4, %v20458_v25  ;;  %16335 = vmatprep.mubr.msk.bf16.mxu1 %vm6186_vm1, %v6056_v29  ;;  %v6058_v25 = vpack.c.bf16 %v5663_v1, %v5662_v55  ;;  %v4456_v29 = vadd.f32 %v20240_v59, %v20506_v31  ;;  %v16932_v31 = vld [vmem:[%s23704_s0 + $0x7d0] sm:$0xff]  }
 0x3ea   :  { %v8196_v44 = vpop.f32.mrf.mxu1  ;;  %v20813_v10 = vpop.f32.mrf.mxu0  ;;  %15856 = vmatmul.mubr.msk.bf16.gmra.mxu0 %vm2100_vm0, %v16929_v54 }
 0x3eb   :  { %v20817_v33 = vadd.f32 %v8196_v44, %v20465_v13  ;;  %15859 = vmatprep.mubr.msk.bf16.mxu0 %vm2100_vm0, %v16930_v52  ;;  %v4448_v13 = vadd.f32 %v20240_v59, %v20461_v43  ;;  %v5666_v22 = vmax.f32 %v4456_v29, 0.0  ;;  %v5665_v44 = vmax.f32 %v4451_v51, 0.0  ;;  %v24071_v51 = vld [vmem:[#allocation22_spill] sm:$0xff] }
 0x3ec   :  { %v16230_v24 = vpop.f32.mrf.mxu1  ;;  %v20820_v36 = vpop.f32.mrf.mxu0 }
 0x3ed   :  { %v20823_v4 = vadd.f32 %v16230_v24, %v20471_v27  ;;  %v16931_v27 = vld [vmem:[%s23704_s0 + $0x7c8] sm:$0xff]   ;;  %v5664_v41 = vmax.f32 %v4448_v13, 0.0 }
 0x3ee   :  { %v8199_v54 = vpop.f32.mrf.mxu1  ;;  %v20833_v52 = vpop.f32.mrf.mxu0 }
 0x3ef   :  { %v20839_v55 = vadd.f32 %v8199_v54, %v20487_v12  ;;  %v6059_v13 = vpack.c.bf16 %v5665_v44, %v5664_v41  ;;  %v16935_v41 = vld [vmem:[%s23704_s0 + $0x7e0] sm:$0xff]  }
 0x3f0   :  { %v16233_v42 = vpop.f32.mrf.mxu1  ;;  %16336 = vmatmul.mubr.msk.bf16.gmra.mxu1 %vm6186_vm1, %v6057_v16  ;;  %v20845_v43 = vpop.f32.mrf.mxu0 }
 0x3f1   :  { %v20848_v1 = vadd.f32 %v16233_v42, %v20496_v18  ;;  %16343 = vmatprep.mubr.msk.bf16.mxu1 %vm6186_vm1, %v6058_v25  ;;  %v6060_v18 = vpack.c.bf16 %v5667_v37, %v5666_v22  ;;  %v24070_v42 = vld [vmem:[#allocation52_spill] sm:$0xff]  ;;  %v4472_v25 = vadd.f32 %v20240_v59, %v20553_v38  ;;  %v16933_v38 = vld [vmem:[%s23704_s0 + $0x7d8] sm:$0xff]  }
 0x3f2   :  { %v8212_v12 = vpop.f32.mrf.mxu1  ;;  %v20851_v24 = vpop.f32.mrf.mxu0  ;;  %15860 = vmatmul.mubr.msk.bf16.gmra.mxu0 %vm2100_vm0, %v16931_v27  ;;  %v24072_v27 = vld [vmem:[#allocation53_spill] sm:$0xff]  ;;  %v16924_v22 = vld [vmem:[%s23705_s3 + $0xb0] sm:$0xff]  }
 0x3f3   :  { %24068 = vst [vmem:[#allocation34_spill] sm:$0xff] %v20848_v1  ;;  %24069 = vst [vmem:[#allocation33_spill] sm:$0xff] %v20851_v24  ;;  %v20855_v54 = vadd.f32 %v8212_v12, %v20503_v30  ;;  %15863 = vmatprep.mubr.msk.bf16.mxu0 %vm2100_vm0, %v16932_v31  ;;  %v4464_v30 = vadd.f32 %v20240_v59, %v24071_v51  ;;  %v4467_v31 = vadd.f32 %v20240_v59, %v24072_v27 }
 0x3f4   :  { %v16234_v16 = vpop.f32.mrf.mxu1  ;;  %v20858_v29 = vpop.f32.mrf.mxu0  ;;  %v5670_v51 = vmax.f32 %v4472_v25, 0.0  ;;  %v20899_v25 = vld [vmem:[%s23705_s3 + $0xc8] sm:$0xff]  }
 0x3f5   :  { %v20861_v1 = vadd.f32 %v16234_v16, %v24070_v42  ;;  %v24074_v16 = vld [vmem:[#allocation51_spill] sm:$0xff] }
 0x3f6   :  { %v8215_v12 = vpop.f32.mrf.mxu1  ;;  %v20874_v37 = vpop.f32.mrf.mxu0 }
 0x3f7   :  { %24073 = vst [vmem:[#allocation4_spill] sm:$0xff] %v20874_v37  ;;  %v20880_v9 = vadd.f32 %v8215_v12, %v24074_v16  ;;  %v5671_v37 = vmax.f32 %v4475_v49, 0.0  ;;  %v5668_v12 = vmax.f32 %v4464_v30, 0.0  ;;  %v5669_v16 = vmax.f32 %v4467_v31, 0.0 }
 0x3f8   :  { %v16237_v44 = vpop.f32.mrf.mxu1  ;;  %16344 = vmatmul.mubr.msk.bf16.vlgmr.msra.gmra.mxu1 %vm6186_vm1, %v6059_v13  ;;  %v20886_v42 = vpop.f32.mrf.mxu0  ;;  %v24078_v13 = vld [vmem:[#allocation54_spill] sm:$0xff]  ;;  %v4488_v31 = vadd.f32 %v20240_v59, %v20592_v8  ;;  %v16936_v8 = vld [vmem:[%s23704_s0 + $0x7e8] sm:$0xff]  }
 0x3f9   :  { %24075 = vst [vmem:[#allocation36_spill] sm:$0xff] %v20880_v9  ;;  %v20889_v27 = vadd.f32 %v16237_v44, %v20537_v56  ;;  %16380 = vmatpush3.bf16.msra.mxu1 %v20547_v23  ;;  %16347 = vmatprep.mubr.msk.bf16.mxu1 %vm6186_vm1, %v6060_v18  ;;  %v6062_v49 = vpack.c.bf16 %v5671_v37, %v5670_v51  ;;  %v24082_v51 = vld [vmem:[#allocation25_spill] sm:$0xff] }
 0x3fa   :  { %v8228_v9 = vpop.f32.mrf.mxu1  ;;  %16381 = vmatprep.subr.bf16.mxu1 %v16924_v22  ;;  %v20893_v24 = vpop.f32.mrf.mxu0  ;;  %15864 = vmatmul.mubr.msk.bf16.gmra.mxu0 %vm2100_vm0, %v16933_v38  ;;  %v4491_v38 = vadd.f32 %v20240_v59, %v20617_v57  ;;  %v6061_v44 = vpack.c.bf16 %v5669_v16, %v5668_v12  ;;  %v16937_v57 = vld [vmem:[%s23704_s0 + $0x7f0] sm:$0xff]   ;;  %v24084_v12 = vld [vmem:[#allocation26_spill] sm:$0xff] }
 0x3fb   :  { %24076 = vst [vmem:[#allocation5_spill] sm:$0xff] %v20893_v24  ;;  %v20902_v56 = vadd.f32 %v8228_v9, %v20550_v47  ;;  %15867 = vmatprep.mubr.msk.bf16.mxu0 %vm2100_vm0, %v16935_v41  ;;  %v24079_v24 = vld [vmem:[#allocation23_spill] sm:$0xff]  ;;  %v24080_v9 = vld [vmem:[#allocation24_spill] sm:$0xff] }
 0x3fc   :  { %v16238_v23 = vpop.f32.mrf.mxu1  ;;  %v20905_v18 = vpop.f32.mrf.mxu0  ;;  %v4480_v47 = vadd.f32 %v20240_v59, %v24079_v24  ;;  %v4483_v41 = vadd.f32 %v20240_v59, %v24080_v9 }
 0x3fd   :  { %24077 = vst [vmem:[#allocation6_spill] sm:$0xff] %v20902_v56  ;;  %v20908_v30 = vadd.f32 %v16238_v23, %v24078_v13  ;;  %16382 = vmatpush3.bf16.msra.mxu1 %v16924_v22  ;;  %v5674_v22 = vmax.f32 %v4488_v31, 0.0  ;;  %v5675_v13 = vmax.f32 %v4491_v38, 0.0 }
 0x3fe   :  { %v8231_v56 = vpop.f32.mrf.mxu1  ;;  %16419 = vmatprep.subr.bf16.mxu1 %v20899_v25  ;;  %v20919_v37 = vpop.f32.mrf.mxu0  ;;  %v5672_v9 = vmax.f32 %v4480_v47, 0.0 }
 0x3ff   :  { %24081 = vst [vmem:[#allocation35_spill] sm:$0xff] %v20919_v37  ;;  %v20925_v23 = vadd.f32 %v8231_v56, %v24082_v51  ;;  %v5673_v37 = vmax.f32 %v4483_v41, 0.0  ;;  %v24090_v41 = vld [vmem:[#allocation56_spill] sm:$0xff] }
 0x400   :  { %v16241_v24 = vpop.f32.mrf.mxu1  ;;  %16348 = vmatmul.mubr.msk.bf16.gmra.mxu1 %vm6186_vm1, %v6061_v44  ;;  %v20931_v59 = vpop.f32.mrf.mxu0 }
 0x401   :  { %24083 = vst [vmem:[#allocation37_spill] sm:$0xff] %v20925_v23  ;;  %v20934_v16 = vadd.f32 %v16241_v24, %v24084_v12  ;;  %16351 = vmatprep.mubr.msk.bf16.mxu1 %vm6186_vm1, %v6062_v49  ;;  %v6064_v24 = vpack.c.bf16 %v5675_v13, %v5674_v22  ;;  %v24088_v12 = vld [vmem:[#allocation57_spill] sm:$0xff]  ;;  %v20952_v49 = vld [vmem:[%s23706_s2] ss:$0 sm:$0xff]  ;;  %v6063_v47 = vpack.c.bf16 %v5673_v37, %v5672_v9 }
 0x402   :  { %v8244_v56 = vpop.f32.mrf.mxu1  ;;  %v20937_v51 = vpop.f32.mrf.mxu0  ;;  %15868 = vmatmul.mubr.msk.bf16.gmra.mxu0 %vm2100_vm0, %v16936_v8  ;;  %v4504_v38 = vadd.f32 %v20952_v49, %v20630_v45  ;;  %v4496_v8 = vadd.f32 %v20952_v49, %v24090_v41  ;;  %v16939_v45 = vld [vmem:[%s23704_s0 + $0x800] sm:$0xff]  }
 0x403   :  { %24085 = vst [vmem:[#allocation8_spill] sm:$0xff] %v20934_v16  ;;  %24086 = vst [vmem:[#allocation7_spill] sm:$0xff] %v20937_v51  ;;  %v20941_v23 = vadd.f32 %v8244_v56, %v20589_v17  ;;  %15871 = vmatprep.mubr.msk.bf16.mxu0 %vm2100_vm0, %v16937_v57  ;;  %v4507_v17 = vadd.f32 %v20952_v49, %v20655_v20  ;;  %v24091_v57 = vld [vmem:[#allocation55_spill] sm:$0xff]  ;;  %v24095_v41 = vld [vmem:[#allocation58_spill] sm:$0xff] }
 0x404   :  { %v16242_v44 = vpop.f32.mrf.mxu1  ;;  %v20944_v31 = vpop.f32.mrf.mxu0  ;;  %v4499_v22 = vadd.f32 %v20952_v49, %v24091_v57  ;;  %v5678_v9 = vmax.f32 %v4504_v38, 0.0 }
 0x405   :  { %24087 = vst [vmem:[#allocation9_spill] sm:$0xff] %v20941_v23  ;;  %v20947_v16 = vadd.f32 %v16242_v44, %v24088_v12  ;;  %v16938_v44 = vld [vmem:[%s23704_s0 + $0x7f8] sm:$0xff]   ;;  %v24093_v12 = vld [vmem:[#allocation27_spill] sm:$0xff] }
 0x406   :  { %v8247_v13 = vpop.f32.mrf.mxu1  ;;  %v20962_v56 = vpop.f32.mrf.mxu0  ;;  %v5677_v23 = vmax.f32 %v4499_v22, 0.0  ;;  %v24099_v22 = vld [vmem:[#allocation29_spill] sm:$0xff] }
 0x407   :  { %24089 = vst [vmem:[#allocation39_spill] sm:$0xff] %v20947_v16  ;;  %24092 = vst [vmem:[#allocation40_spill] sm:$0xff] %v20962_v56  ;;  %v20968_v51 = vadd.f32 %v8247_v13, %v24093_v12  ;;  %v5679_v56 = vmax.f32 %v4507_v17, 0.0  ;;  %v5676_v16 = vmax.f32 %v4496_v8, 0.0  ;;  %v4523_v17 = vadd.f32 %v20952_v49, %v20693_v48 }
 0x408   :  { %v16245_v20 = vpop.f32.mrf.mxu1  ;;  %16352 = vmatmul.mubr.msk.bf16.gmra.mxu1 %vm6186_vm1, %v6063_v47  ;;  %v20974_v37 = vpop.f32.mrf.mxu0 }
 0x409   :  { %24094 = vst [vmem:[#allocation10_spill] sm:$0xff] %v20968_v51  ;;  %v20977_v57 = vadd.f32 %v16245_v20, %v24095_v41  ;;  %16355 = vmatprep.mubr.msk.bf16.mxu1 %vm6186_vm1, %v6064_v24  ;;  %v6066_v20 = vpack.c.bf16 %v5679_v56, %v5678_v9  ;;  %v24098_v41 = vld [vmem:[#allocation60_spill] sm:$0xff]  ;;  %v4520_v24 = vadd.f32 %v20952_v49, %v20668_v40  ;;  %v16940_v56 = vld [vmem:[%s23704_s0 + $0x808] sm:$0xff]   ;;  %v24102_v9 = vld [vmem:[#allocation30_spill] sm:$0xff] }
 0x40a   :  { %v8260_v13 = vpop.f32.mrf.mxu1  ;;  %v20980_v12 = vpop.f32.mrf.mxu0  ;;  %15872 = vmatmul.mubr.msk.bf16.gmra.mxu0 %vm2100_vm0, %v16938_v44  ;;  %v6065_v8 = vpack.c.bf16 %v5677_v23, %v5676_v16  ;;  %v24100_v44 = vld [vmem:[#allocation28_spill] sm:$0xff] }
 0x40b   :  { %24096 = vst [vmem:[#allocation38_spill] sm:$0xff] %v20977_v57  ;;  %24097 = vst [vmem:[#allocation42_spill] sm:$0xff] %v20980_v12  ;;  %v20984_v51 = vadd.f32 %v8260_v13, %v20627_v32  ;;  %15875 = vmatprep.mubr.msk.bf16.mxu0 %vm2100_vm0, %v16939_v45  ;;  %v4512_v32 = vadd.f32 %v20952_v49, %v24099_v22  ;;  %v4515_v45 = vadd.f32 %v20952_v49, %v24100_v44  ;;  %v16941_v40 = vld [vmem:[%s23704_s0 + $0x810] sm:$0xff]  }
 0x40c   :  { %v16246_v47 = vpop.f32.mrf.mxu1  ;;  %v20987_v38 = vpop.f32.mrf.mxu0  ;;  %v5682_v16 = vmax.f32 %v4520_v24, 0.0  ;;  %v5683_v22 = vmax.f32 %v4523_v17, 0.0  ;;  %v4539_v17 = vadd.f32 %v20952_v49, %v20731_v63 }
 0x40d   :  { %v20990_v57 = vadd.f32 %v16246_v47, %v24098_v41  ;;  %v5680_v44 = vmax.f32 %v4512_v32, 0.0 }
 0x40e   :  { %v8263_v13 = vpop.f32.mrf.mxu1  ;;  %v21000_v12 = vpop.f32.mrf.mxu0 }
 0x40f   :  { %24101 = vst [vmem:[#allocation41_spill] sm:$0xff] %v21000_v12  ;;  %v21006_v47 = vadd.f32 %v8263_v13, %v24102_v9  ;;  %v5681_v12 = vmax.f32 %v4515_v45, 0.0  ;;  %v24105_v45 = vld [vmem:[#allocation61_spill] sm:$0xff] }
 0x410   :  { %v16249_v48 = vpop.f32.mrf.mxu1  ;;  %16356 = vmatmul.mubr.msk.bf16.gmra.mxu1 %vm6186_vm1, %v6065_v8  ;;  %v21012_v23 = vpop.f32.mrf.mxu0 }
 0x411   :  { %24103 = vst [vmem:[#allocation12_spill] sm:$0xff] %v21006_v47  ;;  %v21015_v41 = vadd.f32 %v16249_v48, %v20658_v3  ;;  %16359 = vmatprep.mubr.msk.bf16.mxu1 %vm6186_vm1, %v6066_v20  ;;  %v6068_v3 = vpack.c.bf16 %v5683_v22, %v5682_v16  ;;  %v4536_v20 = vadd.f32 %v20952_v49, %v20706_v26  ;;  %v24108_v16 = vld [vmem:[#allocation59_spill] sm:$0xff]  ;;  %v16943_v26 = vld [vmem:[%s23704_s0 + $0x820] sm:$0xff]  }
 0x412   :  { %v8276_v13 = vpop.f32.mrf.mxu1  ;;  %v21018_v9 = vpop.f32.mrf.mxu0  ;;  %15876 = vmatmul.mubr.msk.bf16.gmra.mxu0 %vm2100_vm0, %v16940_v56  ;;  %v6067_v32 = vpack.c.bf16 %v5681_v12, %v5680_v44  ;;  %v24106_v56 = vld [vmem:[#allocation62_spill] sm:$0xff] }
 0x413   :  { %24104 = vst [vmem:[#allocation11_spill] sm:$0xff] %v21018_v9  ;;  %v21022_v47 = vadd.f32 %v8276_v13, %v20665_v62  ;;  %15879 = vmatprep.mubr.msk.bf16.mxu0 %vm2100_vm0, %v16941_v40  ;;  %v4528_v62 = vadd.f32 %v20952_v49, %v24105_v45  ;;  %v4531_v40 = vadd.f32 %v20952_v49, %v24106_v56  ;;  %v5686_v44 = vmax.f32 %v4536_v20, 0.0 }
 0x414   :  { %v16250_v8 = vpop.f32.mrf.mxu1  ;;  %v21025_v24 = vpop.f32.mrf.mxu0  ;;  %v5687_v45 = vmax.f32 %v4539_v17, 0.0  ;;  %v4555_v17 = vadd.f32 %v20952_v49, %v20769_v11 }
 0x415   :  { %v21028_v48 = vadd.f32 %v16250_v8, %v20671_v60  ;;  %v16942_v60 = vld [vmem:[%s23704_s0 + $0x818] sm:$0xff]   ;;  %v5684_v56 = vmax.f32 %v4528_v62, 0.0 }
 0x416   :  { %v8279_v13 = vpop.f32.mrf.mxu1  ;;  %v21038_v9 = vpop.f32.mrf.mxu0 }
 0x417   :  { %24107 = vst [vmem:[#allocation14_spill] sm:$0xff] %v21038_v9  ;;  %v21044_v22 = vadd.f32 %v8279_v13, %v24108_v16  ;;  %v5685_v9 = vmax.f32 %v4531_v40, 0.0  ;;  %v24111_v40 = vld [vmem:[#allocation2_spill] sm:$0xff] }
 0x418   :  { %v16253_v63 = vpop.f32.mrf.mxu1  ;;  %16360 = vmatmul.mubr.msk.bf16.gmra.mxu1 %vm6186_vm1, %v6067_v32  ;;  %v21050_v12 = vpop.f32.mrf.mxu0 }
 0x419   :  { %24109 = vst [vmem:[#allocation13_spill] sm:$0xff] %v21044_v22  ;;  %v21053_v8 = vadd.f32 %v16253_v63, %v20696_v39  ;;  %16363 = vmatprep.mubr.msk.bf16.mxu1 %vm6186_vm1, %v6068_v3  ;;  %v6070_v39 = vpack.c.bf16 %v5687_v45, %v5686_v44  ;;  %v4552_v3 = vadd.f32 %v20952_v49, %v20744_v28  ;;  %v24114_v44 = vld [vmem:[#allocation3_spill] sm:$0xff]  ;;  %v16946_v28 = vld [vmem:[%s23704_s0 + $0x830] sm:$0xff]  }
 0x41a   :  { %v8292_v13 = vpop.f32.mrf.mxu1  ;;  %v21056_v16 = vpop.f32.mrf.mxu0  ;;  %15880 = vmatmul.mubr.msk.bf16.gmra.mxu0 %vm2100_vm0, %v16942_v60  ;;  %v6069_v62 = vpack.c.bf16 %v5685_v9, %v5684_v56  ;;  %v24112_v60 = vld [vmem:[#allocation32_spill] sm:$0xff] }
 0x41b   :  { %24110 = vst [vmem:[#allocation43_spill] sm:$0xff] %v21056_v16  ;;  %v21060_v22 = vadd.f32 %v8292_v13, %v20703_v34  ;;  %15883 = vmatprep.mubr.msk.bf16.mxu0 %vm2100_vm0, %v16943_v26  ;;  %v4544_v34 = vadd.f32 %v20952_v49, %v24111_v40  ;;  %v4547_v26 = vadd.f32 %v20952_v49, %v24112_v60  ;;  %v5690_v56 = vmax.f32 %v4552_v3, 0.0 }
 0x41c   :  { %v16254_v32 = vpop.f32.mrf.mxu1  ;;  %v21063_v20 = vpop.f32.mrf.mxu0  ;;  %v5691_v40 = vmax.f32 %v4555_v17, 0.0  ;;  %v4571_v17 = vadd.f32 %v20952_v49, %v20807_v5 }
 0x41d   :  { %v21066_v63 = vadd.f32 %v16254_v32, %v20709_v7  ;;  %v16945_v7 = vld [vmem:[%s23704_s0 + $0x828] sm:$0xff]   ;;  %v5688_v60 = vmax.f32 %v4544_v34, 0.0 }
 0x41e   :  { %v8295_v13 = vpop.f32.mrf.mxu1  ;;  %v21076_v16 = vpop.f32.mrf.mxu0 }
 0x41f   :  { %24113 = vst [vmem:[#allocation44_spill] sm:$0xff] %v21076_v16  ;;  %v21082_v45 = vadd.f32 %v8295_v13, %v24114_v44  ;;  %v5689_v16 = vmax.f32 %v4547_v26, 0.0  ;;  %v4563_v26 = vadd.f32 %v20952_v49, %v20757_v21 }
 0x420   :  { %v16257_v11 = vpop.f32.mrf.mxu1  ;;  %16364 = vmatmul.mubr.msk.bf16.gmra.mxu1 %vm6186_vm1, %v6069_v62  ;;  %v21088_v9 = vpop.f32.mrf.mxu0 }
 0x421   :  { %24115 = vst [vmem:[#allocation15_spill] sm:$0xff] %v21082_v45  ;;  %v21091_v32 = vadd.f32 %v16257_v11, %v20734_v35  ;;  %16367 = vmatprep.mubr.msk.bf16.mxu1 %vm6186_vm1, %v6070_v39  ;;  %v6072_v35 = vpack.c.bf16 %v5691_v40, %v5690_v56  ;;  %v4568_v39 = vadd.f32 %v20952_v49, %v20782_v2  ;;  %v24116_v56 = vld [vmem:[#allocation31_spill] sm:$0xff]  ;;  %v16948_v2 = vld [vmem:[%s23704_s0 + $0x840] sm:$0xff]  }
 0x422   :  { %v8308_v13 = vpop.f32.mrf.mxu1  ;;  %v21094_v44 = vpop.f32.mrf.mxu0  ;;  %15884 = vmatmul.mubr.msk.bf16.gmra.mxu0 %vm2100_vm0, %v16945_v7  ;;  %v6071_v34 = vpack.c.bf16 %v5689_v16, %v5688_v60  ;;  %v5695_v60 = vmax.f32 %v4571_v17, 0.0  ;;  %v4587_v17 = vadd.f32 %v20952_v49, %v20845_v43 }
 0x423   :  { %v21098_v45 = vadd.f32 %v8308_v13, %v20741_v53  ;;  %15887 = vmatprep.mubr.msk.bf16.mxu0 %vm2100_vm0, %v16946_v28  ;;  %v4560_v53 = vadd.f32 %v20952_v49, %v20737_v19  ;;  %v5694_v21 = vmax.f32 %v4568_v39, 0.0 }
 0x424   :  { %v16258_v62 = vpop.f32.mrf.mxu1  ;;  %v21101_v3 = vpop.f32.mrf.mxu0 }
 0x425   :  { %v21104_v11 = vadd.f32 %v16258_v62, %v20747_v14  ;;  %v16947_v14 = vld [vmem:[%s23704_s0 + $0x838] sm:$0xff]   ;;  %v5692_v13 = vmax.f32 %v4560_v53, 0.0  ;;  %v5693_v62 = vmax.f32 %v4563_v26, 0.0  ;;  %v4579_v26 = vadd.f32 %v20952_v49, %v20795_v61 }
 0x426   :  { %v8311_v7 = vpop.f32.mrf.mxu1  ;;  %v21114_v28 = vpop.f32.mrf.mxu0 }
 0x427   :  { %v21120_v40 = vadd.f32 %v8311_v7, %v24116_v56  ;;  %v6073_v53 = vpack.c.bf16 %v5693_v62, %v5692_v13  ;;  %v5699_v13 = vmax.f32 %v4587_v17, 0.0  ;;  %v4603_v17 = vadd.f32 %v20952_v49, %v20886_v42 }
 0x428   :  { %v16265_v5 = vpop.f32.mrf.mxu1  ;;  %16368 = vmatmul.mubr.msk.bf16.gmra.mxu1 %vm6186_vm1, %v6071_v34  ;;  %v21126_v19 = vpop.f32.mrf.mxu0 }
 0x429   :  { %24117 = vst [vmem:[#allocation17_spill] sm:$0xff] %v21120_v40  ;;  %v21129_v16 = vadd.f32 %v16265_v5, %v20772_v0  ;;  %16371 = vmatprep.mubr.msk.bf16.mxu1 %vm6186_vm1, %v6072_v35  ;;  %v6074_v0 = vpack.c.bf16 %v5695_v60, %v5694_v21  ;;  %v4584_v35 = vadd.f32 %v20952_v49, %v20820_v36  ;;  %v16950_v36 = vld [vmem:[%s23704_s0 + $0x850] sm:$0xff]  }
 0x42a   :  { %v8463_v7 = vpop.f32.mrf.mxu1  ;;  %v21132_v56 = vpop.f32.mrf.mxu0  ;;  %15888 = vmatmul.mubr.msk.bf16.gmra.mxu0 %vm2100_vm0, %v16947_v14 }
 0x42b   :  { %v21136_v40 = vadd.f32 %v8463_v7, %v20779_v6  ;;  %15891 = vmatprep.mubr.msk.bf16.mxu0 %vm2100_vm0, %v16948_v2  ;;  %v4576_v6 = vadd.f32 %v20952_v49, %v20775_v15  ;;  %v5698_v61 = vmax.f32 %v4584_v35, 0.0  ;;  %v5697_v7 = vmax.f32 %v4579_v26, 0.0 }
 0x42c   :  { %v16266_v34 = vpop.f32.mrf.mxu1  ;;  %v21139_v39 = vpop.f32.mrf.mxu0  ;;  %v4595_v26 = vadd.f32 %v20952_v49, %v20833_v52 }
 0x42d   :  { %v21142_v5 = vadd.f32 %v16266_v34, %v20785_v50  ;;  %v16949_v50 = vld [vmem:[%s23704_s0 + $0x848] sm:$0xff]   ;;  %v5696_v62 = vmax.f32 %v4576_v6, 0.0 }
 0x42e   :  { %v8466_v14 = vpop.f32.mrf.mxu1  ;;  %v21152_v2 = vpop.f32.mrf.mxu0 }
 0x42f   :  { %v21158_v21 = vadd.f32 %v8466_v14, %v20801_v46  ;;  %v6075_v6 = vpack.c.bf16 %v5697_v7, %v5696_v62  ;;  %v5703_v7 = vmax.f32 %v4603_v17, 0.0  ;;  %v4619_v17 = vadd.f32 %v20952_v49, %v20931_v59 }
 0x430   :  { %v16269_v43 = vpop.f32.mrf.mxu1  ;;  %16372 = vmatmul.mubr.msk.bf16.gmra.mxu1 %vm6186_vm1, %v6073_v53  ;;  %v21164_v15 = vpop.f32.mrf.mxu0 }
 0x431   :  { %v21167_v60 = vadd.f32 %v16269_v43, %v20810_v58  ;;  %16375 = vmatprep.mubr.msk.bf16.mxu1 %vm6186_vm1, %v6074_v0  ;;  %v6076_v58 = vpack.c.bf16 %v5699_v13, %v5698_v61  ;;  %v4600_v0 = vadd.f32 %v20952_v49, %v20858_v29  ;;  %v16952_v29 = vld [vmem:[%s23704_s0 + $0x860] sm:$0xff]  }
 0x432   :  { %v8479_v46 = vpop.f32.mrf.mxu1  ;;  %v21170_v34 = vpop.f32.mrf.mxu0  ;;  %15892 = vmatmul.mubr.msk.bf16.gmra.mxu0 %vm2100_vm0, %v16949_v50  ;;  %v24119_v13 = vld [vmem:[#allocation34_spill] sm:$0xff] }
 0x433   :  { %v21174_v14 = vadd.f32 %v8479_v46, %v20817_v33  ;;  %15895 = vmatprep.mubr.msk.bf16.mxu0 %vm2100_vm0, %v16950_v36  ;;  %v4592_v33 = vadd.f32 %v20952_v49, %v20813_v10  ;;  %v5702_v52 = vmax.f32 %v4600_v0, 0.0 }
 0x434   :  { %v16270_v53 = vpop.f32.mrf.mxu1  ;;  %v21177_v35 = vpop.f32.mrf.mxu0 }
 0x435   :  { %v21180_v43 = vadd.f32 %v16270_v53, %v20823_v4  ;;  %v16951_v4 = vld [vmem:[%s23704_s0 + $0x858] sm:$0xff]   ;;  %v5700_v46 = vmax.f32 %v4592_v33, 0.0  ;;  %v5701_v53 = vmax.f32 %v4595_v26, 0.0 }
 0x436   :  { %v8482_v50 = vpop.f32.mrf.mxu1  ;;  %v21190_v36 = vpop.f32.mrf.mxu0  ;;  %v24121_v26 = vld [vmem:[#allocation33_spill] sm:$0xff] }
 0x437   :  { %v21196_v61 = vadd.f32 %v8482_v50, %v20839_v55  ;;  %v6077_v33 = vpack.c.bf16 %v5701_v53, %v5700_v46  ;;  %v16955_v46 = vld [vmem:[%s23704_s0 + $0x870] sm:$0xff]  }
 0x438   :  { %v16273_v42 = vpop.f32.mrf.mxu1  ;;  %16376 = vmatmul.mubr.msk.bf16.gmra.mxu1 %vm6186_vm1, %v6075_v6  ;;  %v21202_v10 = vpop.f32.mrf.mxu0 }
 0x439   :  { %24118 = vst [vmem:[#allocation45_spill] sm:$0xff] %v21196_v61  ;;  %v21205_v62 = vadd.f32 %v16273_v42, %v24119_v13  ;;  %16383 = vmatprep.mubr.msk.bf16.mxu1 %vm6186_vm1, %v6076_v58  ;;  %v6078_v42 = vpack.c.bf16 %v5703_v7, %v5702_v52  ;;  %v4616_v58 = vadd.f32 %v20952_v49, %v20905_v18  ;;  %v16944_v52 = vld [vmem:[%s23705_s3 + $0xc0] sm:$0xff]   ;;  %v16953_v18 = vld [vmem:[%s23704_s0 + $0x868] sm:$0xff]   ;;  %v24124_v7 = vld [vmem:[#allocation36_spill] sm:$0xff] }
 0x43a   :  { %v8495_v55 = vpop.f32.mrf.mxu1  ;;  %v21208_v50 = vpop.f32.mrf.mxu0  ;;  %15896 = vmatmul.mubr.msk.bf16.gmra.mxu0 %vm2100_vm0, %v16951_v4  ;;  %v24122_v4 = vld [vmem:[#allocation4_spill] sm:$0xff] }
 0x43b   :  { %24120 = vst [vmem:[#allocation16_spill] sm:$0xff] %v21208_v50  ;;  %v21212_v61 = vadd.f32 %v8495_v55, %v20855_v54  ;;  %15899 = vmatprep.mubr.msk.bf16.mxu0 %vm2100_vm0, %v16952_v29  ;;  %v4608_v54 = vadd.f32 %v20952_v49, %v24121_v26  ;;  %v4611_v29 = vadd.f32 %v20952_v49, %v24122_v4  ;;  %v5706_v26 = vmax.f32 %v4616_v58, 0.0  ;;  %v21256_v58 = vld [vmem:[%s23705_s3 + $0xd8] sm:$0xff]  }
 0x43c   :  { %v16274_v6 = vpop.f32.mrf.mxu1  ;;  %v21215_v0 = vpop.f32.mrf.mxu0  ;;  %24127 = vst [vmem:[#allocation46_spill] sm:$0xff] %v21256_v58 }
 0x43d   :  { %v21218_v13 = vadd.f32 %v16274_v6, %v20861_v1 }
 0x43e   :  { %v8498_v55 = vpop.f32.mrf.mxu1  ;;  %v21231_v1 = vpop.f32.mrf.mxu0 }
 0x43f   :  { %24123 = vst [vmem:[#allocation47_spill] sm:$0xff] %v21231_v1  ;;  %v21237_v59 = vadd.f32 %v8498_v55, %v24124_v7  ;;  %v5707_v1 = vmax.f32 %v4619_v17, 0.0  ;;  %v5704_v55 = vmax.f32 %v4608_v54, 0.0  ;;  %v5705_v7 = vmax.f32 %v4611_v29, 0.0 }
 0x440   :  { %v16277_v53 = vpop.f32.mrf.mxu1  ;;  %16384 = vmatmul.mubr.msk.bf16.vlgmr.msra.gmra.mxu1 %vm6186_vm1, %v6077_v33  ;;  %v21243_v6 = vpop.f32.mrf.mxu0  ;;  %v4632_v29 = vadd.f32 %v20952_v49, %v20944_v31  ;;  %v24134_v31 = vld [vmem:[#allocation37_spill] sm:$0xff] }
 0x441   :  { %24125 = vst [vmem:[#allocation18_spill] sm:$0xff] %v21237_v59  ;;  %v21246_v4 = vadd.f32 %v16277_v53, %v20889_v27  ;;  %16420 = vmatpush3.bf16.msra.mxu1 %v20899_v25  ;;  %16387 = vmatprep.mubr.msk.bf16.mxu1 %vm6186_vm1, %v6078_v42  ;;  %v24128_v27 = vld [vmem:[#allocation6_spill] sm:$0xff]  ;;  %v6080_v17 = vpack.c.bf16 %v5707_v1, %v5706_v26 }
 0x442   :  { %v8511_v59 = vpop.f32.mrf.mxu1  ;;  %16421 = vmatprep.subr.bf16.mxu1 %v16944_v52  ;;  %v21250_v50 = vpop.f32.mrf.mxu0  ;;  %15900 = vmatmul.mubr.msk.bf16.gmra.mxu0 %vm2100_vm0, %v16953_v18  ;;  %v4635_v18 = vadd.f32 %v20952_v49, %v20974_v37  ;;  %v6079_v53 = vpack.c.bf16 %v5705_v7, %v5704_v55  ;;  %v16957_v37 = vld [vmem:[%s23704_s0 + $0x880] sm:$0xff]   ;;  %v5710_v55 = vmax.f32 %v4632_v29, 0.0  ;;  %v24136_v7 = vld [vmem:[#allocation8_spill] sm:$0xff] }
 0x443   :  { %24126 = vst [vmem:[#allocation48_spill] sm:$0xff] %v21250_v50  ;;  %v21259_v33 = vadd.f32 %v8511_v59, %v24128_v27  ;;  %15903 = vmatprep.mubr.msk.bf16.mxu0 %vm2100_vm0, %v16955_v46  ;;  %v24131_v50 = vld [vmem:[#allocation5_spill] sm:$0xff]  ;;  %v24132_v27 = vld [vmem:[#allocation35_spill] sm:$0xff] }
 0x444   :  { %v16278_v25 = vpop.f32.mrf.mxu1  ;;  %v21262_v42 = vpop.f32.mrf.mxu0  ;;  %v4624_v59 = vadd.f32 %v20952_v49, %v24131_v50  ;;  %v4627_v46 = vadd.f32 %v20952_v49, %v24132_v27  ;;  %v5711_v27 = vmax.f32 %v4635_v18, 0.0  ;;  %v4651_v18 = vadd.f32 %v20952_v49, %v21012_v23 }
 0x445   :  { %24129 = vst [vmem:[#allocation49_spill] sm:$0xff] %v21259_v33  ;;  %v21265_v54 = vadd.f32 %v16278_v25, %v20908_v30  ;;  %16422 = vmatpush3.bf16.msra.mxu1 %v16944_v52  ;;  %v16956_v30 = vld [vmem:[%s23704_s0 + $0x878] sm:$0xff]  }
 0x446   :  { %v8514_v33 = vpop.f32.mrf.mxu1  ;;  %16459 = vmatprep.subr.bf16.mxu1 %v21256_v58  ;;  %v21276_v1 = vpop.f32.mrf.mxu0 }
 0x447   :  { %24130 = vst [vmem:[#allocation19_spill] sm:$0xff] %v21265_v54  ;;  %24133 = vst [vmem:[#allocation50_spill] sm:$0xff] %v21276_v1  ;;  %v21282_v26 = vadd.f32 %v8514_v33, %v24134_v31  ;;  %v5708_v1 = vmax.f32 %v4624_v59, 0.0  ;;  %v5709_v54 = vmax.f32 %v4627_v46, 0.0  ;;  %v24142_v46 = vld [vmem:[#allocation7_spill] sm:$0xff] }
 0x448   :  { %v16281_v50 = vpop.f32.mrf.mxu1  ;;  %16388 = vmatmul.mubr.msk.bf16.gmra.mxu1 %vm6186_vm1, %v6079_v53  ;;  %v21288_v52 = vpop.f32.mrf.mxu0 }
 0x449   :  { %24135 = vst [vmem:[#allocation20_spill] sm:$0xff] %v21282_v26  ;;  %v21291_v25 = vadd.f32 %v16281_v50, %v24136_v7  ;;  %16391 = vmatprep.mubr.msk.bf16.mxu1 %vm6186_vm1, %v6080_v17  ;;  %v24139_v26 = vld [vmem:[#allocation9_spill] sm:$0xff]  ;;  %v6082_v50 = vpack.c.bf16 %v5711_v27, %v5710_v55  ;;  %v24140_v7 = vld [vmem:[#allocation39_spill] sm:$0xff]  ;;  %v4648_v17 = vadd.f32 %v20952_v49, %v20987_v38  ;;  %v24145_v27 = vld [vmem:[#allocation10_spill] sm:$0xff] }
 0x44a   :  { %v8527_v33 = vpop.f32.mrf.mxu1  ;;  %v21294_v31 = vpop.f32.mrf.mxu0  ;;  %15904 = vmatmul.mubr.msk.bf16.gmra.mxu0 %vm2100_vm0, %v16956_v30  ;;  %v6081_v59 = vpack.c.bf16 %v5709_v54, %v5708_v1  ;;  %v4640_v30 = vadd.f32 %v20952_v49, %v24142_v46  ;;  %v16958_v55 = vld [vmem:[%s23704_s0 + $0x888] sm:$0xff]   ;;  %v16959_v38 = vld [vmem:[%s23704_s0 + $0x890] sm:$0xff]  }
 0x44b   :  { %24137 = vst [vmem:[#allocation21_spill] sm:$0xff] %v21291_v25  ;;  %24138 = vst [vmem:[#allocation52_spill] sm:$0xff] %v21294_v31  ;;  %v21298_v58 = vadd.f32 %v8527_v33, %v24139_v26  ;;  %15907 = vmatprep.mubr.msk.bf16.mxu0 %vm2100_vm0, %v16957_v37  ;;  %v24143_v26 = vld [vmem:[#allocation40_spill] sm:$0xff]  ;;  %v5714_v1 = vmax.f32 %v4648_v17, 0.0 }
 0x44c   :  { %v16282_v53 = vpop.f32.mrf.mxu1  ;;  %v21301_v29 = vpop.f32.mrf.mxu0  ;;  %v4643_v37 = vadd.f32 %v20952_v49, %v24143_v26  ;;  %v5715_v26 = vmax.f32 %v4651_v18, 0.0  ;;  %v4667_v18 = vadd.f32 %v20952_v49, %v21050_v12 }
 0x44d   :  { %v21304_v25 = vadd.f32 %v16282_v53, %v24140_v7  ;;  %v24147_v7 = vld [vmem:[#allocation38_spill] sm:$0xff] }
 0x44e   :  { %v8530_v33 = vpop.f32.mrf.mxu1  ;;  %v21314_v31 = vpop.f32.mrf.mxu0 }
 0x44f   :  { %24141 = vst [vmem:[#allocation22_spill] sm:$0xff] %v21304_v25  ;;  %24144 = vst [vmem:[#allocation53_spill] sm:$0xff] %v21314_v31  ;;  %v21320_v53 = vadd.f32 %v8530_v33, %v24145_v27  ;;  %v5712_v31 = vmax.f32 %v4640_v30, 0.0  ;;  %v5713_v25 = vmax.f32 %v4643_v37, 0.0  ;;  %v24149_v37 = vld [vmem:[#allocation42_spill] sm:$0xff] }
 0x450   :  { %v16285_v23 = vpop.f32.mrf.mxu1  ;;  %16392 = vmatmul.mubr.msk.bf16.gmra.mxu1 %vm6186_vm1, %v6081_v59  ;;  %v21326_v54 = vpop.f32.mrf.mxu0 }
 0x451   :  { %24146 = vst [vmem:[#allocation51_spill] sm:$0xff] %v21320_v53  ;;  %v21329_v46 = vadd.f32 %v16285_v23, %v24147_v7  ;;  %16395 = vmatprep.mubr.msk.bf16.mxu1 %vm6186_vm1, %v6082_v50  ;;  %v6084_v23 = vpack.c.bf16 %v5715_v26, %v5714_v1  ;;  %v4664_v50 = vadd.f32 %v20952_v49, %v21025_v24  ;;  %v24152_v1 = vld [vmem:[#allocation12_spill] sm:$0xff]  ;;  %v16961_v24 = vld [vmem:[%s23704_s0 + $0x8a0] sm:$0xff]  }
 0x452   :  { %v8543_v33 = vpop.f32.mrf.mxu1  ;;  %v21332_v27 = vpop.f32.mrf.mxu0  ;;  %15908 = vmatmul.mubr.msk.bf16.gmra.mxu0 %vm2100_vm0, %v16958_v55  ;;  %v6083_v30 = vpack.c.bf16 %v5713_v25, %v5712_v31  ;;  %v24150_v55 = vld [vmem:[#allocation41_spill] sm:$0xff] }
 0x453   :  { %24148 = vst [vmem:[#allocation54_spill] sm:$0xff] %v21332_v27  ;;  %v21336_v53 = vadd.f32 %v8543_v33, %v20984_v51  ;;  %15911 = vmatprep.mubr.msk.bf16.mxu0 %vm2100_vm0, %v16959_v38  ;;  %v4656_v51 = vadd.f32 %v20952_v49, %v24149_v37  ;;  %v4659_v38 = vadd.f32 %v20952_v49, %v24150_v55  ;;  %v5718_v31 = vmax.f32 %v4664_v50, 0.0 }
 0x454   :  { %v16286_v59 = vpop.f32.mrf.mxu1  ;;  %v21339_v17 = vpop.f32.mrf.mxu0  ;;  %v5719_v37 = vmax.f32 %v4667_v18, 0.0  ;;  %v4683_v18 = vadd.f32 %v20952_v49, %v21088_v9 }
 0x455   :  { %v21342_v7 = vadd.f32 %v16286_v59, %v20990_v57  ;;  %v16960_v57 = vld [vmem:[%s23704_s0 + $0x898] sm:$0xff]   ;;  %v5716_v55 = vmax.f32 %v4656_v51, 0.0 }
 0x456   :  { %v8546_v33 = vpop.f32.mrf.mxu1  ;;  %v21352_v27 = vpop.f32.mrf.mxu0 }
 0x457   :  { %24151 = vst [vmem:[#allocation23_spill] sm:$0xff] %v21352_v27  ;;  %v21358_v26 = vadd.f32 %v8546_v33, %v24152_v1  ;;  %v5717_v27 = vmax.f32 %v4659_v38, 0.0  ;;  %v24155_v38 = vld [vmem:[#allocation11_spill] sm:$0xff] }
 0x458   :  { %v16289_v12 = vpop.f32.mrf.mxu1  ;;  %16396 = vmatmul.mubr.msk.bf16.gmra.mxu1 %vm6186_vm1, %v6083_v30  ;;  %v21364_v25 = vpop.f32.mrf.mxu0 }
 0x459   :  { %24153 = vst [vmem:[#allocation24_spill] sm:$0xff] %v21358_v26  ;;  %v21367_v59 = vadd.f32 %v16289_v12, %v21015_v41  ;;  %16399 = vmatprep.mubr.msk.bf16.mxu1 %vm6186_vm1, %v6084_v23  ;;  %v6086_v41 = vpack.c.bf16 %v5719_v37, %v5718_v31  ;;  %v4680_v23 = vadd.f32 %v20952_v49, %v21063_v20  ;;  %v24158_v31 = vld [vmem:[#allocation13_spill] sm:$0xff]  ;;  %v16963_v20 = vld [vmem:[%s23704_s0 + $0x8b0] sm:$0xff]  }
 0x45a   :  { %v8559_v33 = vpop.f32.mrf.mxu1  ;;  %v21370_v1 = vpop.f32.mrf.mxu0  ;;  %15912 = vmatmul.mubr.msk.bf16.gmra.mxu0 %vm2100_vm0, %v16960_v57  ;;  %v6085_v51 = vpack.c.bf16 %v5717_v27, %v5716_v55  ;;  %v24156_v57 = vld [vmem:[#allocation14_spill] sm:$0xff] }
 0x45b   :  { %24154 = vst [vmem:[#allocation25_spill] sm:$0xff] %v21370_v1  ;;  %v21374_v26 = vadd.f32 %v8559_v33, %v21022_v47  ;;  %15915 = vmatprep.mubr.msk.bf16.mxu0 %vm2100_vm0, %v16961_v24  ;;  %v4672_v47 = vadd.f32 %v20952_v49, %v24155_v38  ;;  %v4675_v24 = vadd.f32 %v20952_v49, %v24156_v57  ;;  %v5722_v55 = vmax.f32 %v4680_v23, 0.0 }
 0x45c   :  { %v16290_v30 = vpop.f32.mrf.mxu1  ;;  %v21377_v50 = vpop.f32.mrf.mxu0  ;;  %v5723_v38 = vmax.f32 %v4683_v18, 0.0  ;;  %v4699_v18 = vadd.f32 %v20952_v49, %v21126_v19 }
 0x45d   :  { %v21380_v12 = vadd.f32 %v16290_v30, %v21028_v48  ;;  %v16962_v48 = vld [vmem:[%s23704_s0 + $0x8a8] sm:$0xff]   ;;  %v5720_v57 = vmax.f32 %v4672_v47, 0.0 }
 0x45e   :  { %v8562_v33 = vpop.f32.mrf.mxu1  ;;  %v21390_v1 = vpop.f32.mrf.mxu0 }
 0x45f   :  { %24157 = vst [vmem:[#allocation26_spill] sm:$0xff] %v21390_v1  ;;  %v21396_v37 = vadd.f32 %v8562_v33, %v24158_v31  ;;  %v5721_v1 = vmax.f32 %v4675_v24, 0.0  ;;  %v24161_v24 = vld [vmem:[#allocation43_spill] sm:$0xff] }
 0x460   :  { %v16293_v9 = vpop.f32.mrf.mxu1  ;;  %16400 = vmatmul.mubr.msk.bf16.gmra.mxu1 %vm6186_vm1, %v6085_v51  ;;  %v21402_v27 = vpop.f32.mrf.mxu0 }
 0x461   :  { %24159 = vst [vmem:[#allocation57_spill] sm:$0xff] %v21396_v37  ;;  %v21405_v30 = vadd.f32 %v16293_v9, %v21053_v8  ;;  %16403 = vmatprep.mubr.msk.bf16.mxu1 %vm6186_vm1, %v6086_v41  ;;  %v6088_v8 = vpack.c.bf16 %v5723_v38, %v5722_v55  ;;  %v4696_v41 = vadd.f32 %v20952_v49, %v21101_v3  ;;  %v24164_v55 = vld [vmem:[#allocation15_spill] sm:$0xff]  ;;  %v16966_v3 = vld [vmem:[%s23704_s0 + $0x8c0] sm:$0xff]  }
 0x462   :  { %v8575_v33 = vpop.f32.mrf.mxu1  ;;  %v21408_v31 = vpop.f32.mrf.mxu0  ;;  %15916 = vmatmul.mubr.msk.bf16.gmra.mxu0 %vm2100_vm0, %v16962_v48  ;;  %v6087_v47 = vpack.c.bf16 %v5721_v1, %v5720_v57  ;;  %v24162_v48 = vld [vmem:[#allocation44_spill] sm:$0xff] }
 0x463   :  { %24160 = vst [vmem:[#allocation56_spill] sm:$0xff] %v21408_v31  ;;  %v21412_v37 = vadd.f32 %v8575_v33, %v21060_v22  ;;  %15919 = vmatprep.mubr.msk.bf16.mxu0 %vm2100_vm0, %v16963_v20  ;;  %v4688_v22 = vadd.f32 %v20952_v49, %v24161_v24  ;;  %v4691_v20 = vadd.f32 %v20952_v49, %v24162_v48  ;;  %v5726_v57 = vmax.f32 %v4696_v41, 0.0 }
 0x464   :  { %v16294_v51 = vpop.f32.mrf.mxu1  ;;  %v21415_v23 = vpop.f32.mrf.mxu0  ;;  %v5727_v24 = vmax.f32 %v4699_v18, 0.0  ;;  %v4715_v18 = vadd.f32 %v20952_v49, %v21164_v15 }
 0x465   :  { %v21418_v9 = vadd.f32 %v16294_v51, %v21066_v63  ;;  %v16965_v63 = vld [vmem:[%s23704_s0 + $0x8b8] sm:$0xff]   ;;  %v5724_v48 = vmax.f32 %v4688_v22, 0.0 }
 0x466   :  { %v8578_v33 = vpop.f32.mrf.mxu1  ;;  %v21428_v31 = vpop.f32.mrf.mxu0 }
 0x467   :  { %24163 = vst [vmem:[#allocation55_spill] sm:$0xff] %v21428_v31  ;;  %v21434_v38 = vadd.f32 %v8578_v33, %v24164_v55  ;;  %v5725_v31 = vmax.f32 %v4691_v20, 0.0  ;;  %v4707_v20 = vadd.f32 %v20952_v49, %v21114_v28 }
 0x468   :  { %v16297_v19 = vpop.f32.mrf.mxu1  ;;  %16404 = vmatmul.mubr.msk.bf16.gmra.mxu1 %vm6186_vm1, %v6087_v47  ;;  %v21440_v1 = vpop.f32.mrf.mxu0 }
 0x469   :  { %24165 = vst [vmem:[#allocation27_spill] sm:$0xff] %v21434_v38  ;;  %v21443_v51 = vadd.f32 %v16297_v19, %v21091_v32  ;;  %16407 = vmatprep.mubr.msk.bf16.mxu1 %vm6186_vm1, %v6088_v8  ;;  %v6090_v32 = vpack.c.bf16 %v5727_v24, %v5726_v57  ;;  %v4712_v8 = vadd.f32 %v20952_v49, %v21139_v39  ;;  %v24166_v57 = vld [vmem:[#allocation17_spill] sm:$0xff]  ;;  %v16968_v39 = vld [vmem:[%s23704_s0 + $0x8d0] sm:$0xff]  }
 0x46a   :  { %v8591_v33 = vpop.f32.mrf.mxu1  ;;  %v21446_v55 = vpop.f32.mrf.mxu0  ;;  %15920 = vmatmul.mubr.msk.bf16.gmra.mxu0 %vm2100_vm0, %v16965_v63  ;;  %v6089_v22 = vpack.c.bf16 %v5725_v31, %v5724_v48  ;;  %v5731_v48 = vmax.f32 %v4715_v18, 0.0  ;;  %v4731_v18 = vadd.f32 %v20952_v49, %v21202_v10 }
 0x46b   :  { %v21450_v38 = vadd.f32 %v8591_v33, %v21098_v45  ;;  %15923 = vmatprep.mubr.msk.bf16.mxu0 %vm2100_vm0, %v16966_v3  ;;  %v4704_v45 = vadd.f32 %v20952_v49, %v21094_v44  ;;  %v5730_v28 = vmax.f32 %v4712_v8, 0.0 }
 0x46c   :  { %v16298_v47 = vpop.f32.mrf.mxu1  ;;  %v21453_v41 = vpop.f32.mrf.mxu0 }
 0x46d   :  { %v21456_v19 = vadd.f32 %v16298_v47, %v21104_v11  ;;  %v16967_v11 = vld [vmem:[%s23704_s0 + $0x8c8] sm:$0xff]   ;;  %v5728_v33 = vmax.f32 %v4704_v45, 0.0  ;;  %v5729_v47 = vmax.f32 %v4707_v20, 0.0  ;;  %v4723_v20 = vadd.f32 %v20952_v49, %v21152_v2 }
 0x46e   :  { %v8594_v63 = vpop.f32.mrf.mxu1  ;;  %v21466_v3 = vpop.f32.mrf.mxu0 }
 0x46f   :  { %v21472_v24 = vadd.f32 %v8594_v63, %v24166_v57  ;;  %v6091_v45 = vpack.c.bf16 %v5729_v47, %v5728_v33  ;;  %v5735_v33 = vmax.f32 %v4731_v18, 0.0  ;;  %v4747_v18 = vadd.f32 %v20952_v49, %v21243_v6 }
 0x470   :  { %v16305_v15 = vpop.f32.mrf.mxu1  ;;  %16408 = vmatmul.mubr.msk.bf16.gmra.mxu1 %vm6186_vm1, %v6089_v22  ;;  %v21478_v44 = vpop.f32.mrf.mxu0 }
 0x471   :  { %24167 = vst [vmem:[#allocation58_spill] sm:$0xff] %v21472_v24  ;;  %v21481_v31 = vadd.f32 %v16305_v15, %v21129_v16  ;;  %16411 = vmatprep.mubr.msk.bf16.mxu1 %vm6186_vm1, %v6090_v32  ;;  %v6092_v16 = vpack.c.bf16 %v5731_v48, %v5730_v28  ;;  %v4728_v32 = vadd.f32 %v20952_v49, %v21177_v35  ;;  %v16970_v35 = vld [vmem:[%s23704_s0 + $0x8e0] sm:$0xff]  }
 0x472   :  { %v8746_v63 = vpop.f32.mrf.mxu1  ;;  %v21484_v57 = vpop.f32.mrf.mxu0  ;;  %15924 = vmatmul.mubr.msk.bf16.gmra.mxu0 %vm2100_vm0, %v16967_v11 }
 0x473   :  { %v21488_v24 = vadd.f32 %v8746_v63, %v21136_v40  ;;  %15927 = vmatprep.mubr.msk.bf16.mxu0 %vm2100_vm0, %v16968_v39  ;;  %v4720_v40 = vadd.f32 %v20952_v49, %v21132_v56  ;;  %v5734_v2 = vmax.f32 %v4728_v32, 0.0  ;;  %v5733_v63 = vmax.f32 %v4723_v20, 0.0 }
 0x474   :  { %v16306_v22 = vpop.f32.mrf.mxu1  ;;  %v21491_v8 = vpop.f32.mrf.mxu0  ;;  %v4739_v20 = vadd.f32 %v20952_v49, %v21190_v36 }
 0x475   :  { %v21494_v15 = vadd.f32 %v16306_v22, %v21142_v5  ;;  %v16969_v5 = vld [vmem:[%s23704_s0 + $0x8d8] sm:$0xff]   ;;  %v5732_v47 = vmax.f32 %v4720_v40, 0.0 }
 0x476   :  { %v8749_v11 = vpop.f32.mrf.mxu1  ;;  %v21504_v39 = vpop.f32.mrf.mxu0 }
 0x477   :  { %v21510_v28 = vadd.f32 %v8749_v11, %v21158_v21  ;;  %v6093_v40 = vpack.c.bf16 %v5733_v63, %v5732_v47  ;;  %v5739_v63 = vmax.f32 %v4747_v18, 0.0  ;;  %v4763_v18 = vadd.f32 %v20952_v49, %v21288_v52 }
 0x478   :  { %v16309_v10 = vpop.f32.mrf.mxu1  ;;  %16412 = vmatmul.mubr.msk.bf16.gmra.mxu1 %vm6186_vm1, %v6091_v45  ;;  %v21516_v56 = vpop.f32.mrf.mxu0 }
 0x479   :  { %v21519_v48 = vadd.f32 %v16309_v10, %v21167_v60  ;;  %16415 = vmatprep.mubr.msk.bf16.mxu1 %vm6186_vm1, %v6092_v16  ;;  %v6094_v60 = vpack.c.bf16 %v5735_v33, %v5734_v2  ;;  %v4744_v16 = vadd.f32 %v20952_v49, %v21215_v0  ;;  %v24168_v2 = vld [vmem:[#allocation45_spill] sm:$0xff]  ;;  %v16972_v0 = vld [vmem:[%s23704_s0 + $0x8f0] sm:$0xff]  }
 0x47a   :  { %v8762_v21 = vpop.f32.mrf.mxu1  ;;  %v21522_v22 = vpop.f32.mrf.mxu0  ;;  %15928 = vmatmul.mubr.msk.bf16.gmra.mxu0 %vm2100_vm0, %v16969_v5 }
 0x47b   :  { %v21526_v11 = vadd.f32 %v8762_v21, %v21174_v14  ;;  %15931 = vmatprep.mubr.msk.bf16.mxu0 %vm2100_vm0, %v16970_v35  ;;  %v4736_v14 = vadd.f32 %v20952_v49, %v21170_v34  ;;  %v5738_v36 = vmax.f32 %v4744_v16, 0.0 }
 0x47c   :  { %v16310_v45 = vpop.f32.mrf.mxu1  ;;  %v21529_v32 = vpop.f32.mrf.mxu0 }
 0x47d   :  { %v21532_v10 = vadd.f32 %v16310_v45, %v21180_v43  ;;  %v16971_v43 = vld [vmem:[%s23704_s0 + $0x8e8] sm:$0xff]   ;;  %v5736_v21 = vmax.f32 %v4736_v14, 0.0  ;;  %v5737_v45 = vmax.f32 %v4739_v20, 0.0  ;;  %v24173_v20 = vld [vmem:[#allocation16_spill] sm:$0xff] }
 0x47e   :  { %v8765_v5 = vpop.f32.mrf.mxu1  ;;  %v21542_v35 = vpop.f32.mrf.mxu0 }
 0x47f   :  { %v21548_v33 = vadd.f32 %v8765_v5, %v24168_v2  ;;  %v6095_v14 = vpack.c.bf16 %v5737_v45, %v5736_v21 }
 0x480   :  { %v16313_v6 = vpop.f32.mrf.mxu1  ;;  %16416 = vmatmul.mubr.msk.bf16.gmra.mxu1 %vm6186_vm1, %v6093_v40  ;;  %v21554_v34 = vpop.f32.mrf.mxu0 }
 0x481   :  { %24169 = vst [vmem:[#allocation60_spill] sm:$0xff] %v21548_v33  ;;  %v21557_v47 = vadd.f32 %v16313_v6, %v21205_v62  ;;  %16423 = vmatprep.mubr.msk.bf16.mxu1 %vm6186_vm1, %v6094_v60  ;;  %v6096_v62 = vpack.c.bf16 %v5739_v63, %v5738_v36  ;;  %v4760_v60 = vadd.f32 %v20952_v49, %v21262_v42  ;;  %v16964_v36 = vld [vmem:[%s23705_s3 + $0xd0] sm:$0xff]   ;;  %v16973_v42 = vld [vmem:[%s23704_s0 + $0x8f8] sm:$0xff]   ;;  %v24176_v63 = vld [vmem:[#allocation18_spill] sm:$0xff] }
 0x482   :  { %v8778_v5 = vpop.f32.mrf.mxu1  ;;  %v21560_v2 = vpop.f32.mrf.mxu0  ;;  %15932 = vmatmul.mubr.msk.bf16.gmra.mxu0 %vm2100_vm0, %v16971_v43  ;;  %v24174_v43 = vld [vmem:[#allocation47_spill] sm:$0xff] }
 0x483   :  { %24170 = vst [vmem:[#allocation29_spill] sm:$0xff] %v21560_v2  ;;  %v21564_v33 = vadd.f32 %v8778_v5, %v21212_v61  ;;  %15935 = vmatprep.mubr.msk.bf16.mxu0 %vm2100_vm0, %v16972_v0  ;;  %v4752_v61 = vadd.f32 %v20952_v49, %v24173_v20  ;;  %v4755_v0 = vadd.f32 %v20952_v49, %v24174_v43  ;;  %v24178_v43 = vld [vmem:[#allocation46_spill] sm:$0xff] }
 0x484   :  { %v16314_v40 = vpop.f32.mrf.mxu1  ;;  %v21567_v16 = vpop.f32.mrf.mxu0 }
 0x485   :  { %24171 = vst [vmem:[#allocation28_spill] sm:$0xff] %v21564_v33  ;;  %v21570_v6 = vadd.f32 %v16314_v40, %v21218_v13  ;;  %v5742_v40 = vmax.f32 %v4760_v60, 0.0  ;;  %v5740_v2 = vmax.f32 %v4752_v61, 0.0  ;;  %v21605_v60 = vld [vmem:[%s23705_s3 + $0xe8] sm:$0xff]  }
 0x486   :  { %v8781_v5 = vpop.f32.mrf.mxu1  ;;  %v21583_v13 = vpop.f32.mrf.mxu0  ;;  %24180 = vst [vmem:[#allocation2_spill] sm:$0xff] %v21605_v60 }
 0x487   :  { %24172 = vst [vmem:[#allocation30_spill] sm:$0xff] %v21570_v6  ;;  %24175 = vst [vmem:[#allocation61_spill] sm:$0xff] %v21583_v13  ;;  %v21589_v52 = vadd.f32 %v8781_v5, %v24176_v63  ;;  %v5743_v13 = vmax.f32 %v4763_v18, 0.0  ;;  %v5741_v6 = vmax.f32 %v4755_v0, 0.0  ;;  %v24183_v18 = vld [vmem:[#allocation19_spill] sm:$0xff]  ;;  %v4776_v0 = vadd.f32 %v20952_v49, %v21301_v29 }
 0x488   :  { %v16317_v21 = vpop.f32.mrf.mxu1  ;;  %16424 = vmatmul.mubr.msk.bf16.vlgmr.msra.gmra.mxu1 %vm6186_vm1, %v6095_v14  ;;  %v21592_v45 = vpop.f32.mrf.mxu0 }
 0x489   :  { %v21595_v20 = vadd.f32 %v16317_v21, %v21246_v4  ;;  %16460 = vmatpush3.bf16.msra.mxu1 %v24178_v43  ;;  %16427 = vmatprep.mubr.msk.bf16.mxu1 %vm6186_vm1, %v6096_v62  ;;  %v24181_v4 = vld [vmem:[#allocation49_spill] sm:$0xff]  ;;  %v6098_v62 = vpack.c.bf16 %v5743_v13, %v5742_v40  ;;  %v6097_v43 = vpack.c.bf16 %v5741_v6, %v5740_v2  ;;  %v24188_v40 = vld [vmem:[#allocation20_spill] sm:$0xff]  ;;  %v5746_v2 = vmax.f32 %v4776_v0, 0.0 }
 0x48a   :  { %v8794_v33 = vpop.f32.mrf.mxu1  ;;  %16461 = vmatprep.subr.bf16.mxu1 %v16964_v36  ;;  %v21599_v5 = vpop.f32.mrf.mxu0  ;;  %15936 = vmatmul.mubr.msk.bf16.gmra.mxu0 %vm2100_vm0, %v16973_v42  ;;  %v4779_v42 = vadd.f32 %v20952_v49, %v21326_v54  ;;  %v24190_v6 = vld [vmem:[#allocation21_spill] sm:$0xff] }
 0x48b   :  { %24177 = vst [vmem:[#allocation62_spill] sm:$0xff] %v21595_v20  ;;  %24179 = vst [vmem:[#allocation59_spill] sm:$0xff] %v21599_v5  ;;  %v21608_v14 = vadd.f32 %v8794_v33, %v24181_v4  ;;  %v24185_v5 = vld [vmem:[#allocation48_spill] sm:$0xff]  ;;  %v24186_v33 = vld [vmem:[#allocation50_spill] sm:$0xff] }
 0x48c   :  { %v16318_v63 = vpop.f32.mrf.mxu1  ;;  %v21610_v21 = vpop.f32.mrf.mxu0  ;;  %v4768_v20 = vadd.f32 %v20952_v49, %v24185_v5  ;;  %v4771_v4 = vadd.f32 %v20952_v49, %v24186_v33  ;;  %v5747_v5 = vmax.f32 %v4779_v42, 0.0  ;;  %v21653_v42 = vld [vmem:[%s23706_s2] ss:$0 sm:$0xff] }
 0x48d   :  { %24182 = vst [vmem:[#allocation32_spill] sm:$0xff] %v21608_v14  ;;  %v21613_v61 = vadd.f32 %v16318_v63, %v24183_v18  ;;  %16462 = vmatpush3.bf16.msra.mxu1 %v16964_v36 }
 0x48e   :  { %v8797_v14 = vpop.f32.mrf.mxu1  ;;  %16499 = vmatprep.subr.bf16.mxu1 %v21605_v60  ;;  %v21624_v13 = vpop.f32.mrf.mxu0  ;;  %v5744_v18 = vmax.f32 %v4768_v20, 0.0  ;;  %v5745_v33 = vmax.f32 %v4771_v4, 0.0  ;;  %v4795_v20 = vadd.f32 %v20952_v49, %v21364_v25  ;;  %v24195_v4 = vld [vmem:[#allocation53_spill] sm:$0xff] }
 0x48f   :  { %24184 = vst [vmem:[#allocation3_spill] sm:$0xff] %v21613_v61  ;;  %24187 = vst [vmem:[#allocation31_spill] sm:$0xff] %v21624_v13  ;;  %v21627_v63 = vadd.f32 %v8797_v14, %v24188_v40  ;;  %v24192_v13 = vld [vmem:[#allocation22_spill] sm:$0xff] }
 0x490   :  { %v16321_v29 = vpop.f32.mrf.mxu1  ;;  %16428 = vmatmul.mubr.msk.bf16.gmra.mxu1 %vm6186_vm1, %v6097_v43  ;;  %v21630_v54 = vpop.f32.mrf.mxu0  ;;  %v6100_v43 = vpack.c.bf16 %v5747_v5, %v5746_v2  ;;  %v4787_v2 = vadd.f32 %v21653_v42, %v24195_v4  ;;  %v24196_v5 = vld [vmem:[#allocation51_spill] sm:$0xff] }
 0x491   :  { %24189 = vst [vmem:[#allocation34_spill] sm:$0xff] %v21627_v63  ;;  %v21633_v36 = vadd.f32 %v16321_v29, %v24190_v6  ;;  %16431 = vmatprep.mubr.msk.bf16.mxu1 %vm6186_vm1, %v6098_v62  ;;  %v4792_v29 = vadd.f32 %v20952_v49, %v21339_v17  ;;  %v6099_v62 = vpack.c.bf16 %v5745_v33, %v5744_v18  ;;  %v5751_v33 = vmax.f32 %v4795_v20, 0.0 }
 0x492   :  { %v8810_v61 = vpop.f32.mrf.mxu1  ;;  %v21636_v60 = vpop.f32.mrf.mxu0  ;;  %v5749_v4 = vmax.f32 %v4787_v2, 0.0 }
 0x493   :  { %24191 = vst [vmem:[#allocation33_spill] sm:$0xff] %v21636_v60  ;;  %v21639_v14 = vadd.f32 %v8810_v61, %v21298_v58  ;;  %v24194_v58 = vld [vmem:[#allocation52_spill] sm:$0xff]  ;;  %v5750_v25 = vmax.f32 %v4792_v29, 0.0 }
 0x494   :  { %v16322_v40 = vpop.f32.mrf.mxu1  ;;  %v21641_v63 = vpop.f32.mrf.mxu0  ;;  %v4784_v61 = vadd.f32 %v21653_v42, %v24194_v58 }
 0x495   :  { %v21644_v0 = vadd.f32 %v16322_v40, %v24192_v13 }
 0x496   :  { %v8813_v13 = vpop.f32.mrf.mxu1  ;;  %v21659_v6 = vpop.f32.mrf.mxu0  ;;  %v5748_v58 = vmax.f32 %v4784_v61, 0.0  ;;  %v24200_v61 = vld [vmem:[#allocation54_spill] sm:$0xff] }
 0x497   :  { %24193 = vst [vmem:[#allocation4_spill] sm:$0xff] %v21644_v0  ;;  %v21662_v17 = vadd.f32 %v8813_v13, %v24196_v5  ;;  %v4800_v2 = vadd.f32 %v21653_v42, %v24200_v61 }
 0x498   :  { %v16325_v40 = vpop.f32.mrf.mxu1  ;;  %16432 = vmatmul.mubr.msk.bf16.gmra.mxu1 %vm6186_vm1, %v6099_v62  ;;  %v21665_v49 = vpop.f32.mrf.mxu0  ;;  %v6102_v62 = vpack.c.bf16 %v5751_v33, %v5750_v25  ;;  %v6101_v20 = vpack.c.bf16 %v5749_v4, %v5748_v58  ;;  %v24202_v25 = vld [vmem:[#allocation24_spill] sm:$0xff] }
 0x499   :  { %24197 = vst [vmem:[#allocation36_spill] sm:$0xff] %v21662_v17  ;;  %v21668_v18 = vadd.f32 %v16325_v40, %v21329_v46  ;;  %16435 = vmatprep.mubr.msk.bf16.mxu1 %vm6186_vm1, %v6100_v43  ;;  %v4808_v46 = vadd.f32 %v21653_v42, %v21377_v50  ;;  %v4811_v43 = vadd.f32 %v21653_v42, %v21402_v27  ;;  %v24201_v40 = vld [vmem:[#allocation23_spill] sm:$0xff]  ;;  %v5752_v4 = vmax.f32 %v4800_v2, 0.0  ;;  %v24206_v2 = vld [vmem:[#allocation25_spill] sm:$0xff] }
 0x49a   :  { %v8826_v60 = vpop.f32.mrf.mxu1  ;;  %v21671_v0 = vpop.f32.mrf.mxu0 }
 0x49b   :  { %24198 = vst [vmem:[#allocation6_spill] sm:$0xff] %v21671_v0  ;;  %v21674_v13 = vadd.f32 %v8826_v60, %v21336_v53  ;;  %v4803_v53 = vadd.f32 %v21653_v42, %v24201_v40  ;;  %v5755_v58 = vmax.f32 %v4811_v43, 0.0 }
 0x49c   :  { %v16326_v5 = vpop.f32.mrf.mxu1  ;;  %v21676_v17 = vpop.f32.mrf.mxu0 }
 0x49d   :  { %v21679_v29 = vadd.f32 %v16326_v5, %v21342_v7  ;;  %v5754_v5 = vmax.f32 %v4808_v46, 0.0  ;;  %v5753_v61 = vmax.f32 %v4803_v53, 0.0  ;;  %v4816_v53 = vadd.f32 %v21653_v42, %v24206_v2 }
 0x49e   :  { %v8829_v60 = vpop.f32.mrf.mxu1  ;;  %v21689_v0 = vpop.f32.mrf.mxu0 }
 0x49f   :  { %24199 = vst [vmem:[#allocation5_spill] sm:$0xff] %v21679_v29  ;;  %v21692_v33 = vadd.f32 %v8829_v60, %v24202_v25  ;;  %v6103_v43 = vpack.c.bf16 %v5753_v61, %v5752_v4  ;;  %v5756_v61 = vmax.f32 %v4816_v53, 0.0  ;;  %v24212_v53 = vld [vmem:[#allocation56_spill] sm:$0xff] }
 0x4a0   :  { %v16329_v7 = vpop.f32.mrf.mxu1  ;;  %16436 = vmatmul.mubr.msk.bf16.gmra.mxu1 %vm6186_vm1, %v6101_v20  ;;  %v21695_v50 = vpop.f32.mrf.mxu0  ;;  %v6104_v20 = vpack.c.bf16 %v5755_v58, %v5754_v5  ;;  %v24208_v5 = vld [vmem:[#allocation57_spill] sm:$0xff] }
 0x4a1   :  { %24203 = vst [vmem:[#allocation35_spill] sm:$0xff] %v21692_v33  ;;  %v21698_v27 = vadd.f32 %v16329_v7, %v21367_v59  ;;  %16439 = vmatprep.mubr.msk.bf16.mxu1 %vm6186_vm1, %v6102_v62  ;;  %v4824_v59 = vadd.f32 %v21653_v42, %v21415_v23  ;;  %v4827_v62 = vadd.f32 %v21653_v42, %v21440_v1  ;;  %v24207_v7 = vld [vmem:[#allocation26_spill] sm:$0xff] }
 0x4a2   :  { %v8842_v40 = vpop.f32.mrf.mxu1  ;;  %v21701_v29 = vpop.f32.mrf.mxu0 }
 0x4a3   :  { %24204 = vst [vmem:[#allocation37_spill] sm:$0xff] %v21701_v29  ;;  %v21704_v60 = vadd.f32 %v8842_v40, %v21374_v26  ;;  %v4819_v26 = vadd.f32 %v21653_v42, %v24207_v7  ;;  %v5759_v4 = vmax.f32 %v4827_v62, 0.0 }
 0x4a4   :  { %v16330_v25 = vpop.f32.mrf.mxu1  ;;  %v21706_v33 = vpop.f32.mrf.mxu0 }
 0x4a5   :  { %v21709_v46 = vadd.f32 %v16330_v25, %v21380_v12  ;;  %v5758_v25 = vmax.f32 %v4824_v59, 0.0  ;;  %v5757_v2 = vmax.f32 %v4819_v26, 0.0  ;;  %v4832_v26 = vadd.f32 %v21653_v42, %v24212_v53 }
 0x4a6   :  { %v8845_v40 = vpop.f32.mrf.mxu1  ;;  %v21719_v29 = vpop.f32.mrf.mxu0 }
 0x4a7   :  { %24205 = vst [vmem:[#allocation8_spill] sm:$0xff] %v21709_v46  ;;  %v21722_v58 = vadd.f32 %v8845_v40, %v24208_v5  ;;  %v6105_v62 = vpack.c.bf16 %v5757_v2, %v5756_v61  ;;  %v5760_v2 = vmax.f32 %v4832_v26, 0.0  ;;  %v4848_v26 = vadd.f32 %v21653_v42, %v21446_v55 }
 0x4a8   :  { %v16333_v12 = vpop.f32.mrf.mxu1  ;;  %16440 = vmatmul.mubr.msk.bf16.gmra.mxu1 %vm6186_vm1, %v6103_v43  ;;  %v21725_v23 = vpop.f32.mrf.mxu0  ;;  %v6106_v43 = vpack.c.bf16 %v5759_v4, %v5758_v25  ;;  %v24214_v25 = vld [vmem:[#allocation27_spill] sm:$0xff] }
 0x4a9   :  { %24209 = vst [vmem:[#allocation9_spill] sm:$0xff] %v21722_v58  ;;  %v21728_v1 = vadd.f32 %v16333_v12, %v21405_v30  ;;  %16443 = vmatprep.mubr.msk.bf16.mxu1 %vm6186_vm1, %v6104_v20  ;;  %v4840_v30 = vadd.f32 %v21653_v42, %v21453_v41  ;;  %v4843_v20 = vadd.f32 %v21653_v42, %v21478_v44  ;;  %v24213_v12 = vld [vmem:[#allocation55_spill] sm:$0xff] }
 0x4aa   :  { %v8858_v7 = vpop.f32.mrf.mxu1  ;;  %v21731_v46 = vpop.f32.mrf.mxu0 }
 0x4ab   :  { %24210 = vst [vmem:[#allocation39_spill] sm:$0xff] %v21731_v46  ;;  %v21734_v40 = vadd.f32 %v8858_v7, %v21412_v37  ;;  %v4835_v37 = vadd.f32 %v21653_v42, %v24213_v12  ;;  %v5763_v61 = vmax.f32 %v4843_v20, 0.0 }
 0x4ac   :  { %v16334_v5 = vpop.f32.mrf.mxu1  ;;  %v21736_v58 = vpop.f32.mrf.mxu0 }
 0x4ad   :  { %v21739_v59 = vadd.f32 %v16334_v5, %v21418_v9  ;;  %v5762_v5 = vmax.f32 %v4840_v30, 0.0  ;;  %v5761_v53 = vmax.f32 %v4835_v37, 0.0 }
 0x4ae   :  { %v8861_v7 = vpop.f32.mrf.mxu1  ;;  %v21749_v46 = vpop.f32.mrf.mxu0 }
 0x4af   :  { %24211 = vst [vmem:[#allocation7_spill] sm:$0xff] %v21739_v59  ;;  %v21752_v4 = vadd.f32 %v8861_v7, %v24214_v25  ;;  %v6107_v20 = vpack.c.bf16 %v5761_v53, %v5760_v2  ;;  %v5764_v2 = vmax.f32 %v4848_v26, 0.0  ;;  %v4864_v26 = vadd.f32 %v21653_v42, %v21484_v57 }
 0x4b0   :  { %v16337_v9 = vpop.f32.mrf.mxu1  ;;  %16444 = vmatmul.mubr.msk.bf16.gmra.mxu1 %vm6186_vm1, %v6105_v62  ;;  %v21755_v41 = vpop.f32.mrf.mxu0  ;;  %v6108_v62 = vpack.c.bf16 %v5763_v61, %v5762_v5  ;;  %v24216_v5 = vld [vmem:[#allocation58_spill] sm:$0xff] }
 0x4b1   :  { %24215 = vst [vmem:[#allocation40_spill] sm:$0xff] %v21752_v4  ;;  %v21758_v44 = vadd.f32 %v16337_v9, %v21443_v51  ;;  %16447 = vmatprep.mubr.msk.bf16.mxu1 %vm6186_vm1, %v6106_v43  ;;  %v4856_v51 = vadd.f32 %v21653_v42, %v21491_v8  ;;  %v4859_v43 = vadd.f32 %v21653_v42, %v21516_v56 }
 0x4b2   :  { %v8874_v12 = vpop.f32.mrf.mxu1  ;;  %v21761_v59 = vpop.f32.mrf.mxu0 }
 0x4b3   :  { %v21764_v7 = vadd.f32 %v8874_v12, %v21450_v38  ;;  %v4851_v38 = vadd.f32 %v21653_v42, %v21466_v3  ;;  %v5766_v12 = vmax.f32 %v4856_v51, 0.0  ;;  %v5767_v55 = vmax.f32 %v4859_v43, 0.0 }
 0x4b4   :  { %v16338_v25 = vpop.f32.mrf.mxu1  ;;  %v21766_v4 = vpop.f32.mrf.mxu0 }
 0x4b5   :  { %v21769_v30 = vadd.f32 %v16338_v25, %v21456_v19  ;;  %v5765_v3 = vmax.f32 %v4851_v38, 0.0 }
 0x4b6   :  { %v8877_v37 = vpop.f32.mrf.mxu1  ;;  %v21779_v9 = vpop.f32.mrf.mxu0 }
 0x4b7   :  { %v21782_v61 = vadd.f32 %v8877_v37, %v24216_v5  ;;  %v6109_v43 = vpack.c.bf16 %v5765_v3, %v5764_v2  ;;  %v5768_v2 = vmax.f32 %v4864_v26, 0.0  ;;  %v4880_v26 = vadd.f32 %v21653_v42, %v21522_v22 }
 0x4b8   :  { %v16345_v19 = vpop.f32.mrf.mxu1  ;;  %16448 = vmatmul.mubr.msk.bf16.gmra.mxu1 %vm6186_vm1, %v6107_v20  ;;  %v21785_v8 = vpop.f32.mrf.mxu0  ;;  %v6110_v20 = vpack.c.bf16 %v5767_v55, %v5766_v12 }
 0x4b9   :  { %24217 = vst [vmem:[#allocation10_spill] sm:$0xff] %v21782_v61  ;;  %v21788_v56 = vadd.f32 %v16345_v19, %v21481_v31  ;;  %16451 = vmatprep.mubr.msk.bf16.mxu1 %vm6186_vm1, %v6108_v62  ;;  %v4872_v31 = vadd.f32 %v21653_v42, %v21529_v32  ;;  %v4875_v62 = vadd.f32 %v21653_v42, %v21554_v34 }
 0x4ba   :  { %v9029_v53 = vpop.f32.mrf.mxu1  ;;  %v21791_v25 = vpop.f32.mrf.mxu0 }
 0x4bb   :  { %v21794_v37 = vadd.f32 %v9029_v53, %v21488_v24  ;;  %v4867_v24 = vadd.f32 %v21653_v42, %v21504_v39  ;;  %v5770_v55 = vmax.f32 %v4872_v31, 0.0  ;;  %v5771_v57 = vmax.f32 %v4875_v62, 0.0 }
 0x4bc   :  { %v16346_v5 = vpop.f32.mrf.mxu1  ;;  %v21796_v61 = vpop.f32.mrf.mxu0 }
 0x4bd   :  { %v21799_v51 = vadd.f32 %v16346_v5, %v21494_v15  ;;  %v5769_v39 = vmax.f32 %v4867_v24, 0.0 }
 0x4be   :  { %v9032_v38 = vpop.f32.mrf.mxu1  ;;  %v21809_v19 = vpop.f32.mrf.mxu0 }
 0x4bf   :  { %v21812_v12 = vadd.f32 %v9032_v38, %v21510_v28  ;;  %v6111_v62 = vpack.c.bf16 %v5769_v39, %v5768_v2  ;;  %v5772_v2 = vmax.f32 %v4880_v26, 0.0  ;;  %v24226_v26 = vld [vmem:[#allocation29_spill] sm:$0xff] }
 0x4c0   :  { %v16349_v15 = vpop.f32.mrf.mxu1  ;;  %16452 = vmatmul.mubr.msk.bf16.gmra.mxu1 %vm6186_vm1, %v6109_v43  ;;  %v21815_v32 = vpop.f32.mrf.mxu0  ;;  %v6112_v43 = vpack.c.bf16 %v5771_v57, %v5770_v55  ;;  %v24220_v55 = vld [vmem:[#allocation60_spill] sm:$0xff] }
 0x4c1   :  { %v21818_v34 = vadd.f32 %v16349_v15, %v21519_v48  ;;  %16455 = vmatprep.mubr.msk.bf16.mxu1 %vm6186_vm1, %v6110_v20  ;;  %v4888_v48 = vadd.f32 %v21653_v42, %v21567_v16  ;;  %v4891_v20 = vadd.f32 %v21653_v42, %v21592_v45 }
 0x4c2   :  { %v9045_v3 = vpop.f32.mrf.mxu1  ;;  %v21821_v53 = vpop.f32.mrf.mxu0 }
 0x4c3   :  { %24218 = vst [vmem:[#allocation38_spill] sm:$0xff] %v21821_v53  ;;  %v21824_v28 = vadd.f32 %v9045_v3, %v21526_v11  ;;  %v4883_v11 = vadd.f32 %v21653_v42, %v21542_v35  ;;  %v5774_v3 = vmax.f32 %v4888_v48, 0.0  ;;  %v5775_v22 = vmax.f32 %v4891_v20, 0.0  ;;  %v24224_v53 = vld [vmem:[#allocation30_spill] sm:$0xff] }
 0x4c4   :  { %v16350_v5 = vpop.f32.mrf.mxu1  ;;  %v21826_v38 = vpop.f32.mrf.mxu0 }
 0x4c5   :  { %v21829_v31 = vadd.f32 %v16350_v5, %v21532_v10  ;;  %v5773_v35 = vmax.f32 %v4883_v11, 0.0  ;;  %v4896_v11 = vadd.f32 %v21653_v42, %v24226_v26  ;;  %v24232_v26 = vld [vmem:[#allocation2_spill] sm:$0xff] }
 0x4c6   :  { %v9048_v24 = vpop.f32.mrf.mxu1  ;;  %v21839_v15 = vpop.f32.mrf.mxu0 }
 0x4c7   :  { %24219 = vst [vmem:[#allocation42_spill] sm:$0xff] %v21839_v15  ;;  %v21842_v57 = vadd.f32 %v9048_v24, %v24220_v55  ;;  %v24223_v15 = vld [vmem:[#allocation28_spill] sm:$0xff]  ;;  %v6113_v20 = vpack.c.bf16 %v5773_v35, %v5772_v2  ;;  %v24230_v35 = vld [vmem:[#allocation62_spill] sm:$0xff] }
 0x4c8   :  { %v16353_v10 = vpop.f32.mrf.mxu1  ;;  %16456 = vmatmul.mubr.msk.bf16.gmra.mxu1 %vm6186_vm1, %v6111_v62  ;;  %v21845_v16 = vpop.f32.mrf.mxu0  ;;  %v6114_v62 = vpack.c.bf16 %v5775_v22, %v5774_v3  ;;  %v16975_v3 = vld [vmem:[%s23705_s3 + $0xe0] sm:$0xff]  }
 0x4c9   :  { %24221 = vst [vmem:[#allocation41_spill] sm:$0xff] %v21842_v57  ;;  %v21848_v45 = vadd.f32 %v16353_v10, %v21557_v47  ;;  %16463 = vmatprep.mubr.msk.bf16.mxu1 %vm6186_vm1, %v6112_v43  ;;  %v4904_v47 = vadd.f32 %v21653_v42, %v21610_v21  ;;  %v4907_v43 = vadd.f32 %v21653_v42, %v21630_v54  ;;  %v24227_v10 = vld [vmem:[#allocation61_spill] sm:$0xff] }
 0x4ca   :  { %v9061_v39 = vpop.f32.mrf.mxu1  ;;  %v21851_v5 = vpop.f32.mrf.mxu0 }
 0x4cb   :  { %24222 = vst [vmem:[#allocation12_spill] sm:$0xff] %v21851_v5  ;;  %v21854_v24 = vadd.f32 %v9061_v39, %v24223_v15  ;;  %v4899_v15 = vadd.f32 %v21653_v42, %v24227_v10  ;;  %v5778_v2 = vmax.f32 %v4904_v47, 0.0  ;;  %v5779_v10 = vmax.f32 %v4907_v43, 0.0  ;;  %v24234_v47 = vld [vmem:[#allocation32_spill] sm:$0xff] }
 0x4cc   :  { %v16354_v55 = vpop.f32.mrf.mxu1  ;;  %v21856_v57 = vpop.f32.mrf.mxu0  ;;  %v5776_v5 = vmax.f32 %v4896_v11, 0.0  ;;  %v4920_v11 = vadd.f32 %v21653_v42, %v21641_v63 }
 0x4cd   :  { %v21859_v48 = vadd.f32 %v16354_v55, %v24224_v53 }
 0x4ce   :  { %v9064_v39 = vpop.f32.mrf.mxu1  ;;  %v21872_v53 = vpop.f32.mrf.mxu0 }
 0x4cf   :  { %24225 = vst [vmem:[#allocation11_spill] sm:$0xff] %v21859_v48  ;;  %24228 = vst [vmem:[#allocation14_spill] sm:$0xff] %v21872_v53  ;;  %v21875_v22 = vadd.f32 %v9064_v39, %v21589_v52  ;;  %v5777_v48 = vmax.f32 %v4899_v15, 0.0  ;;  %v4923_v15 = vadd.f32 %v21653_v42, %v21665_v49 }
 0x4d0   :  { %v16357_v21 = vpop.f32.mrf.mxu1  ;;  %16464 = vmatmul.mubr.msk.bf16.vlgmr.msra.gmra.mxu1 %vm6186_vm1, %v6113_v20  ;;  %v21878_v54 = vpop.f32.mrf.mxu0  ;;  %v21890_v20 = vld [vmem:[%s23705_s3 + $0xf8] sm:$0xff]  }
 0x4d1   :  { %24229 = vst [vmem:[#allocation13_spill] sm:$0xff] %v21875_v22  ;;  %v21881_v55 = vadd.f32 %v16357_v21, %v24230_v35  ;;  %16500 = vmatpush3.bf16.msra.mxu1 %v24232_v26  ;;  %16467 = vmatprep.mubr.msk.bf16.mxu1 %vm6186_vm1, %v6114_v62  ;;  %v6116_v26 = vpack.c.bf16 %v5779_v10, %v5778_v2  ;;  %v24236_v62 = vld [vmem:[#allocation3_spill] sm:$0xff]  ;;  %v24241_v10 = vld [vmem:[#allocation34_spill] sm:$0xff] }
 0x4d2   :  { %v9077_v53 = vpop.f32.mrf.mxu1  ;;  %16501 = vmatprep.subr.bf16.mxu1 %v16975_v3  ;;  %v21885_v52 = vpop.f32.mrf.mxu0 }
 0x4d3   :  { %24231 = vst [vmem:[#allocation43_spill] sm:$0xff] %v21881_v55  ;;  %24233 = vst [vmem:[#allocation44_spill] sm:$0xff] %v21885_v52  ;;  %v21893_v39 = vadd.f32 %v9077_v53, %v24234_v47  ;;  %v6115_v52 = vpack.c.bf16 %v5777_v48, %v5776_v5  ;;  %v24238_v55 = vld [vmem:[#allocation59_spill] sm:$0xff]  ;;  %v5782_v5 = vmax.f32 %v4920_v11, 0.0 }
 0x4d4   :  { %v16358_v21 = vpop.f32.mrf.mxu1  ;;  %v21895_v35 = vpop.f32.mrf.mxu0  ;;  %v4912_v22 = vadd.f32 %v21653_v42, %v24238_v55  ;;  %v24239_v53 = vld [vmem:[#allocation31_spill] sm:$0xff] }
 0x4d5   :  { %24235 = vst [vmem:[#allocation15_spill] sm:$0xff] %v21893_v39  ;;  %v21898_v43 = vadd.f32 %v16358_v21, %v24236_v62  ;;  %16502 = vmatpush3.bf16.msra.mxu1 %v16975_v3  ;;  %v4915_v47 = vadd.f32 %v21653_v42, %v24239_v53  ;;  %v5783_v3 = vmax.f32 %v4923_v15, 0.0  ;;  %v24245_v15 = vld [vmem:[#allocation33_spill] sm:$0xff] }
 0x4d6   :  { %v9080_v39 = vpop.f32.mrf.mxu1  ;;  %16539 = vmatprep.subr.bf16.mxu1 %v21890_v20  ;;  %v21909_v2 = vpop.f32.mrf.mxu0  ;;  %v5780_v55 = vmax.f32 %v4912_v22, 0.0  ;;  %v4939_v22 = vadd.f32 %v21653_v42, %v21695_v50 }
 0x4d7   :  { %24237 = vst [vmem:[#allocation17_spill] sm:$0xff] %v21898_v43  ;;  %24240 = vst [vmem:[#allocation45_spill] sm:$0xff] %v21909_v2  ;;  %v21912_v21 = vadd.f32 %v9080_v39, %v24241_v10  ;;  %v5781_v62 = vmax.f32 %v4915_v47, 0.0  ;;  %v24244_v2 = vld [vmem:[#allocation4_spill] sm:$0xff]  ;;  %v4928_v47 = vadd.f32 %v21653_v42, %v24245_v15 }
 0x4d8   :  { %v16361_v63 = vpop.f32.mrf.mxu1  ;;  %16468 = vmatmul.mubr.msk.bf16.gmra.mxu1 %vm6186_vm1, %v6115_v52  ;;  %v21915_v49 = vpop.f32.mrf.mxu0  ;;  %v6118_v52 = vpack.c.bf16 %v5783_v3, %v5782_v5  ;;  %v24247_v5 = vld [vmem:[#allocation36_spill] sm:$0xff] }
 0x4d9   :  { %24242 = vst [vmem:[#allocation16_spill] sm:$0xff] %v21912_v21  ;;  %v21918_v48 = vadd.f32 %v16361_v63, %v21633_v36  ;;  %16471 = vmatprep.mubr.msk.bf16.mxu1 %vm6186_vm1, %v6116_v26  ;;  %v4936_v36 = vadd.f32 %v21653_v42, %v21676_v17  ;;  %v6117_v26 = vpack.c.bf16 %v5781_v62, %v5780_v55  ;;  %v5787_v55 = vmax.f32 %v4939_v22, 0.0 }
 0x4da   :  { %v9093_v53 = vpop.f32.mrf.mxu1  ;;  %v21921_v43 = vpop.f32.mrf.mxu0  ;;  %v5784_v62 = vmax.f32 %v4928_v47, 0.0  ;;  %v24251_v47 = vld [vmem:[#allocation6_spill] sm:$0xff] }
 0x4db   :  { %24243 = vst [vmem:[#allocation47_spill] sm:$0xff] %v21921_v43  ;;  %v21924_v39 = vadd.f32 %v9093_v53, %v21639_v14  ;;  %v4931_v14 = vadd.f32 %v21653_v42, %v21659_v6 }
 0x4dc   :  { %v16362_v10 = vpop.f32.mrf.mxu1  ;;  %v21926_v21 = vpop.f32.mrf.mxu0 }
 0x4dd   :  { %v21929_v11 = vadd.f32 %v16362_v10, %v24244_v2  ;;  %v5786_v10 = vmax.f32 %v4936_v36, 0.0  ;;  %v5785_v6 = vmax.f32 %v4931_v14, 0.0  ;;  %v4944_v14 = vadd.f32 %v21653_v42, %v24251_v47 }
 0x4de   :  { %v9096_v63 = vpop.f32.mrf.mxu1  ;;  %v21939_v53 = vpop.f32.mrf.mxu0 }
 0x4df   :  { %24246 = vst [vmem:[#allocation18_spill] sm:$0xff] %v21939_v53  ;;  %v21942_v3 = vadd.f32 %v9096_v63, %v24247_v5  ;;  %v24250_v53 = vld [vmem:[#allocation5_spill] sm:$0xff]  ;;  %v6119_v22 = vpack.c.bf16 %v5785_v6, %v5784_v62  ;;  %v5788_v6 = vmax.f32 %v4944_v14, 0.0 }
 0x4e0   :  { %v16365_v2 = vpop.f32.mrf.mxu1  ;;  %16472 = vmatmul.mubr.msk.bf16.gmra.mxu1 %vm6186_vm1, %v6117_v26  ;;  %v21945_v17 = vpop.f32.mrf.mxu0  ;;  %v6120_v26 = vpack.c.bf16 %v5787_v55, %v5786_v10  ;;  %v24253_v10 = vld [vmem:[#allocation35_spill] sm:$0xff]  ;;  %v24257_v14 = vld [vmem:[#allocation37_spill] sm:$0xff] }
 0x4e1   :  { %24248 = vst [vmem:[#allocation46_spill] sm:$0xff] %v21942_v3  ;;  %v21948_v50 = vadd.f32 %v16365_v2, %v21668_v18  ;;  %16475 = vmatprep.mubr.msk.bf16.mxu1 %vm6186_vm1, %v6118_v52  ;;  %v4952_v18 = vadd.f32 %v21653_v42, %v21706_v33  ;;  %v4955_v52 = vadd.f32 %v21653_v42, %v21725_v23 }
 0x4e2   :  { %v9109_v15 = vpop.f32.mrf.mxu1  ;;  %v21951_v43 = vpop.f32.mrf.mxu0 }
 0x4e3   :  { %24249 = vst [vmem:[#allocation49_spill] sm:$0xff] %v21951_v43  ;;  %v21954_v63 = vadd.f32 %v9109_v15, %v21674_v13  ;;  %v4947_v13 = vadd.f32 %v21653_v42, %v21689_v0  ;;  %v5791_v62 = vmax.f32 %v4955_v52, 0.0 }
 0x4e4   :  { %v16366_v5 = vpop.f32.mrf.mxu1  ;;  %v21956_v3 = vpop.f32.mrf.mxu0 }
 0x4e5   :  { %v21959_v36 = vadd.f32 %v16366_v5, %v24250_v53  ;;  %v5790_v5 = vmax.f32 %v4952_v18, 0.0  ;;  %v5789_v0 = vmax.f32 %v4947_v13, 0.0  ;;  %v4960_v13 = vadd.f32 %v21653_v42, %v24257_v14 }
 0x4e6   :  { %v9112_v2 = vpop.f32.mrf.mxu1  ;;  %v21969_v15 = vpop.f32.mrf.mxu0 }
 0x4e7   :  { %24252 = vst [vmem:[#allocation19_spill] sm:$0xff] %v21969_v15  ;;  %v21972_v55 = vadd.f32 %v9112_v2, %v24253_v10  ;;  %v24256_v15 = vld [vmem:[#allocation8_spill] sm:$0xff]  ;;  %v6121_v52 = vpack.c.bf16 %v5789_v0, %v5788_v6  ;;  %v5792_v0 = vmax.f32 %v4960_v13, 0.0  ;;  %v24263_v13 = vld [vmem:[#allocation39_spill] sm:$0xff] }
 0x4e8   :  { %v16369_v53 = vpop.f32.mrf.mxu1  ;;  %16476 = vmatmul.mubr.msk.bf16.gmra.mxu1 %vm6186_vm1, %v6119_v22  ;;  %v21975_v33 = vpop.f32.mrf.mxu0  ;;  %v6122_v22 = vpack.c.bf16 %v5791_v62, %v5790_v5  ;;  %v24259_v5 = vld [vmem:[#allocation9_spill] sm:$0xff] }
 0x4e9   :  { %24254 = vst [vmem:[#allocation48_spill] sm:$0xff] %v21972_v55  ;;  %v21978_v23 = vadd.f32 %v16369_v53, %v21698_v27  ;;  %16479 = vmatprep.mubr.msk.bf16.mxu1 %vm6186_vm1, %v6120_v26  ;;  %v4968_v27 = vadd.f32 %v21653_v42, %v21736_v58  ;;  %v4971_v26 = vadd.f32 %v21653_v42, %v21755_v41 }
 0x4ea   :  { %v9125_v47 = vpop.f32.mrf.mxu1  ;;  %v21981_v43 = vpop.f32.mrf.mxu0 }
 0x4eb   :  { %24255 = vst [vmem:[#allocation50_spill] sm:$0xff] %v21981_v43  ;;  %v21984_v2 = vadd.f32 %v9125_v47, %v21704_v60  ;;  %v4963_v60 = vadd.f32 %v21653_v42, %v21719_v29  ;;  %v5795_v6 = vmax.f32 %v4971_v26, 0.0 }
 0x4ec   :  { %v16370_v10 = vpop.f32.mrf.mxu1  ;;  %v21986_v55 = vpop.f32.mrf.mxu0 }
 0x4ed   :  { %v21989_v18 = vadd.f32 %v16370_v10, %v24256_v15  ;;  %v5794_v10 = vmax.f32 %v4968_v27, 0.0  ;;  %v5793_v29 = vmax.f32 %v4963_v60, 0.0  ;;  %v4976_v60 = vadd.f32 %v21653_v42, %v24263_v13 }
 0x4ee   :  { %v9128_v53 = vpop.f32.mrf.mxu1  ;;  %v21999_v47 = vpop.f32.mrf.mxu0 }
 0x4ef   :  { %24258 = vst [vmem:[#allocation20_spill] sm:$0xff] %v21999_v47  ;;  %v22002_v62 = vadd.f32 %v9128_v53, %v24259_v5  ;;  %v24262_v47 = vld [vmem:[#allocation7_spill] sm:$0xff]  ;;  %v6123_v26 = vpack.c.bf16 %v5793_v29, %v5792_v0  ;;  %v5796_v29 = vmax.f32 %v4976_v60, 0.0  ;;  %v4992_v60 = vadd.f32 %v21653_v42, %v21761_v59 }
 0x4f0   :  { %v16373_v15 = vpop.f32.mrf.mxu1  ;;  %16480 = vmatmul.mubr.msk.bf16.gmra.mxu1 %vm6186_vm1, %v6121_v52  ;;  %v22005_v58 = vpop.f32.mrf.mxu0  ;;  %v6124_v52 = vpack.c.bf16 %v5795_v6, %v5794_v10  ;;  %v24264_v10 = vld [vmem:[#allocation40_spill] sm:$0xff] }
 0x4f1   :  { %24260 = vst [vmem:[#allocation21_spill] sm:$0xff] %v22002_v62  ;;  %v22008_v41 = vadd.f32 %v16373_v15, %v21728_v1  ;;  %16483 = vmatprep.mubr.msk.bf16.mxu1 %vm6186_vm1, %v6122_v22  ;;  %v4984_v1 = vadd.f32 %v21653_v42, %v21766_v4  ;;  %v4987_v22 = vadd.f32 %v21653_v42, %v21785_v8 }
 0x4f2   :  { %v9141_v14 = vpop.f32.mrf.mxu1  ;;  %v22011_v43 = vpop.f32.mrf.mxu0 }
 0x4f3   :  { %24261 = vst [vmem:[#allocation22_spill] sm:$0xff] %v22011_v43  ;;  %v22014_v53 = vadd.f32 %v9141_v14, %v21734_v40  ;;  %v4979_v40 = vadd.f32 %v21653_v42, %v21749_v46  ;;  %v5799_v0 = vmax.f32 %v4987_v22, 0.0 }
 0x4f4   :  { %v16374_v5 = vpop.f32.mrf.mxu1  ;;  %v22016_v62 = vpop.f32.mrf.mxu0 }
 0x4f5   :  { %v22019_v27 = vadd.f32 %v16374_v5, %v24262_v47  ;;  %v5798_v5 = vmax.f32 %v4984_v1, 0.0  ;;  %v5797_v46 = vmax.f32 %v4979_v40, 0.0 }
 0x4f6   :  { %v9144_v15 = vpop.f32.mrf.mxu1  ;;  %v22029_v14 = vpop.f32.mrf.mxu0 }
 0x4f7   :  { %v22032_v6 = vadd.f32 %v9144_v15, %v24264_v10  ;;  %v6125_v22 = vpack.c.bf16 %v5797_v46, %v5796_v29  ;;  %v5800_v29 = vmax.f32 %v4992_v60, 0.0  ;;  %v5008_v60 = vadd.f32 %v21653_v42, %v21791_v25 }
 0x4f8   :  { %v16377_v47 = vpop.f32.mrf.mxu1  ;;  %16484 = vmatmul.mubr.msk.bf16.gmra.mxu1 %vm6186_vm1, %v6123_v26  ;;  %v22035_v4 = vpop.f32.mrf.mxu0  ;;  %v6126_v26 = vpack.c.bf16 %v5799_v0, %v5798_v5  ;;  %v24266_v5 = vld [vmem:[#allocation10_spill] sm:$0xff] }
 0x4f9   :  { %24265 = vst [vmem:[#allocation52_spill] sm:$0xff] %v22032_v6  ;;  %v22038_v8 = vadd.f32 %v16377_v47, %v21758_v44  ;;  %16487 = vmatprep.mubr.msk.bf16.mxu1 %vm6186_vm1, %v6124_v52  ;;  %v5000_v44 = vadd.f32 %v21653_v42, %v21796_v61  ;;  %v5003_v52 = vadd.f32 %v21653_v42, %v21815_v32 }
 0x4fa   :  { %v9157_v13 = vpop.f32.mrf.mxu1  ;;  %v22041_v43 = vpop.f32.mrf.mxu0 }
 0x4fb   :  { %v22044_v15 = vadd.f32 %v9157_v13, %v21764_v7  ;;  %v4995_v7 = vadd.f32 %v21653_v42, %v21779_v9  ;;  %v5802_v13 = vmax.f32 %v5000_v44, 0.0  ;;  %v5803_v59 = vmax.f32 %v5003_v52, 0.0 }
 0x4fc   :  { %v16378_v10 = vpop.f32.mrf.mxu1  ;;  %v22046_v6 = vpop.f32.mrf.mxu0 }
 0x4fd   :  { %v22049_v1 = vadd.f32 %v16378_v10, %v21769_v30  ;;  %v5801_v9 = vmax.f32 %v4995_v7, 0.0 }
 0x4fe   :  { %v9160_v40 = vpop.f32.mrf.mxu1  ;;  %v22059_v47 = vpop.f32.mrf.mxu0 }
 0x4ff   :  { %v22062_v0 = vadd.f32 %v9160_v40, %v24266_v5  ;;  %v6127_v52 = vpack.c.bf16 %v5801_v9, %v5800_v29  ;;  %v5804_v29 = vmax.f32 %v5008_v60, 0.0  ;;  %v24270_v60 = vld [vmem:[#allocation38_spill] sm:$0xff] }
 0x500   :  { %v16385_v30 = vpop.f32.mrf.mxu1  ;;  %16488 = vmatmul.mubr.msk.bf16.gmra.mxu1 %vm6186_vm1, %v6125_v22  ;;  %v22065_v61 = vpop.f32.mrf.mxu0  ;;  %v6128_v22 = vpack.c.bf16 %v5803_v59, %v5802_v13 }
 0x501   :  { %24267 = vst [vmem:[#allocation53_spill] sm:$0xff] %v22062_v0  ;;  %v22068_v32 = vadd.f32 %v16385_v30, %v21788_v56  ;;  %16491 = vmatprep.mubr.msk.bf16.mxu1 %vm6186_vm1, %v6126_v26  ;;  %v5016_v56 = vadd.f32 %v21653_v42, %v21826_v38  ;;  %v5019_v26 = vadd.f32 %v21653_v42, %v21845_v16 }
 0x502   :  { %v9312_v46 = vpop.f32.mrf.mxu1  ;;  %v22071_v10 = vpop.f32.mrf.mxu0 }
 0x503   :  { %v22074_v40 = vadd.f32 %v9312_v46, %v21794_v37  ;;  %v5011_v37 = vadd.f32 %v21653_v42, %v21809_v19  ;;  %v5806_v59 = vmax.f32 %v5016_v56, 0.0  ;;  %v5807_v25 = vmax.f32 %v5019_v26, 0.0 }
 0x504   :  { %v16386_v5 = vpop.f32.mrf.mxu1  ;;  %v22076_v0 = vpop.f32.mrf.mxu0 }
 0x505   :  { %v22079_v44 = vadd.f32 %v16386_v5, %v21799_v51  ;;  %v5805_v19 = vmax.f32 %v5011_v37, 0.0  ;;  %v5024_v37 = vadd.f32 %v21653_v42, %v24270_v60 }
 0x506   :  { %v9315_v7 = vpop.f32.mrf.mxu1  ;;  %v22089_v30 = vpop.f32.mrf.mxu0 }
 0x507   :  { %v22092_v13 = vadd.f32 %v9315_v7, %v21812_v12  ;;  %v6129_v26 = vpack.c.bf16 %v5805_v19, %v5804_v29  ;;  %v5808_v19 = vmax.f32 %v5024_v37, 0.0  ;;  %v24279_v37 = vld [vmem:[#allocation12_spill] sm:$0xff] }
 0x508   :  { %v16389_v51 = vpop.f32.mrf.mxu1  ;;  %16492 = vmatmul.mubr.msk.bf16.gmra.mxu1 %vm6186_vm1, %v6127_v52  ;;  %v22095_v38 = vpop.f32.mrf.mxu0  ;;  %v6130_v52 = vpack.c.bf16 %v5807_v25, %v5806_v59  ;;  %v24273_v59 = vld [vmem:[#allocation41_spill] sm:$0xff] }
 0x509   :  { %v22098_v16 = vadd.f32 %v16389_v51, %v21818_v34  ;;  %16495 = vmatprep.mubr.msk.bf16.mxu1 %vm6186_vm1, %v6128_v22  ;;  %v5032_v34 = vadd.f32 %v21653_v42, %v21856_v57  ;;  %v5035_v22 = vadd.f32 %v21653_v42, %v21878_v54  ;;  %v24271_v51 = vld [vmem:[#allocation42_spill] sm:$0xff] }
 0x50a   :  { %v9328_v9 = vpop.f32.mrf.mxu1  ;;  %v22101_v46 = vpop.f32.mrf.mxu0 }
 0x50b   :  { %24268 = vst [vmem:[#allocation51_spill] sm:$0xff] %v22101_v46  ;;  %v22104_v12 = vadd.f32 %v9328_v9, %v21824_v28  ;;  %v5027_v28 = vadd.f32 %v21653_v42, %v24271_v51  ;;  %v5811_v29 = vmax.f32 %v5035_v22, 0.0 }
 0x50c   :  { %v16390_v5 = vpop.f32.mrf.mxu1  ;;  %v22106_v7 = vpop.f32.mrf.mxu0 }
 0x50d   :  { %v22109_v56 = vadd.f32 %v16390_v5, %v21829_v31  ;;  %v5810_v5 = vmax.f32 %v5032_v34, 0.0  ;;  %v5809_v60 = vmax.f32 %v5027_v28, 0.0  ;;  %v5040_v28 = vadd.f32 %v21653_v42, %v24279_v37 }
 0x50e   :  { %v9331_v9 = vpop.f32.mrf.mxu1  ;;  %v22119_v46 = vpop.f32.mrf.mxu0 }
 0x50f   :  { %24269 = vst [vmem:[#allocation54_spill] sm:$0xff] %v22109_v56  ;;  %24272 = vst [vmem:[#allocation23_spill] sm:$0xff] %v22119_v46  ;;  %v22122_v25 = vadd.f32 %v9331_v9, %v24273_v59  ;;  %v24277_v46 = vld [vmem:[#allocation11_spill] sm:$0xff]  ;;  %v6131_v22 = vpack.c.bf16 %v5809_v60, %v5808_v19 }
 0x510   :  { %v16393_v31 = vpop.f32.mrf.mxu1  ;;  %16496 = vmatmul.mubr.msk.bf16.gmra.mxu1 %vm6186_vm1, %v6129_v26  ;;  %v22125_v57 = vpop.f32.mrf.mxu0  ;;  %v6132_v26 = vpack.c.bf16 %v5811_v29, %v5810_v5  ;;  %v16977_v5 = vld [vmem:[%s23705_s3 + $0xf0] sm:$0xff]   ;;  %v24282_v29 = vld [vmem:[#allocation13_spill] sm:$0xff]  ;;  %v24284_v19 = vld [vmem:[#allocation43_spill] sm:$0xff] }
 0x511   :  { %24274 = vst [vmem:[#allocation24_spill] sm:$0xff] %v22122_v25  ;;  %v22128_v54 = vadd.f32 %v16393_v31, %v21848_v45  ;;  %16503 = vmatprep.mubr.msk.bf16.mxu1 %vm6186_vm1, %v6130_v52  ;;  %v5048_v45 = vadd.f32 %v21653_v42, %v21895_v35  ;;  %v5051_v52 = vadd.f32 %v21653_v42, %v21915_v49  ;;  %v24280_v31 = vld [vmem:[#allocation14_spill] sm:$0xff] }
 0x512   :  { %v9344_v51 = vpop.f32.mrf.mxu1  ;;  %v22131_v56 = vpop.f32.mrf.mxu0 }
 0x513   :  { %24275 = vst [vmem:[#allocation25_spill] sm:$0xff] %v22131_v56  ;;  %v22134_v9 = vadd.f32 %v9344_v51, %v21854_v24  ;;  %v5043_v24 = vadd.f32 %v21653_v42, %v24280_v31  ;;  %v5814_v49 = vmax.f32 %v5048_v45, 0.0  ;;  %v5815_v37 = vmax.f32 %v5051_v52, 0.0  ;;  %v24286_v45 = vld [vmem:[#allocation17_spill] sm:$0xff] }
 0x514   :  { %v16394_v59 = vpop.f32.mrf.mxu1  ;;  %v22136_v25 = vpop.f32.mrf.mxu0  ;;  %v5812_v31 = vmax.f32 %v5040_v28, 0.0  ;;  %v24287_v28 = vld [vmem:[#allocation44_spill] sm:$0xff] }
 0x515   :  { %24276 = vst [vmem:[#allocation26_spill] sm:$0xff] %v22134_v9  ;;  %v22139_v34 = vadd.f32 %v16394_v59, %v24277_v46  ;;  %v5813_v56 = vmax.f32 %v5043_v24, 0.0  ;;  %v5056_v24 = vadd.f32 %v21653_v42, %v24287_v28 }
 0x516   :  { %v9347_v51 = vpop.f32.mrf.mxu1  ;;  %v22152_v46 = vpop.f32.mrf.mxu0 }
 0x517   :  { %24278 = vst [vmem:[#allocation57_spill] sm:$0xff] %v22139_v34  ;;  %24281 = vst [vmem:[#allocation56_spill] sm:$0xff] %v22152_v46  ;;  %v22155_v59 = vadd.f32 %v9347_v51, %v24282_v29  ;;  %v24285_v51 = vld [vmem:[#allocation15_spill] sm:$0xff]  ;;  %v6133_v52 = vpack.c.bf16 %v5813_v56, %v5812_v31 }
 0x518   :  { %v16397_v35 = vpop.f32.mrf.mxu1  ;;  %16504 = vmatmul.mubr.msk.bf16.vlgmr.msra.gmra.mxu1 %vm6186_vm1, %v6131_v22  ;;  %v22163_v46 = vpop.f32.mrf.mxu0  ;;  %v6134_v22 = vpack.c.bf16 %v5815_v37, %v5814_v49  ;;  %v24289_v49 = vld [vmem:[#allocation16_spill] sm:$0xff] }
 0x519   :  { %24283 = vst [vmem:[#allocation55_spill] sm:$0xff] %v22155_v59  ;;  %v22159_v60 = vadd.f32 %v16397_v35, %v24284_v19  ;;  %16540 = vmatpush3.bf16.msra.mxu1 %v21890_v20  ;;  %16507 = vmatprep.mubr.msk.bf16.mxu1 %vm6186_vm1, %v6132_v26  ;;  %v5064_v20 = vadd.f32 %v21653_v42, %v21926_v21  ;;  %v24288_v35 = vld [vmem:[#allocation45_spill] sm:$0xff] }
 0x51a   :  { %v9360_v34 = vpop.f32.mrf.mxu1  ;;  %16541 = vmatprep.subr.bf16.mxu1 %v16977_v5  ;;  %v5067_v26 = vadd.f32 %v21653_v42, %v21945_v17 }
 0x51b   :  { %v22166_v29 = vadd.f32 %v9360_v34, %v24285_v51  ;;  %v5059_v34 = vadd.f32 %v21653_v42, %v24288_v35  ;;  %v22179_v51 = vpop.f32.mrf.mxu0  ;;  %v5818_v21 = vmax.f32 %v5064_v20, 0.0 }
 0x51c   :  { %v16398_v59 = vpop.f32.mrf.mxu1  ;;  %v5819_v56 = vmax.f32 %v5067_v26, 0.0  ;;  %v24291_v26 = vld [vmem:[#allocation47_spill] sm:$0xff] }
 0x51d   :  { %v22169_v9 = vadd.f32 %v16398_v59, %v24286_v45  ;;  %16542 = vmatpush3.bf16.msra.mxu1 %v16977_v5  ;;  %v5816_v5 = vmax.f32 %v5056_v24, 0.0  ;;  %v5817_v31 = vmax.f32 %v5059_v34, 0.0  ;;  %v22189_v28 = vpop.f32.mrf.mxu0  ;;  %v24292_v24 = vld [vmem:[#allocation18_spill] sm:$0xff] }
 0x51e   :  { %v9363_v19 = vpop.f32.mrf.mxu1  ;;  %v5075_v34 = vadd.f32 %v21653_v42, %v24292_v24 }
 0x51f   :  { %v22182_v59 = vadd.f32 %v9363_v19, %v24289_v49  ;;  %v6136_v49 = vpack.c.bf16 %v5819_v56, %v5818_v21  ;;  %v6135_v20 = vpack.c.bf16 %v5817_v31, %v5816_v5  ;;  %v24293_v21 = vld [vmem:[#allocation46_spill] sm:$0xff] }
 0x520   :  { %v16401_v37 = vpop.f32.mrf.mxu1  ;;  %16508 = vmatmul.mubr.msk.bf16.gmra.mxu1 %vm6186_vm1, %v6133_v52  ;;  %v5072_v52 = vadd.f32 %v21653_v42, %v24291_v26  ;;  %v5821_v31 = vmax.f32 %v5075_v34, 0.0 }
 0x521   :  { %24290 = vst [vmem:[#allocation27_spill] sm:$0xff] %v22182_v59  ;;  %v22186_v17 = vadd.f32 %v16401_v37, %v21918_v48  ;;  %16511 = vmatprep.mubr.msk.bf16.mxu1 %vm6186_vm1, %v6134_v22  ;;  %v5080_v48 = vadd.f32 %v21653_v42, %v21956_v3  ;;  %v5083_v22 = vadd.f32 %v21653_v42, %v21975_v33  ;;  %v22205_v37 = vpop.f32.mrf.mxu0 }
 0x522   :  { %v9376_v45 = vpop.f32.mrf.mxu1  ;;  %v5820_v5 = vmax.f32 %v5072_v52, 0.0  ;;  %v24296_v52 = vld [vmem:[#allocation19_spill] sm:$0xff] }
 0x523   :  { %v22192_v35 = vadd.f32 %v9376_v45, %v21924_v39  ;;  %v5822_v3 = vmax.f32 %v5080_v48, 0.0  ;;  %v5823_v33 = vmax.f32 %v5083_v22, 0.0  ;;  %v22215_v26 = vpop.f32.mrf.mxu0  ;;  %v24295_v22 = vld [vmem:[#allocation49_spill] sm:$0xff]  ;;  %v5091_v34 = vadd.f32 %v21653_v42, %v24296_v52 }
 0x524   :  { %v16402_v19 = vpop.f32.mrf.mxu1  ;;  %v6137_v48 = vpack.c.bf16 %v5821_v31, %v5820_v5 }
 0x525   :  { %v22195_v59 = vadd.f32 %v16402_v19, %v21929_v11  ;;  %v5825_v31 = vmax.f32 %v5091_v34, 0.0 }
 0x526   :  { %v9379_v39 = vpop.f32.mrf.mxu1 }
 0x527   :  { %v22208_v56 = vadd.f32 %v9379_v39, %v24293_v21  ;;  %v6138_v21 = vpack.c.bf16 %v5823_v33, %v5822_v3  ;;  %v24297_v3 = vld [vmem:[#allocation48_spill] sm:$0xff] }
 0x528   :  { %v16405_v11 = vpop.f32.mrf.mxu1  ;;  %16512 = vmatmul.mubr.msk.bf16.gmra.mxu1 %vm6186_vm1, %v6135_v20  ;;  %v5088_v20 = vadd.f32 %v21653_v42, %v24295_v22 }
 0x529   :  { %24294 = vst [vmem:[#allocation58_spill] sm:$0xff] %v22208_v56  ;;  %v22212_v45 = vadd.f32 %v16405_v11, %v21948_v50  ;;  %16515 = vmatprep.mubr.msk.bf16.mxu1 %vm6186_vm1, %v6136_v49  ;;  %v5096_v50 = vadd.f32 %v21653_v42, %v21986_v55  ;;  %v5099_v49 = vadd.f32 %v21653_v42, %v22005_v58  ;;  %v22231_v11 = vpop.f32.mrf.mxu0 }
 0x52a   :  { %v9392_v19 = vpop.f32.mrf.mxu1  ;;  %v5824_v5 = vmax.f32 %v5088_v20, 0.0  ;;  %v24300_v20 = vld [vmem:[#allocation20_spill] sm:$0xff] }
 0x52b   :  { %v22218_v24 = vadd.f32 %v9392_v19, %v21954_v63  ;;  %v5826_v55 = vmax.f32 %v5096_v50, 0.0  ;;  %v5827_v58 = vmax.f32 %v5099_v49, 0.0  ;;  %v22241_v22 = vpop.f32.mrf.mxu0  ;;  %v24299_v49 = vld [vmem:[#allocation50_spill] sm:$0xff]  ;;  %v5107_v34 = vadd.f32 %v21653_v42, %v24300_v20 }
 0x52c   :  { %v16406_v39 = vpop.f32.mrf.mxu1  ;;  %v6139_v50 = vpack.c.bf16 %v5825_v31, %v5824_v5 }
 0x52d   :  { %v22221_v56 = vadd.f32 %v16406_v39, %v21959_v36  ;;  %v5829_v31 = vmax.f32 %v5107_v34, 0.0 }
 0x52e   :  { %v9395_v63 = vpop.f32.mrf.mxu1 }
 0x52f   :  { %v22234_v33 = vadd.f32 %v9395_v63, %v24297_v3  ;;  %v6140_v3 = vpack.c.bf16 %v5827_v58, %v5826_v55  ;;  %v24301_v55 = vld [vmem:[#allocation21_spill] sm:$0xff] }
 0x530   :  { %v16409_v36 = vpop.f32.mrf.mxu1  ;;  %16516 = vmatmul.mubr.msk.bf16.gmra.mxu1 %vm6186_vm1, %v6137_v48  ;;  %v5104_v48 = vadd.f32 %v21653_v42, %v24299_v49 }
 0x531   :  { %24298 = vst [vmem:[#allocation60_spill] sm:$0xff] %v22234_v33  ;;  %v22238_v19 = vadd.f32 %v16409_v36, %v21978_v23  ;;  %16519 = vmatprep.mubr.msk.bf16.mxu1 %vm6186_vm1, %v6138_v21  ;;  %v5112_v23 = vadd.f32 %v21653_v42, %v22016_v62  ;;  %v5115_v21 = vadd.f32 %v21653_v42, %v22035_v4  ;;  %v22257_v36 = vpop.f32.mrf.mxu0 }
 0x532   :  { %v9408_v39 = vpop.f32.mrf.mxu1  ;;  %v5828_v5 = vmax.f32 %v5104_v48, 0.0  ;;  %v5123_v48 = vadd.f32 %v21653_v42, %v22029_v14 }
 0x533   :  { %v22244_v52 = vadd.f32 %v9408_v39, %v21984_v2  ;;  %v5830_v62 = vmax.f32 %v5112_v23, 0.0  ;;  %v5831_v4 = vmax.f32 %v5115_v21, 0.0  ;;  %v22267_v49 = vpop.f32.mrf.mxu0  ;;  %v24303_v21 = vld [vmem:[#allocation22_spill] sm:$0xff] }
 0x534   :  { %v16410_v63 = vpop.f32.mrf.mxu1  ;;  %v6141_v23 = vpack.c.bf16 %v5829_v31, %v5828_v5  ;;  %v5833_v31 = vmax.f32 %v5123_v48, 0.0  ;;  %v24305_v48 = vld [vmem:[#allocation53_spill] sm:$0xff] }
 0x535   :  { %v22247_v33 = vadd.f32 %v16410_v63, %v21989_v18  ;;  %v22283_v34 = vpop.f32.mrf.mxu0 }
 0x536   :  { %v9411_v2 = vpop.f32.mrf.mxu1 }
 0x537   :  { %v22260_v58 = vadd.f32 %v9411_v2, %v24301_v55  ;;  %v6142_v55 = vpack.c.bf16 %v5831_v4, %v5830_v62 }
 0x538   :  { %v16413_v18 = vpop.f32.mrf.mxu1  ;;  %16520 = vmatmul.mubr.msk.bf16.gmra.mxu1 %vm6186_vm1, %v6139_v50  ;;  %v5120_v50 = vadd.f32 %v21653_v42, %v24303_v21 }
 0x539   :  { %24302 = vst [vmem:[#allocation28_spill] sm:$0xff] %v22260_v58  ;;  %v22264_v39 = vadd.f32 %v16413_v18, %v22008_v41  ;;  %16523 = vmatprep.mubr.msk.bf16.mxu1 %vm6186_vm1, %v6140_v3  ;;  %v5128_v41 = vadd.f32 %v21653_v42, %v22046_v6  ;;  %v5131_v3 = vadd.f32 %v21653_v42, %v22065_v61  ;;  %v24304_v18 = vld [vmem:[#allocation52_spill] sm:$0xff]  ;;  %v22293_v42 = vpop.f32.mrf.mxu0 }
 0x53a   :  { %v9424_v63 = vpop.f32.mrf.mxu1  ;;  %v5832_v5 = vmax.f32 %v5120_v50, 0.0 }
 0x53b   :  { %v22270_v20 = vadd.f32 %v9424_v63, %v22014_v53  ;;  %v5834_v6 = vmax.f32 %v5128_v41, 0.0  ;;  %v5835_v61 = vmax.f32 %v5131_v3, 0.0  ;;  %v22314_v50 = vpop.f32.mrf.mxu0 }
 0x53c   :  { %v16414_v2 = vpop.f32.mrf.mxu1  ;;  %v6143_v3 = vpack.c.bf16 %v5833_v31, %v5832_v5 }
 0x53d   :  { %v22273_v58 = vadd.f32 %v16414_v2, %v22019_v27  ;;  %v6144_v21 = vpack.c.bf16 %v5835_v61, %v5834_v6 }
 0x53e   :  { %v9427_v53 = vpop.f32.mrf.mxu1 }
 0x53f   :  { %v22286_v62 = vadd.f32 %v9427_v53, %v24304_v18 }
 0x540   :  { %v16417_v27 = vpop.f32.mrf.mxu1  ;;  %16524 = vmatmul.mubr.msk.bf16.gmra.mxu1 %vm6186_vm1, %v6141_v23 }
 0x541   :  { %v22290_v4 = vadd.f32 %v16417_v27, %v22038_v8  ;;  %16527 = vmatprep.mubr.msk.bf16.mxu1 %vm6186_vm1, %v6142_v55  ;;  %v22304_v8 = vld [vmem:[%s23706_s2] ss:$0 sm:$0xff] }
 0x542   :  { %v9440_v63 = vpop.f32.mrf.mxu1  ;;  %v5144_v55 = vadd.f32 %v22304_v8, %v22076_v0  ;;  %v5147_v41 = vadd.f32 %v22304_v8, %v22095_v38  ;;  %v5139_v23 = vadd.f32 %v22304_v8, %v22059_v47  ;;  %v22324_v47 = vpop.f32.mrf.mxu0 }
 0x543   :  { %v22296_v14 = vadd.f32 %v9440_v63, %v22044_v15  ;;  %v5136_v15 = vadd.f32 %v22304_v8, %v22041_v43 }
 0x544   :  { %v16418_v2 = vpop.f32.mrf.mxu1  ;;  %v5838_v0 = vmax.f32 %v5144_v55, 0.0  ;;  %v5839_v38 = vmax.f32 %v5147_v41, 0.0  ;;  %v5837_v61 = vmax.f32 %v5139_v23, 0.0  ;;  %v5152_v41 = vadd.f32 %v22304_v8, %v22071_v10 }
 0x545   :  { %v22299_v53 = vadd.f32 %v16418_v2, %v22049_v1  ;;  %v5836_v43 = vmax.f32 %v5136_v15, 0.0  ;;  %v22340_v15 = vpop.f32.mrf.mxu0 }
 0x546   :  { %v9443_v1 = vpop.f32.mrf.mxu1  ;;  %v6146_v2 = vpack.c.bf16 %v5839_v38, %v5838_v0  ;;  %v5840_v10 = vmax.f32 %v5152_v41, 0.0 }
 0x547   :  { %v22317_v18 = vadd.f32 %v9443_v1, %v24305_v48  ;;  %v6145_v55 = vpack.c.bf16 %v5837_v61, %v5836_v43  ;;  %v24307_v61 = vld [vmem:[#allocation54_spill] sm:$0xff] }
 0x548   :  { %v16425_v27 = vpop.f32.mrf.mxu1  ;;  %16528 = vmatmul.mubr.msk.bf16.gmra.mxu1 %vm6186_vm1, %v6143_v3  ;;  %v5155_v3 = vadd.f32 %v22304_v8, %v22089_v30  ;;  %v22350_v30 = vpop.f32.mrf.mxu0 }
 0x549   :  { %v22321_v6 = vadd.f32 %v16425_v27, %v22068_v32  ;;  %16531 = vmatprep.mubr.msk.bf16.mxu1 %vm6186_vm1, %v6144_v21  ;;  %v5160_v32 = vadd.f32 %v22304_v8, %v22106_v7  ;;  %v5163_v21 = vadd.f32 %v22304_v8, %v22125_v57 }
 0x54a   :  { %v9595_v5 = vpop.f32.mrf.mxu1  ;;  %v5841_v27 = vmax.f32 %v5155_v3, 0.0  ;;  %v22366_v3 = vpop.f32.mrf.mxu0 }
 0x54b   :  { %v22327_v31 = vadd.f32 %v9595_v5, %v22074_v40  ;;  %v5842_v7 = vmax.f32 %v5160_v32, 0.0  ;;  %v5843_v57 = vmax.f32 %v5163_v21, 0.0  ;;  %v24308_v32 = vld [vmem:[#allocation51_spill] sm:$0xff] }
 0x54c   :  { %v16426_v63 = vpop.f32.mrf.mxu1  ;;  %v5168_v21 = vadd.f32 %v22304_v8, %v24308_v32 }
 0x54d   :  { %v22330_v1 = vadd.f32 %v16426_v63, %v22079_v44  ;;  %v6148_v43 = vpack.c.bf16 %v5843_v57, %v5842_v7  ;;  %v5179_v63 = vadd.f32 %v22304_v8, %v22163_v46 }
 0x54e   :  { %v9598_v40 = vpop.f32.mrf.mxu1 }
 0x54f   :  { %v22343_v23 = vadd.f32 %v9598_v40, %v22092_v13  ;;  %v24310_v40 = vld [vmem:[#allocation24_spill] sm:$0xff]  ;;  %v5847_v46 = vmax.f32 %v5179_v63, 0.0  ;;  %v24314_v63 = vld [vmem:[#allocation25_spill] sm:$0xff] }
 0x550   :  { %v16429_v44 = vpop.f32.mrf.mxu1  ;;  %16532 = vmatmul.mubr.msk.bf16.gmra.mxu1 %vm6186_vm1, %v6145_v55  ;;  %v24309_v55 = vld [vmem:[#allocation23_spill] sm:$0xff] }
 0x551   :  { %24306 = vst [vmem:[#allocation30_spill] sm:$0xff] %v22343_v23  ;;  %v22347_v48 = vadd.f32 %v16429_v44, %v22098_v16  ;;  %16535 = vmatprep.mubr.msk.bf16.mxu1 %vm6186_vm1, %v6146_v2  ;;  %v5176_v16 = vadd.f32 %v22304_v8, %v22136_v25  ;;  %v6147_v2 = vpack.c.bf16 %v5841_v27, %v5840_v10  ;;  %v5844_v10 = vmax.f32 %v5168_v21, 0.0  ;;  %v24315_v21 = vld [vmem:[#allocation56_spill] sm:$0xff] }
 0x552   :  { %v9611_v0 = vpop.f32.mrf.mxu1  ;;  %v5171_v41 = vadd.f32 %v22304_v8, %v24309_v55 }
 0x553   :  { %v22353_v38 = vadd.f32 %v9611_v0, %v22104_v12  ;;  %v5846_v25 = vmax.f32 %v5176_v16, 0.0 }
 0x554   :  { %v16430_v13 = vpop.f32.mrf.mxu1  ;;  %v5845_v27 = vmax.f32 %v5171_v41, 0.0  ;;  %v5187_v41 = vadd.f32 %v22304_v8, %v24315_v21 }
 0x555   :  { %v22356_v5 = vadd.f32 %v16430_v13, %v24307_v61  ;;  %v22376_v13 = vpop.f32.mrf.mxu0  ;;  %v24312_v61 = vld [vmem:[#allocation26_spill] sm:$0xff] }
 0x556   :  { %v9614_v12 = vpop.f32.mrf.mxu1  ;;  %v6149_v16 = vpack.c.bf16 %v5845_v27, %v5844_v10  ;;  %v5849_v27 = vmax.f32 %v5187_v41, 0.0  ;;  %v24317_v41 = vld [vmem:[#allocation27_spill] sm:$0xff] }
 0x557   :  { %v22369_v44 = vadd.f32 %v9614_v12, %v24310_v40  ;;  %v6150_v12 = vpack.c.bf16 %v5847_v46, %v5846_v25  ;;  %v24313_v40 = vld [vmem:[#allocation57_spill] sm:$0xff]  ;;  %v24316_v25 = vld [vmem:[#allocation55_spill] sm:$0xff] }
 0x558   :  { %v16433_v7 = vpop.f32.mrf.mxu1  ;;  %16536 = vmatmul.mubr.msk.bf16.gmra.mxu1 %vm6186_vm1, %v6147_v2  ;;  %v5184_v2 = vadd.f32 %v22304_v8, %v24314_v63 }
 0x559   :  { %24311 = vst [vmem:[#allocation29_spill] sm:$0xff] %v22369_v44  ;;  %v22373_v57 = vadd.f32 %v16433_v7, %v22128_v54  ;;  %16543 = vmatprep.mubr.msk.bf16.mxu1 %vm6186_vm1, %v6148_v43  ;;  %v5192_v54 = vadd.f32 %v22304_v8, %v22189_v28  ;;  %v5195_v43 = vadd.f32 %v22304_v8, %v22215_v26 }
 0x55a   :  { %v9627_v0 = vpop.f32.mrf.mxu1  ;;  %v5848_v10 = vmax.f32 %v5184_v2, 0.0 }
 0x55b   :  { %v22379_v32 = vadd.f32 %v9627_v0, %v24312_v61  ;;  %v22392_v0 = vpop.f32.mrf.mxu0  ;;  %v5850_v28 = vmax.f32 %v5192_v54, 0.0  ;;  %v5851_v26 = vmax.f32 %v5195_v43, 0.0  ;;  %v5200_v43 = vadd.f32 %v22304_v8, %v22179_v51 }
 0x55c   :  { %v16434_v55 = vpop.f32.mrf.mxu1  ;;  %v6151_v54 = vpack.c.bf16 %v5849_v27, %v5848_v10 }
 0x55d   :  { %v22382_v44 = vadd.f32 %v16434_v55, %v24313_v40  ;;  %v22402_v63 = vpop.f32.mrf.mxu0  ;;  %v5852_v51 = vmax.f32 %v5200_v43, 0.0 }
 0x55e   :  { %v9630_v7 = vpop.f32.mrf.mxu1 }
 0x55f   :  { %v22395_v46 = vadd.f32 %v9630_v7, %v24316_v25  ;;  %v6152_v25 = vpack.c.bf16 %v5851_v26, %v5850_v28  ;;  %v22418_v2 = vpop.f32.mrf.mxu0 }
 0x560   :  { %v16437_v61 = vpop.f32.mrf.mxu1  ;;  %16544 = vmatmul.mubr.msk.bf16.vlgmr.msra.gmra.mxu1 %vm6186_vm1, %v6149_v16  ;;  %v5203_v16 = vadd.f32 %v22304_v8, %v22205_v37 }
 0x561   :  { %v22399_v55 = vadd.f32 %v16437_v61, %v22159_v60  ;;  %16547 = vmatprep.mubr.msk.bf16.mxu1 %vm6186_vm1, %v6150_v12  ;;  %v5208_v60 = vadd.f32 %v22304_v8, %v22241_v22  ;;  %v5211_v12 = vadd.f32 %v22304_v8, %v22267_v49  ;;  %v5258_v37 = vpop.f32.mrf.mxu0 }
 0x562   :  { %v9643_v40 = vpop.f32.mrf.mxu1  ;;  %v5853_v26 = vmax.f32 %v5203_v16, 0.0  ;;  %v24318_v16 = vld [vmem:[#allocation58_spill] sm:$0xff] }
 0x563   :  { %v22405_v21 = vadd.f32 %v9643_v40, %v22166_v29  ;;  %v5854_v22 = vmax.f32 %v5208_v60, 0.0  ;;  %v5855_v49 = vmax.f32 %v5211_v12, 0.0  ;;  %v5224_v60 = vadd.f32 %v22304_v8, %v22293_v42  ;;  %v22442_v43 = vpop.f32.mrf.mxu0 }
 0x564   :  { %v16438_v7 = vpop.f32.mrf.mxu1  ;;  %v5216_v12 = vadd.f32 %v22304_v8, %v22231_v11 }
 0x565   :  { %v22408_v23 = vadd.f32 %v16438_v7, %v22169_v9  ;;  %v6154_v7 = vpack.c.bf16 %v5855_v49, %v5854_v22  ;;  %v5858_v42 = vmax.f32 %v5224_v60, 0.0  ;;  %v5240_v60 = vadd.f32 %v22304_v8, %v22350_v30 }
 0x566   :  { %v9646_v29 = vpop.f32.mrf.mxu1  ;;  %v5856_v11 = vmax.f32 %v5216_v12, 0.0 }
 0x567   :  { %v22421_v61 = vadd.f32 %v9646_v29, %v24317_v41  ;;  %v5862_v30 = vmax.f32 %v5240_v60, 0.0 }
 0x568   :  { %v16441_v9 = vpop.f32.mrf.mxu1  ;;  %16548 = vmatmul.mubr.msk.bf16.gmra.mxu1 %vm6186_vm1, %v6151_v54  ;;  %v5219_v54 = vadd.f32 %v22304_v8, %v22257_v36  ;;  %v5271_v36 = vpop.f32.mrf.mxu0 }
 0x569   :  { %v22425_v28 = vadd.f32 %v16441_v9, %v22186_v17  ;;  %16551 = vmatprep.mubr.msk.bf16.mxu1 %vm6186_vm1, %v6152_v25  ;;  %v5227_v17 = vadd.f32 %v22304_v8, %v22324_v47  ;;  %v6153_v25 = vpack.c.bf16 %v5853_v26, %v5852_v51 }
 0x56a   :  { %v9659_v10 = vpop.f32.mrf.mxu1  ;;  %v5857_v22 = vmax.f32 %v5219_v54, 0.0  ;;  %v22466_v12 = vpop.f32.mrf.mxu0  ;;  %v24319_v54 = vld [vmem:[#allocation60_spill] sm:$0xff] }
 0x56b   :  { %v22429_v27 = vadd.f32 %v9659_v10, %v22192_v35  ;;  %v5859_v47 = vmax.f32 %v5227_v17, 0.0  ;;  %v5232_v17 = vadd.f32 %v22304_v8, %v22283_v34 }
 0x56c   :  { %v16442_v40 = vpop.f32.mrf.mxu1 }
 0x56d   :  { %v22432_v29 = vadd.f32 %v16442_v40, %v22195_v59  ;;  %v6156_v10 = vpack.c.bf16 %v5859_v47, %v5858_v42  ;;  %v5860_v34 = vmax.f32 %v5232_v17, 0.0  ;;  %v24320_v17 = vld [vmem:[#allocation28_spill] sm:$0xff] }
 0x56e   :  { %v9662_v35 = vpop.f32.mrf.mxu1 }
 0x56f   :  { %v22445_v41 = vadd.f32 %v9662_v35, %v24318_v16 }
 0x570   :  { %v16445_v59 = vpop.f32.mrf.mxu1  ;;  %16552 = vmatmul.mubr.msk.bf16.gmra.mxu1 %vm6186_vm1, %v6153_v25  ;;  %v5235_v25 = vadd.f32 %v22304_v8, %v22314_v50  ;;  %v5274_v50 = vpop.f32.mrf.mxu0 }
 0x571   :  { %v22449_v9 = vadd.f32 %v16445_v59, %v22212_v45  ;;  %16555 = vmatprep.mubr.msk.bf16.mxu1 %vm6186_vm1, %v6154_v7  ;;  %v5243_v45 = vadd.f32 %v22304_v8, %v22376_v13  ;;  %v6155_v7 = vpack.c.bf16 %v5857_v22, %v5856_v11 }
 0x572   :  { %v9675_v49 = vpop.f32.mrf.mxu1  ;;  %v5861_v59 = vmax.f32 %v5235_v25, 0.0 }
 0x573   :  { %v22453_v51 = vadd.f32 %v9675_v49, %v22218_v24  ;;  %v5863_v13 = vmax.f32 %v5243_v45, 0.0  ;;  %v5251_v45 = vadd.f32 %v22304_v8, %v22366_v3 }
 0x574   :  { %v16446_v26 = vpop.f32.mrf.mxu1  ;;  %v6157_v60 = vpack.c.bf16 %v5861_v59, %v5860_v34 }
 0x575   :  { %v22456_v40 = vadd.f32 %v16446_v26, %v22221_v56  ;;  %v6158_v22 = vpack.c.bf16 %v5863_v13, %v5862_v30  ;;  %v5256_v26 = vadd.f32 %v22304_v8, %v22402_v63 }
 0x576   :  { %v9678_v24 = vpop.f32.mrf.mxu1 }
 0x577   :  { %v22469_v35 = vadd.f32 %v9678_v24, %v24319_v54 }
 0x578   :  { %v16449_v56 = vpop.f32.mrf.mxu1  ;;  %16556 = vmatmul.mubr.msk.bf16.gmra.mxu1 %vm6186_vm1, %v6155_v7 }
 0x579   :  { %v22473_v16 = vadd.f32 %v16449_v56, %v22238_v19  ;;  %16559 = vmatprep.mubr.msk.bf16.mxu1 %vm6186_vm1, %v6156_v10  ;;  %v5259_v19 = vadd.f32 %v22304_v8, %v5258_v37  ;;  %v5248_v10 = vadd.f32 %v22304_v8, %v22340_v15  ;;  %v5865_v15 = vmax.f32 %v5251_v45, 0.0 }
 0x57a   :  { %v9691_v42 = vpop.f32.mrf.mxu1 }
 0x57b   :  { %v22477_v47 = vadd.f32 %v9691_v42, %v22244_v52  ;;  %v15937_v52 = vpop.f32.mrf.mxu0  ;;  %v5867_v37 = vmax.f32 %v5259_v19, 0.0  ;;  %v5864_v54 = vmax.f32 %v5248_v10, 0.0  ;;  %v5272_v42 = vadd.f32 %v22304_v8, %v5271_v36 }
 0x57c   :  { %v16450_v11 = vpop.f32.mrf.mxu1 }
 0x57d   :  { %v22480_v49 = vadd.f32 %v16450_v11, %v22247_v33  ;;  %v5866_v33 = vmax.f32 %v5256_v26, 0.0  ;;  %v5287_v30 = vpop.f32.mrf.mxu0  ;;  %v6159_v11 = vpack.c.bf16 %v5865_v15, %v5864_v54  ;;  %v5267_v26 = vadd.f32 %v22304_v8, %v22418_v2 }
 0x57e   :  { %v9694_v7 = vpop.f32.mrf.mxu1  ;;  %v5870_v36 = vmax.f32 %v5272_v42, 0.0 }
 0x57f   :  { %v22490_v25 = vadd.f32 %v9694_v7, %v24320_v17  ;;  %v6160_v34 = vpack.c.bf16 %v5867_v37, %v5866_v33  ;;  %v5869_v45 = vmax.f32 %v5267_v26, 0.0 }
 0x580   :  { %v16453_v24 = vpop.f32.mrf.mxu1  ;;  %16560 = vmatmul.mubr.msk.bf16.gmra.mxu1 %vm6186_vm1, %v6157_v60  ;;  %v15938_v60 = vpop.f32.mrf.mxu0 }
 0x581   :  { %v22494_v63 = vadd.f32 %v16453_v24, %v22264_v39  ;;  %16563 = vmatprep.mubr.msk.bf16.mxu1 %vm6186_vm1, %v6158_v22  ;;  %v5275_v39 = vadd.f32 %v22304_v8, %v5274_v50  ;;  %v5264_v22 = vadd.f32 %v22304_v8, %v22392_v0 }
 0x582   :  { %v9707_v56 = vpop.f32.mrf.mxu1 }
 0x583   :  { %v22498_v3 = vadd.f32 %v9707_v56, %v22270_v20  ;;  %v5871_v0 = vmax.f32 %v5275_v39, 0.0  ;;  %v5868_v2 = vmax.f32 %v5264_v22, 0.0  ;;  %v5280_v56 = vadd.f32 %v22304_v8, %v22442_v43 }
 0x584   :  { %v16454_v13 = vpop.f32.mrf.mxu1 }
 0x585   :  { %v22501_v59 = vadd.f32 %v16454_v13, %v22273_v58  ;;  %v16978_v58 = vld [vmem:[%s23707_s5 + $0x18] sm:$0xff]   ;;  %v6162_v33 = vpack.c.bf16 %v5871_v0, %v5870_v36  ;;  %v6161_v15 = vpack.c.bf16 %v5869_v45, %v5868_v2  ;;  %v5283_v13 = vadd.f32 %v22304_v8, %v22466_v12 }
 0x586   :  { %v9710_v19 = vpop.f32.mrf.mxu1  ;;  %16579 = vmatprep.subr.bf16.mxu1 %v16978_v58  ;;  %v5872_v39 = vmax.f32 %v5280_v56, 0.0 }
 0x587   :  { %v22510_v20 = vadd.f32 %v9710_v19, %v22286_v62  ;;  %v5290_v62 = vpop.f32.mrf.mxu0  ;;  %16580 = vmatpush3.bf16.msra.mxu1 %v16978_v58 }
 0x588   :  { %v16457_v10 = vpop.f32.mrf.mxu1  ;;  %16564 = vmatmul.mubr.msk.bf16.gmra.mxu1 %vm6186_vm1, %v6159_v11  ;;  %v5291_v54 = vadd.f32 %v22304_v8, %v5290_v62  ;;  %v5873_v11 = vmax.f32 %v5283_v13, 0.0 }
 0x589   :  { %v22517_v50 = vadd.f32 %v16457_v10, %v22290_v4  ;;  %16567 = vmatprep.mubr.msk.bf16.mxu1 %vm6186_vm1, %v6160_v34  ;;  %v5288_v4 = vadd.f32 %v22304_v8, %v5287_v30  ;;  %v5296_v10 = vadd.f32 %v22304_v8, %v15937_v52 }
 0x58a   :  { %v9723_v7 = vpop.f32.mrf.mxu1  ;;  %v5875_v30 = vmax.f32 %v5291_v54, 0.0  ;;  %v6163_v58 = vpack.c.bf16 %v5873_v11, %v5872_v39 }
 0x58b   :  { %v22521_v17 = vadd.f32 %v9723_v7, %v22296_v14  ;;  %v5874_v42 = vmax.f32 %v5288_v4, 0.0 }
 0x58c   :  { %v16458_v24 = vpop.f32.mrf.mxu1 }
 0x58d   :  { %v22524_v37 = vadd.f32 %v16458_v24, %v22299_v53  ;;  %v6164_v12 = vpack.c.bf16 %v5875_v30, %v5874_v42 }
 0x58e   :  { %v22532_v34 = vpop.f32.mrf.mxu1 }
 0x590   :  { %v16465_v14 = vpop.f32.mrf.mxu1  ;;  %16568 = vmatmul.mubr.msk.bf16.gmra.mxu1 %vm6186_vm1, %v6161_v15 }
 0x591   :  { %v22536_v53 = vadd.f32 %v16465_v14, %v22321_v6  ;;  %16571 = vmatprep.mubr.msk.bf16.mxu1 %vm6186_vm1, %v6162_v33  ;;  %v5299_v6 = vadd.f32 %v22304_v8, %v15938_v60 }
 0x592   :  { %v9878_v22 = vpop.f32.mrf.mxu1 }
 0x593   :  { %v22540_v43 = vadd.f32 %v9878_v22, %v22327_v31  ;;  %v5876_v31 = vmax.f32 %v5296_v10, 0.0  ;;  %v5877_v45 = vmax.f32 %v5299_v6, 0.0 }
 0x594   :  { %v16466_v26 = vpop.f32.mrf.mxu1 }
 0x595   :  { %v22543_v19 = vadd.f32 %v16466_v26, %v22330_v1  ;;  %v6165_v8 = vpack.c.bf16 %v5877_v45, %v5876_v31  ;;  %v22602_v26 = vld [vmem:[%s23707_s5 + $0x28] sm:$0xff]  }
 0x596   :  { %v22547_v36 = vpop.f32.mrf.mxu1 }
 0x598   :  { %v16469_v0 = vpop.f32.mrf.mxu1  ;;  %16572 = vmatmul.mubr.msk.bf16.gmra.mxu1 %vm6186_vm1, %v6163_v58 }
 0x599   :  { %v22551_v2 = vadd.f32 %v16469_v0, %v22347_v48  ;;  %16575 = vmatprep.mubr.msk.bf16.mxu1 %vm6186_vm1, %v6164_v12  ;;  %v22619_v0 = vld [vmem:[%s23707_s5 + $0x38] sm:$0xff]  }
 0x59a   :  { %v9894_v7 = vpop.f32.mrf.mxu1  ;;  %16603 = vmatprep.subr.bf16.mxu0 %v22619_v0 }
 0x59b   :  { %v22555_v1 = vadd.f32 %v9894_v7, %v22353_v38 }
 0x59c   :  { %v16470_v62 = vpop.f32.mrf.mxu1 }
 0x59d   :  { %v22558_v52 = vadd.f32 %v16470_v62, %v22356_v5 }
 0x59e   :  { %v22560_v60 = vpop.f32.mrf.mxu1 }
 0x5a0   :  { %v16473_v24 = vpop.f32.mrf.mxu1  ;;  %16576 = vmatmul.mubr.msk.bf16.gmra.mxu1 %vm6186_vm1, %v6165_v8 }
 0x5a1   :  { %v22564_v48 = vadd.f32 %v16473_v24, %v22373_v57 }
 0x5a2   :  { %v9910_v33 = vpop.f32.mrf.mxu1 }
 0x5a3   :  { %v22567_v4 = vadd.f32 %v9910_v33, %v22379_v32 }
 0x5a4   :  { %v16474_v54 = vpop.f32.mrf.mxu1 }
 0x5a5   :  { %v22570_v38 = vadd.f32 %v16474_v54, %v22382_v44  ;;  %v16979_v44 = vld [vmem:[%s23707_s5 + $0x10] sm:$0xff]  }
 0x5a6   :  { %v22572_v15 = vpop.f32.mrf.mxu1  ;;  %16581 = vmatprep.subr.bf16.mxu1 %v16979_v44 }
 0x5a7   :  { %16582 = vmatpush3.bf16.msra.mxu1 %v16979_v44 }
 0x5a8   :  { %v16477_v5 = vpop.f32.mrf.mxu1  ;;  %16595 = vmatprep.subr.bf16.mxu1 %v22602_v26 }
 0x5a9   :  { %v22575_v56 = vadd.f32 %v16477_v5, %v22399_v55 }
 0x5aa   :  { %v9926_v13 = vpop.f32.mrf.mxu1 }
 0x5ab   :  { %v22578_v14 = vadd.f32 %v9926_v13, %v22405_v21 }
 0x5ac   :  { %v16478_v57 = vpop.f32.mrf.mxu1 }
 0x5ad   :  { %v22581_v42 = vadd.f32 %v16478_v57, %v22408_v23 }
 0x5ae   :  { %v22583_v32 = vpop.f32.mrf.mxu1 }
 0x5b0   :  { %v16481_v30 = vpop.f32.mrf.mxu1 }
 0x5b1   :  { %v22589_v39 = vadd.f32 %v16481_v30, %v22425_v28 }
 0x5b2   :  { %v9942_v55 = vpop.f32.mrf.mxu1 }
 0x5b3   :  { %v22592_v21 = vadd.f32 %v9942_v55, %v22429_v27 }
 0x5b4   :  { %v16482_v11 = vpop.f32.mrf.mxu1 }
 0x5b5   :  { %v22595_v23 = vadd.f32 %v16482_v11, %v22432_v29 }
 0x5b6   :  { %v22597_v22 = vpop.f32.mrf.mxu1 }
 0x5b8   :  { %v16485_v12 = vpop.f32.mrf.mxu1 }
 0x5b9   :  { %v22606_v28 = vadd.f32 %v16485_v12, %v22449_v9 }
 0x5ba   :  { %v9958_v58 = vpop.f32.mrf.mxu1 }
 0x5bb   :  { %v22609_v27 = vadd.f32 %v9958_v58, %v22453_v51 }
 0x5bc   :  { %v16486_v10 = vpop.f32.mrf.mxu1 }
 0x5bd   :  { %v22612_v29 = vadd.f32 %v16486_v10, %v22456_v40 }
 0x5be   :  { %v22614_v6 = vpop.f32.mrf.mxu1 }
 0x5c0   :  { %v16489_v31 = vpop.f32.mrf.mxu1 }
 0x5c1   :  { %v22623_v9 = vadd.f32 %v16489_v31, %v22473_v16 }
 0x5c2   :  { %v9974_v45 = vpop.f32.mrf.mxu1 }
 0x5c3   :  { %v22626_v51 = vadd.f32 %v9974_v45, %v22477_v47 }
 0x5c4   :  { %v16490_v7 = vpop.f32.mrf.mxu1 }
 0x5c5   :  { %v22629_v40 = vadd.f32 %v16490_v7, %v22480_v49 }
 0x5c6   :  { %v22631_v62 = vpop.f32.mrf.mxu1 }
 0x5c8   :  { %v16493_v8 = vpop.f32.mrf.mxu1 }
 0x5c9   :  { %v22634_v24 = vadd.f32 %v16493_v8, %v22494_v63 }
 0x5ca   :  { %v9990_v33 = vpop.f32.mrf.mxu1 }
 0x5cb   :  { %v22637_v54 = vadd.f32 %v9990_v33, %v22498_v3 }
 0x5cc   :  { %v16494_v16 = vpop.f32.mrf.mxu1 }
 0x5cd   :  { %v22640_v5 = vadd.f32 %v16494_v16, %v22501_v59 }
 0x5ce   :  { %v22642_v47 = vpop.f32.mrf.mxu1 }
 0x5d0   :  { %v16497_v13 = vpop.f32.mrf.mxu1 }
 0x5d1   :  { %v22645_v49 = vadd.f32 %v16497_v13, %v22517_v50  ;;  %v10030_v13 = vadd.f32 %v22572_v15, %v22395_v46 }
 0x5d2   :  { %v10006_v57 = vpop.f32.mrf.mxu1 }
 0x5d3   :  { %v22648_v44 = vadd.f32 %v10006_v57, %v22521_v17 }
 0x5d4   :  { %v16498_v63 = vpop.f32.mrf.mxu1 }
 0x5d5   :  { %v22651_v30 = vadd.f32 %v16498_v63, %v22524_v37 }
 0x5d6   :  { %v22653_v3 = vpop.f32.mrf.mxu1 }
 0x5d8   :  { %v16505_v55 = vpop.f32.mrf.mxu1 }
 0x5d9   :  { %v22656_v59 = vadd.f32 %v16505_v55, %v22536_v53 }
 0x5da   :  { %v10161_v11 = vpop.f32.mrf.mxu1 }
 0x5db   :  { %v22659_v12 = vadd.f32 %v10161_v11, %v22540_v43 }
 0x5dc   :  { %v16506_v50 = vpop.f32.mrf.mxu1 }
 0x5dd   :  { %v22662_v58 = vadd.f32 %v16506_v50, %v22543_v19  ;;  %v10034_v50 = vadd.f32 %v22583_v32, %v22421_v61 }
 0x5de   :  { %v22664_v17 = vpop.f32.mrf.mxu1 }
 0x5e0   :  { %v16509_v10 = vpop.f32.mrf.mxu1 }
 0x5e1   :  { %v22667_v37 = vadd.f32 %v16509_v10, %v22551_v2 }
 0x5e2   :  { %v10177_v31 = vpop.f32.mrf.mxu1 }
 0x5e3   :  { %v22670_v45 = vadd.f32 %v10177_v31, %v22555_v1 }
 0x5e4   :  { %v16510_v53 = vpop.f32.mrf.mxu1 }
 0x5e5   :  { %v22673_v7 = vadd.f32 %v16510_v53, %v22558_v52 }
 0x5e6   :  { %v22675_v43 = vpop.f32.mrf.mxu1 }
 0x5e8   :  { %v16513_v8 = vpop.f32.mrf.mxu1 }
 0x5e9   :  { %v22678_v19 = vadd.f32 %v16513_v8, %v22564_v48  ;;  %v10038_v8 = vadd.f32 %v22597_v22, %v22445_v41 }
 0x5ea   :  { %v10193_v33 = vpop.f32.mrf.mxu1 }
 0x5eb   :  { %v22681_v16 = vadd.f32 %v10193_v33, %v22567_v4 }
 0x5ec   :  { %v16514_v2 = vpop.f32.mrf.mxu1 }
 0x5ed   :  { %v22686_v1 = vadd.f32 %v16514_v2, %v22570_v38 }
 0x5ee   :  { %v10196_v57 = vpop.f32.mrf.mxu1 }
 0x5ef   :  { %v22688_v52 = vadd.f32 %v10196_v57, %v10030_v13  ;;  %v10042_v57 = vadd.f32 %v22614_v6, %v22469_v35 }
 0x5f0   :  { %v16517_v63 = vpop.f32.mrf.mxu1 }
 0x5f1   :  { %v22691_v55 = vadd.f32 %v16517_v63, %v22575_v56 }
 0x5f2   :  { %v10209_v48 = vpop.f32.mrf.mxu1 }
 0x5f3   :  { %v22694_v11 = vadd.f32 %v10209_v48, %v22578_v14 }
 0x5f4   :  { %v16518_v4 = vpop.f32.mrf.mxu1 }
 0x5f5   :  { %v22699_v46 = vadd.f32 %v16518_v4, %v22581_v42 }
 0x5f6   :  { %v10212_v38 = vpop.f32.mrf.mxu1 }
 0x5f7   :  { %v22701_v15 = vadd.f32 %v10212_v38, %v10034_v50  ;;  %v10046_v50 = vadd.f32 %v22631_v62, %v22490_v25 }
 0x5f8   :  { %v16521_v10 = vpop.f32.mrf.mxu1 }
 0x5f9   :  { %v22704_v31 = vadd.f32 %v16521_v10, %v22589_v39 }
 0x5fa   :  { %v10225_v56 = vpop.f32.mrf.mxu1 }
 0x5fb   :  { %v22707_v53 = vadd.f32 %v10225_v56, %v22592_v21 }
 0x5fc   :  { %v16522_v14 = vpop.f32.mrf.mxu1 }
 0x5fd   :  { %v22712_v61 = vadd.f32 %v16522_v14, %v22595_v23  ;;  %v10050_v14 = vadd.f32 %v22642_v47, %v22510_v20 }
 0x5fe   :  { %v10228_v42 = vpop.f32.mrf.mxu1 }
 0x5ff   :  { %v22714_v32 = vadd.f32 %v10228_v42, %v10038_v8 }
 0x600   :  { %v16525_v33 = vpop.f32.mrf.mxu1 }
 0x601   :  { %v22717_v2 = vadd.f32 %v16525_v33, %v22606_v28  ;;  %v9771_v33 = vadd.f32 %v22532_v34, %v22317_v18  ;;  %v24321_v34 = vld [vmem:[#allocation30_spill] sm:$0xff] }
 0x602   :  { %v10241_v39 = vpop.f32.mrf.mxu1 }
 0x603   :  { %v22720_v13 = vadd.f32 %v10241_v39, %v22609_v27  ;;  %v10054_v20 = vadd.f32 %v22653_v3, %v9771_v33 }
 0x604   :  { %v16526_v21 = vpop.f32.mrf.mxu1 }
 0x605   :  { %v22725_v41 = vadd.f32 %v16526_v21, %v22612_v29 }
 0x606   :  { %v10244_v23 = vpop.f32.mrf.mxu1 }
 0x607   :  { %v22727_v22 = vadd.f32 %v10244_v23, %v10042_v57  ;;  %v22773_v23 = vld [vmem:[%s23708_s4] ss:$0 sm:$0xff] }
 0x608   :  { %v16529_v63 = vpop.f32.mrf.mxu1 }
 0x609   :  { %v22730_v48 = vadd.f32 %v16529_v63, %v22623_v9 }
 0x60a   :  { %v10257_v28 = vpop.f32.mrf.mxu1 }
 0x60b   :  { %v22733_v4 = vadd.f32 %v10257_v28, %v22626_v51 }
 0x60c   :  { %v16530_v27 = vpop.f32.mrf.mxu1 }
 0x60d   :  { %v22738_v35 = vadd.f32 %v16530_v27, %v22629_v40 }
 0x60e   :  { %v10260_v29 = vpop.f32.mrf.mxu1 }
 0x60f   :  { %v22740_v6 = vadd.f32 %v10260_v29, %v10046_v50 }
 0x610   :  { %v16533_v38 = vpop.f32.mrf.mxu1 }
 0x611   :  { %v22743_v10 = vadd.f32 %v16533_v38, %v22634_v24 }
 0x612   :  { %v10273_v9 = vpop.f32.mrf.mxu1 }
 0x613   :  { %v22746_v56 = vadd.f32 %v10273_v9, %v22637_v54 }
 0x614   :  { %v16534_v51 = vpop.f32.mrf.mxu1 }
 0x615   :  { %v22751_v25 = vadd.f32 %v16534_v51, %v22640_v5 }
 0x616   :  { %v10276_v40 = vpop.f32.mrf.mxu1 }
 0x617   :  { %v22753_v62 = vadd.f32 %v10276_v40, %v10050_v14  ;;  %v24322_v40 = vld [vmem:[#allocation29_spill] sm:$0xff] }
 0x618   :  { %v16537_v8 = vpop.f32.mrf.mxu1 }
 0x619   :  { %v22756_v42 = vadd.f32 %v16537_v8, %v22645_v49 }
 0x61a   :  { %v10289_v24 = vpop.f32.mrf.mxu1 }
 0x61b   :  { %v22761_v54 = vadd.f32 %v10289_v24, %v22648_v44  ;;  %v10022_v44 = vadd.f32 %v22547_v36, %v24321_v34 }
 0x61c   :  { %v16538_v39 = vpop.f32.mrf.mxu1 }
 0x61d   :  { %v22765_v5 = vadd.f32 %v16538_v39, %v22651_v30  ;;  %v10305_v30 = vadd.f32 %v22664_v17, %v10022_v44  ;;  %v10026_v17 = vadd.f32 %v22560_v60, %v24322_v40 }
 0x61e   :  { %v10292_v47 = vpop.f32.mrf.mxu1 }
 0x61f   :  { %v22767_v21 = vadd.f32 %v10292_v47, %v10054_v20  ;;  %v10309_v47 = vadd.f32 %v22675_v43, %v10026_v17 }
 0x620   :  { %v16545_v57 = vpop.f32.mrf.mxu1 }
 0x621   :  { %v10589_v49 = vadd.f32 %v16545_v57, %v22656_v59 }
 0x622   :  { %v10444_v18 = vpop.f32.mrf.mxu1 }
 0x623   :  { %v10587_v3 = vadd.f32 %v10444_v18, %v22659_v12  ;;  %v10632_v28 = vadd.f32 %v22773_v23, %v10589_v49 }
 0x624   :  { %v16546_v63 = vpop.f32.mrf.mxu1 }
 0x625   :  { %v10590_v27 = vadd.f32 %v16546_v63, %v22662_v58  ;;  %v10630_v59 = vadd.f32 %v22773_v23, %v10587_v3  ;;  %v10668_v51 = vmax.f32 %v10632_v28, 0.0 }
 0x626   :  { %v10447_v50 = vpop.f32.mrf.mxu1 }
 0x627   :  { %v10633_v29 = vadd.f32 %v22773_v23, %v10590_v27  ;;  %v10588_v38 = vadd.f32 %v10447_v50, %v10305_v30  ;;  %v10666_v24 = vmax.f32 %v10630_v59, 0.0  ;;  %v22804_v27 = vld [vmem:[%s23707_s5 + $0x58] sm:$0xff]  }
 0x628   :  { %v16549_v9 = vpop.f32.mrf.mxu1 }
 0x629   :  { %v10669_v14 = vmax.f32 %v10633_v29, 0.0  ;;  %v10631_v36 = vadd.f32 %v22773_v23, %v10588_v38  ;;  %v10593_v12 = vadd.f32 %v16549_v9, %v22667_v37  ;;  %v16983_v37 = vld [vmem:[%s23707_s5 + $0x30] sm:$0xff]  }
 0x62a   :  { %v10460_v8 = vpop.f32.mrf.mxu1 }
 0x62b   :  { %v10703_v33 = vpack.c.bf16 %v10669_v14, %v10668_v51  ;;  %v10667_v58 = vmax.f32 %v10631_v36, 0.0  ;;  %v10591_v39 = vadd.f32 %v10460_v8, %v22670_v45  ;;  %v10636_v49 = vadd.f32 %v22773_v23, %v10593_v12  ;;  %v16981_v36 = vld [vmem:[%s23707_s5 + $0x20] sm:$0xff]  }
 0x62c   :  { %v16550_v20 = vpop.f32.mrf.mxu1 }
 0x62d   :  { %v10702_v57 = vpack.c.bf16 %v10667_v58, %v10666_v24  ;;  %v10594_v18 = vadd.f32 %v16550_v20, %v22673_v7  ;;  %v10634_v60 = vadd.f32 %v22773_v23, %v10591_v39  ;;  %v10672_v43 = vmax.f32 %v10636_v49, 0.0  ;;  %v16984_v39 = vld [vmem:[%s23707_s5 + $0x48] sm:$0xff]  }
 0x62e   :  { %v10463_v34 = vpop.f32.mrf.mxu1 }
 0x62f   :  { %v10637_v44 = vadd.f32 %v22773_v23, %v10594_v18  ;;  %v10592_v3 = vadd.f32 %v10463_v34, %v10309_v47  ;;  %16591 = vmatprep.mubr.msk.bf16.mxu0 %vm6186_vm1, %v10702_v57  ;;  %v10670_v50 = vmax.f32 %v10634_v60, 0.0 }
 0x630   :  { %v16553_v45 = vpop.f32.mrf.mxu1  ;;  %16592 = vmatmul.mubr.msk.bf16.vlgmr.msra.gmra.mxu0 %vm6186_vm1, %v10703_v33 }
 0x631   :  { %v10673_v63 = vmax.f32 %v10637_v44, 0.0  ;;  %v10635_v30 = vadd.f32 %v22773_v23, %v10592_v3  ;;  %v10597_v7 = vadd.f32 %v16553_v45, %v22678_v19  ;;  %16604 = vmatpush3.bf16.msra.mxu0 %v22619_v0 }
 0x632   :  { %v10476_v28 = vpop.f32.mrf.mxu1  ;;  %16605 = vmatprep.subr.bf16.mxu0 %v16983_v37 }
 0x633   :  { %v10705_v59 = vpack.c.bf16 %v10673_v63, %v10672_v43  ;;  %v10671_v29 = vmax.f32 %v10635_v30, 0.0  ;;  %v10595_v38 = vadd.f32 %v10476_v28, %v22681_v16  ;;  %v10640_v14 = vadd.f32 %v22773_v23, %v10597_v7  ;;  %v16988_v7 = vld [vmem:[%s23707_s5 + $0x68] sm:$0xff]  }
 0x634   :  { %v16554_v9 = vpop.f32.mrf.mxu1 }
 0x635   :  { %v10704_v51 = vpack.c.bf16 %v10671_v29, %v10670_v50  ;;  %v10598_v19 = vadd.f32 %v16554_v9, %v22686_v1  ;;  %16606 = vmatpush3.bf16.msra.mxu0 %v16983_v37  ;;  %v10638_v12 = vadd.f32 %v22773_v23, %v10595_v38  ;;  %v10676_v1 = vmax.f32 %v10640_v14, 0.0  ;;  %v16987_v14 = vld [vmem:[%s23707_s5 + $0x50] sm:$0xff]  }
 0x636   :  { %v10479_v0 = vpop.f32.mrf.mxu1  ;;  %16619 = vmatprep.subr.bf16.mxu0 %v22804_v27 }
 0x637   :  { %v10641_v40 = vadd.f32 %v22773_v23, %v10598_v19  ;;  %v10596_v16 = vadd.f32 %v10479_v0, %v22688_v52  ;;  %16583 = vmatprep.mubr.msk.bf16.mxu1 %vm6186_vm1, %v10704_v51  ;;  %v10674_v52 = vmax.f32 %v10638_v12, 0.0 }
 0x638   :  { %v16557_v17 = vpop.f32.mrf.mxu1  ;;  %16584 = vmatmul.mubr.msk.bf16.vlgmr.msra.gmra.mxu1 %vm6186_vm1, %v10705_v59 }
 0x639   :  { %v10677_v8 = vmax.f32 %v10641_v40, 0.0  ;;  %v10639_v24 = vadd.f32 %v22773_v23, %v10596_v16  ;;  %v10601_v33 = vadd.f32 %v16557_v17, %v22691_v55  ;;  %16596 = vmatpush3.bf16.msra.mxu1 %v22602_v26  ;;  %v16985_v26 = vld [vmem:[%s23707_s5 + $0x40] sm:$0xff]  }
 0x63a   :  { %v10492_v58 = vpop.f32.mrf.mxu1  ;;  %16597 = vmatprep.subr.bf16.mxu1 %v16981_v36 }
 0x63b   :  { %v10707_v20 = vpack.c.bf16 %v10677_v8, %v10676_v1  ;;  %v10675_v47 = vmax.f32 %v10639_v24, 0.0  ;;  %v10599_v57 = vadd.f32 %v10492_v58, %v22694_v11  ;;  %v10644_v34 = vadd.f32 %v22773_v23, %v10601_v33  ;;  %v16990_v1 = vld [vmem:[%s23707_s5 + $0x78] sm:$0xff]  }
 0x63c   :  { %v16558_v49 = vpop.f32.mrf.mxu1 }
 0x63d   :  { %v10706_v18 = vpack.c.bf16 %v10675_v47, %v10674_v52  ;;  %v10602_v37 = vadd.f32 %v16558_v49, %v22699_v46  ;;  %16598 = vmatpush3.bf16.msra.mxu1 %v16981_v36  ;;  %v10642_v60 = vadd.f32 %v22773_v23, %v10599_v57  ;;  %v10680_v45 = vmax.f32 %v10644_v34, 0.0 }
 0x63e   :  { %v10495_v55 = vpop.f32.mrf.mxu1  ;;  %16611 = vmatprep.subr.bf16.mxu1 %v16984_v39 }
 0x63f   :  { %v10645_v44 = vadd.f32 %v22773_v23, %v10602_v37  ;;  %v10600_v3 = vadd.f32 %v10495_v55, %v22701_v15  ;;  %16599 = vmatprep.mubr.msk.bf16.mxu1 %vm6186_vm1, %v10706_v18  ;;  %v10678_v28 = vmax.f32 %v10642_v60, 0.0 }
 0x640   :  { %v16561_v11 = vpop.f32.mrf.mxu1  ;;  %16600 = vmatmul.mubr.msk.bf16.vlgmr.msra.gmra.mxu1 %vm6186_vm1, %v10707_v20 }
 0x641   :  { %v10681_v46 = vmax.f32 %v10645_v44, 0.0  ;;  %v10643_v43 = vadd.f32 %v22773_v23, %v10600_v3  ;;  %v10605_v63 = vadd.f32 %v16561_v11, %v22704_v31  ;;  %16612 = vmatpush3.bf16.msra.mxu1 %v16984_v39 }
 0x642   :  { %v10508_v30 = vpop.f32.mrf.mxu1  ;;  %16613 = vmatprep.subr.bf16.mxu1 %v16985_v26 }
 0x643   :  { %v10709_v15 = vpack.c.bf16 %v10681_v46, %v10680_v45  ;;  %v10679_v50 = vmax.f32 %v10643_v43, 0.0  ;;  %v10603_v59 = vadd.f32 %v10508_v30, %v22707_v53  ;;  %v10648_v9 = vadd.f32 %v22773_v23, %v10605_v63  ;;  %v16991_v63 = vld [vmem:[%s23707_s5 + $0x70] sm:$0xff]  }
 0x644   :  { %v16562_v29 = vpop.f32.mrf.mxu1 }
 0x645   :  { %v10708_v38 = vpack.c.bf16 %v10679_v50, %v10678_v28  ;;  %v10606_v51 = vadd.f32 %v16562_v29, %v22712_v61  ;;  %16614 = vmatpush3.bf16.msra.mxu1 %v16985_v26  ;;  %v10646_v19 = vadd.f32 %v22773_v23, %v10603_v59  ;;  %v10684_v12 = vmax.f32 %v10648_v9, 0.0  ;;  %v16992_v26 = vld [vmem:[%s23707_s5 + $0x88] sm:$0xff]  }
 0x646   :  { %v10511_v31 = vpop.f32.mrf.mxu1  ;;  %16627 = vmatprep.subr.bf16.mxu1 %v16988_v7 }
 0x647   :  { %v10649_v0 = vadd.f32 %v22773_v23, %v10606_v51  ;;  %v10604_v36 = vadd.f32 %v10511_v31, %v22714_v32  ;;  %16607 = vmatprep.mubr.msk.bf16.mxu0 %vm6186_vm1, %v10708_v38  ;;  %v10682_v32 = vmax.f32 %v10646_v19, 0.0 }
 0x648   :  { %v16565_v53 = vpop.f32.mrf.mxu1  ;;  %16608 = vmatmul.mubr.msk.bf16.vlgmr.msra.gmra.mxu0 %vm6186_vm1, %v10709_v15 }
 0x649   :  { %v10685_v61 = vmax.f32 %v10649_v0, 0.0  ;;  %v10647_v40 = vadd.f32 %v22773_v23, %v10604_v36  ;;  %v10609_v16 = vadd.f32 %v16565_v53, %v22717_v2  ;;  %16620 = vmatpush3.bf16.msra.mxu0 %v22804_v27  ;;  %v16989_v27 = vld [vmem:[%s23707_s5 + $0x60] sm:$0xff]  }
 0x64a   :  { %v10524_v17 = vpop.f32.mrf.mxu1  ;;  %16621 = vmatprep.subr.bf16.mxu0 %v16987_v14 }
 0x64b   :  { %v10711_v8 = vpack.c.bf16 %v10685_v61, %v10684_v12  ;;  %v10683_v24 = vmax.f32 %v10647_v40, 0.0  ;;  %v10607_v33 = vadd.f32 %v10524_v17, %v22720_v13  ;;  %v10652_v52 = vadd.f32 %v22773_v23, %v10609_v16 }
 0x64c   :  { %v16566_v58 = vpop.f32.mrf.mxu1 }
 0x64d   :  { %v10710_v39 = vpack.c.bf16 %v10683_v24, %v10682_v32  ;;  %v10610_v20 = vadd.f32 %v16566_v58, %v22725_v41  ;;  %16622 = vmatpush3.bf16.msra.mxu0 %v16987_v14  ;;  %v10650_v47 = vadd.f32 %v22773_v23, %v10607_v33  ;;  %v10688_v18 = vmax.f32 %v10652_v52, 0.0 }
 0x64e   :  { %v10527_v2 = vpop.f32.mrf.mxu1  ;;  %16635 = vmatprep.subr.bf16.mxu0 %v16990_v1 }
 0x64f   :  { %v10653_v57 = vadd.f32 %v22773_v23, %v10610_v20  ;;  %v10608_v49 = vadd.f32 %v10527_v2, %v22727_v22  ;;  %16615 = vmatprep.mubr.msk.bf16.mxu1 %vm6186_vm1, %v10710_v39  ;;  %v10686_v60 = vmax.f32 %v10650_v47, 0.0 }
 0x650   :  { %v16569_v13 = vpop.f32.mrf.mxu1  ;;  %16616 = vmatmul.mubr.msk.bf16.vlgmr.msra.gmra.mxu1 %vm6186_vm1, %v10711_v8 }
 0x651   :  { %v10689_v41 = vmax.f32 %v10653_v57, 0.0  ;;  %v10651_v34 = vadd.f32 %v22773_v23, %v10608_v49  ;;  %v10613_v37 = vadd.f32 %v16569_v13, %v22730_v48  ;;  %16628 = vmatpush3.bf16.msra.mxu1 %v16988_v7 }
 0x652   :  { %v10540_v55 = vpop.f32.mrf.mxu1  ;;  %16629 = vmatprep.subr.bf16.mxu1 %v16989_v27 }
 0x653   :  { %v10713_v22 = vpack.c.bf16 %v10689_v41, %v10688_v18  ;;  %v10687_v44 = vmax.f32 %v10651_v34, 0.0  ;;  %v10611_v3 = vadd.f32 %v10540_v55, %v22733_v4  ;;  %v10656_v46 = vadd.f32 %v22773_v23, %v10613_v37  ;;  %v16994_v41 = vld [vmem:[%s23709_s7 + $0xe0] ss:$16 sps:$4 sm:$0xff]   ;;  %v16999_v34 = vld [vmem:[%s23709_s7 + $0xec] ss:$16 sps:$4 sm:$0xff]  }
 0x654   :  { %v16570_v11 = vpop.f32.mrf.mxu1  ;;  %v17002_v37 = vld [vmem:[%s23709_s7 + $0xc4] ss:$16 sps:$4 sm:$0xff]   ;;  %v17005_v55 = vld [vmem:[%s23709_s7 + $0xcc] ss:$16 sps:$4 sm:$0xff]  }
 0x655   :  { %v10712_v45 = vpack.c.bf16 %v10687_v44, %v10686_v60  ;;  %v10614_v43 = vadd.f32 %v16570_v11, %v22738_v35  ;;  %16630 = vmatpush3.bf16.msra.mxu1 %v16989_v27  ;;  %v10654_v30 = vadd.f32 %v22773_v23, %v10611_v3  ;;  %v10692_v15 = vmax.f32 %v10656_v46, 0.0  ;;  %v17003_v60 = vld [vmem:[%s23709_s7 + $0xc8] ss:$16 sps:$4 sm:$0xff]   ;;  %v17011_v44 = vld [vmem:[%s23709_s7 + $0xac] ss:$16 sps:$4 sm:$0xff]  }
 0x656   :  { %v10543_v48 = vpop.f32.mrf.mxu1  ;;  %16643 = vmatprep.subr.bf16.mxu1 %v16992_v26  ;;  %v17006_v3 = vld [vmem:[%s23709_s7 + $0xa0] ss:$16 sps:$4 sm:$0xff]   ;;  %v17009_v11 = vld [vmem:[%s23709_s7 + $0xa8] ss:$16 sps:$4 sm:$0xff]   ;;  %v17017_v46 = vld [vmem:[%s23709_s7 + $0x8c] ss:$16 sps:$4 sm:$0xff]  }
 0x657   :  { %v10657_v7 = vadd.f32 %v22773_v23, %v10614_v43  ;;  %v10612_v28 = vadd.f32 %v10543_v48, %v22740_v6  ;;  %16623 = vmatprep.mubr.msk.bf16.mxu0 %vm6186_vm1, %v10712_v45  ;;  %v10690_v38 = vmax.f32 %v10654_v30, 0.0  ;;  %v17014_v45 = vld [vmem:[%s23709_s7 + $0x84] ss:$16 sps:$4 sm:$0xff]   ;;  %v17012_v43 = vld [vmem:[%s23709_s7 + $0x80] ss:$16 sps:$4 sm:$0xff]  }
 0x658   :  { %v16573_v4 = vpop.f32.mrf.mxu1  ;;  %16624 = vmatmul.mubr.msk.bf16.vlgmr.msra.gmra.mxu0 %vm6186_vm1, %v10713_v22  ;;  %v17008_v22 = vld [vmem:[%s23709_s7 + $0xa4] ss:$16 sps:$4 sm:$0xff]   ;;  %v17015_v48 = vld [vmem:[%s23709_s7 + $0x88] ss:$16 sps:$4 sm:$0xff]   ;;  %v17023_v30 = vld [vmem:[%s23709_s7 + $0x6c] ss:$16 sps:$4 sm:$0xff]  }
 0x659   :  { %v10693_v35 = vmax.f32 %v10657_v7, 0.0  ;;  %v10655_v50 = vadd.f32 %v22773_v23, %v10612_v28  ;;  %v10617_v59 = vadd.f32 %v16573_v4, %v22743_v10  ;;  %16636 = vmatpush3.bf16.msra.mxu0 %v16990_v1  ;;  %v16993_v10 = vld [vmem:[%s23707_s5 + $0x80] sm:$0xff]   ;;  %v17325_v7 = vmov 0  }
 0x65a   :  { %v10556_v29 = vpop.f32.mrf.mxu1  ;;  %16637 = vmatprep.subr.bf16.mxu0 %v16991_v63 }
 0x65b   :  { %v10715_v9 = vpack.c.bf16 %v10693_v35, %v10692_v15  ;;  %v10691_v51 = vmax.f32 %v10655_v50, 0.0  ;;  %v10615_v31 = vadd.f32 %v10556_v29, %v22746_v56  ;;  %v10660_v19 = vadd.f32 %v22773_v23, %v10617_v59 }
 0x65c   :  { %v16574_v6 = vpop.f32.mrf.mxu1 }
 0x65d   :  { %v10714_v14 = vpack.c.bf16 %v10691_v51, %v10690_v38  ;;  %v10618_v0 = vadd.f32 %v16574_v6, %v22751_v25  ;;  %16638 = vmatpush3.bf16.msra.mxu0 %v16991_v63  ;;  %v10658_v53 = vadd.f32 %v22773_v23, %v10615_v31  ;;  %v10696_v40 = vmax.f32 %v10660_v19, 0.0  ;;  %v17020_v63 = vld [vmem:[%s23709_s7 + $0x64] ss:$16 sps:$4 sm:$0xff]  }
 0x65e   :  { %v10559_v36 = vpop.f32.mrf.mxu1 }
 0x65f   :  { %v10661_v12 = vadd.f32 %v22773_v23, %v10618_v0  ;;  %v10616_v61 = vadd.f32 %v10559_v36, %v22753_v62  ;;  %16631 = vmatprep.mubr.msk.bf16.mxu1 %vm6186_vm1, %v10714_v14  ;;  %v10694_v32 = vmax.f32 %v10658_v53, 0.0 }
 0x660   :  { %v16577_v56 = vpop.f32.mrf.mxu1  ;;  %16632 = vmatmul.mubr.msk.bf16.vlgmr.msra.gmra.mxu1 %vm6186_vm1, %v10715_v9 }
 0x661   :  { %v10697_v16 = vmax.f32 %v10661_v12, 0.0  ;;  %v10659_v25 = vadd.f32 %v22773_v23, %v10616_v61  ;;  %v10621_v17 = vadd.f32 %v16577_v56, %v22756_v42  ;;  %16644 = vmatpush3.bf16.msra.mxu1 %v16992_v26  ;;  %v17000_v26 = vld [vmem:[%s23709_s7 + $0xc0] ss:$16 sps:$4 sm:$0xff]  }
 0x662   :  { %v10572_v1 = vpop.f32.mrf.mxu1  ;;  %16645 = vmatprep.subr.bf16.mxu1 %v16993_v10 }
 0x663   :  { %v10717_v8 = vpack.c.bf16 %v10697_v16, %v10696_v40  ;;  %v10695_v24 = vmax.f32 %v10659_v25, 0.0  ;;  %v10619_v33 = vadd.f32 %v10572_v1, %v22761_v54  ;;  %v10664_v39 = vadd.f32 %v22773_v23, %v10621_v17 }
 0x664   :  { %v16578_v62 = vpop.f32.mrf.mxu1 }
 0x665   :  { %v10716_v58 = vpack.c.bf16 %v10695_v24, %v10694_v32  ;;  %v10622_v52 = vadd.f32 %v16578_v62, %v22765_v5  ;;  %16646 = vmatpush3.bf16.msra.mxu1 %v16993_v10  ;;  %v10662_v2 = vadd.f32 %v22773_v23, %v10619_v33  ;;  %v10700_v47 = vmax.f32 %v10664_v39, 0.0 }
 0x666   :  { %v10575_v20 = vpop.f32.mrf.mxu1  ;;  %11568 = vmatprep.subr.bf16.mxu1 %v16999_v34 }
 0x667   :  { %v10665_v42 = vadd.f32 %v22773_v23, %v10622_v52  ;;  %v10620_v27 = vadd.f32 %v10575_v20, %v22767_v21  ;;  %16639 = vmatprep.mubr.msk.bf16.mxu0 %vm6186_vm1, %v10716_v58  ;;  %v10698_v49 = vmax.f32 %v10662_v2, 0.0  ;;  %v16996_v21 = vld [vmem:[%s23709_s7 + $0xe4] ss:$16 sps:$4 sm:$0xff]  }
 0x668   :  { %16640 = vmatmul.mubr.msk.bf16.vlgmr.msra.gmra.mxu0 %vm6186_vm1, %v10717_v8  ;;  %11527 = vmatprep.subr.bf16.mxu0 %v16996_v21 }
 0x669   :  { %v10701_v54 = vmax.f32 %v10665_v42, 0.0  ;;  %v10663_v57 = vadd.f32 %v22773_v23, %v10620_v27  ;;  %v16997_v23 = vld [vmem:[%s23709_s7 + $0xe8] ss:$16 sps:$4 sm:$0xff]   ;;  %11528 = vmatpush1.bf16.msra.mxu0 %v16994_v41  ;;  %11551 = vmatprep.mubr.bf16.mxu0 %v17325_v7 }
 0x66a   :  { %11529 = vmatprep.subr.bf16.mxu0 %v17002_v37 }
 0x66b   :  { %v10719_v13 = vpack.c.bf16 %v10701_v54, %v10700_v47  ;;  %v10699_v18 = vmax.f32 %v10663_v57, 0.0 }
 0x66d   :  { %v10718_v5 = vpack.c.bf16 %v10699_v18, %v10698_v49  ;;  %11530 = vmatpush1.bf16.msra.mxu0 %v17000_v26 }
 0x66e   :  { %11531 = vmatprep.subr.bf16.mxu0 %v17008_v22  ;;  %v17021_v22 = vld [vmem:[%s23709_s7 + $0x68] ss:$16 sps:$4 sm:$0xff]  }
 0x66f   :  { %16647 = vmatprep.mubr.msk.bf16.mxu1 %vm6186_vm1, %v10718_v5 }
 0x670   :  { %16648 = vmatmul.mubr.msk.bf16.vlgmr.msra.gmra.mxu1 %vm6186_vm1, %v10719_v13 }
 0x671   :  { %11569 = vmatpush1.bf16.msra.mxu1 %v16997_v23  ;;  %11532 = vmatpush1.bf16.msra.mxu0 %v17006_v3  ;;  %v23005_v23 = vld [vmem:[%s23711_s6] ss:$0 sm:$0xff] }
 0x672   :  { %11570 = vmatprep.subr.bf16.mxu1 %v17005_v55  ;;  %11533 = vmatprep.subr.bf16.mxu0 %v17014_v45  ;;  %v17029_v45 = vld [vmem:[%s23709_s7 + $0x4c] ss:$16 sps:$4 sm:$0xff]  }
 0x673   :  { %11592 = vmatprep.mubr.bf16.mxu1 %v17325_v7 }
 0x675   :  { %11571 = vmatpush1.bf16.msra.mxu1 %v17003_v60  ;;  %11534 = vmatpush1.bf16.msra.mxu0 %v17012_v43  ;;  %v17018_v60 = vld [vmem:[%s23709_s7 + $0x60] ss:$16 sps:$4 sm:$0xff]  }
 0x676   :  { %11572 = vmatprep.subr.bf16.mxu1 %v17011_v44  ;;  %11692 = vmatprep.subr.bf16.mxu0 %v17020_v63  ;;  %v17024_v43 = vld [vmem:[%s23709_s7 + $0x40] ss:$16 sps:$4 sm:$0xff]  }
 0x679   :  { %11573 = vmatpush1.bf16.msra.mxu1 %v17009_v11  ;;  %v17026_v11 = vld [vmem:[%s23709_s7 + $0x44] ss:$16 sps:$4 sm:$0xff]  }
 0x67a   :  { %11574 = vmatprep.subr.bf16.mxu1 %v17017_v46 }
 0x67d   :  { %11575 = vmatpush1.bf16.msra.mxu1 %v17015_v48  ;;  %v17027_v48 = vld [vmem:[%s23709_s7 + $0x48] ss:$16 sps:$4 sm:$0xff]  }
 0x67e   :  { %11733 = vmatprep.subr.bf16.mxu1 %v17023_v30  ;;  %v17032_v30 = vld [vmem:[%s23709_s7 + $0x24] ss:$16 sps:$4 sm:$0xff]  }
 0x6f0   :  { %v22968_v15 = vpop.f32.mrf.mxu0 }
 0x6f2   :  { %v10847_v50 = vpop.f32.mrf.mxu0 }
 0x6f4   :  { %v22972_v29 = vpop.f32.mrf.mxu0 }
 0x6f6   :  { %v10850_v9 = vpop.f32.mrf.mxu0 }
 0x6f8   :  { %v22966_v28 = vpop.f32.mrf.mxu1 }
 0x6fa   :  { %v10780_v4 = vpop.f32.mrf.mxu1 }
 0x6fb   :  { %v10848_v54 = vadd.f32 %v10847_v50, %v10780_v4  ;;  %v17035_v4 = vld [vmem:[%s23709_s7 + $0x2c] ss:$16 sps:$4 sm:$0xff]   ;;  %v10856_v50 = vadd.f32 %v22968_v15, %v22966_v28  ;;  %v17038_v28 = vld [vmem:[%s23709_s7 + $0x4] ss:$16 sps:$4 sm:$0xff]  }
 0x6fc   :  { %v22970_v35 = vpop.f32.mrf.mxu1  ;;  %v17041_v15 = vld [vmem:[%s23709_s7 + $0xc] ss:$16 sps:$4 sm:$0xff]  }
 0x6fe   :  { %v10783_v59 = vpop.f32.mrf.mxu1 }
 0x6ff   :  { %v10851_v8 = vadd.f32 %v10850_v9, %v10783_v59  ;;  %v17030_v59 = vld [vmem:[%s23709_s7 + $0x20] ss:$16 sps:$4 sm:$0xff]   ;;  %v17033_v9 = vld [vmem:[%s23709_s7 + $0x28] ss:$16 sps:$4 sm:$0xff]  }
 0x700   :  { %v22974_v38 = vpop.f32.mrf.mxu1 }
 0x702   :  { %v10918_v51 = vpop.f32.mrf.mxu1 }
 0x703   :  { %v10933_v13 = vadd.f32 %v10918_v51, %v10848_v54  ;;  %v10935_v51 = vadd.f32 %v22974_v38, %v10856_v50  ;;  %v17036_v38 = vld [vmem:[%s23709_s7] ss:$16 sps:$4 sm:$0xff]  }
 0x704   :  { %v22978_v6 = vpop.f32.mrf.mxu1  ;;  %v17090_v50 = vld [vmem:[%s23710_s9 + $0xe0] ss:$16 sps:$4 sm:$0xff]  }
 0x706   :  { %v10921_v19 = vpop.f32.mrf.mxu1 }
 0x707   :  { %v10934_v62 = vadd.f32 %v10921_v19, %v10851_v8 }
 0x708   :  { %v22976_v31 = vpop.f32.mrf.mxu0 }
 0x709   :  { %v11010_v19 = vadd.f32 %v22976_v31, %v10935_v51  ;;  %v17047_v31 = vld [vmem:[%s23709_s7 + $0x16c] ss:$16 sps:$4 sm:$0xff]   ;;  %v17098_v51 = vld [vmem:[%s23710_s9 + $0xc4] ss:$16 sps:$4 sm:$0xff]  }
 0x70a   :  { %v10993_v14 = vpop.f32.mrf.mxu0 }
 0x70b   :  { %v11008_v21 = vadd.f32 %v10993_v14, %v10933_v13 }
 0x70c   :  { %v22980_v0 = vpop.f32.mrf.mxu0 }
 0x70e   :  { %v10996_v10 = vpop.f32.mrf.mxu0 }
 0x70f   :  { %v11009_v58 = vadd.f32 %v10996_v10, %v10934_v62  ;;  %v17039_v10 = vld [vmem:[%s23709_s7 + $0x8] ss:$16 sps:$4 sm:$0xff]   ;;  %v17050_v62 = vld [vmem:[%s23709_s7 + $0x144] ss:$16 sps:$4 sm:$0xff]  }
 0x710   :  { %v22982_v36 = vpop.f32.mrf.mxu1 }
 0x712   :  { %v11068_v53 = vpop.f32.mrf.mxu1 }
 0x713   :  { %v11083_v34 = vadd.f32 %v11068_v53, %v11008_v21  ;;  %v11085_v53 = vadd.f32 %v22982_v36, %v11010_v19  ;;  %v17045_v36 = vld [vmem:[%s23709_s7 + $0x168] ss:$16 sps:$4 sm:$0xff]   ;;  %v17104_v19 = vld [vmem:[%s23710_s9 + $0xa4] ss:$16 sps:$4 sm:$0xff]  }
 0x714   :  { %v22986_v61 = vpop.f32.mrf.mxu1 }
 0x716   :  { %v11071_v40 = vpop.f32.mrf.mxu1 }
 0x717   :  { %v11084_v20 = vadd.f32 %v11071_v40, %v11009_v58  ;;  %v17044_v40 = vld [vmem:[%s23709_s7 + $0x164] ss:$16 sps:$4 sm:$0xff]  }
 0x718   :  { %v22984_v12 = vpop.f32.mrf.mxu0 }
 0x71a   :  { %v11143_v56 = vpop.f32.mrf.mxu0 }
 0x71b   :  { %v11158_v55 = vadd.f32 %v11143_v56, %v11083_v34 }
 0x71c   :  { %v22988_v16 = vpop.f32.mrf.mxu0 }
 0x71e   :  { %v11146_v17 = vpop.f32.mrf.mxu0 }
 0x71f   :  { %v11159_v42 = vadd.f32 %v11146_v17, %v11084_v20  ;;  %v11160_v17 = vadd.f32 %v22984_v12, %v11085_v53  ;;  %v17053_v12 = vld [vmem:[%s23709_s7 + $0x14c] ss:$16 sps:$4 sm:$0xff]   ;;  %v17105_v53 = vld [vmem:[%s23710_s9 + $0x2a0] ss:$16 sps:$4 sm:$0xff]  }
 0x720   :  { %v22990_v25 = vpop.f32.mrf.mxu1 }
 0x721   :  { %v11235_v8 = vadd.f32 %v22990_v25, %v11160_v17  ;;  %v17048_v25 = vld [vmem:[%s23709_s7 + $0x140] ss:$16 sps:$4 sm:$0xff]  }
 0x722   :  { %v11218_v1 = vpop.f32.mrf.mxu1  ;;  %v17111_v17 = vld [vmem:[%s23710_s9 + $0x280] ss:$16 sps:$4 sm:$0xff]  }
 0x723   :  { %v11233_v44 = vadd.f32 %v11218_v1, %v11158_v55  ;;  %v17042_v1 = vld [vmem:[%s23709_s7 + $0x160] ss:$16 sps:$4 sm:$0xff]  }
 0x724   :  { %v22994_v24 = vpop.f32.mrf.mxu1 }
 0x726   :  { %v11221_v39 = vpop.f32.mrf.mxu1 }
 0x727   :  { %v11234_v57 = vadd.f32 %v11221_v39, %v11159_v42  ;;  %v17051_v39 = vld [vmem:[%s23709_s7 + $0x148] ss:$16 sps:$4 sm:$0xff]   ;;  %v17059_v42 = vld [vmem:[%s23709_s7 + $0x12c] ss:$16 sps:$4 sm:$0xff]  }
 0x728   :  { %v22992_v32 = vpop.f32.mrf.mxu0 }
 0x729   :  { %v11310_v58 = vadd.f32 %v22992_v32, %v11235_v8  ;;  %v17056_v32 = vld [vmem:[%s23709_s7 + $0x124] ss:$16 sps:$4 sm:$0xff]   ;;  %v17114_v8 = vld [vmem:[%s23710_s9 + $0x60] ss:$16 sps:$4 sm:$0xff]  }
 0x72a   :  { %v11293_v33 = vpop.f32.mrf.mxu0 }
 0x72b   :  { %v11308_v46 = vadd.f32 %v11293_v33, %v11233_v44  ;;  %v17075_v44 = vld [vmem:[%s23709_s7 + $0x1c8] ss:$16 sps:$4 sm:$0xff]  }
 0x72c   :  { %v22996_v52 = vpop.f32.mrf.mxu0 }
 0x72e   :  { %v11296_v27 = vpop.f32.mrf.mxu0 }
 0x72f   :  { %v11309_v18 = vadd.f32 %v11296_v27, %v11234_v57  ;;  %v10859_v27 = vadd.f32 %v22972_v29, %v22970_v35  ;;  %v17062_v35 = vld [vmem:[%s23709_s7 + $0x104] ss:$16 sps:$4 sm:$0xff]   ;;  %v17065_v29 = vld [vmem:[%s23709_s7 + $0x10c] ss:$16 sps:$4 sm:$0xff]  }
 0x730   :  { %v22998_v2 = vpop.f32.mrf.mxu1 }
 0x731   :  { %v11385_v20 = vadd.f32 %v22998_v2, %v11310_v58  ;;  %v17054_v2 = vld [vmem:[%s23709_s7 + $0x120] ss:$16 sps:$4 sm:$0xff]   ;;  %v10936_v54 = vadd.f32 %v22978_v6, %v10859_v27  ;;  %v17134_v27 = vld [vmem:[%s23710_s9 + $0x4] ss:$16 sps:$4 sm:$0xff]  }
 0x732   :  { %v11368_v47 = vpop.f32.mrf.mxu1  ;;  %v17060_v6 = vld [vmem:[%s23709_s7 + $0x100] ss:$16 sps:$4 sm:$0xff]  }
 0x733   :  { %v11383_v63 = vadd.f32 %v11368_v47, %v11308_v46  ;;  %v17057_v47 = vld [vmem:[%s23709_s7 + $0x128] ss:$16 sps:$4 sm:$0xff]   ;;  %v11396_v57 = vadd.f32 %v23005_v23, %v11385_v20  ;;  %v11011_v13 = vadd.f32 %v22980_v0, %v10936_v54  ;;  %v17071_v0 = vld [vmem:[%s23709_s7 + $0x1ec] ss:$16 sps:$4 sm:$0xff]   ;;  %v17120_v58 = vld [vmem:[%s23710_s9 + $0x40] ss:$16 sps:$4 sm:$0xff]  }
 0x734   :  { %v23000_v49 = vpop.f32.mrf.mxu1  ;;  %v17131_v20 = vld [vmem:[%s23710_s9 + $0x224] ss:$16 sps:$4 sm:$0xff]   ;;  %v17135_v54 = vld [vmem:[%s23710_s9 + $0x200] ss:$16 sps:$4 sm:$0xff]  }
 0x735   :  { %v11394_v14 = vadd.f32 %v23005_v23, %v11383_v63  ;;  %v11400_v21 = vmax.f32 %v11396_v57, 0.0  ;;  %v17140_v57 = vld [vmem:[%s23710_s9 + $0x1e4] ss:$16 sps:$4 sm:$0xff]  }
 0x736   :  { %v11371_v5 = vpop.f32.mrf.mxu1 }
 0x737   :  { %v11384_v41 = vadd.f32 %v11371_v5, %v11309_v18  ;;  %v11398_v56 = vmax.f32 %v11394_v14, 0.0  ;;  %v17063_v18 = vld [vmem:[%s23709_s7 + $0x108] ss:$16 sps:$4 sm:$0xff]   ;;  %v11086_v5 = vadd.f32 %v22986_v61, %v11011_v13  ;;  %v17101_v14 = vld [vmem:[%s23710_s9 + $0x2c4] ss:$16 sps:$4 sm:$0xff]  }
 0x738   :  { %v17069_v61 = vld [vmem:[%s23709_s7 + $0x1e8] ss:$16 sps:$4 sm:$0xff]   ;;  %v17141_v13 = vld [vmem:[%s23710_s9 + $0x3e0] ss:$16 sps:$4 sm:$0xff]  }
 0x739   :  { %v11395_v37 = vadd.f32 %v23005_v23, %v11384_v41  ;;  %v11402_v33 = vpack.c.bf16 %v11398_v56, %v11398_v56  ;;  %v17068_v41 = vld [vmem:[%s23709_s7 + $0x1e4] ss:$16 sps:$4 sm:$0xff]   ;;  %v11161_v34 = vadd.f32 %v22988_v16, %v11086_v5  ;;  %v17077_v16 = vld [vmem:[%s23709_s7 + $0x1cc] ss:$16 sps:$4 sm:$0xff]   ;;  %v17144_v5 = vld [vmem:[%s23710_s9 + $0x1c0] ss:$16 sps:$4 sm:$0xff]  }
 0x73a   :  { %v17110_v56 = vld [vmem:[%s23710_s9 + $0x84] ss:$16 sps:$4 sm:$0xff]  }
 0x73b   :  { %v11399_v26 = vmax.f32 %v11395_v37, 0.0  ;;  %v17066_v37 = vld [vmem:[%s23709_s7 + $0x1e0] ss:$16 sps:$4 sm:$0xff]   ;;  %v11236_v55 = vadd.f32 %v22994_v24, %v11161_v34 }
 0x73c   :  { %v17072_v24 = vld [vmem:[%s23709_s7 + $0x1c0] ss:$16 sps:$4 sm:$0xff]  }
 0x73d   :  { %v11419_v3 = vpack.c.bf16 %v11399_v26, %v11399_v26  ;;  %v11766_v26 = vpack.c.bf16 %v11400_v21, %v11400_v21  ;;  %v17147_v21 = vld [vmem:[%s23710_s9 + $0x3c0] ss:$16 sps:$4 sm:$0xff]  }
 0x73e   :  { %v17150_v34 = vld [vmem:[%s23710_s9 + $0x1a0] ss:$16 sps:$4 sm:$0xff]  }
 0x73f   :  { %14446 = vmatmul.mubr.msk.bf16.vlgmr.msra.gmra.mxu0 %vm2100_vm0, %v11419_v3  ;;  %14447 = vmatmul.mubr.msk.bf16.vlgmr.msra.gmra.mxu1 %vm2100_vm0, %v11419_v3 }
 0x740   :  { %11693 = vmatpush1.bf16.msra.mxu0 %v17018_v60  ;;  %11734 = vmatpush1.bf16.msra.mxu1 %v17021_v22  ;;  %v17074_v60 = vld [vmem:[%s23709_s7 + $0x1c4] ss:$16 sps:$4 sm:$0xff]   ;;  %v11311_v22 = vadd.f32 %v22996_v52, %v11236_v55 }
 0x741   :  { %11694 = vmatprep.subr.bf16.mxu0 %v17026_v11  ;;  %11735 = vmatprep.subr.bf16.mxu1 %v17029_v45  ;;  %v17080_v52 = vld [vmem:[%s23709_s7 + $0x1a4] ss:$16 sps:$4 sm:$0xff]   ;;  %v17083_v11 = vld [vmem:[%s23709_s7 + $0x1ac] ss:$16 sps:$4 sm:$0xff]   ;;  %v17081_v45 = vld [vmem:[%s23709_s7 + $0x1a8] ss:$16 sps:$4 sm:$0xff]  }
 0x742   :  { %11716 = vmatprep.mubr.bf16.mxu0 %v17325_v7  ;;  %11757 = vmatprep.mubr.bf16.mxu1 %v17325_v7  ;;  %v11386_v3 = vadd.f32 %v23000_v49, %v11311_v22  ;;  %v17078_v49 = vld [vmem:[%s23709_s7 + $0x1a0] ss:$16 sps:$4 sm:$0xff]   ;;  %v17161_v55 = vld [vmem:[%s23710_s9 + $0x384] ss:$16 sps:$4 sm:$0xff]  }
 0x743   :  { %v17167_v22 = vld [vmem:[%s23710_s9 + $0x364] ss:$16 sps:$4 sm:$0xff]  }
 0x744   :  { %11695 = vmatpush1.bf16.msra.mxu0 %v17024_v43  ;;  %11736 = vmatpush1.bf16.msra.mxu1 %v17027_v48  ;;  %v11397_v46 = vadd.f32 %v23005_v23, %v11386_v3  ;;  %v17086_v43 = vld [vmem:[%s23709_s7 + $0x184] ss:$16 sps:$4 sm:$0xff]   ;;  %v17084_v48 = vld [vmem:[%s23709_s7 + $0x180] ss:$16 sps:$4 sm:$0xff]   ;;  %v17087_v23 = vld [vmem:[%s23709_s7 + $0x188] ss:$16 sps:$4 sm:$0xff]  }
 0x745   :  { %11696 = vmatprep.subr.bf16.mxu0 %v17032_v30  ;;  %11737 = vmatprep.subr.bf16.mxu1 %v17035_v4  ;;  %v17092_v30 = vld [vmem:[%s23710_s9 + $0xe4] ss:$16 sps:$4 sm:$0xff]  }
 0x746   :  { %v11401_v63 = vmax.f32 %v11397_v46, 0.0  ;;  %v17095_v4 = vld [vmem:[%s23710_s9 + $0x2e4] ss:$16 sps:$4 sm:$0xff]  }
 0x747   :  { %v17170_v3 = vld [vmem:[%s23710_s9 + $0x144] ss:$16 sps:$4 sm:$0xff]  }
 0x748   :  { %11697 = vmatpush1.bf16.msra.mxu0 %v17030_v59  ;;  %11738 = vmatpush1.bf16.msra.mxu1 %v17033_v9  ;;  %v17093_v59 = vld [vmem:[%s23710_s9 + $0x2e0] ss:$16 sps:$4 sm:$0xff]   ;;  %v11952_v9 = vpack.c.bf16 %v11401_v63, %v11401_v63  ;;  %v17179_v46 = vld [vmem:[%s23710_s9 + $0x324] ss:$16 sps:$4 sm:$0xff]  }
 0x749   :  { %11698 = vmatprep.subr.bf16.mxu0 %v17038_v28  ;;  %11739 = vmatprep.subr.bf16.mxu1 %v17041_v15  ;;  %v17096_v28 = vld [vmem:[%s23710_s9 + $0xc0] ss:$16 sps:$4 sm:$0xff]  }
 0x74a   :  { %v17099_v15 = vld [vmem:[%s23710_s9 + $0x2c0] ss:$16 sps:$4 sm:$0xff]  }
 0x74b   :  { %v17180_v63 = vld [vmem:[%s23710_s9 + $0x100] ss:$16 sps:$4 sm:$0xff]  }
 0x74c   :  { %11699 = vmatpush1.bf16.msra.mxu0 %v17036_v38  ;;  %11740 = vmatpush1.bf16.msra.mxu1 %v17039_v10  ;;  %v17107_v38 = vld [vmem:[%s23710_s9 + $0x2a4] ss:$16 sps:$4 sm:$0xff]   ;;  %v17102_v10 = vld [vmem:[%s23710_s9 + $0xa0] ss:$16 sps:$4 sm:$0xff]  }
 0x74d   :  { %11874 = vmatprep.subr.bf16.mxu0 %v17044_v40  ;;  %11915 = vmatprep.subr.bf16.mxu1 %v17047_v31  ;;  %v17113_v40 = vld [vmem:[%s23710_s9 + $0x284] ss:$16 sps:$4 sm:$0xff]   ;;  %v17108_v31 = vld [vmem:[%s23710_s9 + $0x80] ss:$16 sps:$4 sm:$0xff]  }
 0x74f   :  { %14464 = vmatmul.mubr.msk.bf16.vlgmr.msra.gmra.mxu0 %vm2100_vm0, %v11402_v33  ;;  %14465 = vmatmul.mubr.msk.bf16.vlgmr.msra.gmra.mxu1 %vm2100_vm0, %v11402_v33  ;;  %v17117_v33 = vld [vmem:[%s23710_s9 + $0x260] ss:$16 sps:$4 sm:$0xff]  }
 0x750   :  { %11875 = vmatpush1.bf16.msra.mxu0 %v17042_v1  ;;  %11916 = vmatpush1.bf16.msra.mxu1 %v17045_v36  ;;  %v17116_v1 = vld [vmem:[%s23710_s9 + $0x64] ss:$16 sps:$4 sm:$0xff]  }
 0x751   :  { %11876 = vmatprep.subr.bf16.mxu0 %v17050_v62  ;;  %11917 = vmatprep.subr.bf16.mxu1 %v17053_v12  ;;  %v17119_v36 = vld [vmem:[%s23710_s9 + $0x264] ss:$16 sps:$4 sm:$0xff]  }
 0x752   :  { %11898 = vmatprep.mubr.bf16.mxu0 %v17325_v7  ;;  %11939 = vmatprep.mubr.bf16.mxu1 %v17325_v7  ;;  %v17122_v62 = vld [vmem:[%s23710_s9 + $0x44] ss:$16 sps:$4 sm:$0xff]  }
 0x753   :  { %v17125_v12 = vld [vmem:[%s23710_s9 + $0x244] ss:$16 sps:$4 sm:$0xff]  }
 0x754   :  { %11877 = vmatpush1.bf16.msra.mxu0 %v17048_v25  ;;  %11918 = vmatpush1.bf16.msra.mxu1 %v17051_v39  ;;  %v17123_v25 = vld [vmem:[%s23710_s9 + $0x240] ss:$16 sps:$4 sm:$0xff]   ;;  %v17128_v39 = vld [vmem:[%s23710_s9 + $0x24] ss:$16 sps:$4 sm:$0xff]  }
 0x755   :  { %11878 = vmatprep.subr.bf16.mxu0 %v17056_v32  ;;  %11919 = vmatprep.subr.bf16.mxu1 %v17059_v42  ;;  %v17126_v32 = vld [vmem:[%s23710_s9 + $0x20] ss:$16 sps:$4 sm:$0xff]  }
 0x756   :  { %v17129_v42 = vld [vmem:[%s23710_s9 + $0x220] ss:$16 sps:$4 sm:$0xff]  }
 0x758   :  { %11879 = vmatpush1.bf16.msra.mxu0 %v17054_v2  ;;  %11920 = vmatpush1.bf16.msra.mxu1 %v17057_v47  ;;  %v17137_v2 = vld [vmem:[%s23710_s9 + $0x204] ss:$16 sps:$4 sm:$0xff]   ;;  %v17132_v47 = vld [vmem:[%s23710_s9] ss:$16 sps:$4 sm:$0xff]  }
 0x759   :  { %11880 = vmatprep.subr.bf16.mxu0 %v17062_v35  ;;  %11921 = vmatprep.subr.bf16.mxu1 %v17065_v29  ;;  %v17143_v35 = vld [vmem:[%s23710_s9 + $0x3e4] ss:$16 sps:$4 sm:$0xff]   ;;  %v17138_v29 = vld [vmem:[%s23710_s9 + $0x1e0] ss:$16 sps:$4 sm:$0xff]  }
 0x75c   :  { %11881 = vmatpush1.bf16.msra.mxu0 %v17060_v6  ;;  %11922 = vmatpush1.bf16.msra.mxu1 %v17063_v18  ;;  %v17146_v6 = vld [vmem:[%s23710_s9 + $0x1c4] ss:$16 sps:$4 sm:$0xff]  }
 0x75d   :  { %12060 = vmatprep.subr.bf16.mxu0 %v17068_v41  ;;  %12101 = vmatprep.subr.bf16.mxu1 %v17071_v0  ;;  %v17149_v18 = vld [vmem:[%s23710_s9 + $0x3c4] ss:$16 sps:$4 sm:$0xff]  }
 0x75e   :  { %v17152_v41 = vld [vmem:[%s23710_s9 + $0x1a4] ss:$16 sps:$4 sm:$0xff]  }
 0x75f   :  { %14482 = vmatmul.mubr.msk.bf16.vlgmr.msra.gmra.mxu0 %vm2100_vm0, %v11766_v26  ;;  %14483 = vmatmul.mubr.msk.bf16.vlgmr.msra.gmra.mxu1 %vm2100_vm0, %v11766_v26  ;;  %v17155_v0 = vld [vmem:[%s23710_s9 + $0x3a4] ss:$16 sps:$4 sm:$0xff]   ;;  %v17156_v26 = vld [vmem:[%s23710_s9 + $0x180] ss:$16 sps:$4 sm:$0xff]  }
 0x760   :  { %12061 = vmatpush1.bf16.msra.mxu0 %v17066_v37  ;;  %12102 = vmatpush1.bf16.msra.mxu1 %v17069_v61  ;;  %v17153_v37 = vld [vmem:[%s23710_s9 + $0x3a0] ss:$16 sps:$4 sm:$0xff]   ;;  %v17158_v61 = vld [vmem:[%s23710_s9 + $0x184] ss:$16 sps:$4 sm:$0xff]  }
 0x761   :  { %12062 = vmatprep.subr.bf16.mxu0 %v17074_v60  ;;  %12103 = vmatprep.subr.bf16.mxu1 %v17077_v16  ;;  %v17159_v60 = vld [vmem:[%s23710_s9 + $0x380] ss:$16 sps:$4 sm:$0xff]   ;;  %v17164_v16 = vld [vmem:[%s23710_s9 + $0x164] ss:$16 sps:$4 sm:$0xff]  }
 0x762   :  { %12084 = vmatprep.mubr.bf16.mxu0 %v17325_v7  ;;  %12125 = vmatprep.mubr.bf16.mxu1 %v17325_v7  ;;  %v17089_v7 = vld [vmem:[%s23709_s7 + $0x18c] ss:$16 sps:$4 sm:$0xff]  }
 0x764   :  { %12063 = vmatpush1.bf16.msra.mxu0 %v17072_v24  ;;  %12104 = vmatpush1.bf16.msra.mxu1 %v17075_v44  ;;  %v17162_v24 = vld [vmem:[%s23710_s9 + $0x160] ss:$16 sps:$4 sm:$0xff]  }
 0x765   :  { %12064 = vmatprep.subr.bf16.mxu0 %v17080_v52  ;;  %12105 = vmatprep.subr.bf16.mxu1 %v17083_v11  ;;  %v17165_v44 = vld [vmem:[%s23710_s9 + $0x360] ss:$16 sps:$4 sm:$0xff]   ;;  %v17173_v52 = vld [vmem:[%s23710_s9 + $0x344] ss:$16 sps:$4 sm:$0xff]  }
 0x766   :  { %v17168_v11 = vld [vmem:[%s23710_s9 + $0x140] ss:$16 sps:$4 sm:$0xff]  }
 0x768   :  { %12065 = vmatpush1.bf16.msra.mxu0 %v17078_v49  ;;  %12106 = vmatpush1.bf16.msra.mxu1 %v17081_v45  ;;  %v17171_v49 = vld [vmem:[%s23710_s9 + $0x340] ss:$16 sps:$4 sm:$0xff]   ;;  %v17176_v45 = vld [vmem:[%s23710_s9 + $0x124] ss:$16 sps:$4 sm:$0xff]  }
 0x769   :  { %12066 = vmatprep.subr.bf16.mxu0 %v17086_v43  ;;  %12107 = vmatprep.subr.bf16.mxu1 %v17089_v7  ;;  %v17174_v43 = vld [vmem:[%s23710_s9 + $0x120] ss:$16 sps:$4 sm:$0xff]  }
 0x76a   :  { %v17177_v7 = vld [vmem:[%s23710_s9 + $0x320] ss:$16 sps:$4 sm:$0xff]  }
 0x76c   :  { %12067 = vmatpush1.bf16.msra.mxu0 %v17084_v48  ;;  %12108 = vmatpush1.bf16.msra.mxu1 %v17087_v23  ;;  %v17182_v48 = vld [vmem:[%s23710_s9 + $0x104] ss:$16 sps:$4 sm:$0xff]  }
 0x76d   :  { %12962 = vmatprep.subr.bf16.mxu0 %v17092_v30  ;;  %13003 = vmatprep.subr.bf16.mxu1 %v17095_v4  ;;  %v17185_v23 = vld [vmem:[%s23710_s9 + $0x304] ss:$16 sps:$4 sm:$0xff]   ;;  %v17183_v30 = vld [vmem:[%s23710_s9 + $0x300] ss:$16 sps:$4 sm:$0xff]   ;;  %v17188_v4 = vld [vmem:[%s23710_s9 + $0xec] ss:$16 sps:$4 sm:$0xff]  }
 0x76f   :  { %14500 = vmatmul.mubr.msk.bf16.vlgmr.msra.gmra.mxu0 %vm2100_vm0, %v11952_v9  ;;  %14501 = vmatmul.mubr.msk.bf16.vlgmr.msra.gmra.mxu1 %vm2100_vm0, %v11952_v9 }
 0x770   :  { %12963 = vmatpush1.bf16.msra.mxu0 %v17090_v50  ;;  %13004 = vmatpush1.bf16.msra.mxu1 %v17093_v59  ;;  %v17191_v50 = vld [vmem:[%s23710_s9 + $0x2ec] ss:$16 sps:$4 sm:$0xff]  }
 0x771   :  { %12964 = vmatprep.subr.bf16.mxu0 %v17098_v51  ;;  %13005 = vmatprep.subr.bf16.mxu1 %v17101_v14 }
 0x774   :  { %12965 = vmatpush1.bf16.msra.mxu0 %v17096_v28  ;;  %13006 = vmatpush1.bf16.msra.mxu1 %v17099_v15 }
 0x775   :  { %12966 = vmatprep.subr.bf16.mxu0 %v17104_v19  ;;  %13007 = vmatprep.subr.bf16.mxu1 %v17107_v38 }
 0x778   :  { %12967 = vmatpush1.bf16.msra.mxu0 %v17102_v10  ;;  %13008 = vmatpush1.bf16.msra.mxu1 %v17105_v53 }
 0x779   :  { %12968 = vmatprep.subr.bf16.mxu0 %v17110_v56  ;;  %13009 = vmatprep.subr.bf16.mxu1 %v17113_v40 }
 0x77c   :  { %12969 = vmatpush1.bf16.msra.mxu0 %v17108_v31  ;;  %13010 = vmatpush1.bf16.msra.mxu1 %v17111_v17 }
 0x77d   :  { %12970 = vmatprep.subr.bf16.mxu0 %v17116_v1  ;;  %13011 = vmatprep.subr.bf16.mxu1 %v17119_v36 }
 0x780   :  { %12971 = vmatpush1.bf16.msra.mxu0 %v17114_v8  ;;  %13012 = vmatpush1.bf16.msra.mxu1 %v17117_v33 }
 0x781   :  { %12972 = vmatprep.subr.bf16.mxu0 %v17122_v62  ;;  %13013 = vmatprep.subr.bf16.mxu1 %v17125_v12 }
 0x784   :  { %12973 = vmatpush1.bf16.msra.mxu0 %v17120_v58  ;;  %13014 = vmatpush1.bf16.msra.mxu1 %v17123_v25  ;;  %v12140_v58 = vlaneseq }
 0x785   :  { %12974 = vmatprep.subr.bf16.mxu0 %v17128_v39  ;;  %13015 = vmatprep.subr.bf16.mxu1 %v17131_v20 }
 0x788   :  { %12975 = vmatpush1.bf16.msra.mxu0 %v17126_v32  ;;  %13016 = vmatpush1.bf16.msra.mxu1 %v17129_v42  ;;  %v23379_v42 = vshrl.u32 %v12140_v58, 7  ;;  %v17213_v58 = vld [vmem:[%s23710_s9 + $0x268] ss:$16 sps:$4 sm:$0xff]  }
 0x789   :  { %12976 = vmatprep.subr.bf16.mxu0 %v17134_v27  ;;  %13017 = vmatprep.subr.bf16.mxu1 %v17137_v2 }
 0x78a   :  { %v12142_v27 = vsub.s32 0, %v23379_v42  ;;  %v12150_v2 = vsub.s32 2, %v23379_v42 }
 0x78c   :  { %12977 = vmatpush1.bf16.msra.mxu0 %v17132_v47  ;;  %13018 = vmatpush1.bf16.msra.mxu1 %v17135_v54  ;;  %v12138_v47 = vld [vmem:[%s23713_s8] sm:$0xf]  ;;  %v12146_v54 = vsub.s32 1, %v23379_v42 }
 0x78d   :  { %12978 = vmatprep.subr.bf16.mxu0 %v17140_v57  ;;  %13019 = vmatprep.subr.bf16.mxu1 %v17143_v35  ;;  %v12154_v57 = vsub.s32 3, %v23379_v42 }
 0x790   :  { %12979 = vmatpush2.bf16.msra.mxu0 %v17138_v29  ;;  %13020 = vmatpush2.bf16.msra.mxu1 %v17141_v13  ;;  %v12143_v13 = vrot.slane %v12138_v47, %v12142_v27 }
 0x791   :  { %12980 = vmatprep.subr.bf16.mxu0 %v17146_v6  ;;  %13021 = vmatprep.subr.bf16.mxu1 %v17149_v18  ;;  %v12151_v6 = vrot.slane %v12138_v47, %v12150_v2 }
 0x794   :  { %12981 = vmatpush2.bf16.msra.mxu0 %v17144_v5  ;;  %13022 = vmatpush2.bf16.msra.mxu1 %v17147_v21 }
 0x795   :  { %12982 = vmatprep.subr.bf16.mxu0 %v17152_v41  ;;  %13023 = vmatprep.subr.bf16.mxu1 %v17155_v0 }
 0x798   :  { %12983 = vmatpush2.bf16.msra.mxu0 %v17150_v34  ;;  %13024 = vmatpush2.bf16.msra.mxu1 %v17153_v37  ;;  %v12147_v37 = vrot.slane %v12138_v47, %v12146_v54 }
 0x799   :  { %12984 = vmatprep.subr.bf16.mxu0 %v17158_v61  ;;  %13025 = vmatprep.subr.bf16.mxu1 %v17161_v55  ;;  %v12155_v61 = vrot.slane %v12138_v47, %v12154_v57  ;;  %v17224_v47 = vld [vmem:[%s23710_s9 + $0x2c] ss:$16 sps:$4 sm:$0xff]  }
 0x79c   :  { %12985 = vmatpush2.bf16.msra.mxu0 %v17156_v26  ;;  %13026 = vmatpush2.bf16.msra.mxu1 %v17159_v60 }
 0x79d   :  { %12986 = vmatprep.subr.bf16.mxu0 %v17164_v16  ;;  %13027 = vmatprep.subr.bf16.mxu1 %v17167_v22 }
 0x7a0   :  { %12987 = vmatpush2.bf16.msra.mxu0 %v17162_v24  ;;  %13028 = vmatpush2.bf16.msra.mxu1 %v17165_v44 }
 0x7a1   :  { %12988 = vmatprep.subr.bf16.mxu0 %v17170_v3  ;;  %13029 = vmatprep.subr.bf16.mxu1 %v17173_v52 }
 0x7a4   :  { %12989 = vmatpush2.bf16.msra.mxu0 %v17168_v11  ;;  %13030 = vmatpush2.bf16.msra.mxu1 %v17171_v49 }
 0x7a5   :  { %12990 = vmatprep.subr.bf16.mxu0 %v17176_v45  ;;  %13031 = vmatprep.subr.bf16.mxu1 %v17179_v46 }
 0x7a8   :  { %12991 = vmatpush2.bf16.msra.mxu0 %v17174_v43  ;;  %13032 = vmatpush2.bf16.msra.mxu1 %v17177_v7 }
 0x7a9   :  { %12992 = vmatprep.subr.bf16.mxu0 %v17182_v48  ;;  %13033 = vmatprep.subr.bf16.mxu1 %v17185_v23 }
 0x7ac   :  { %12993 = vmatpush2.bf16.msra.mxu0 %v17180_v63  ;;  %13034 = vmatpush2.bf16.msra.mxu1 %v17183_v30 }
 0x7ad   :  { %13044 = vmatprep.subr.bf16.mxu0 %v17188_v4  ;;  %13085 = vmatprep.subr.bf16.mxu1 %v17191_v50 }
 0x7ff   :  { %v11553_v59 = vpop.f32.mrf.mxu0  ;;  %v11594_v9 = vpop.f32.mrf.mxu1 }
 0x801   :  { %v11555_v51 = vpop.f32.mrf.mxu0  ;;  %v11596_v14 = vpop.f32.mrf.mxu1 }
 0x803   :  { %v11557_v28 = vpop.f32.mrf.mxu0  ;;  %v11598_v15 = vpop.f32.mrf.mxu1 }
 0x804   :  { %v17194_v15 = vld [vmem:[%s23710_s9 + $0xcc] ss:$16 sps:$4 sm:$0xff]  }
 0x805   :  { %v11558_v19 = vpop.f32.mrf.mxu0  ;;  %v11599_v38 = vpop.f32.mrf.mxu1 }
 0x806   :  { %v17197_v19 = vld [vmem:[%s23710_s9 + $0x2cc] ss:$16 sps:$4 sm:$0xff]   ;;  %v17192_v38 = vld [vmem:[%s23710_s9 + $0xc8] ss:$16 sps:$4 sm:$0xff]  }
 0x80f   :  { %v11718_v10 = vpop.f32.mrf.mxu0  ;;  %v11759_v53 = vpop.f32.mrf.mxu1 }
 0x810   :  { %v11719_v35 = vadd.f32 %v11718_v10, %v11553_v59  ;;  %v11760_v29 = vadd.f32 %v11759_v53, %v11594_v9  ;;  %v17186_v9 = vld [vmem:[%s23710_s9 + $0xe8] ss:$16 sps:$4 sm:$0xff]   ;;  %v17200_v53 = vld [vmem:[%s23710_s9 + $0xac] ss:$16 sps:$4 sm:$0xff]  }
 0x811   :  { %v11720_v56 = vpop.f32.mrf.mxu0  ;;  %v11761_v40 = vpop.f32.mrf.mxu1  ;;  %v17195_v10 = vld [vmem:[%s23710_s9 + $0x2c8] ss:$16 sps:$4 sm:$0xff]  }
 0x812   :  { %v11721_v18 = vadd.f32 %v11720_v56, %v11555_v51  ;;  %v11762_v5 = vadd.f32 %v11761_v40, %v11596_v14  ;;  %v17189_v51 = vld [vmem:[%s23710_s9 + $0x2e8] ss:$16 sps:$4 sm:$0xff]   ;;  %v17203_v56 = vld [vmem:[%s23710_s9 + $0x2ac] ss:$16 sps:$4 sm:$0xff]  }
 0x813   :  { %v11722_v31 = vpop.f32.mrf.mxu0  ;;  %v11763_v17 = vpop.f32.mrf.mxu1  ;;  %v17198_v40 = vld [vmem:[%s23710_s9 + $0xa8] ss:$16 sps:$4 sm:$0xff]  }
 0x814   :  { %v17201_v31 = vld [vmem:[%s23710_s9 + $0x2a8] ss:$16 sps:$4 sm:$0xff]   ;;  %v17206_v17 = vld [vmem:[%s23710_s9 + $0x8c] ss:$16 sps:$4 sm:$0xff]  }
 0x815   :  { %v11723_v1 = vpop.f32.mrf.mxu0  ;;  %v11764_v36 = vpop.f32.mrf.mxu1 }
 0x816   :  { %v17209_v1 = vld [vmem:[%s23710_s9 + $0x28c] ss:$16 sps:$4 sm:$0xff]   ;;  %v17204_v36 = vld [vmem:[%s23710_s9 + $0x88] ss:$16 sps:$4 sm:$0xff]  }
 0x81f   :  { %v11900_v8 = vpop.f32.mrf.mxu0  ;;  %v11941_v33 = vpop.f32.mrf.mxu1 }
 0x820   :  { %v11948_v21 = vadd.f32 %v11900_v8, %v11719_v35  ;;  %v11950_v41 = vadd.f32 %v11941_v33, %v11760_v29  ;;  %v17207_v8 = vld [vmem:[%s23710_s9 + $0x288] ss:$16 sps:$4 sm:$0xff]   ;;  %v17212_v33 = vld [vmem:[%s23710_s9 + $0x6c] ss:$16 sps:$4 sm:$0xff]  }
 0x821   :  { %v11902_v62 = vpop.f32.mrf.mxu0  ;;  %v11943_v12 = vpop.f32.mrf.mxu1  ;;  %v17227_v35 = vld [vmem:[%s23710_s9 + $0x22c] ss:$16 sps:$4 sm:$0xff]   ;;  %v17222_v29 = vld [vmem:[%s23710_s9 + $0x28] ss:$16 sps:$4 sm:$0xff]  }
 0x822   :  { %v11949_v55 = vadd.f32 %v11902_v62, %v11721_v18  ;;  %v11951_v26 = vadd.f32 %v11943_v12, %v11762_v5  ;;  %v17215_v62 = vld [vmem:[%s23710_s9 + $0x26c] ss:$16 sps:$4 sm:$0xff]   ;;  %v17210_v12 = vld [vmem:[%s23710_s9 + $0x68] ss:$16 sps:$4 sm:$0xff]  }
 0x823   :  { %v11904_v25 = vpop.f32.mrf.mxu0  ;;  %v11945_v39 = vpop.f32.mrf.mxu1  ;;  %v17233_v18 = vld [vmem:[%s23710_s9 + $0x20c] ss:$16 sps:$4 sm:$0xff]   ;;  %v17228_v5 = vld [vmem:[%s23710_s9 + $0x8] ss:$16 sps:$4 sm:$0xff]  }
 0x824   :  { %v17218_v25 = vld [vmem:[%s23710_s9 + $0x4c] ss:$16 sps:$4 sm:$0xff]  }
 0x825   :  { %v11905_v20 = vpop.f32.mrf.mxu0  ;;  %v11946_v32 = vpop.f32.mrf.mxu1  ;;  %v17221_v39 = vld [vmem:[%s23710_s9 + $0x24c] ss:$16 sps:$4 sm:$0xff]  }
 0x826   :  { %v17216_v20 = vld [vmem:[%s23710_s9 + $0x48] ss:$16 sps:$4 sm:$0xff]  }
 0x827   :  { %v17219_v32 = vld [vmem:[%s23710_s9 + $0x248] ss:$16 sps:$4 sm:$0xff]  }
 0x82f   :  { %v12086_v0 = vpop.f32.mrf.mxu0  ;;  %v12127_v34 = vpop.f32.mrf.mxu1 }
 0x830   :  { %v12134_v60 = vadd.f32 %v12086_v0, %v11948_v21  ;;  %v12136_v16 = vadd.f32 %v12127_v34, %v11950_v41  ;;  %v17231_v21 = vld [vmem:[%s23710_s9 + $0x208] ss:$16 sps:$4 sm:$0xff]   ;;  %v17236_v41 = vld [vmem:[%s23710_s9 + $0x1ec] ss:$16 sps:$4 sm:$0xff]  }
 0x831   :  { %v12088_v22 = vpop.f32.mrf.mxu0  ;;  %v12129_v24 = vpop.f32.mrf.mxu1  ;;  %v17239_v0 = vld [vmem:[%s23710_s9 + $0x3ec] ss:$16 sps:$4 sm:$0xff]   ;;  %v17234_v34 = vld [vmem:[%s23710_s9 + $0x1e8] ss:$16 sps:$4 sm:$0xff]  }
 0x832   :  { %v12160_v44 = vadd.f32 %v12143_v13, %v12134_v60  ;;  %v12162_v3 = vadd.f32 %v12151_v6, %v12136_v16  ;;  %v12135_v52 = vadd.f32 %v12088_v22, %v11949_v55  ;;  %v12137_v11 = vadd.f32 %v12129_v24, %v11951_v26  ;;  %v17225_v13 = vld [vmem:[%s23710_s9 + $0x228] ss:$16 sps:$4 sm:$0xff]   ;;  %v17230_v6 = vld [vmem:[%s23710_s9 + $0xc] ss:$16 sps:$4 sm:$0xff]  }
 0x833   :  { %v12090_v49 = vpop.f32.mrf.mxu0  ;;  %v12131_v45 = vpop.f32.mrf.mxu1  ;;  %v17245_v55 = vld [vmem:[%s23710_s9 + $0x3cc] ss:$16 sps:$4 sm:$0xff]   ;;  %v17240_v26 = vld [vmem:[%s23710_s9 + $0x1c8] ss:$16 sps:$4 sm:$0xff]  }
 0x834   :  { %v12161_v46 = vadd.f32 %v12147_v37, %v12135_v52  ;;  %v12163_v43 = vadd.f32 %v12155_v61, %v12137_v11  ;;  %v12164_v7 = vmax.f32 %v12160_v44, 0.0  ;;  %v12166_v48 = vmax.f32 %v12162_v3, 0.0  ;;  %v17237_v37 = vld [vmem:[%s23710_s9 + $0x3e8] ss:$16 sps:$4 sm:$0xff]   ;;  %v17242_v61 = vld [vmem:[%s23710_s9 + $0x1cc] ss:$16 sps:$4 sm:$0xff]  }
 0x835   :  { %v12091_v23 = vpop.f32.mrf.mxu0  ;;  %v12132_v63 = vpop.f32.mrf.mxu1  ;;  %v17243_v60 = vld [vmem:[%s23710_s9 + $0x3c8] ss:$16 sps:$4 sm:$0xff]   ;;  %v17248_v16 = vld [vmem:[%s23710_s9 + $0x1ac] ss:$16 sps:$4 sm:$0xff]  }
 0x836   :  { %v12165_v30 = vmax.f32 %v12161_v46, 0.0  ;;  %v12167_v4 = vmax.f32 %v12163_v43, 0.0  ;;  %v23402_v14 = vpack.c.bf16 %v12164_v7, %v12164_v7  ;;  %v23404_v28 = vpack.c.bf16 %v12166_v48, %v12166_v48  ;;  %v17251_v22 = vld [vmem:[%s23710_s9 + $0x3ac] ss:$16 sps:$4 sm:$0xff]   ;;  %v17246_v24 = vld [vmem:[%s23710_s9 + $0x1a8] ss:$16 sps:$4 sm:$0xff]  }
 0x837   :  { %v17249_v44 = vld [vmem:[%s23710_s9 + $0x3a8] ss:$16 sps:$4 sm:$0xff]   ;;  %v17254_v3 = vld [vmem:[%s23710_s9 + $0x18c] ss:$16 sps:$4 sm:$0xff]  }
 0x838   :  { %v12169_v50 = vpack.c.bf16 %v12165_v30, %v12165_v30  ;;  %v12171_v59 = vpack.c.bf16 %v12167_v4, %v12167_v4  ;;  %v17257_v52 = vld [vmem:[%s23710_s9 + $0x38c] ss:$16 sps:$4 sm:$0xff]   ;;  %v17252_v11 = vld [vmem:[%s23710_s9 + $0x188] ss:$16 sps:$4 sm:$0xff]  }
 0x839   :  { %v17255_v49 = vld [vmem:[%s23710_s9 + $0x388] ss:$16 sps:$4 sm:$0xff]   ;;  %v17260_v45 = vld [vmem:[%s23710_s9 + $0x16c] ss:$16 sps:$4 sm:$0xff]  }
 0x83a   :  { %12994 = vmatprep.mubr.bf16.mxu0 %v12169_v50  ;;  %13035 = vmatprep.mubr.bf16.mxu1 %v12171_v59  ;;  %v17263_v46 = vld [vmem:[%s23710_s9 + $0x36c] ss:$16 sps:$4 sm:$0xff]   ;;  %v17258_v43 = vld [vmem:[%s23710_s9 + $0x168] ss:$16 sps:$4 sm:$0xff]  }
 0x83b   :  { %12995 = vmatmul.mubr.bf16.vlgmr.msra.gmra.mxu0 %v23402_v14  ;;  %13036 = vmatmul.mubr.bf16.vlgmr.msra.gmra.mxu1 %v23404_v28  ;;  %v17261_v7 = vld [vmem:[%s23710_s9 + $0x368] ss:$16 sps:$4 sm:$0xff]   ;;  %v17266_v48 = vld [vmem:[%s23710_s9 + $0x14c] ss:$16 sps:$4 sm:$0xff]  }
 0x83c   :  { %13045 = vmatpush1.bf16.msra.mxu0 %v17186_v9  ;;  %13086 = vmatpush1.bf16.msra.mxu1 %v17189_v51  ;;  %v17269_v23 = vld [vmem:[%s23710_s9 + $0x34c] ss:$16 sps:$4 sm:$0xff]   ;;  %v17264_v63 = vld [vmem:[%s23710_s9 + $0x148] ss:$16 sps:$4 sm:$0xff]  }
 0x83d   :  { %13076 = vmatprep.mubr.bf16.mxu0 %v12169_v50  ;;  %13117 = vmatprep.mubr.bf16.mxu1 %v12171_v59  ;;  %v17267_v30 = vld [vmem:[%s23710_s9 + $0x348] ss:$16 sps:$4 sm:$0xff]   ;;  %v17272_v4 = vld [vmem:[%s23710_s9 + $0x12c] ss:$16 sps:$4 sm:$0xff]  }
 0x83e   :  { %13046 = vmatprep.subr.bf16.mxu0 %v17194_v15  ;;  %13087 = vmatprep.subr.bf16.mxu1 %v17197_v19  ;;  %v17275_v50 = vld [vmem:[%s23710_s9 + $0x32c] ss:$16 sps:$4 sm:$0xff]   ;;  %v17270_v59 = vld [vmem:[%s23710_s9 + $0x128] ss:$16 sps:$4 sm:$0xff]  }
 0x83f   :  { %v17273_v9 = vld [vmem:[%s23710_s9 + $0x328] ss:$16 sps:$4 sm:$0xff]   ;;  %v17278_v51 = vld [vmem:[%s23710_s9 + $0x10c] ss:$16 sps:$4 sm:$0xff]  }
 0x840   :  { %13047 = vmatpush1.bf16.msra.mxu0 %v17192_v38  ;;  %13088 = vmatpush1.bf16.msra.mxu1 %v17195_v10  ;;  %v17281_v15 = vld [vmem:[%s23710_s9 + $0x30c] ss:$16 sps:$4 sm:$0xff]   ;;  %v17276_v19 = vld [vmem:[%s23710_s9 + $0x108] ss:$16 sps:$4 sm:$0xff]  }
 0x841   :  { %13048 = vmatprep.subr.bf16.mxu0 %v17200_v53  ;;  %13089 = vmatprep.subr.bf16.mxu1 %v17203_v56  ;;  %v17279_v38 = vld [vmem:[%s23710_s9 + $0x308] ss:$16 sps:$4 sm:$0xff]   ;;  %v17284_v56 = vld [vmem:[%s23712_s11 + $0x70] sm:$0xff]  }
 0x842   :  { %v17282_v10 = vld [vmem:[%s23712_s11 + $0x78] sm:$0xff]  }
 0x843   :  { %v17283_v53 = vld [vmem:[%s23712_s11 + $0x38] sm:$0xff]  }
 0x844   :  { %13049 = vmatpush1.bf16.msra.mxu0 %v17198_v40  ;;  %13090 = vmatpush1.bf16.msra.mxu1 %v17201_v31  ;;  %v17285_v40 = vld [vmem:[%s23712_s11 + $0x30] sm:$0xff]   ;;  %v17286_v31 = vld [vmem:[%s23712_s11 + $0x68] sm:$0xff]  }
 0x845   :  { %13050 = vmatprep.subr.bf16.mxu0 %v17206_v17  ;;  %13091 = vmatprep.subr.bf16.mxu1 %v17209_v1  ;;  %v17287_v17 = vld [vmem:[%s23712_s11 + $0x28] sm:$0xff]   ;;  %v17290_v1 = vld [vmem:[%s23712_s11 + $0x58] sm:$0xff]  }
 0x848   :  { %13051 = vmatpush1.bf16.msra.mxu0 %v17204_v36  ;;  %13092 = vmatpush1.bf16.msra.mxu1 %v17207_v8  ;;  %v17298_v36 = vld [vmem:[%s23712_s11 + $0xf8] sm:$0xff]  }
 0x849   :  { %13052 = vmatprep.subr.bf16.mxu0 %v17212_v33  ;;  %13093 = vmatprep.subr.bf16.mxu1 %v17215_v62  ;;  %v17299_v8 = vld [vmem:[%s23712_s11 + $0xb8] sm:$0xff]   ;;  %v17300_v33 = vld [vmem:[%s23712_s11 + $0xf0] sm:$0xff]  }
 0x84a   :  { %v17291_v62 = vld [vmem:[%s23712_s11 + $0x18] sm:$0xff]  }
 0x84c   :  { %13053 = vmatpush1.bf16.msra.mxu0 %v17210_v12  ;;  %13094 = vmatpush1.bf16.msra.mxu1 %v17213_v58  ;;  %v17292_v12 = vld [vmem:[%s23712_s11 + $0x50] sm:$0xff]  }
 0x84d   :  { %13054 = vmatprep.subr.bf16.mxu0 %v17218_v25  ;;  %13095 = vmatprep.subr.bf16.mxu1 %v17221_v39  ;;  %v17301_v58 = vld [vmem:[%s23712_s11 + $0xb0] sm:$0xff]   ;;  %v17302_v25 = vld [vmem:[%s23712_s11 + $0xe8] sm:$0xff]  }
 0x84e   :  { %v17293_v39 = vld [vmem:[%s23712_s11 + $0x10] sm:$0xff]  }
 0x850   :  { %13055 = vmatpush1.bf16.msra.mxu0 %v17216_v20  ;;  %13096 = vmatpush1.bf16.msra.mxu1 %v17219_v32  ;;  %v17294_v20 = vld [vmem:[%s23712_s11 + $0x48] sm:$0xff]  }
 0x851   :  { %13056 = vmatprep.subr.bf16.mxu0 %v17224_v47  ;;  %13097 = vmatprep.subr.bf16.mxu1 %v17227_v35  ;;  %v17303_v32 = vld [vmem:[%s23712_s11 + $0xa8] sm:$0xff]   ;;  %v17304_v47 = vld [vmem:[%s23712_s11 + $0xe0] sm:$0xff]  }
 0x852   :  { %v17295_v35 = vld [vmem:[%s23712_s11 + $0x8] sm:$0xff]  }
 0x854   :  { %13057 = vmatpush1.bf16.msra.mxu0 %v17222_v29  ;;  %13098 = vmatpush1.bf16.msra.mxu1 %v17225_v13  ;;  %v17296_v29 = vld [vmem:[%s23712_s11 + $0x40] sm:$0xff]  }
 0x855   :  { %13058 = vmatprep.subr.bf16.mxu0 %v17230_v6  ;;  %13099 = vmatprep.subr.bf16.mxu1 %v17233_v18  ;;  %v17305_v13 = vld [vmem:[%s23712_s11 + $0xa0] sm:$0xff]   ;;  %v17306_v6 = vld [vmem:[%s23712_s11 + $0xd8] sm:$0xff]  }
 0x856   :  { %v17297_v18 = vld [vmem:[%s23712_s11] sm:$0xff]  }
 0x858   :  { %13059 = vmatpush1.bf16.msra.mxu0 %v17228_v5  ;;  %13100 = vmatpush1.bf16.msra.mxu1 %v17231_v21  ;;  %v17307_v5 = vld [vmem:[%s23712_s11 + $0x98] sm:$0xff]   ;;  %v17308_v21 = vld [vmem:[%s23712_s11 + $0xd0] sm:$0xff]  }
 0x859   :  { %13060 = vmatprep.subr.bf16.mxu0 %v17236_v41  ;;  %13101 = vmatprep.subr.bf16.mxu1 %v17239_v0  ;;  %v17309_v41 = vld [vmem:[%s23712_s11 + $0x90] sm:$0xff]   ;;  %v17310_v0 = vld [vmem:[%s23712_s11 + $0xc8] sm:$0xff]  }
 0x85c   :  { %13061 = vmatpush2.bf16.msra.mxu0 %v17234_v34  ;;  %13102 = vmatpush2.bf16.msra.mxu1 %v17237_v37  ;;  %v17311_v34 = vld [vmem:[%s23712_s11 + $0x88] sm:$0xff]   ;;  %v17312_v37 = vld [vmem:[%s23712_s11 + $0xc0] sm:$0xff]  }
 0x85d   :  { %13062 = vmatprep.subr.bf16.mxu0 %v17242_v61  ;;  %13103 = vmatprep.subr.bf16.mxu1 %v17245_v55  ;;  %v17313_v61 = vld [vmem:[%s23712_s11 + $0x80] sm:$0xff]  }
 0x85e   :  { %v12300_v55 = vld [vmem:[%s23714_s10] sm:$0xf] }
 0x860   :  { %13063 = vmatpush2.bf16.msra.mxu0 %v17240_v26  ;;  %13104 = vmatpush2.bf16.msra.mxu1 %v17243_v60  ;;  %v12305_v26 = vrot.slane %v12300_v55, %v12142_v27  ;;  %v12309_v60 = vrot.slane %v12300_v55, %v12146_v54  ;;  %v12313_v27 = vrot.slane %v12300_v55, %v12150_v2 }
 0x861   :  { %13064 = vmatprep.subr.bf16.mxu0 %v17248_v16  ;;  %13105 = vmatprep.subr.bf16.mxu1 %v17251_v22  ;;  %v12317_v54 = vrot.slane %v12300_v55, %v12154_v57 }
 0x864   :  { %13065 = vmatpush2.bf16.msra.mxu0 %v17246_v24  ;;  %13106 = vmatpush2.bf16.msra.mxu1 %v17249_v44 }
 0x865   :  { %13066 = vmatprep.subr.bf16.mxu0 %v17254_v3  ;;  %13107 = vmatprep.subr.bf16.mxu1 %v17257_v52 }
 0x868   :  { %13067 = vmatpush2.bf16.msra.mxu0 %v17252_v11  ;;  %13108 = vmatpush2.bf16.msra.mxu1 %v17255_v49 }
 0x869   :  { %13068 = vmatprep.subr.bf16.mxu0 %v17260_v45  ;;  %13109 = vmatprep.subr.bf16.mxu1 %v17263_v46 }
 0x86c   :  { %13069 = vmatpush2.bf16.msra.mxu0 %v17258_v43  ;;  %13110 = vmatpush2.bf16.msra.mxu1 %v17261_v7 }
 0x86d   :  { %13070 = vmatprep.subr.bf16.mxu0 %v17266_v48  ;;  %13111 = vmatprep.subr.bf16.mxu1 %v17269_v23 }
 0x870   :  { %13071 = vmatpush2.bf16.msra.mxu0 %v17264_v63  ;;  %13112 = vmatpush2.bf16.msra.mxu1 %v17267_v30 }
 0x871   :  { %13072 = vmatprep.subr.bf16.mxu0 %v17272_v4  ;;  %13113 = vmatprep.subr.bf16.mxu1 %v17275_v50 }
 0x874   :  { %13073 = vmatpush2.bf16.msra.mxu0 %v17270_v59  ;;  %13114 = vmatpush2.bf16.msra.mxu1 %v17273_v9 }
 0x875   :  { %13074 = vmatprep.subr.bf16.mxu0 %v17278_v51  ;;  %13115 = vmatprep.subr.bf16.mxu1 %v17281_v15 }
 0x878   :  { %13075 = vmatpush2.bf16.msra.mxu0 %v17276_v19  ;;  %13116 = vmatpush2.bf16.msra.mxu1 %v17279_v38 }
 0x879   :  { %15311 = vmatprep.subr.bf16.mxu0 %v17282_v10  ;;  %15333 = vmatprep.subr.bf16.mxu1 %v17298_v36 }
 0x87b   :  { %13077 = vmatmul.mubr.bf16.vlgmr.msra.gmra.mxu0 %v23402_v14  ;;  %13118 = vmatmul.mubr.bf16.vlgmr.msra.gmra.mxu1 %v23404_v28  ;;  %v17288_v14 = vld [vmem:[%s23712_s11 + $0x60] sm:$0xff]  }
 0x87c   :  { %15312 = vmatpush3.bf16.msra.mxu0 %v17283_v53  ;;  %v17289_v28 = vld [vmem:[%s23712_s11 + $0x20] sm:$0xff]   ;;  %15334 = vmatpush3.bf16.msra.mxu1 %v17299_v8 }
 0x87d   :  { %15313 = vmatprep.subr.bf16.mxu0 %v17284_v56  ;;  %15335 = vmatprep.subr.bf16.mxu1 %v17300_v33  ;;  %v14630_v8 = vld [vmem:[%s23715_s12] ss:$0 sm:$0xff] }
 0x880   :  { %15314 = vmatpush3.bf16.msra.mxu0 %v17285_v40  ;;  %15336 = vmatpush3.bf16.msra.mxu1 %v17301_v58 }
 0x881   :  { %15315 = vmatprep.subr.bf16.mxu0 %v17286_v31  ;;  %15337 = vmatprep.subr.bf16.mxu1 %v17302_v25 }
 0x884   :  { %15316 = vmatpush3.bf16.msra.mxu0 %v17287_v17  ;;  %15338 = vmatpush3.bf16.msra.mxu1 %v17303_v32 }
 0x885   :  { %15317 = vmatprep.subr.bf16.mxu0 %v17288_v14  ;;  %15339 = vmatprep.subr.bf16.mxu1 %v17304_v47 }
 0x888   :  { %15318 = vmatpush3.bf16.msra.mxu0 %v17289_v28  ;;  %15340 = vmatpush3.bf16.msra.mxu1 %v17305_v13 }
 0x889   :  { %15319 = vmatprep.subr.bf16.mxu0 %v17290_v1  ;;  %15341 = vmatprep.subr.bf16.mxu1 %v17306_v6 }
 0x88c   :  { %15320 = vmatpush3.bf16.msra.mxu0 %v17291_v62  ;;  %15342 = vmatpush3.bf16.msra.mxu1 %v17307_v5 }
 0x88d   :  { %15321 = vmatprep.subr.bf16.mxu0 %v17292_v12  ;;  %15343 = vmatprep.subr.bf16.mxu1 %v17308_v21 }
 0x890   :  { %15322 = vmatpush3.bf16.msra.mxu0 %v17293_v39  ;;  %15344 = vmatpush3.bf16.msra.mxu1 %v17309_v41 }
 0x891   :  { %15323 = vmatprep.subr.bf16.mxu0 %v17294_v20  ;;  %15345 = vmatprep.subr.bf16.mxu1 %v17310_v0 }
 0x894   :  { %15324 = vmatpush3.bf16.msra.mxu0 %v17295_v35  ;;  %15346 = vmatpush3.bf16.msra.mxu1 %v17311_v34 }
 0x895   :  { %15325 = vmatprep.subr.bf16.mxu0 %v17296_v29  ;;  %15347 = vmatprep.subr.bf16.mxu1 %v17312_v37 }
 0x898   :  { %15326 = vmatpush3.bf16.msra.mxu0 %v17297_v18  ;;  %15348 = vmatpush3.bf16.msra.mxu1 %v17313_v61 }
 0x8fb   :  { %v12996_v16 = vpop.f32.mrf.mxu0  ;;  %v13037_v22 = vpop.f32.mrf.mxu1 }
 0x8fc   :  { %v12997_v24 = vadd.f32 %v12996_v16, %v12305_v26 }
 0x8fd   :  { %v12998_v44 = vpop.f32.mrf.mxu0  ;;  %v13039_v3 = vpop.f32.mrf.mxu1 }
 0x8fe   :  { %v13038_v52 = vadd.f32 %v13037_v22, %v12997_v24  ;;  %v12999_v11 = vadd.f32 %v12998_v44, %v12309_v60 }
 0x8ff   :  { %v13000_v49 = vpop.f32.mrf.mxu0  ;;  %v13041_v45 = vpop.f32.mrf.mxu1 }
 0x900   :  { %v13040_v46 = vadd.f32 %v13039_v3, %v12999_v11  ;;  %v13126_v43 = vmax.f32 %v13038_v52, 0.0 }
 0x901   :  { %v13001_v7 = vpop.f32.mrf.mxu0  ;;  %v13042_v48 = vpop.f32.mrf.mxu1 }
 0x902   :  { %v13127_v23 = vmax.f32 %v13040_v46, 0.0  ;;  %v13130_v30 = vpack.c.bf16 %v13126_v43, %v13126_v43 }
 0x904   :  { %v13131_v63 = vpack.c.bf16 %v13127_v23, %v13127_v23 }
 0x906   :  { %13429 = vmatprep.mubr.bf16.mxu0 %v13131_v63 }
 0x907   :  { %13430 = vmatmul.mubr.bf16.vlgmr.msra.gmra.mxu0 %v13130_v30 }
 0x93b   :  { %v13078_v4 = vpop.f32.mrf.mxu0  ;;  %v13119_v50 = vpop.f32.mrf.mxu1 }
 0x93c   :  { %v13079_v59 = vadd.f32 %v13078_v4, %v12313_v27 }
 0x93d   :  { %v13080_v9 = vpop.f32.mrf.mxu0  ;;  %v13121_v51 = vpop.f32.mrf.mxu1 }
 0x93e   :  { %v13120_v15 = vadd.f32 %v13119_v50, %v13079_v59  ;;  %v13081_v19 = vadd.f32 %v13080_v9, %v12317_v54 }
 0x93f   :  { %v13082_v38 = vpop.f32.mrf.mxu0  ;;  %v13123_v10 = vpop.f32.mrf.mxu1 }
 0x940   :  { %v13122_v53 = vadd.f32 %v13121_v51, %v13081_v19  ;;  %v13128_v56 = vmax.f32 %v13120_v15, 0.0 }
 0x941   :  { %v13083_v40 = vpop.f32.mrf.mxu0  ;;  %v13124_v31 = vpop.f32.mrf.mxu1 }
 0x942   :  { %v13129_v17 = vmax.f32 %v13122_v53, 0.0  ;;  %v13132_v28 = vpack.c.bf16 %v13128_v56, %v13128_v56 }
 0x944   :  { %v13133_v14 = vpack.c.bf16 %v13129_v17, %v13129_v17 }
 0x946   :  { %13469 = vmatprep.mubr.bf16.mxu1 %v13133_v14 }
 0x947   :  { %13470 = vmatmul.mubr.bf16.vlgmr.msra.gmra.mxu1 %v13132_v28 }
 0x9c7   :  { %v15327_v42 = vpop.f32.mrf.mxu0 }
 0x9c9   :  { %v15328_v2 = vpop.f32.mrf.mxu0 }
 0x9ca   :  { %v15329_v36 = vadd.f32 %v15328_v2, %v15327_v42 }
 0x9cb   :  { %v15330_v57 = vpop.f32.mrf.mxu0 }
 0x9cc   :  { %v13432_v12 = vadd.f32 %v15329_v36, %v14630_v8 }
 0x9cd   :  { %v15331_v1 = vpop.f32.mrf.mxu0 }
 0xa07   :  { %v15349_v33 = vpop.f32.mrf.mxu1 }
 0xa09   :  { %v15350_v62 = vpop.f32.mrf.mxu1 }
 0xa0a   :  { %v15351_v58 = vadd.f32 %v15350_v62, %v15349_v33 }
 0xa0b   :  { %v15352_v25 = vpop.f32.mrf.mxu1 }
 0xa0c   :  { %v13472_v39 = vadd.f32 %v15351_v58, %v13432_v12 }
 0xa0d   :  { %v15353_v20 = vpop.f32.mrf.mxu1 }
 0xa0e   :  { %13477 = vmax.xlane.f32.xlu0 %v13472_v39 }
 0xa97   :  { %v13478_v32 = vpop.xlane.xlu0 %13477 }
 0xa98   :  { %v13479_v47 = vsub.f32 %v13472_v39, %v13478_v32 }
 0xa9a   :  { %v13480_v35 = vmul.f32 1.442695, %v13479_v47 }
 0xa9c   :  { %17314 = vpow2.f32 %v13480_v35 }
 0xaa9   :  { %v17315_v29 = vpop.eup %17314 }
 0xaaa   :  { %13482 = vadd.xlane.f32.xlu0 %v17315_v29 }
 0xb33   :  { %v13483_v13 = vpop.xlane.xlu0 %13482 }
 0xb34   :  { %17316 = vrcp.f32 %v13483_v13 }
 0xb41   :  { %v17317_v6 = vpop.eup %17316 }
 0xb42   :  { %v13485_v18 = vmul.f32 %v17317_v6, %v17315_v29 }
 0xb44   :  { %13486 = vst [vmem:[%s23716_s13] sm:$0xff] %v13485_v18 }

</bundles_post_ra>
